<compile_context>
chip_gen: v6e
topology: v6e:2x2x1
jax: 0.10.0
libtpu: 0.0.40
codegen_flags: <defaults>
</compile_context>

<pallas_src>
import jax
import jax.numpy as jnp
from jax.experimental import pallas as pl
from jax.experimental.pallas import tpu as pltpu

# ---- original model dims -----------------------------------------------------
ISZ = 1275
NN = 120
DSZ = 50
BN_EPS = 1e-5

# ---- lane-padded dims (multiples of 128) --------------------------------------
ISZ_P = 1280
NN_P = 128
DSZ_P = 128

BM = 256  # batch tile (sublane-aligned, amortizes per-grid-step overhead)


def _softplus(x):
    # numerically stable softplus (torch.nn.Softplus, beta=1)
    return jnp.maximum(x, 0.0) + jnp.log(1.0 + jnp.exp(-jnp.abs(x)))


# ---------------------------------------------------------------------------
# Kernel: full AAE forward for one batch tile. All BN folded into the weights,
# so every layer is dot (bf16 in, f32 acc) + bias (+ ReLU / residual / softplus).
# ---------------------------------------------------------------------------
def aae_kernel(
    x_ref,
    ew1_ref, eb1_ref, ew2a_ref, eb2a_ref, ew2b_ref, eb2b_ref, ew3_ref, eb3_ref,
    dw1_ref, db1_ref, dw2a_ref, db2a_ref, dw2b_ref, db2b_ref, dw3_ref, db3_ref,
    xr_ref, z_ref,
):
    x = x_ref[...]  # bf16 (BM, ISZ_P)

    # ---------------- Encoder ----------------
    # lyrE1: Linear(+folded BN) -> ReLU        (Dropout = identity in eval mode)
    h1 = jnp.dot(x, ew1_ref[...], preferred_element_type=jnp.float32) + eb1_ref[...]
    h1 = jnp.maximum(h1, 0.0)

    # lyrE2 first half: Linear(+BN) -> ReLU
    a = jnp.dot(h1.astype(jnp.bfloat16), ew2a_ref[...],
                preferred_element_type=jnp.float32) + eb2a_ref[...]
    a = jnp.maximum(a, 0.0)

    # lyrE2 second half: Linear(+BN), no ReLU
    b = jnp.dot(a.astype(jnp.bfloat16), ew2b_ref[...],
                preferred_element_type=jnp.float32) + eb2b_ref[...]

    # residual + ReLU
    h2 = jnp.maximum(h1 + b, 0.0)

    # lyrE3: Linear -> z
    z = jnp.dot(h2.astype(jnp.bfloat16), ew3_ref[...],
                preferred_element_type=jnp.float32) + eb3_ref[...]
    z_ref[...] = z.astype(z_ref.dtype)

    # ---------------- Decoder ----------------
    # lyrD1: Linear(+BN) -> ReLU
    g1 = jnp.dot(z.astype(jnp.bfloat16), dw1_ref[...],
                 preferred_element_type=jnp.float32) + db1_ref[...]
    g1 = jnp.maximum(g1, 0.0)

    # lyrD2 first half: Linear(+BN) -> ReLU
    c = jnp.dot(g1.astype(jnp.bfloat16), dw2a_ref[...],
                preferred_element_type=jnp.float32) + db2a_ref[...]
    c = jnp.maximum(c, 0.0)

    # lyrD2 second half: Linear(+BN), no ReLU
    d = jnp.dot(c.astype(jnp.bfloat16), dw2b_ref[...],
                preferred_element_type=jnp.float32) + db2b_ref[...]

    # residual + ReLU
    g2 = jnp.maximum(g1 + d, 0.0)

    # lyrD3: Linear -> Softplus
    r = jnp.dot(g2.astype(jnp.bfloat16), dw3_ref[...],
                preferred_element_type=jnp.float32) + db3_ref[...]
    xr_ref[...] = _softplus(r).astype(xr_ref.dtype)


def _const_spec(shape):
    # whole-array block, resident across the batch grid (constant block index)
    return pl.BlockSpec(shape, lambda i: tuple(0 for _ in shape))


@jax.jit
def aae_forward(x, params):
    """x: (B, ISZ) float32 -> (x_recon (B, ISZ), z (B, DSZ)), eval-mode semantics."""
    (ew1, eb1, ew2a, eb2a, ew2b, eb2b, ew3, eb3,
     dw1, db1, dw2a, db2a, dw2b, db2b, dw3, db3) = params

    B = x.shape[0]
    n_tiles = pl.cdiv(B, BM)
    Bp = n_tiles * BM

    # Pad batch to a multiple of BM and features to ISZ_P; cast to bf16 for the MXU.
    xp = jnp.zeros((Bp, ISZ_P), jnp.bfloat16)
    xp = xp.at[:B, :ISZ].set(x.astype(jnp.bfloat16))

    in_specs = [
        pl.BlockSpec((BM, ISZ_P), lambda i: (i, 0)),            # x tile
        _const_spec((ISZ_P, NN_P)), _const_spec((1, NN_P)),     # enc L1
        _const_spec((NN_P, NN_P)), _const_spec((1, NN_P)),      # enc L2a
        _const_spec((NN_P, NN_P)), _const_spec((1, NN_P)),      # enc L2b
        _const_spec((NN_P, DSZ_P)), _const_spec((1, DSZ_P)),    # enc L3
        _const_spec((DSZ_P, NN_P)), _const_spec((1, NN_P)),     # dec L1
        _const_spec((NN_P, NN_P)), _const_spec((1, NN_P)),      # dec L2a
        _const_spec((NN_P, NN_P)), _const_spec((1, NN_P)),      # dec L2b
        _const_spec((NN_P, ISZ_P)), _const_spec((1, ISZ_P)),    # dec L3
    ]

    out_shape = (
        jax.ShapeDtypeStruct((Bp, ISZ_P), jnp.float32),   # reconstruction
        jax.ShapeDtypeStruct((Bp, DSZ_P), jnp.float32),   # latent z
    )
    out_specs = (
        pl.BlockSpec((BM, ISZ_P), lambda i: (i, 0)),
        pl.BlockSpec((BM, DSZ_P), lambda i: (i, 0)),
    )

    xr_p, z_p = pl.pallas_call(
        aae_kernel,
        out_shape=out_shape,
        grid_spec=pltpu.PrefetchScalarGridSpec(
            num_scalar_prefetch=0,
            grid=(n_tiles,),
            in_specs=in_specs,
            out_specs=out_specs,
        ),
        compiler_params=pltpu.CompilerParams(
            dimension_semantics=("parallel",),      # batch tiles are independent
            vmem_limit_bytes=32 * 1024 * 1024,      # headroom for the BM=256 tiles
        ),
    )(xp, ew1, eb1, ew2a, eb2a, ew2b, eb2b, ew3, eb3,
      dw1, db1, dw2a, db2a, dw2b, db2b, dw3, db3)

    # Slice off batch padding and lane padding.
    return xr_p[:B, :ISZ], z_p[:B, :DSZ]


# ---------------------------------------------------------------------------
# Synthetic parameters (PyTorch shapes), BN folding, lane padding.
# ---------------------------------------------------------------------------
def make_raw_params(key):
    ks = iter(jax.random.split(key, 40))

    def lin(fan_in, fan_out):
        lim = 1.0 / jnp.sqrt(float(fan_in))
        w = jax.random.uniform(next(ks), (fan_in, fan_out), jnp.float32, -lim, lim)
        b = jax.random.uniform(next(ks), (fan_out,), jnp.float32, -lim, lim)
        return w, b

    def bn(n):
        gamma = 1.0 + 0.1 * jax.random.normal(next(ks), (n,), jnp.float32)
        beta = 0.1 * jax.random.normal(next(ks), (n,), jnp.float32)
        mean = 0.05 * jax.random.normal(next(ks), (n,), jnp.float32)
        var = jnp.abs(1.0 + 0.1 * jax.random.normal(next(ks), (n,), jnp.float32))
        return gamma, beta, mean, var

    return {
        "e1":  (lin(ISZ, NN), bn(NN)),
        "e2a": (lin(NN, NN), bn(NN)),
        "e2b": (lin(NN, NN), bn(NN)),
        "e3":  (lin(NN, DSZ), None),
        "d1":  (lin(DSZ, NN), bn(NN)),
        "d2a": (lin(NN, NN), bn(NN)),
        "d2b": (lin(NN, NN), bn(NN)),
        "d3":  (lin(NN, ISZ), None),
    }


def _fold(lin_params, bn_params):
    """Fold eval-mode BatchNorm1d into the preceding Linear."""
    w, b = lin_params
    if bn_params is None:
        return w, b
    gamma, beta, mean, var = bn_params
    s = gamma / jnp.sqrt(var + BN_EPS)
    return w * s[None, :], b * s + (beta - mean * s)


def _pad(w, b, in_p, out_p):
    """Zero-pad to lane-aligned shapes; weights -> bf16, bias -> (1, out_p) f32."""
    wp = jnp.zeros((in_p, out_p), jnp.float32).at[: w.shape[0], : w.shape[1]].set(w)
    bp = jnp.zeros((1, out_p), jnp.float32).at[0, : b.shape[0]].set(b)
    return wp.astype(jnp.bfloat16), bp


def pack_params(raw):
    ew1, eb1 = _pad(*_fold(*raw["e1"]), ISZ_P, NN_P)
    ew2a, eb2a = _pad(*_fold(*raw["e2a"]), NN_P, NN_P)
    ew2b, eb2b = _pad(*_fold(*raw["e2b"]), NN_P, NN_P)
    ew3, eb3 = _pad(*_fold(*raw["e3"]), NN_P, DSZ_P)
    dw1, db1 = _pad(*_fold(*raw["d1"]), DSZ_P, NN_P)
    dw2a, db2a = _pad(*_fold(*raw["d2a"]), NN_P, NN_P)
    dw2b, db2b = _pad(*_fold(*raw["d2b"]), NN_P, NN_P)
    dw3, db3 = _pad(*_fold(*raw["d3"]), NN_P, ISZ_P)
    return (ew1, eb1, ew2a, eb2a, ew2b, eb2b, ew3, eb3,
            dw1, db1, dw2a, db2a, dw2b, db2b, dw3, db3)


# ---------------------------------------------------------------------------
# References for validation.
# ---------------------------------------------------------------------------
def aae_reference(x, raw):
    """Pure-JAX f32, unfolded, unpadded eval-mode PyTorch semantics."""
    def layer(h, key):
        (w, b), bn = raw[key]
        y = h @ w + b
        if bn is not None:
            gamma, beta, mean, var = bn
            y = (y - mean) / jnp.sqrt(var + BN_EPS) * gamma + beta
        return y

    h1 = jax.nn.relu(layer(x, "e1"))
    a = jax.nn.relu(layer(h1, "e2a"))
    h2 = jax.nn.relu(h1 + layer(a, "e2b"))
    z = layer(h2, "e3")

    g1 = jax.nn.relu(layer(z, "d1"))
    c = jax.nn.relu(layer(g1, "d2a"))
    g2 = jax.nn.relu(g1 + layer(c, "d2b"))
    xr = jax.nn.softplus(layer(g2, "d3"))
    return xr, z


def aae_matched_reference(x, params):
    """Same folded/padded params and bf16 matmul rounding as the kernel."""
    (ew1, eb1, ew2a, eb2a, ew2b, eb2b, ew3, eb3,
     dw1, db1, dw2a, db2a, dw2b, db2b, dw3, db3) = params

    def dot(h, w):
        return jnp.dot(h.astype(jnp.bfloat16), w, preferred_element_type=jnp.float32)

    xp = jnp.zeros((x.shape[0], ISZ_P), jnp.float32).at[:, :ISZ].set(x)
    h1 = jax.nn.relu(dot(xp, ew1) + eb1)
    a = jax.nn.relu(dot(h1, ew2a) + eb2a)
    h2 = jax.nn.relu(h1 + dot(a, ew2b) + eb2b)
    z = dot(h2, ew3) + eb3
    g1 = jax.nn.relu(dot(z, dw1) + db1)
    c = jax.nn.relu(dot(g1, dw2a) + db2a)
    g2 = jax.nn.relu(g1 + dot(c, dw2b) + db2b)
    xr = _softplus(dot(g2, dw3) + db3)
    return xr[:, :ISZ], z[:, :DSZ]


if __name__ == "__main__":
    key = jax.random.PRNGKey(0)
    kx, kp = jax.random.split(key)

    # B=300 exercises both batch padding (not a multiple of BM) and a 2-step grid
    # (so both v7x TensorCores get work); still small/fast.
    B = 300
    x = jax.random.normal(kx, (B, ISZ), jnp.float32)

    raw = make_raw_params(kp)
    params = pack_params(raw)

    xr, z = aae_forward(x, params)
    xr, z = jax.block_until_ready((xr, z))

    assert xr.shape == (B, ISZ) and z.shape == (B, DSZ)

    # Strict check: identical folded/padded/bf16-rounded math as the kernel
    # (validates kernel wiring / tiling to ~accumulation-order differences).
    xr_m, z_m = aae_matched_reference(x, params)
    assert jnp.allclose(z, z_m, atol=2e-3, rtol=2e-3), "z mismatch vs matched reference"
    assert jnp.allclose(xr, xr_m, atol=2e-3, rtol=2e-3), "x mismatch vs matched reference"

    # Loose check: full-f32, unfolded, unpadded eval-mode semantics. The only
    # expected difference is bf16 matmul rounding across 8 layers (~1e-2 level);
    # a folding/padding bug would show up as O(1) errors.
    xr_f, z_f = aae_reference(x, raw)
    assert float(jnp.max(jnp.abs(z - z_f))) < 1e-1, "z drift vs f32 reference too large"
    assert float(jnp.max(jnp.abs(xr - xr_f))) < 1e-1, "x drift vs f32 reference too large"

    print("KERNEL_OK")
</pallas_src>

<mosaic_0001>
module attributes {stable_mosaic.version = 11 : i64} {
  func.func @aae_kernel(%arg0: i32, %arg1: memref<256x1280xbf16, #tpu.memory_space<vmem>>, %arg2: memref<1280x128xbf16, #tpu.memory_space<vmem>>, %arg3: memref<1x128xf32, #tpu.memory_space<vmem>>, %arg4: memref<128x128xbf16, #tpu.memory_space<vmem>>, %arg5: memref<1x128xf32, #tpu.memory_space<vmem>>, %arg6: memref<128x128xbf16, #tpu.memory_space<vmem>>, %arg7: memref<1x128xf32, #tpu.memory_space<vmem>>, %arg8: memref<128x128xbf16, #tpu.memory_space<vmem>>, %arg9: memref<1x128xf32, #tpu.memory_space<vmem>>, %arg10: memref<128x128xbf16, #tpu.memory_space<vmem>>, %arg11: memref<1x128xf32, #tpu.memory_space<vmem>>, %arg12: memref<128x128xbf16, #tpu.memory_space<vmem>>, %arg13: memref<1x128xf32, #tpu.memory_space<vmem>>, %arg14: memref<128x128xbf16, #tpu.memory_space<vmem>>, %arg15: memref<1x128xf32, #tpu.memory_space<vmem>>, %arg16: memref<128x1280xbf16, #tpu.memory_space<vmem>>, %arg17: memref<1x1280xf32, #tpu.memory_space<vmem>>, %arg18: memref<256x1280xf32, #tpu.memory_space<vmem>>, %arg19: memref<256x128xf32, #tpu.memory_space<vmem>>) attributes {dimension_semantics = [#tpu.dimension_semantics<parallel>], iteration_bounds = array<i64: 2>, scalar_prefetch = 0 : i64, scratch_operands = 0 : i64, tpu.core_type = #tpu.core_type<tc>, window_params = [{transform_indices = @transform_0, window_bounds = array<i64: 256, 1280>}, {pipeline_mode = #tpu.pipeline_mode<synchronous>, transform_indices = @transform_1, window_bounds = array<i64: 1280, 128>}, {pipeline_mode = #tpu.pipeline_mode<synchronous>, transform_indices = @transform_2, window_bounds = array<i64: 1, 128>}, {pipeline_mode = #tpu.pipeline_mode<synchronous>, transform_indices = @transform_3, window_bounds = array<i64: 128, 128>}, {pipeline_mode = #tpu.pipeline_mode<synchronous>, transform_indices = @transform_4, window_bounds = array<i64: 1, 128>}, {pipeline_mode = #tpu.pipeline_mode<synchronous>, transform_indices = @transform_5, window_bounds = array<i64: 128, 128>}, {pipeline_mode = #tpu.pipeline_mode<synchronous>, transform_indices = @transform_6, window_bounds = array<i64: 1, 128>}, {pipeline_mode = #tpu.pipeline_mode<synchronous>, transform_indices = @transform_7, window_bounds = array<i64: 128, 128>}, {pipeline_mode = #tpu.pipeline_mode<synchronous>, transform_indices = @transform_8, window_bounds = array<i64: 1, 128>}, {pipeline_mode = #tpu.pipeline_mode<synchronous>, transform_indices = @transform_9, window_bounds = array<i64: 128, 128>}, {pipeline_mode = #tpu.pipeline_mode<synchronous>, transform_indices = @transform_10, window_bounds = array<i64: 1, 128>}, {pipeline_mode = #tpu.pipeline_mode<synchronous>, transform_indices = @transform_11, window_bounds = array<i64: 128, 128>}, {pipeline_mode = #tpu.pipeline_mode<synchronous>, transform_indices = @transform_12, window_bounds = array<i64: 1, 128>}, {pipeline_mode = #tpu.pipeline_mode<synchronous>, transform_indices = @transform_13, window_bounds = array<i64: 128, 128>}, {pipeline_mode = #tpu.pipeline_mode<synchronous>, transform_indices = @transform_14, window_bounds = array<i64: 1, 128>}, {pipeline_mode = #tpu.pipeline_mode<synchronous>, transform_indices = @transform_15, window_bounds = array<i64: 128, 1280>}, {pipeline_mode = #tpu.pipeline_mode<synchronous>, transform_indices = @transform_16, window_bounds = array<i64: 1, 1280>}, {transform_indices = @transform_17, window_bounds = array<i64: 256, 1280>}, {transform_indices = @transform_18, window_bounds = array<i64: 256, 128>}]} {
    %c0 = arith.constant 0 : index
    %c0_0 = arith.constant 0 : index
    %0 = vector.load %arg1[%c0, %c0_0] : memref<256x1280xbf16, #tpu.memory_space<vmem>>, vector<256x1280xbf16>
    %c0_1 = arith.constant 0 : index
    %c0_2 = arith.constant 0 : index
    %1 = vector.load %arg2[%c0_1, %c0_2] : memref<1280x128xbf16, #tpu.memory_space<vmem>>, vector<1280x128xbf16>
    %cst = arith.constant dense<0.000000e+00> : vector<256x128xf32>
    %2 = tpu.matmul %0, %1, %cst {dimension_numbers = #tpu.dot_dimension_numbers<[1], [0], [0], [1], [0, 0, 1, 1], [], []>} : vector<256x1280xbf16>, vector<1280x128xbf16>, vector<256x128xf32> -> vector<256x128xf32>
    %c0_3 = arith.constant 0 : index
    %c0_4 = arith.constant 0 : index
    %3 = vector.load %arg3[%c0_3, %c0_4] : memref<1x128xf32, #tpu.memory_space<vmem>>, vector<1x128xf32>
    %4 = vector.broadcast %3 : vector<1x128xf32> to vector<256x128xf32>
    %5 = arith.addf %2, %4 : vector<256x128xf32>
    %cst_5 = arith.constant 0.000000e+00 : f32
    %6 = vector.broadcast %cst_5 : f32 to vector<256x128xf32>
    %7 = arith.maximumf %5, %6 : vector<256x128xf32>
    %8 = arith.truncf %7 : vector<256x128xf32> to vector<256x128xbf16>
    %c0_6 = arith.constant 0 : index
    %c0_7 = arith.constant 0 : index
    %9 = vector.load %arg4[%c0_6, %c0_7] : memref<128x128xbf16, #tpu.memory_space<vmem>>, vector<128x128xbf16>
    %cst_8 = arith.constant dense<0.000000e+00> : vector<256x128xf32>
    %10 = tpu.matmul %8, %9, %cst_8 {dimension_numbers = #tpu.dot_dimension_numbers<[1], [0], [0], [1], [0, 0, 1, 1], [], []>} : vector<256x128xbf16>, vector<128x128xbf16>, vector<256x128xf32> -> vector<256x128xf32>
    %c0_9 = arith.constant 0 : index
    %c0_10 = arith.constant 0 : index
    %11 = vector.load %arg5[%c0_9, %c0_10] : memref<1x128xf32, #tpu.memory_space<vmem>>, vector<1x128xf32>
    %12 = vector.broadcast %11 : vector<1x128xf32> to vector<256x128xf32>
    %13 = arith.addf %10, %12 : vector<256x128xf32>
    %cst_11 = arith.constant 0.000000e+00 : f32
    %14 = vector.broadcast %cst_11 : f32 to vector<256x128xf32>
    %15 = arith.maximumf %13, %14 : vector<256x128xf32>
    %16 = arith.truncf %15 : vector<256x128xf32> to vector<256x128xbf16>
    %c0_12 = arith.constant 0 : index
    %c0_13 = arith.constant 0 : index
    %17 = vector.load %arg6[%c0_12, %c0_13] : memref<128x128xbf16, #tpu.memory_space<vmem>>, vector<128x128xbf16>
    %cst_14 = arith.constant dense<0.000000e+00> : vector<256x128xf32>
    %18 = tpu.matmul %16, %17, %cst_14 {dimension_numbers = #tpu.dot_dimension_numbers<[1], [0], [0], [1], [0, 0, 1, 1], [], []>} : vector<256x128xbf16>, vector<128x128xbf16>, vector<256x128xf32> -> vector<256x128xf32>
    %c0_15 = arith.constant 0 : index
    %c0_16 = arith.constant 0 : index
    %19 = vector.load %arg7[%c0_15, %c0_16] : memref<1x128xf32, #tpu.memory_space<vmem>>, vector<1x128xf32>
    %20 = vector.broadcast %19 : vector<1x128xf32> to vector<256x128xf32>
    %21 = arith.addf %18, %20 : vector<256x128xf32>
    %22 = arith.addf %7, %21 : vector<256x128xf32>
    %cst_17 = arith.constant 0.000000e+00 : f32
    %23 = vector.broadcast %cst_17 : f32 to vector<256x128xf32>
    %24 = arith.maximumf %22, %23 : vector<256x128xf32>
    %25 = arith.truncf %24 : vector<256x128xf32> to vector<256x128xbf16>
    %c0_18 = arith.constant 0 : index
    %c0_19 = arith.constant 0 : index
    %26 = vector.load %arg8[%c0_18, %c0_19] : memref<128x128xbf16, #tpu.memory_space<vmem>>, vector<128x128xbf16>
    %cst_20 = arith.constant dense<0.000000e+00> : vector<256x128xf32>
    %27 = tpu.matmul %25, %26, %cst_20 {dimension_numbers = #tpu.dot_dimension_numbers<[1], [0], [0], [1], [0, 0, 1, 1], [], []>} : vector<256x128xbf16>, vector<128x128xbf16>, vector<256x128xf32> -> vector<256x128xf32>
    %c0_21 = arith.constant 0 : index
    %c0_22 = arith.constant 0 : index
    %28 = vector.load %arg9[%c0_21, %c0_22] : memref<1x128xf32, #tpu.memory_space<vmem>>, vector<1x128xf32>
    %29 = vector.broadcast %28 : vector<1x128xf32> to vector<256x128xf32>
    %30 = arith.addf %27, %29 : vector<256x128xf32>
    %c0_23 = arith.constant 0 : index
    %c0_24 = arith.constant 0 : index
    %31 = vector.load %arg19[%c0_23, %c0_24] : memref<256x128xf32, #tpu.memory_space<vmem>>, vector<256x128xf32>
    tpu.vector_store %arg19[%c0_23, %c0_24], %30 {strides = array<i32>} : memref<256x128xf32, #tpu.memory_space<vmem>>, vector<256x128xf32>,
    %32 = arith.truncf %30 : vector<256x128xf32> to vector<256x128xbf16>
    %c0_25 = arith.constant 0 : index
    %c0_26 = arith.constant 0 : index
    %33 = vector.load %arg10[%c0_25, %c0_26] : memref<128x128xbf16, #tpu.memory_space<vmem>>, vector<128x128xbf16>
    %cst_27 = arith.constant dense<0.000000e+00> : vector<256x128xf32>
    %34 = tpu.matmul %32, %33, %cst_27 {dimension_numbers = #tpu.dot_dimension_numbers<[1], [0], [0], [1], [0, 0, 1, 1], [], []>} : vector<256x128xbf16>, vector<128x128xbf16>, vector<256x128xf32> -> vector<256x128xf32>
    %c0_28 = arith.constant 0 : index
    %c0_29 = arith.constant 0 : index
    %35 = vector.load %arg11[%c0_28, %c0_29] : memref<1x128xf32, #tpu.memory_space<vmem>>, vector<1x128xf32>
    %36 = vector.broadcast %35 : vector<1x128xf32> to vector<256x128xf32>
    %37 = arith.addf %34, %36 : vector<256x128xf32>
    %cst_30 = arith.constant 0.000000e+00 : f32
    %38 = vector.broadcast %cst_30 : f32 to vector<256x128xf32>
    %39 = arith.maximumf %37, %38 : vector<256x128xf32>
    %40 = arith.truncf %39 : vector<256x128xf32> to vector<256x128xbf16>
    %c0_31 = arith.constant 0 : index
    %c0_32 = arith.constant 0 : index
    %41 = vector.load %arg12[%c0_31, %c0_32] : memref<128x128xbf16, #tpu.memory_space<vmem>>, vector<128x128xbf16>
    %cst_33 = arith.constant dense<0.000000e+00> : vector<256x128xf32>
    %42 = tpu.matmul %40, %41, %cst_33 {dimension_numbers = #tpu.dot_dimension_numbers<[1], [0], [0], [1], [0, 0, 1, 1], [], []>} : vector<256x128xbf16>, vector<128x128xbf16>, vector<256x128xf32> -> vector<256x128xf32>
    %c0_34 = arith.constant 0 : index
    %c0_35 = arith.constant 0 : index
    %43 = vector.load %arg13[%c0_34, %c0_35] : memref<1x128xf32, #tpu.memory_space<vmem>>, vector<1x128xf32>
    %44 = vector.broadcast %43 : vector<1x128xf32> to vector<256x128xf32>
    %45 = arith.addf %42, %44 : vector<256x128xf32>
    %cst_36 = arith.constant 0.000000e+00 : f32
    %46 = vector.broadcast %cst_36 : f32 to vector<256x128xf32>
    %47 = arith.maximumf %45, %46 : vector<256x128xf32>
    %48 = arith.truncf %47 : vector<256x128xf32> to vector<256x128xbf16>
    %c0_37 = arith.constant 0 : index
    %c0_38 = arith.constant 0 : index
    %49 = vector.load %arg14[%c0_37, %c0_38] : memref<128x128xbf16, #tpu.memory_space<vmem>>, vector<128x128xbf16>
    %cst_39 = arith.constant dense<0.000000e+00> : vector<256x128xf32>
    %50 = tpu.matmul %48, %49, %cst_39 {dimension_numbers = #tpu.dot_dimension_numbers<[1], [0], [0], [1], [0, 0, 1, 1], [], []>} : vector<256x128xbf16>, vector<128x128xbf16>, vector<256x128xf32> -> vector<256x128xf32>
    %c0_40 = arith.constant 0 : index
    %c0_41 = arith.constant 0 : index
    %51 = vector.load %arg15[%c0_40, %c0_41] : memref<1x128xf32, #tpu.memory_space<vmem>>, vector<1x128xf32>
    %52 = vector.broadcast %51 : vector<1x128xf32> to vector<256x128xf32>
    %53 = arith.addf %50, %52 : vector<256x128xf32>
    %54 = arith.addf %39, %53 : vector<256x128xf32>
    %cst_42 = arith.constant 0.000000e+00 : f32
    %55 = vector.broadcast %cst_42 : f32 to vector<256x128xf32>
    %56 = arith.maximumf %54, %55 : vector<256x128xf32>
    %57 = arith.truncf %56 : vector<256x128xf32> to vector<256x128xbf16>
    %c0_43 = arith.constant 0 : index
    %c0_44 = arith.constant 0 : index
    %58 = vector.load %arg16[%c0_43, %c0_44] : memref<128x1280xbf16, #tpu.memory_space<vmem>>, vector<128x1280xbf16>
    %cst_45 = arith.constant dense<0.000000e+00> : vector<256x1280xf32>
    %59 = tpu.matmul %57, %58, %cst_45 {dimension_numbers = #tpu.dot_dimension_numbers<[1], [0], [0], [1], [0, 0, 1, 1], [], []>} : vector<256x128xbf16>, vector<128x1280xbf16>, vector<256x1280xf32> -> vector<256x1280xf32>
    %c0_46 = arith.constant 0 : index
    %c0_47 = arith.constant 0 : index
    %60 = vector.load %arg17[%c0_46, %c0_47] : memref<1x1280xf32, #tpu.memory_space<vmem>>, vector<1x1280xf32>
    %61 = vector.broadcast %60 : vector<1x1280xf32> to vector<256x1280xf32>
    %62 = arith.addf %59, %61 : vector<256x1280xf32>
    %cst_48 = arith.constant 0.000000e+00 : f32
    %63 = vector.broadcast %cst_48 : f32 to vector<256x1280xf32>
    %64 = arith.maximumf %62, %63 : vector<256x1280xf32>
    %65 = math.absf %62 : vector<256x1280xf32>
    %cst_49 = arith.constant 0.000000e+00 : f32
    %66 = vector.broadcast %cst_49 : f32 to vector<256x1280xf32>
    %67 = arith.subf %66, %65 : vector<256x1280xf32>
    %68 = math.exp %67 : vector<256x1280xf32>
    %cst_50 = arith.constant 1.000000e+00 : f32
    %69 = vector.broadcast %cst_50 : f32 to vector<256x1280xf32>
    %70 = arith.addf %69, %68 : vector<256x1280xf32>
    %71 = math.log %70 : vector<256x1280xf32>
    %72 = arith.addf %64, %71 : vector<256x1280xf32>
    %c0_51 = arith.constant 0 : index
    %c0_52 = arith.constant 0 : index
    %73 = vector.load %arg18[%c0_51, %c0_52] : memref<256x1280xf32, #tpu.memory_space<vmem>>, vector<256x1280xf32>
    tpu.vector_store %arg18[%c0_51, %c0_52], %72 {strides = array<i32>} : memref<256x1280xf32, #tpu.memory_space<vmem>>, vector<256x1280xf32>,
    return
  }
  func.func @transform_0(%arg0: i32) -> (i32, i32) {
    %c0_i32 = arith.constant 0 : i32
    %c0_i32_0 = arith.constant 0 : i32
    return %arg0, %c0_i32 : i32, i32
  }
  func.func @transform_1(%arg0: i32) -> (i32, i32) {
    %c0_i32 = arith.constant 0 : i32
    %c0_i32_0 = arith.constant 0 : i32
    %c0_i32_1 = arith.constant 0 : i32
    return %c0_i32, %c0_i32_0 : i32, i32
  }
  func.func @transform_2(%arg0: i32) -> (i32, i32) {
    %c0_i32 = arith.constant 0 : i32
    %c0_i32_0 = arith.constant 0 : i32
    %c0_i32_1 = arith.constant 0 : i32
    return %c0_i32, %c0_i32_0 : i32, i32
  }
  func.func @transform_3(%arg0: i32) -> (i32, i32) {
    %c0_i32 = arith.constant 0 : i32
    %c0_i32_0 = arith.constant 0 : i32
    %c0_i32_1 = arith.constant 0 : i32
    return %c0_i32, %c0_i32_0 : i32, i32
  }
  func.func @transform_4(%arg0: i32) -> (i32, i32) {
    %c0_i32 = arith.constant 0 : i32
    %c0_i32_0 = arith.constant 0 : i32
    %c0_i32_1 = arith.constant 0 : i32
    return %c0_i32, %c0_i32_0 : i32, i32
  }
  func.func @transform_5(%arg0: i32) -> (i32, i32) {
    %c0_i32 = arith.constant 0 : i32
    %c0_i32_0 = arith.constant 0 : i32
    %c0_i32_1 = arith.constant 0 : i32
    return %c0_i32, %c0_i32_0 : i32, i32
  }
  func.func @transform_6(%arg0: i32) -> (i32, i32) {
    %c0_i32 = arith.constant 0 : i32
    %c0_i32_0 = arith.constant 0 : i32
    %c0_i32_1 = arith.constant 0 : i32
    return %c0_i32, %c0_i32_0 : i32, i32
  }
  func.func @transform_7(%arg0: i32) -> (i32, i32) {
    %c0_i32 = arith.constant 0 : i32
    %c0_i32_0 = arith.constant 0 : i32
    %c0_i32_1 = arith.constant 0 : i32
    return %c0_i32, %c0_i32_0 : i32, i32
  }
  func.func @transform_8(%arg0: i32) -> (i32, i32) {
    %c0_i32 = arith.constant 0 : i32
    %c0_i32_0 = arith.constant 0 : i32
    %c0_i32_1 = arith.constant 0 : i32
    return %c0_i32, %c0_i32_0 : i32, i32
  }
  func.func @transform_9(%arg0: i32) -> (i32, i32) {
    %c0_i32 = arith.constant 0 : i32
    %c0_i32_0 = arith.constant 0 : i32
    %c0_i32_1 = arith.constant 0 : i32
    return %c0_i32, %c0_i32_0 : i32, i32
  }
  func.func @transform_10(%arg0: i32) -> (i32, i32) {
    %c0_i32 = arith.constant 0 : i32
    %c0_i32_0 = arith.constant 0 : i32
    %c0_i32_1 = arith.constant 0 : i32
    return %c0_i32, %c0_i32_0 : i32, i32
  }
  func.func @transform_11(%arg0: i32) -> (i32, i32) {
    %c0_i32 = arith.constant 0 : i32
    %c0_i32_0 = arith.constant 0 : i32
    %c0_i32_1 = arith.constant 0 : i32
    return %c0_i32, %c0_i32_0 : i32, i32
  }
  func.func @transform_12(%arg0: i32) -> (i32, i32) {
    %c0_i32 = arith.constant 0 : i32
    %c0_i32_0 = arith.constant 0 : i32
    %c0_i32_1 = arith.constant 0 : i32
    return %c0_i32, %c0_i32_0 : i32, i32
  }
  func.func @transform_13(%arg0: i32) -> (i32, i32) {
    %c0_i32 = arith.constant 0 : i32
    %c0_i32_0 = arith.constant 0 : i32
    %c0_i32_1 = arith.constant 0 : i32
    return %c0_i32, %c0_i32_0 : i32, i32
  }
  func.func @transform_14(%arg0: i32) -> (i32, i32) {
    %c0_i32 = arith.constant 0 : i32
    %c0_i32_0 = arith.constant 0 : i32
    %c0_i32_1 = arith.constant 0 : i32
    return %c0_i32, %c0_i32_0 : i32, i32
  }
  func.func @transform_15(%arg0: i32) -> (i32, i32) {
    %c0_i32 = arith.constant 0 : i32
    %c0_i32_0 = arith.constant 0 : i32
    %c0_i32_1 = arith.constant 0 : i32
    return %c0_i32, %c0_i32_0 : i32, i32
  }
  func.func @transform_16(%arg0: i32) -> (i32, i32) {
    %c0_i32 = arith.constant 0 : i32
    %c0_i32_0 = arith.constant 0 : i32
    %c0_i32_1 = arith.constant 0 : i32
    return %c0_i32, %c0_i32_0 : i32, i32
  }
  func.func @transform_17(%arg0: i32) -> (i32, i32) {
    %c0_i32 = arith.constant 0 : i32
    %c0_i32_0 = arith.constant 0 : i32
    return %arg0, %c0_i32 : i32, i32
  }
  func.func @transform_18(%arg0: i32) -> (i32, i32) {
    %c0_i32 = arith.constant 0 : i32
    %c0_i32_0 = arith.constant 0 : i32
    return %arg0, %c0_i32 : i32, i32
  }
}

</mosaic_0001>

<bundles_post_ra>
// kernel: aae_forward.1
= control target key start
LH: loop header
LB: loop body
LE: loop exit
PB: predicated region body
PF: predicated region fallthrough
CT: control target
= control target key end

     0   :  { %s12874_s27 = smov 0   ;;  %s17341_s0 = inlined_call_operand.vmem [shape: bf16[512,1280], index: 0, kind: input, shape index: {}]   ;;  %s17342_s1 = inlined_call_operand.vmem [shape: bf16[1280,128], index: 1, kind: input, shape index: {}]   ;;  %s17343_s2 = inlined_call_operand.vmem [shape: f32[1,128], index: 2, kind: input, shape index: {}]   ;;  %s17344_s3 = inlined_call_operand.vmem [shape: bf16[128,128], index: 3, kind: input, shape index: {}]   ;;  %s17345_s4 = inlined_call_operand.vmem [shape: f32[1,128], index: 4, kind: input, shape index: {}]   ;;  %s17346_s5 = inlined_call_operand.vmem [shape: bf16[128,128], index: 5, kind: input, shape index: {}]   ;;  %s17347_s6 = inlined_call_operand.vmem [shape: f32[1,128], index: 6, kind: input, shape index: {}]   ;;  %s17348_s7 = inlined_call_operand.vmem [shape: bf16[128,128], index: 7, kind: input, shape index: {}]   ;;  %s17349_s8 = inlined_call_operand.vmem [shape: f32[1,128], index: 8, kind: input, shape index: {}]   ;;  %s17350_s9 = inlined_call_operand.vmem [shape: bf16[128,128], index: 9, kind: input, shape index: {}]   ;;  %s17351_s10 = inlined_call_operand.vmem [shape: f32[1,128], index: 10, kind: input, shape index: {}]   ;;  %s17352_s11 = inlined_call_operand.vmem [shape: bf16[128,128], index: 11, kind: input, shape index: {}]   ;;  %s17353_s12 = inlined_call_operand.vmem [shape: f32[1,128], index: 12, kind: input, shape index: {}]   ;;  %s17354_s13 = inlined_call_operand.vmem [shape: bf16[128,128], index: 13, kind: input, shape index: {}]   ;;  %s17355_s14 = inlined_call_operand.vmem [shape: f32[1,128], index: 14, kind: input, shape index: {}]   ;;  %s17356_s15 = inlined_call_operand.vmem [shape: bf16[128,1280], index: 15, kind: input, shape index: {}]   ;;  %s17357_s16 = inlined_call_operand.vmem [shape: f32[1,1280], index: 16, kind: input, shape index: {}]   ;;  %s17358_s17 = inlined_call_operand.vmem [shape: f32[512,1280], index: 17, kind: output, shape index: {0}]   ;;  %s17359_s18 = inlined_call_operand.vmem [shape: f32[512,128], index: 18, kind: output, shape index: {1}]  }
   0x1   :  { %17419 = sst [smem:[#allocation18_spill]] %s17341_s0 }
   0x2   :  { %17420 = sst [smem:[#allocation19_spill]] %s17342_s1 }
   0x3   :  { %17421 = sst [smem:[#allocation20_spill]] %s17343_s2 }
   0x4 LB: > { %s9594_s28 = sadd.s32 4294967295, %s12776_s27   ;;  %p9598_p0 = scmp.ge.s32.totalorder %s12776_s27, 1  ;;  %s12776_s27 = sphi %s12874_s27, %s29_s27  }
   0x5   : > { %p517_p1 = scmp.lt.s32.totalorder %s12776_s27, 3 }
   0x7   : > { %p518_p2 = pnand %p9598_p0, %p517_p1 }
   0x9   : > { %521 = sbr.rel (%p518_p2) target bundleno = 2724 (0xaa4), region = 88 }
   0xe   : > { %s17422_s0 = sld [smem:[#allocation19_spill]]  ;;  %s9599_s19 = sshll.u32 %s9594_s28, 5 }
   0xf   : > { %p579_p3 = scmp.lt.s32.totalorder %s9599_s19, 63  ;;  %s17423_s25 = sld [smem:[#allocation18_spill]] }
  0x10   : > { %s17424_s21 = sld [smem:[#allocation20_spill]] }
  0x11   : > { %s17527_s19 = smov (!%p579_p3, %s9599_s19), 63 }
  0x12   : > { %s10990_s1 = smul.u32 40, %s17527_s19  ;;  %s9604_s20 = sshll.u32 %s17527_s19, 3 }
  0x13   : > { %s13928_s2 = scalar_lea.vmem %s17359_s18, %s9604_s20  ;;  %s10991_s30 = smul.u32 80, %s17527_s19 }
  0x14   : > { %v11001_v0 = vld [vmem:[%s17422_s0 + $0x78] sm:$0xff]   ;;  %v11003_v2 = vld [vmem:[%s17422_s0 + $0x70] sm:$0xff]   ;;  %v11005_v4 = vld [vmem:[%s17422_s0 + $0x68] sm:$0xff]  }
  0x15   : > { %v11002_v1 = vld [vmem:[%s17422_s0 + $0x38] sm:$0xff]   ;;  %9982 = vmatprep.subr.bf16.mxu0 %v11001_v0  ;;  %10974 = vmatprep.subr.bf16.mxu1 %v11001_v0  ;;  %v11004_v3 = vld [vmem:[%s17422_s0 + $0x30] sm:$0xff]   ;;  %v11006_v5 = vld [vmem:[%s17422_s0 + $0x28] sm:$0xff]   ;;  %s12915_s26 = scalar_lea.vmem %s17423_s25, %s10990_s1 }
  0x16   : > { %9983 = vmatpush3.bf16.msra.mxu0 %v11002_v1  ;;  %10982 = vmatpush3.bf16.msra.mxu1 %v11002_v1  ;;  %v11007_v6 = vld [vmem:[%s17422_s0 + $0x60] sm:$0xff]   ;;  %v11009_v8 = vld [vmem:[%s17422_s0 + $0x58] sm:$0xff]   ;;  %v11011_v10 = vld [vmem:[%s17422_s0 + $0x50] sm:$0xff]  }
  0x17   : > { %9984 = vmatprep.subr.bf16.mxu0 %v11003_v2  ;;  %10975 = vmatprep.subr.bf16.mxu1 %v11003_v2  ;;  %v11008_v7 = vld [vmem:[%s17422_s0 + $0x20] sm:$0xff]   ;;  %v11010_v9 = vld [vmem:[%s17422_s0 + $0x18] sm:$0xff]   ;;  %v11012_v13 = vld [vmem:[%s17422_s0 + $0x10] sm:$0xff]  }
  0x18   : > { %v11019_v11 = vld [vmem:[%s12915_s26 + $0x4] ss:$40 sps:$4 sm:$0xff]   ;;  %v11023_v18 = vld [vmem:[%s17422_s0 + $0xf8] sm:$0xff]   ;;  %v11017_v19 = vld [vmem:[%s12915_s26] ss:$40 sps:$4 sm:$0xff]  }
  0x19   : > { %v11022_v12 = vld [vmem:[%s12915_s26 + $0x284] ss:$40 sps:$4 sm:$0xff]   ;;  %2238 = vmatprep.mubr.bf16.mxu0 %v11019_v11  ;;  %v11025_v20 = vld [vmem:[%s17422_s0 + $0x178] sm:$0xff]   ;;  %v11020_v21 = vld [vmem:[%s12915_s26 + $0x280] ss:$40 sps:$4 sm:$0xff]  }
  0x1a   : > { %9985 = vmatpush3.bf16.msra.mxu0 %v11004_v3  ;;  %10983 = vmatpush3.bf16.msra.mxu1 %v11004_v3  ;;  %v11013_v14 = vld [vmem:[%s17422_s0 + $0x48] sm:$0xff]   ;;  %v11015_v16 = vld [vmem:[%s17422_s0 + $0x40] sm:$0xff]   ;;  %v11024_v22 = vld [vmem:[%s17422_s0 + $0xb8] sm:$0xff]  }
  0x1b   : > { %9986 = vmatprep.subr.bf16.mxu0 %v11005_v4  ;;  %10976 = vmatprep.subr.bf16.mxu1 %v11005_v4  ;;  %v11014_v15 = vld [vmem:[%s17422_s0 + $0x8] sm:$0xff]   ;;  %v11016_v17 = vld [vmem:[%s17422_s0] sm:$0xff]   ;;  %v11026_v23 = vld [vmem:[%s17422_s0 + $0x138] sm:$0xff]  }
  0x1c   : > { %2302 = vmatprep.mubr.bf16.mxu1 %v11022_v12  ;;  %v11027_v24 = vld [vmem:[%s12915_s26 + $0x54] ss:$40 sps:$4 sm:$0xff]   ;;  %v11043_v30 = vld [vmem:[%s17422_s0 + $0xe8] sm:$0xff]   ;;  %v11031_v31 = vld [vmem:[%s12915_s26 + $0x50] ss:$40 sps:$4 sm:$0xff]  }
  0x1d   : > { %v11029_v25 = vld [vmem:[%s12915_s26 + $0x2d4] ss:$40 sps:$4 sm:$0xff]   ;;  %v11032_v32 = vld [vmem:[%s12915_s26 + $0x2d0] ss:$40 sps:$4 sm:$0xff]   ;;  %v11045_v33 = vld [vmem:[%s17422_s0 + $0x168] sm:$0xff]  }
  0x1e   : > { %9987 = vmatpush3.bf16.msra.mxu0 %v11006_v5  ;;  %10984 = vmatpush3.bf16.msra.mxu1 %v11006_v5  ;;  %v11033_v26 = vld [vmem:[%s17422_s0 + $0xf0] sm:$0xff]   ;;  %v11037_v34 = vld [vmem:[%s12915_s26 + $0xa4] ss:$40 sps:$4 sm:$0xff]   ;;  %v11041_v40 = vld [vmem:[%s12915_s26 + $0xa0] ss:$40 sps:$4 sm:$0xff]  }
  0x1f   : > { %9988 = vmatprep.subr.bf16.mxu0 %v11007_v6  ;;  %10977 = vmatprep.subr.bf16.mxu1 %v11007_v6  ;;  %v11034_v27 = vld [vmem:[%s17422_s0 + $0xb0] sm:$0xff]   ;;  %v11039_v35 = vld [vmem:[%s12915_s26 + $0x324] ss:$40 sps:$4 sm:$0xff]   ;;  %v11042_v41 = vld [vmem:[%s12915_s26 + $0x320] ss:$40 sps:$4 sm:$0xff]  }
  0x20   : > { %v11035_v28 = vld [vmem:[%s17422_s0 + $0x170] sm:$0xff]   ;;  %v11044_v36 = vld [vmem:[%s17422_s0 + $0xa8] sm:$0xff]   ;;  %v11053_v38 = vld [vmem:[%s17422_s0 + $0xe0] sm:$0xff]  }
  0x21   : > { %v11036_v29 = vld [vmem:[%s17422_s0 + $0x130] sm:$0xff]   ;;  %v11046_v37 = vld [vmem:[%s17422_s0 + $0x128] sm:$0xff]   ;;  %v11055_v39 = vld [vmem:[%s17422_s0 + $0x160] sm:$0xff]  }
  0x22   : > { %9989 = vmatpush3.bf16.msra.mxu0 %v11008_v7  ;;  %10985 = vmatpush3.bf16.msra.mxu1 %v11008_v7  ;;  %v11054_v42 = vld [vmem:[%s17422_s0 + $0xa0] sm:$0xff]   ;;  %v11047_v44 = vld [vmem:[%s12915_s26 + $0xf4] ss:$40 sps:$4 sm:$0xff]   ;;  %v11051_v50 = vld [vmem:[%s12915_s26 + $0xf0] ss:$40 sps:$4 sm:$0xff]  }
  0x23   : > { %9990 = vmatprep.subr.bf16.mxu0 %v11009_v8  ;;  %10978 = vmatprep.subr.bf16.mxu1 %v11009_v8  ;;  %v11056_v43 = vld [vmem:[%s17422_s0 + $0x120] sm:$0xff]   ;;  %v11049_v45 = vld [vmem:[%s12915_s26 + $0x374] ss:$40 sps:$4 sm:$0xff]   ;;  %v11052_v51 = vld [vmem:[%s12915_s26 + $0x370] ss:$40 sps:$4 sm:$0xff]  }
  0x24   : > { %v11063_v46 = vld [vmem:[%s17422_s0 + $0xd8] sm:$0xff]   ;;  %v11073_v52 = vld [vmem:[%s17422_s0 + $0xd0] sm:$0xff]   ;;  %v11057_v53 = vld [vmem:[%s12915_s26 + $0x144] ss:$40 sps:$4 sm:$0xff]  }
  0x25   : > { %v11064_v47 = vld [vmem:[%s17422_s0 + $0x98] sm:$0xff]   ;;  %v11059_v54 = vld [vmem:[%s12915_s26 + $0x3c4] ss:$40 sps:$4 sm:$0xff]   ;;  %v11074_v55 = vld [vmem:[%s17422_s0 + $0x90] sm:$0xff]  }
  0x26   : > { %9991 = vmatpush3.bf16.msra.mxu0 %v11010_v9  ;;  %10986 = vmatpush3.bf16.msra.mxu1 %v11010_v9  ;;  %v11065_v48 = vld [vmem:[%s17422_s0 + $0x158] sm:$0xff]   ;;  %v11075_v56 = vld [vmem:[%s17422_s0 + $0x150] sm:$0xff]   ;;  %v11083_v58 = vld [vmem:[%s17422_s0 + $0xc8] sm:$0xff]  }
  0x27   : > { %9992 = vmatprep.subr.bf16.mxu0 %v11011_v10  ;;  %10979 = vmatprep.subr.bf16.mxu1 %v11011_v10  ;;  %v11066_v49 = vld [vmem:[%s17422_s0 + $0x118] sm:$0xff]   ;;  %v11076_v57 = vld [vmem:[%s17422_s0 + $0x110] sm:$0xff]   ;;  %v11061_v59 = vld [vmem:[%s12915_s26 + $0x140] ss:$40 sps:$4 sm:$0xff]  }
  0x28   : > { %v11062_v60 = vld [vmem:[%s12915_s26 + $0x3c0] ss:$40 sps:$4 sm:$0xff]   ;;  %v11067_v62 = vld [vmem:[%s12915_s26 + $0x194] ss:$40 sps:$4 sm:$0xff]   ;;  %v11071_v6 = vld [vmem:[%s12915_s26 + $0x190] ss:$40 sps:$4 sm:$0xff]  }
  0x29   : > { %v11084_v61 = vld [vmem:[%s17422_s0 + $0x88] sm:$0xff]   ;;  %v11069_v1 = vld [vmem:[%s12915_s26 + $0x414] ss:$40 sps:$4 sm:$0xff]   ;;  %v11093_v2 = vld [vmem:[%s17422_s0 + $0xc0] sm:$0xff]  }
  0x2a   : > { %9993 = vmatpush3.bf16.msra.mxu0 %v11012_v13  ;;  %10987 = vmatpush3.bf16.msra.mxu1 %v11012_v13  ;;  %v11085_v63 = vld [vmem:[%s17422_s0 + $0x148] sm:$0xff]   ;;  %v11094_v3 = vld [vmem:[%s17422_s0 + $0x80] sm:$0xff]   ;;  %v11072_v7 = vld [vmem:[%s12915_s26 + $0x410] ss:$40 sps:$4 sm:$0xff]  }
  0x2b   : > { %9994 = vmatprep.subr.bf16.mxu0 %v11013_v14  ;;  %10980 = vmatprep.subr.bf16.mxu1 %v11013_v14  ;;  %v11086_v0 = vld [vmem:[%s17422_s0 + $0x108] sm:$0xff]   ;;  %v11095_v4 = vld [vmem:[%s17422_s0 + $0x140] sm:$0xff]   ;;  %v11103_v10 = vld [vmem:[%s17422_s0 + $0x1f8] sm:$0xff]  }
  0x2c   : > { %v11096_v5 = vld [vmem:[%s17422_s0 + $0x100] sm:$0xff]   ;;  %v11105_v11 = vld [vmem:[%s17422_s0 + $0x278] sm:$0xff]  }
  0x2d   : > { %v11077_v8 = vld [vmem:[%s12915_s26 + $0x1e4] ss:$40 sps:$4 sm:$0xff]   ;;  %v11081_v12 = vld [vmem:[%s12915_s26 + $0x1e0] ss:$40 sps:$4 sm:$0xff]   ;;  %v11087_v14 = vld [vmem:[%s12915_s26 + $0x234] ss:$40 sps:$4 sm:$0xff]  }
  0x2e   : > { %9995 = vmatpush3.bf16.msra.mxu0 %v11014_v15  ;;  %10988 = vmatpush3.bf16.msra.mxu1 %v11014_v15  ;;  %v11079_v9 = vld [vmem:[%s12915_s26 + $0x464] ss:$40 sps:$4 sm:$0xff]   ;;  %v11082_v13 = vld [vmem:[%s12915_s26 + $0x460] ss:$40 sps:$4 sm:$0xff]   ;;  %v11089_v15 = vld [vmem:[%s12915_s26 + $0x4b4] ss:$40 sps:$4 sm:$0xff]  }
  0x2f   : > { %9996 = vmatprep.subr.bf16.mxu0 %v11015_v16  ;;  %10981 = vmatprep.subr.bf16.mxu1 %v11015_v16  ;;  %v11091_v16 = vld [vmem:[%s12915_s26 + $0x230] ss:$40 sps:$4 sm:$0xff]  }
  0x32   : > { %9997 = vmatpush3.bf16.msra.mxu0 %v11016_v17  ;;  %10989 = vmatpush3.bf16.msra.mxu1 %v11016_v17  ;;  %v11092_v17 = vld [vmem:[%s12915_s26 + $0x4b0] ss:$40 sps:$4 sm:$0xff]  }
  0x33   : > { %10094 = vmatprep.subr.bf16.mxu1 %v11023_v18  ;;  %10206 = vmatprep.subr.bf16.mxu0 %v11025_v20  ;;  %v11099_v18 = vld [vmem:[%s12915_s26 + $0xc] ss:$40 sps:$4 sm:$0xff]   ;;  %v11097_v20 = vld [vmem:[%s12915_s26 + $0x8] ss:$40 sps:$4 sm:$0xff]  }
  0x35   : > { %2239 = vmatmul.mubr.bf16.vlgmr.msra.gmra.mxu0 %v11017_v19  ;;  %2303 = vmatmul.mubr.bf16.vlgmr.msra.gmra.mxu1 %v11020_v21  ;;  %v11102_v19 = vld [vmem:[%s12915_s26 + $0x14] ss:$40 sps:$4 sm:$0xff]   ;;  %v11100_v21 = vld [vmem:[%s12915_s26 + $0x10] ss:$40 sps:$4 sm:$0xff]  }
  0x36   : > { %10095 = vmatpush3.bf16.msra.mxu1 %v11024_v22  ;;  %10207 = vmatpush3.bf16.msra.mxu0 %v11026_v23  ;;  %v11104_v22 = vld [vmem:[%s17422_s0 + $0x1b8] sm:$0xff]  }
  0x37   : > { %2246 = vmatprep.mubr.bf16.mxu0 %v11027_v24  ;;  %2310 = vmatprep.mubr.bf16.mxu1 %v11029_v25  ;;  %v11106_v23 = vld [vmem:[%s17422_s0 + $0x238] sm:$0xff]   ;;  %v11109_v25 = vld [vmem:[%s12915_s26 + $0x64] ss:$40 sps:$4 sm:$0xff]  }
  0x38   : > { %10096 = vmatprep.subr.bf16.mxu1 %v11033_v26  ;;  %10208 = vmatprep.subr.bf16.mxu0 %v11035_v28  ;;  %v11107_v24 = vld [vmem:[%s12915_s26 + $0x5c] ss:$40 sps:$4 sm:$0xff]   ;;  %v11119_v26 = vld [vmem:[%s17422_s0 + $0x1f0] sm:$0xff]  }
  0x39   : > { %v11120_v28 = vld [vmem:[%s17422_s0 + $0x1b0] sm:$0xff]  }
  0x3a   : > { %10097 = vmatpush3.bf16.msra.mxu1 %v11034_v27  ;;  %10209 = vmatpush3.bf16.msra.mxu0 %v11036_v29  ;;  %v11121_v27 = vld [vmem:[%s17422_s0 + $0x270] sm:$0xff]  }
  0x3b   : > { %10098 = vmatprep.subr.bf16.mxu1 %v11043_v30  ;;  %10210 = vmatprep.subr.bf16.mxu0 %v11045_v33  ;;  %v11122_v29 = vld [vmem:[%s17422_s0 + $0x230] sm:$0xff]   ;;  %v11135_v30 = vld [vmem:[%s17422_s0 + $0x1e8] sm:$0xff]  }
  0x3c   : > { %v11137_v33 = vld [vmem:[%s17422_s0 + $0x268] sm:$0xff]  }
  0x3d   : > { %2247 = vmatmul.mubr.bf16.gmra.mxu0 %v11031_v31  ;;  %2311 = vmatmul.mubr.bf16.gmra.mxu1 %v11032_v32  ;;  %v11111_v31 = vld [vmem:[%s12915_s26 + $0x58] ss:$40 sps:$4 sm:$0xff]  }
  0x3e   : > { %2254 = vmatprep.mubr.bf16.mxu0 %v11037_v34  ;;  %2318 = vmatprep.mubr.bf16.mxu1 %v11039_v35  ;;  %v11112_v32 = vld [vmem:[%s12915_s26 + $0x60] ss:$40 sps:$4 sm:$0xff]   ;;  %v11113_v34 = vld [vmem:[%s12915_s26 + $0xac] ss:$40 sps:$4 sm:$0xff]  }
  0x3f   : > { %10099 = vmatpush3.bf16.msra.mxu1 %v11044_v36  ;;  %10211 = vmatpush3.bf16.msra.mxu0 %v11046_v37  ;;  %v11115_v35 = vld [vmem:[%s12915_s26 + $0xb4] ss:$40 sps:$4 sm:$0xff]   ;;  %v11136_v36 = vld [vmem:[%s17422_s0 + $0x1a8] sm:$0xff]  }
  0x40   : > { %10100 = vmatprep.subr.bf16.mxu1 %v11053_v38  ;;  %10212 = vmatprep.subr.bf16.mxu0 %v11055_v39  ;;  %v11138_v37 = vld [vmem:[%s17422_s0 + $0x228] sm:$0xff]   ;;  %v11151_v38 = vld [vmem:[%s17422_s0 + $0x1e0] sm:$0xff]  }
  0x41   : > { %v11153_v39 = vld [vmem:[%s17422_s0 + $0x260] sm:$0xff]  }
  0x43   : > { %10101 = vmatpush3.bf16.msra.mxu1 %v11054_v42  ;;  %10213 = vmatpush3.bf16.msra.mxu0 %v11056_v43  ;;  %v11152_v42 = vld [vmem:[%s17422_s0 + $0x1a0] sm:$0xff]  }
  0x44   : > { %10102 = vmatprep.subr.bf16.mxu1 %v11063_v46  ;;  %10214 = vmatprep.subr.bf16.mxu0 %v11065_v48  ;;  %v11154_v43 = vld [vmem:[%s17422_s0 + $0x220] sm:$0xff]   ;;  %v11167_v46 = vld [vmem:[%s17422_s0 + $0x1d8] sm:$0xff]  }
  0x45   : > { %2255 = vmatmul.mubr.bf16.gmra.mxu0 %v11041_v40  ;;  %2319 = vmatmul.mubr.bf16.gmra.mxu1 %v11042_v41  ;;  %v11117_v40 = vld [vmem:[%s12915_s26 + $0xa8] ss:$40 sps:$4 sm:$0xff]   ;;  %v11169_v48 = vld [vmem:[%s17422_s0 + $0x258] sm:$0xff]  }
  0x46   : > { %2262 = vmatprep.mubr.bf16.mxu0 %v11047_v44  ;;  %2326 = vmatprep.mubr.bf16.mxu1 %v11049_v45  ;;  %v11118_v41 = vld [vmem:[%s12915_s26 + $0xb0] ss:$40 sps:$4 sm:$0xff]   ;;  %v11123_v44 = vld [vmem:[%s12915_s26 + $0xfc] ss:$40 sps:$4 sm:$0xff]  }
  0x47   : > { %10103 = vmatpush3.bf16.msra.mxu1 %v11064_v47  ;;  %10215 = vmatpush3.bf16.msra.mxu0 %v11066_v49  ;;  %v11125_v45 = vld [vmem:[%s12915_s26 + $0x104] ss:$40 sps:$4 sm:$0xff]   ;;  %v11168_v47 = vld [vmem:[%s17422_s0 + $0x198] sm:$0xff]  }
  0x48   : > { %10104 = vmatprep.subr.bf16.mxu1 %v11073_v52  ;;  %10216 = vmatprep.subr.bf16.mxu0 %v11075_v56  ;;  %v11170_v49 = vld [vmem:[%s17422_s0 + $0x218] sm:$0xff]   ;;  %v11129_v52 = vld [vmem:[%s12915_s26 + $0x14c] ss:$40 sps:$4 sm:$0xff]  }
  0x49   : > { %v11185_v56 = vld [vmem:[%s17422_s0 + $0x250] sm:$0xff]  }
  0x4b   : > { %10105 = vmatpush3.bf16.msra.mxu1 %v11074_v55  ;;  %10217 = vmatpush3.bf16.msra.mxu0 %v11076_v57  ;;  %v11184_v55 = vld [vmem:[%s17422_s0 + $0x190] sm:$0xff]  }
  0x4c   : > { %10106 = vmatprep.subr.bf16.mxu1 %v11083_v58  ;;  %10218 = vmatprep.subr.bf16.mxu0 %v11085_v63  ;;  %v11186_v57 = vld [vmem:[%s17422_s0 + $0x210] sm:$0xff]   ;;  %v11200_v63 = vld [vmem:[%s17422_s0 + $0x188] sm:$0xff]  }
  0x4d   : > { %2263 = vmatmul.mubr.bf16.gmra.mxu0 %v11051_v50  ;;  %2327 = vmatmul.mubr.bf16.gmra.mxu1 %v11052_v51  ;;  %v11127_v50 = vld [vmem:[%s12915_s26 + $0xf8] ss:$40 sps:$4 sm:$0xff]   ;;  %v11133_v58 = vld [vmem:[%s12915_s26 + $0x148] ss:$40 sps:$4 sm:$0xff]  }
  0x4e   : > { %2270 = vmatprep.mubr.bf16.mxu0 %v11057_v53  ;;  %2334 = vmatprep.mubr.bf16.mxu1 %v11059_v54  ;;  %v11128_v51 = vld [vmem:[%s12915_s26 + $0x100] ss:$40 sps:$4 sm:$0xff]   ;;  %v11131_v53 = vld [vmem:[%s12915_s26 + $0x154] ss:$40 sps:$4 sm:$0xff]  }
  0x4f   : > { %10107 = vmatpush3.bf16.msra.mxu1 %v11084_v61  ;;  %10219 = vmatpush3.bf16.msra.mxu0 %v11086_v0  ;;  %v11183_v54 = vld [vmem:[%s17422_s0 + $0x1d0] sm:$0xff]   ;;  %v11141_v61 = vld [vmem:[%s12915_s26 + $0x1a4] ss:$40 sps:$4 sm:$0xff]  }
  0x50   : > { %10108 = vmatprep.subr.bf16.mxu1 %v11093_v2  ;;  %10220 = vmatprep.subr.bf16.mxu0 %v11095_v4  ;;  %v11201_v0 = vld [vmem:[%s17422_s0 + $0x248] sm:$0xff]   ;;  %v11143_v2 = vld [vmem:[%s12915_s26 + $0x198] ss:$40 sps:$4 sm:$0xff]  }
  0x51   : > { %v11145_v4 = vld [vmem:[%s12915_s26 + $0x1ec] ss:$40 sps:$4 sm:$0xff]  }
  0x53   : > { %10109 = vmatpush3.bf16.msra.mxu1 %v11094_v3  ;;  %10221 = vmatpush3.bf16.msra.mxu0 %v11096_v5  ;;  %v11144_v3 = vld [vmem:[%s12915_s26 + $0x1a0] ss:$40 sps:$4 sm:$0xff]   ;;  %v11147_v5 = vld [vmem:[%s12915_s26 + $0x1f4] ss:$40 sps:$4 sm:$0xff]  }
  0x54   : > { %10318 = vmatprep.subr.bf16.mxu1 %v11103_v10  ;;  %10430 = vmatprep.subr.bf16.mxu0 %v11105_v11  ;;  %v11218_v10 = vld [vmem:[%s17422_s0 + $0x200] sm:$0xff]   ;;  %v11150_v11 = vld [vmem:[%s12915_s26 + $0x1f0] ss:$40 sps:$4 sm:$0xff]  }
  0x55   : > { %2271 = vmatmul.mubr.bf16.gmra.mxu0 %v11061_v59  ;;  %2335 = vmatmul.mubr.bf16.gmra.mxu1 %v11062_v60  ;;  %v11134_v59 = vld [vmem:[%s12915_s26 + $0x150] ss:$40 sps:$4 sm:$0xff]   ;;  %v11139_v60 = vld [vmem:[%s12915_s26 + $0x19c] ss:$40 sps:$4 sm:$0xff]  }
  0x56   : > { %2278 = vmatprep.mubr.bf16.mxu0 %v11067_v62  ;;  %2342 = vmatprep.mubr.bf16.mxu1 %v11069_v1  ;;  %v11199_v62 = vld [vmem:[%s17422_s0 + $0x1c8] sm:$0xff]  }
  0x57   : > { %v11202_v1 = vld [vmem:[%s17422_s0 + $0x208] sm:$0xff]  }
  0x5d   : > { %2279 = vmatmul.mubr.bf16.gmra.mxu0 %v11071_v6  ;;  %2343 = vmatmul.mubr.bf16.gmra.mxu1 %v11072_v7  ;;  %v11215_v6 = vld [vmem:[%s17422_s0 + $0x1c0] sm:$0xff]  }
  0x5e   : > { %2286 = vmatprep.mubr.bf16.mxu0 %v11077_v8  ;;  %2350 = vmatprep.mubr.bf16.mxu1 %v11079_v9  ;;  %v11216_v7 = vld [vmem:[%s17422_s0 + $0x180] sm:$0xff]   ;;  %v11149_v8 = vld [vmem:[%s12915_s26 + $0x1e8] ss:$40 sps:$4 sm:$0xff]  }
  0x5f   : > { %v11217_v9 = vld [vmem:[%s17422_s0 + $0x240] sm:$0xff]  }
  0x65   : > { %2287 = vmatmul.mubr.bf16.gmra.mxu0 %v11081_v12  ;;  %2351 = vmatmul.mubr.bf16.gmra.mxu1 %v11082_v13  ;;  %v11155_v12 = vld [vmem:[%s12915_s26 + $0x23c] ss:$40 sps:$4 sm:$0xff]  }
  0x66   : > { %2294 = vmatprep.mubr.bf16.mxu0 %v11087_v14  ;;  %2358 = vmatprep.mubr.bf16.mxu1 %v11089_v15  ;;  %v11157_v13 = vld [vmem:[%s12915_s26 + $0x244] ss:$40 sps:$4 sm:$0xff]   ;;  %v11159_v14 = vld [vmem:[%s12915_s26 + $0x238] ss:$40 sps:$4 sm:$0xff]  }
  0x67   : > { %v11160_v15 = vld [vmem:[%s12915_s26 + $0x240] ss:$40 sps:$4 sm:$0xff]  }
  0x6d   : > { %2295 = vmatmul.mubr.bf16.gmra.mxu0 %v11091_v16  ;;  %2359 = vmatmul.mubr.bf16.gmra.mxu1 %v11092_v17  ;;  %v11161_v16 = vld [vmem:[%s12915_s26 + $0x28c] ss:$40 sps:$4 sm:$0xff]  }
  0x6e   : > { %2399 = vmatprep.mubr.bf16.mxu1 %v11099_v18  ;;  %2560 = vmatprep.mubr.bf16.mxu0 %v11102_v19  ;;  %v11163_v17 = vld [vmem:[%s12915_s26 + $0x294] ss:$40 sps:$4 sm:$0xff]   ;;  %v11165_v18 = vld [vmem:[%s12915_s26 + $0x288] ss:$40 sps:$4 sm:$0xff]  }
  0x6f   : > { %v11166_v19 = vld [vmem:[%s12915_s26 + $0x290] ss:$40 sps:$4 sm:$0xff]  }
  0x75   : > { %2400 = vmatmul.mubr.bf16.vlgmr.msra.gmra.mxu1 %v11097_v20  ;;  %2561 = vmatmul.mubr.bf16.vlgmr.msra.gmra.mxu0 %v11100_v21  ;;  %v11171_v20 = vld [vmem:[%s12915_s26 + $0x2dc] ss:$40 sps:$4 sm:$0xff]  }
  0x76   : > { %10319 = vmatpush3.bf16.msra.mxu1 %v11104_v22  ;;  %10431 = vmatpush3.bf16.msra.mxu0 %v11106_v23  ;;  %v11173_v21 = vld [vmem:[%s12915_s26 + $0x2e4] ss:$40 sps:$4 sm:$0xff]   ;;  %v11175_v22 = vld [vmem:[%s12915_s26 + $0x2d8] ss:$40 sps:$4 sm:$0xff]  }
  0x77   : > { %2407 = vmatprep.mubr.bf16.mxu1 %v11107_v24  ;;  %2568 = vmatprep.mubr.bf16.mxu0 %v11109_v25  ;;  %v11176_v23 = vld [vmem:[%s12915_s26 + $0x2e0] ss:$40 sps:$4 sm:$0xff]   ;;  %v11177_v24 = vld [vmem:[%s12915_s26 + $0x32c] ss:$40 sps:$4 sm:$0xff]  }
  0x78   : > { %10320 = vmatprep.subr.bf16.mxu1 %v11119_v26  ;;  %10432 = vmatprep.subr.bf16.mxu0 %v11121_v27  ;;  %v11179_v25 = vld [vmem:[%s12915_s26 + $0x334] ss:$40 sps:$4 sm:$0xff]   ;;  %v11181_v26 = vld [vmem:[%s12915_s26 + $0x328] ss:$40 sps:$4 sm:$0xff]  }
  0x79   : > { %v11182_v27 = vld [vmem:[%s12915_s26 + $0x330] ss:$40 sps:$4 sm:$0xff]  }
  0x7a   : > { %10321 = vmatpush3.bf16.msra.mxu1 %v11120_v28  ;;  %10433 = vmatpush3.bf16.msra.mxu0 %v11122_v29  ;;  %v11187_v28 = vld [vmem:[%s12915_s26 + $0x37c] ss:$40 sps:$4 sm:$0xff]  }
  0x7b   : > { %10322 = vmatprep.subr.bf16.mxu1 %v11135_v30  ;;  %10434 = vmatprep.subr.bf16.mxu0 %v11137_v33  ;;  %v11189_v29 = vld [vmem:[%s12915_s26 + $0x384] ss:$40 sps:$4 sm:$0xff]   ;;  %v11191_v30 = vld [vmem:[%s12915_s26 + $0x378] ss:$40 sps:$4 sm:$0xff]   ;;  %v11195_v33 = vld [vmem:[%s12915_s26 + $0x3d4] ss:$40 sps:$4 sm:$0xff]  }
  0x7d   : > { %2408 = vmatmul.mubr.bf16.gmra.mxu1 %v11111_v31  ;;  %2569 = vmatmul.mubr.bf16.gmra.mxu0 %v11112_v32  ;;  %v11192_v31 = vld [vmem:[%s12915_s26 + $0x380] ss:$40 sps:$4 sm:$0xff]   ;;  %v11193_v32 = vld [vmem:[%s12915_s26 + $0x3cc] ss:$40 sps:$4 sm:$0xff]  }
  0x7e   : > { %2415 = vmatprep.mubr.bf16.mxu1 %v11113_v34  ;;  %2576 = vmatprep.mubr.bf16.mxu0 %v11115_v35  ;;  %v11197_v34 = vld [vmem:[%s12915_s26 + $0x3c8] ss:$40 sps:$4 sm:$0xff]  }
  0x7f   : > { %10323 = vmatpush3.bf16.msra.mxu1 %v11136_v36  ;;  %10435 = vmatpush3.bf16.msra.mxu0 %v11138_v37  ;;  %v11198_v35 = vld [vmem:[%s12915_s26 + $0x3d0] ss:$40 sps:$4 sm:$0xff]   ;;  %v11203_v37 = vld [vmem:[%s12915_s26 + $0x41c] ss:$40 sps:$4 sm:$0xff]  }
  0x80   : > { %10324 = vmatprep.subr.bf16.mxu1 %v11151_v38  ;;  %10436 = vmatprep.subr.bf16.mxu0 %v11153_v39  ;;  %v11297_v36 = vld [vmem:[%s17344_s3 + $0x38] sm:$0xff]   ;;  %v11205_v38 = vld [vmem:[%s12915_s26 + $0x424] ss:$40 sps:$4 sm:$0xff]  }
  0x81   : > { %v11207_v39 = vld [vmem:[%s12915_s26 + $0x418] ss:$40 sps:$4 sm:$0xff]  }
  0x83   : > { %10325 = vmatpush3.bf16.msra.mxu1 %v11152_v42  ;;  %10437 = vmatpush3.bf16.msra.mxu0 %v11154_v43  ;;  %v11211_v42 = vld [vmem:[%s12915_s26 + $0x474] ss:$40 sps:$4 sm:$0xff]   ;;  %v11213_v43 = vld [vmem:[%s12915_s26 + $0x468] ss:$40 sps:$4 sm:$0xff]  }
  0x84   : > { %10326 = vmatprep.subr.bf16.mxu1 %v11167_v46  ;;  %10438 = vmatprep.subr.bf16.mxu0 %v11169_v48  ;;  %v11221_v46 = vld [vmem:[%s12915_s26 + $0x4c4] ss:$40 sps:$4 sm:$0xff]   ;;  %v11224_v48 = vld [vmem:[%s12915_s26 + $0x4c0] ss:$40 sps:$4 sm:$0xff]  }
  0x85   : > { %2416 = vmatmul.mubr.bf16.gmra.mxu1 %v11117_v40  ;;  %2577 = vmatmul.mubr.bf16.gmra.mxu0 %v11118_v41  ;;  %v11208_v40 = vld [vmem:[%s12915_s26 + $0x420] ss:$40 sps:$4 sm:$0xff]   ;;  %v11209_v41 = vld [vmem:[%s12915_s26 + $0x46c] ss:$40 sps:$4 sm:$0xff]  }
  0x86   : > { %2423 = vmatprep.mubr.bf16.mxu1 %v11123_v44  ;;  %2584 = vmatprep.mubr.bf16.mxu0 %v11125_v45  ;;  %v11214_v44 = vld [vmem:[%s12915_s26 + $0x470] ss:$40 sps:$4 sm:$0xff]   ;;  %v11219_v45 = vld [vmem:[%s12915_s26 + $0x4bc] ss:$40 sps:$4 sm:$0xff]  }
  0x87   : > { %10327 = vmatpush3.bf16.msra.mxu1 %v11168_v47  ;;  %10439 = vmatpush3.bf16.msra.mxu0 %v11170_v49  ;;  %v11223_v47 = vld [vmem:[%s12915_s26 + $0x4b8] ss:$40 sps:$4 sm:$0xff]   ;;  %v11227_v49 = vld [vmem:[%s12915_s26 + $0x1c] ss:$40 sps:$4 sm:$0xff]  }
  0x88   : > { %10328 = vmatprep.subr.bf16.mxu1 %v11183_v54  ;;  %10440 = vmatprep.subr.bf16.mxu0 %v11185_v56  ;;  %v11233_v54 = vld [vmem:[%s12915_s26 + $0x74] ss:$40 sps:$4 sm:$0xff]  }
  0x8b   : > { %10329 = vmatpush3.bf16.msra.mxu1 %v11184_v55  ;;  %10441 = vmatpush3.bf16.msra.mxu0 %v11186_v57  ;;  %v11310_v55 = vld [vmem:[%s17344_s3 + $0x30] sm:$0xff]  }
  0x8c   : > { %10330 = vmatprep.subr.bf16.mxu1 %v11199_v62  ;;  %10442 = vmatprep.subr.bf16.mxu0 %v11201_v0  ;;  %v11235_v62 = vld [vmem:[%s12915_s26 + $0x68] ss:$40 sps:$4 sm:$0xff]  }
  0x8d   : > { %2424 = vmatmul.mubr.bf16.gmra.mxu1 %v11127_v50  ;;  %2585 = vmatmul.mubr.bf16.gmra.mxu0 %v11128_v51  ;;  %v11230_v50 = vld [vmem:[%s12915_s26 + $0x24] ss:$40 sps:$4 sm:$0xff]   ;;  %v11225_v51 = vld [vmem:[%s12915_s26 + $0x18] ss:$40 sps:$4 sm:$0xff]  }
  0x8e   : > { %2431 = vmatprep.mubr.bf16.mxu1 %v11129_v52  ;;  %2592 = vmatprep.mubr.bf16.mxu0 %v11131_v53  ;;  %v11228_v52 = vld [vmem:[%s12915_s26 + $0x20] ss:$40 sps:$4 sm:$0xff]   ;;  %v11231_v53 = vld [vmem:[%s12915_s26 + $0x6c] ss:$40 sps:$4 sm:$0xff]  }
  0x8f   : > { %10331 = vmatpush3.bf16.msra.mxu1 %v11200_v63  ;;  %10443 = vmatpush3.bf16.msra.mxu0 %v11202_v1  ;;  %v11236_v63 = vld [vmem:[%s12915_s26 + $0x70] ss:$40 sps:$4 sm:$0xff]  }
  0x90   : > { %10332 = vmatprep.subr.bf16.mxu1 %v11215_v6  ;;  %10444 = vmatprep.subr.bf16.mxu0 %v11217_v9 }
  0x93   : > { %10333 = vmatpush3.bf16.msra.mxu1 %v11216_v7  ;;  %10445 = vmatpush3.bf16.msra.mxu0 %v11218_v10 }
  0x94   : > { %10686 = vmatprep.subr.bf16.mxu1 %v11297_v36 }
  0x95   : > { %2432 = vmatmul.mubr.bf16.gmra.mxu1 %v11133_v58  ;;  %2593 = vmatmul.mubr.bf16.gmra.mxu0 %v11134_v59  ;;  %v13241_v58 = vld [vmem:[%s17424_s21] ss:$0 sm:$0xff]  ;;  %v11323_v59 = vld [vmem:[%s17344_s3 + $0x28] sm:$0xff]  }
  0x96   : > { %2439 = vmatprep.mubr.bf16.mxu1 %v11139_v60  ;;  %2600 = vmatprep.mubr.bf16.mxu0 %v11141_v61 }
  0x9d   : > { %2440 = vmatmul.mubr.bf16.gmra.mxu1 %v11143_v2  ;;  %2601 = vmatmul.mubr.bf16.gmra.mxu0 %v11144_v3  ;;  %v11237_v2 = vld [vmem:[%s12915_s26 + $0xbc] ss:$40 sps:$4 sm:$0xff]  }
  0x9e   : > { %2447 = vmatprep.mubr.bf16.mxu1 %v11145_v4  ;;  %2608 = vmatprep.mubr.bf16.mxu0 %v11147_v5  ;;  %v11239_v3 = vld [vmem:[%s12915_s26 + $0xc4] ss:$40 sps:$4 sm:$0xff]  }
  0xa5   : > { %2448 = vmatmul.mubr.bf16.gmra.mxu1 %v11149_v8  ;;  %2609 = vmatmul.mubr.bf16.gmra.mxu0 %v11150_v11 }
  0xa6   : > { %2455 = vmatprep.mubr.bf16.mxu1 %v11155_v12  ;;  %2616 = vmatprep.mubr.bf16.mxu0 %v11157_v13 }
  0xad   : > { %2456 = vmatmul.mubr.bf16.gmra.mxu1 %v11159_v14  ;;  %2617 = vmatmul.mubr.bf16.gmra.mxu0 %v11160_v15 }
  0xae   : > { %2463 = vmatprep.mubr.bf16.mxu1 %v11161_v16  ;;  %2624 = vmatprep.mubr.bf16.mxu0 %v11163_v17  ;;  %v11241_v16 = vld [vmem:[%s12915_s26 + $0xb8] ss:$40 sps:$4 sm:$0xff]  }
  0xaf   : > { %v11242_v17 = vld [vmem:[%s12915_s26 + $0xc0] ss:$40 sps:$4 sm:$0xff]  }
  0xb5   : > { %2464 = vmatmul.mubr.bf16.gmra.mxu1 %v11165_v18  ;;  %2625 = vmatmul.mubr.bf16.gmra.mxu0 %v11166_v19 }
  0xb6   : > { %2471 = vmatprep.mubr.bf16.mxu1 %v11171_v20  ;;  %2632 = vmatprep.mubr.bf16.mxu0 %v11173_v21  ;;  %v11243_v20 = vld [vmem:[%s12915_s26 + $0x10c] ss:$40 sps:$4 sm:$0xff]  }
  0xb7   : > { %v11245_v21 = vld [vmem:[%s12915_s26 + $0x114] ss:$40 sps:$4 sm:$0xff]  }
  0xbd   : > { %2472 = vmatmul.mubr.bf16.gmra.mxu1 %v11175_v22  ;;  %2633 = vmatmul.mubr.bf16.gmra.mxu0 %v11176_v23  ;;  %v11324_v22 = vld [vmem:[%s17344_s3 + $0x20] sm:$0xff]  }
  0xbe   : > { %2479 = vmatprep.mubr.bf16.mxu1 %v11177_v24  ;;  %2640 = vmatprep.mubr.bf16.mxu0 %v11179_v25 }
  0xc5   : > { %2480 = vmatmul.mubr.bf16.gmra.mxu1 %v11181_v26  ;;  %2641 = vmatmul.mubr.bf16.gmra.mxu0 %v11182_v27 }
  0xc6   : > { %2487 = vmatprep.mubr.bf16.mxu1 %v11187_v28  ;;  %2648 = vmatprep.mubr.bf16.mxu0 %v11189_v29 }
  0xcd   : > { %2488 = vmatmul.mubr.bf16.gmra.mxu1 %v11191_v30  ;;  %2649 = vmatmul.mubr.bf16.gmra.mxu0 %v11192_v31 }
  0xce   : > { %2495 = vmatprep.mubr.bf16.mxu1 %v11193_v32  ;;  %2656 = vmatprep.mubr.bf16.mxu0 %v11195_v33 }
  0xd5   : > { %2496 = vmatmul.mubr.bf16.gmra.mxu1 %v11197_v34  ;;  %2657 = vmatmul.mubr.bf16.gmra.mxu0 %v11198_v35  ;;  %v11247_v35 = vld [vmem:[%s12915_s26 + $0x108] ss:$40 sps:$4 sm:$0xff]  }
  0xd6   : > { %2503 = vmatprep.mubr.bf16.mxu1 %v11203_v37  ;;  %2664 = vmatprep.mubr.bf16.mxu0 %v11205_v38 }
  0xdd   : > { %2504 = vmatmul.mubr.bf16.gmra.mxu1 %v11207_v39  ;;  %2665 = vmatmul.mubr.bf16.gmra.mxu0 %v11208_v40 }
  0xde   : > { %2511 = vmatprep.mubr.bf16.mxu1 %v11209_v41  ;;  %2672 = vmatprep.mubr.bf16.mxu0 %v11211_v42  ;;  %v11251_v42 = vld [vmem:[%s12915_s26 + $0x15c] ss:$40 sps:$4 sm:$0xff]  }
  0xe5   : > { %2512 = vmatmul.mubr.bf16.gmra.mxu1 %v11213_v43  ;;  %2673 = vmatmul.mubr.bf16.gmra.mxu0 %v11214_v44  ;;  %v11254_v43 = vld [vmem:[%s12915_s26 + $0x164] ss:$40 sps:$4 sm:$0xff]  }
  0xe6   : > { %2519 = vmatprep.mubr.bf16.mxu1 %v11219_v45  ;;  %2680 = vmatprep.mubr.bf16.mxu0 %v11221_v46 }
  0xed   : > { %2520 = vmatmul.mubr.bf16.gmra.mxu1 %v11223_v47  ;;  %2681 = vmatmul.mubr.bf16.gmra.mxu0 %v11224_v48 }
  0xee   : > { %2721 = vmatprep.mubr.bf16.mxu1 %v11227_v49  ;;  %2882 = vmatprep.mubr.bf16.mxu0 %v11230_v50 }
  0xf5   : > { %v9998_v56 = vpop.f32.mrf.mxu0  ;;  %v10046_v57 = vpop.f32.mrf.mxu1  ;;  %2722 = vmatmul.mubr.bf16.vlgmr.msra.gmra.mxu1 %v11225_v51  ;;  %2883 = vmatmul.mubr.bf16.vlgmr.msra.gmra.mxu0 %v11228_v52 }
  0xf6   : > { %2729 = vmatprep.mubr.bf16.mxu1 %v11231_v53  ;;  %2890 = vmatprep.mubr.bf16.mxu0 %v11233_v54 }
  0xf7   : > { %v9999_v60 = vpop.f32.mrf.mxu0  ;;  %v10047_v61 = vpop.f32.mrf.mxu1  ;;  %10687 = vmatpush3.bf16.msra.mxu1 %v11297_v36  ;;  %v11248_v36 = vld [vmem:[%s12915_s26 + $0x110] ss:$40 sps:$4 sm:$0xff]  }
  0xf8   : > { %v13248_v0 = vadd.f32 %v9999_v60, %v9998_v56  ;;  %v10048_v1 = vadd.f32 %v10047_v61, %v10046_v57  ;;  %10688 = vmatprep.subr.bf16.mxu1 %v11310_v55  ;;  %v11252_v60 = vld [vmem:[%s12915_s26 + $0x160] ss:$40 sps:$4 sm:$0xff]  }
  0xf9   : > { %v10001_v4 = vpop.f32.mrf.mxu0  ;;  %v10049_v5 = vpop.f32.mrf.mxu1 }
  0xfa   : > { %v13253_v6 = vadd.f32 %v10048_v1, %v13241_v58 }
  0xfb   : > { %v10002_v7 = vpop.f32.mrf.mxu0  ;;  %v10050_v8 = vpop.f32.mrf.mxu1  ;;  %10689 = vmatpush3.bf16.msra.mxu1 %v11310_v55  ;;  %v11325_v55 = vld [vmem:[%s17344_s3 + $0x18] sm:$0xff]  }
  0xfc   : > { %v13255_v9 = vadd.f32 %v10002_v7, %v10001_v4  ;;  %v10051_v10 = vadd.f32 %v10050_v8, %v10049_v5  ;;  %10690 = vmatprep.subr.bf16.mxu1 %v11323_v59 }
  0xfd   : > { %v10004_v11 = vpop.f32.mrf.mxu0  ;;  %v10052_v12 = vpop.f32.mrf.mxu1  ;;  %2730 = vmatmul.mubr.bf16.gmra.mxu1 %v11235_v62  ;;  %2891 = vmatmul.mubr.bf16.gmra.mxu0 %v11236_v63  ;;  %v11257_v62 = vld [vmem:[%s12915_s26 + $0x1ac] ss:$40 sps:$4 sm:$0xff]  }
  0xfe   : > { %v13258_v13 = vadd.f32 %v10051_v10, %v13241_v58  ;;  %2737 = vmatprep.mubr.bf16.mxu1 %v11237_v2  ;;  %2898 = vmatprep.mubr.bf16.mxu0 %v11239_v3  ;;  %v11260_v63 = vld [vmem:[%s12915_s26 + $0x1b4] ss:$40 sps:$4 sm:$0xff]  }
  0xff   : > { %v10005_v14 = vpop.f32.mrf.mxu0  ;;  %v10053_v15 = vpop.f32.mrf.mxu1  ;;  %10691 = vmatpush3.bf16.msra.mxu1 %v11323_v59  ;;  %v11249_v59 = vld [vmem:[%s12915_s26 + $0x158] ss:$40 sps:$4 sm:$0xff]  }
 0x100   : > { %v13262_v18 = vadd.f32 %v10005_v14, %v10004_v11  ;;  %v10054_v19 = vadd.f32 %v10053_v15, %v10052_v12  ;;  %10692 = vmatprep.subr.bf16.mxu1 %v11324_v22 }
 0x101   : > { %v10007_v23 = vpop.f32.mrf.mxu0  ;;  %v10055_v24 = vpop.f32.mrf.mxu1 }
 0x102   : > { %v13270_v25 = vadd.f32 %v10054_v19, %v13241_v58  ;;  %v11258_v19 = vld [vmem:[%s12915_s26 + $0x1b0] ss:$40 sps:$4 sm:$0xff]  }
 0x103   : > { %v10008_v26 = vpop.f32.mrf.mxu0  ;;  %v10056_v27 = vpop.f32.mrf.mxu1  ;;  %10693 = vmatpush3.bf16.msra.mxu1 %v11324_v22  ;;  %v11266_v22 = vld [vmem:[%s12915_s26 + $0x204] ss:$40 sps:$4 sm:$0xff]  }
 0x104   : > { %v13272_v28 = vadd.f32 %v10008_v26, %v10007_v23  ;;  %v10057_v29 = vadd.f32 %v10056_v27, %v10055_v24  ;;  %10694 = vmatprep.subr.bf16.mxu1 %v11325_v55 }
 0x105   : > { %v10010_v30 = vpop.f32.mrf.mxu0  ;;  %v10058_v31 = vpop.f32.mrf.mxu1  ;;  %2738 = vmatmul.mubr.bf16.gmra.mxu1 %v11241_v16  ;;  %2899 = vmatmul.mubr.bf16.gmra.mxu0 %v11242_v17  ;;  %v11255_v17 = vld [vmem:[%s12915_s26 + $0x1a8] ss:$40 sps:$4 sm:$0xff]  }
 0x106   : > { %v13275_v32 = vadd.f32 %v10057_v29, %v13241_v58  ;;  %2745 = vmatprep.mubr.bf16.mxu1 %v11243_v20  ;;  %2906 = vmatprep.mubr.bf16.mxu0 %v11245_v21  ;;  %v11263_v21 = vld [vmem:[%s12915_s26 + $0x1fc] ss:$40 sps:$4 sm:$0xff]  }
 0x107   : > { %v10011_v33 = vpop.f32.mrf.mxu0  ;;  %v10059_v34 = vpop.f32.mrf.mxu1  ;;  %10695 = vmatpush3.bf16.msra.mxu1 %v11325_v55 }
 0x108   : > { %v13279_v37 = vadd.f32 %v10011_v33, %v10010_v30  ;;  %v10060_v38 = vadd.f32 %v10059_v34, %v10058_v31 }
 0x109   : > { %v10013_v39 = vpop.f32.mrf.mxu0  ;;  %v10061_v40 = vpop.f32.mrf.mxu1 }
 0x10a   : > { %v13282_v41 = vadd.f32 %v10060_v38, %v13241_v58  ;;  %v11326_v38 = vld [vmem:[%s17344_s3 + $0x10] sm:$0xff]  }
 0x10b   : > { %v10014_v44 = vpop.f32.mrf.mxu0  ;;  %v10062_v45 = vpop.f32.mrf.mxu1  ;;  %10696 = vmatprep.subr.bf16.mxu1 %v11326_v38 }
 0x10c   : > { %v13286_v46 = vadd.f32 %v10014_v44, %v10013_v39  ;;  %v10063_v47 = vadd.f32 %v10062_v45, %v10061_v40  ;;  %v11269_v45 = vld [vmem:[%s12915_s26 + $0x24c] ss:$40 sps:$4 sm:$0xff]   ;;  %10697 = vmatpush3.bf16.msra.mxu1 %v11326_v38 }
 0x10d   : > { %v10016_v48 = vpop.f32.mrf.mxu0  ;;  %v10064_v49 = vpop.f32.mrf.mxu1  ;;  %2746 = vmatmul.mubr.bf16.gmra.mxu1 %v11247_v35  ;;  %2907 = vmatmul.mubr.bf16.gmra.mxu0 %v11248_v36 }
 0x10e   : > { %v13289_v50 = vadd.f32 %v10063_v47, %v13241_v58  ;;  %2753 = vmatprep.mubr.bf16.mxu1 %v11251_v42  ;;  %2914 = vmatprep.mubr.bf16.mxu0 %v11254_v43  ;;  %v11261_v42 = vld [vmem:[%s12915_s26 + $0x1f8] ss:$40 sps:$4 sm:$0xff]   ;;  %v11272_v47 = vld [vmem:[%s12915_s26 + $0x254] ss:$40 sps:$4 sm:$0xff]  }
 0x10f   : > { %v10017_v51 = vpop.f32.mrf.mxu0  ;;  %v10065_v52 = vpop.f32.mrf.mxu1  ;;  %v11264_v43 = vld [vmem:[%s12915_s26 + $0x200] ss:$40 sps:$4 sm:$0xff]  }
 0x110   : > { %v13291_v53 = vadd.f32 %v10017_v51, %v10016_v48  ;;  %v10066_v54 = vadd.f32 %v10065_v52, %v10064_v49 }
 0x111   : > { %v10019_v56 = vpop.f32.mrf.mxu0  ;;  %v10067_v57 = vpop.f32.mrf.mxu1 }
 0x112   : > { %v13299_v61 = vadd.f32 %v10066_v54, %v13241_v58 }
 0x113   : > { %v10020_v1 = vpop.f32.mrf.mxu0  ;;  %v10068_v2 = vpop.f32.mrf.mxu1 }
 0x114   : > { %v13303_v3 = vadd.f32 %v10020_v1, %v10019_v56  ;;  %v10069_v4 = vadd.f32 %v10068_v2, %v10067_v57  ;;  %v11267_v2 = vld [vmem:[%s12915_s26 + $0x248] ss:$40 sps:$4 sm:$0xff]  }
 0x115   : > { %v10022_v5 = vpop.f32.mrf.mxu0  ;;  %v10070_v7 = vpop.f32.mrf.mxu1  ;;  %2754 = vmatmul.mubr.bf16.gmra.mxu1 %v11249_v59  ;;  %2915 = vmatmul.mubr.bf16.gmra.mxu0 %v11252_v60 }
 0x116   : > { %v13306_v8 = vadd.f32 %v10069_v4, %v13241_v58  ;;  %2761 = vmatprep.mubr.bf16.mxu1 %v11257_v62  ;;  %2922 = vmatprep.mubr.bf16.mxu0 %v11260_v63  ;;  %v11270_v4 = vld [vmem:[%s12915_s26 + $0x250] ss:$40 sps:$4 sm:$0xff]  }
 0x117   : > { %v10023_v10 = vpop.f32.mrf.mxu0  ;;  %v10071_v11 = vpop.f32.mrf.mxu1 }
 0x118   : > { %v13308_v12 = vadd.f32 %v10023_v10, %v10022_v5  ;;  %v10072_v14 = vadd.f32 %v10071_v11, %v10070_v7  ;;  %v11275_v7 = vld [vmem:[%s12915_s26 + $0x29c] ss:$40 sps:$4 sm:$0xff]  }
 0x119   : > { %v10025_v15 = vpop.f32.mrf.mxu0  ;;  %v10073_v16 = vpop.f32.mrf.mxu1  ;;  %v11278_v10 = vld [vmem:[%s12915_s26 + $0x2a4] ss:$40 sps:$4 sm:$0xff]  }
 0x11a   : > { %v13313_v20 = vadd.f32 %v10072_v14, %v13241_v58 }
 0x11b   : > { %v10026_v23 = vpop.f32.mrf.mxu0  ;;  %v10074_v24 = vpop.f32.mrf.mxu1 }
 0x11c   : > { %v13317_v26 = vadd.f32 %v10026_v23, %v10025_v15  ;;  %v10075_v27 = vadd.f32 %v10074_v24, %v10073_v16 }
 0x11d   : > { %v10028_v29 = vpop.f32.mrf.mxu0  ;;  %v10076_v30 = vpop.f32.mrf.mxu1  ;;  %2762 = vmatmul.mubr.bf16.gmra.mxu1 %v11255_v17  ;;  %2923 = vmatmul.mubr.bf16.gmra.mxu0 %v11258_v19 }
 0x11e   : > { %v13320_v31 = vadd.f32 %v10075_v27, %v13241_v58  ;;  %2769 = vmatprep.mubr.bf16.mxu1 %v11263_v21  ;;  %2930 = vmatprep.mubr.bf16.mxu0 %v11266_v22 }
 0x11f   : > { %v10029_v33 = vpop.f32.mrf.mxu0  ;;  %v10077_v34 = vpop.f32.mrf.mxu1 }
 0x120   : > { %v13322_v35 = vadd.f32 %v10029_v33, %v10028_v29  ;;  %v10078_v36 = vadd.f32 %v10077_v34, %v10076_v30  ;;  %v11327_v29 = vld [vmem:[%s17344_s3 + $0x8] sm:$0xff]   ;;  %v11273_v34 = vld [vmem:[%s12915_s26 + $0x298] ss:$40 sps:$4 sm:$0xff]  }
 0x121   : > { %v10031_v39 = vpop.f32.mrf.mxu0  ;;  %v10079_v40 = vpop.f32.mrf.mxu1  ;;  %10698 = vmatprep.subr.bf16.mxu1 %v11327_v29 }
 0x122   : > { %v13330_v44 = vadd.f32 %v10078_v36, %v13241_v58  ;;  %v11276_v36 = vld [vmem:[%s12915_s26 + $0x2a0] ss:$40 sps:$4 sm:$0xff]   ;;  %10699 = vmatpush3.bf16.msra.mxu1 %v11327_v29 }
 0x123   : > { %v10032_v48 = vpop.f32.mrf.mxu0  ;;  %v10080_v49 = vpop.f32.mrf.mxu1 }
 0x124   : > { %v13334_v51 = vadd.f32 %v10032_v48, %v10031_v39  ;;  %v10081_v52 = vadd.f32 %v10080_v49, %v10079_v40  ;;  %v11281_v39 = vld [vmem:[%s12915_s26 + $0x2ec] ss:$40 sps:$4 sm:$0xff]  }
 0x125   : > { %v10034_v54 = vpop.f32.mrf.mxu0  ;;  %v10082_v55 = vpop.f32.mrf.mxu1  ;;  %2770 = vmatmul.mubr.bf16.gmra.mxu1 %v11261_v42  ;;  %2931 = vmatmul.mubr.bf16.gmra.mxu0 %v11264_v43  ;;  %v11284_v40 = vld [vmem:[%s12915_s26 + $0x2f4] ss:$40 sps:$4 sm:$0xff]  }
 0x126   : > { %v13337_v56 = vadd.f32 %v10081_v52, %v13241_v58  ;;  %2777 = vmatprep.mubr.bf16.mxu1 %v11269_v45  ;;  %2938 = vmatprep.mubr.bf16.mxu0 %v11272_v47 }
 0x127   : > { %v10035_v57 = vpop.f32.mrf.mxu0  ;;  %v10083_v59 = vpop.f32.mrf.mxu1 }
 0x128   : > { %v13339_v60 = vadd.f32 %v10035_v57, %v10034_v54  ;;  %v10084_v62 = vadd.f32 %v10083_v59, %v10082_v55  ;;  %v2241_v57 = vadd.f32 %v13248_v0, %v13241_v58 }
 0x129   : > { %v10037_v63 = vpop.f32.mrf.mxu0  ;;  %v10085_v1 = vpop.f32.mrf.mxu1 }
 0x12a   : > { %v13344_v5 = vadd.f32 %v10084_v62, %v13241_v58 }
 0x12b   : > { %v10038_v11 = vpop.f32.mrf.mxu0  ;;  %v10086_v14 = vpop.f32.mrf.mxu1 }
 0x12c   : > { %v13348_v15 = vadd.f32 %v10038_v11, %v10037_v63  ;;  %v10087_v16 = vadd.f32 %v10086_v14, %v10085_v1  ;;  %v11290_v11 = vld [vmem:[%s12915_s26 + $0x344] ss:$40 sps:$4 sm:$0xff]  }
 0x12d   : > { %v10040_v17 = vpop.f32.mrf.mxu0  ;;  %v10088_v19 = vpop.f32.mrf.mxu1  ;;  %2778 = vmatmul.mubr.bf16.gmra.mxu1 %v11267_v2  ;;  %2939 = vmatmul.mubr.bf16.gmra.mxu0 %v11270_v4  ;;  %v11279_v2 = vld [vmem:[%s12915_s26 + $0x2e8] ss:$40 sps:$4 sm:$0xff]  }
 0x12e   : > { %v13351_v21 = vadd.f32 %v10087_v16, %v13241_v58  ;;  %2785 = vmatprep.mubr.bf16.mxu1 %v11275_v7  ;;  %2946 = vmatprep.mubr.bf16.mxu0 %v11278_v10  ;;  %v11282_v4 = vld [vmem:[%s12915_s26 + $0x2f0] ss:$40 sps:$4 sm:$0xff]   ;;  %v11287_v10 = vld [vmem:[%s12915_s26 + $0x33c] ss:$40 sps:$4 sm:$0xff]  }
 0x12f   : > { %v10041_v22 = vpop.f32.mrf.mxu0  ;;  %v10089_v23 = vpop.f32.mrf.mxu1 }
 0x130   : > { %v13353_v24 = vadd.f32 %v10041_v22, %v10040_v17  ;;  %v10090_v27 = vadd.f32 %v10089_v23, %v10088_v19  ;;  %v2244_v17 = vadd.f32 %v13255_v9, %v13241_v58  ;;  %v2249_v9 = vadd.f32 %v13262_v18, %v13241_v58 }
 0x131   : > { %v10043_v30 = vpop.f32.mrf.mxu0  ;;  %v10091_v33 = vpop.f32.mrf.mxu1  ;;  %v2252_v18 = vadd.f32 %v13272_v28, %v13241_v58  ;;  %v2257_v28 = vadd.f32 %v13279_v37, %v13241_v58 }
 0x132   : > { %v13361_v38 = vadd.f32 %v10090_v27, %v13241_v58 }
 0x133   : > { %v10044_v42 = vpop.f32.mrf.mxu0  ;;  %v10092_v43 = vpop.f32.mrf.mxu1 }
 0x134   : > { %v13365_v45 = vadd.f32 %v10044_v42, %v10043_v30  ;;  %v10093_v47 = vadd.f32 %v10092_v43, %v10091_v33  ;;  %v11285_v43 = vld [vmem:[%s12915_s26 + $0x338] ss:$40 sps:$4 sm:$0xff]  }
 0x135   : > { %v10110_v48 = vpop.f32.mrf.mxu1  ;;  %v10222_v49 = vpop.f32.mrf.mxu0  ;;  %2786 = vmatmul.mubr.bf16.gmra.mxu1 %v11273_v34  ;;  %2947 = vmatmul.mubr.bf16.gmra.mxu0 %v11276_v36 }
 0x136   : > { %v13368_v52 = vadd.f32 %v10093_v47, %v13241_v58  ;;  %2793 = vmatprep.mubr.bf16.mxu1 %v11281_v39  ;;  %2954 = vmatprep.mubr.bf16.mxu0 %v11284_v40  ;;  %v11288_v47 = vld [vmem:[%s12915_s26 + $0x340] ss:$40 sps:$4 sm:$0xff]  }
 0x137   : > { %v10111_v54 = vpop.f32.mrf.mxu1  ;;  %v10223_v55 = vpop.f32.mrf.mxu0 }
 0x138   : > { %v10112_v59 = vadd.f32 %v10111_v54, %v10110_v48  ;;  %v10224_v62 = vadd.f32 %v10223_v55, %v10222_v49  ;;  %v11293_v49 = vld [vmem:[%s12915_s26 + $0x38c] ss:$40 sps:$4 sm:$0xff]   ;;  %v11328_v55 = vld [vmem:[%s17344_s3] sm:$0xff]  }
 0x139   : > { %v10113_v63 = vpop.f32.mrf.mxu1  ;;  %v10225_v1 = vpop.f32.mrf.mxu0  ;;  %v11296_v54 = vld [vmem:[%s12915_s26 + $0x394] ss:$40 sps:$4 sm:$0xff]   ;;  %10700 = vmatprep.subr.bf16.mxu1 %v11328_v55 }
 0x13a   : > { %v2402_v7 = vadd.f32 %v10112_v59, %v2241_v57  ;;  %10701 = vmatpush3.bf16.msra.mxu1 %v11328_v55 }
 0x13b   : > { %v10114_v14 = vpop.f32.mrf.mxu1  ;;  %v10226_v16 = vpop.f32.mrf.mxu0 }
 0x13c   : > { %v13378_v19 = vadd.f32 %v10224_v62, %v2402_v7  ;;  %v10115_v22 = vadd.f32 %v10114_v14, %v10113_v63  ;;  %v10227_v23 = vadd.f32 %v10226_v16, %v10225_v1 }
 0x13d   : > { %v10116_v0 = vpop.f32.mrf.mxu1  ;;  %v10228_v27 = vpop.f32.mrf.mxu0  ;;  %2794 = vmatmul.mubr.bf16.gmra.mxu1 %v11279_v2  ;;  %2955 = vmatmul.mubr.bf16.gmra.mxu0 %v11282_v4 }
 0x13e   : > { %v2405_v29 = vadd.f32 %v10115_v22, %v2244_v17  ;;  %2801 = vmatprep.mubr.bf16.mxu1 %v11287_v10  ;;  %2962 = vmatprep.mubr.bf16.mxu0 %v11290_v11 }
 0x13f   : > { %v10117_v30 = vpop.f32.mrf.mxu1  ;;  %v10229_v33 = vpop.f32.mrf.mxu0 }
 0x140   : > { %v13382_v34 = vadd.f32 %v10227_v23, %v2405_v29  ;;  %v10118_v36 = vadd.f32 %v10117_v30, %v10116_v0  ;;  %v10230_v39 = vadd.f32 %v10229_v33, %v10228_v27  ;;  %v11291_v0 = vld [vmem:[%s12915_s26 + $0x388] ss:$40 sps:$4 sm:$0xff]   ;;  %v11300_v30 = vld [vmem:[%s12915_s26 + $0x3dc] ss:$40 sps:$4 sm:$0xff]  }
 0x141   : > { %v10119_v40 = vpop.f32.mrf.mxu1  ;;  %v10231_v42 = vpop.f32.mrf.mxu0  ;;  %v11294_v27 = vld [vmem:[%s12915_s26 + $0x390] ss:$40 sps:$4 sm:$0xff]   ;;  %v11303_v33 = vld [vmem:[%s12915_s26 + $0x3e4] ss:$40 sps:$4 sm:$0xff]  }
 0x142   : > { %v2410_v48 = vadd.f32 %v10118_v36, %v2249_v9 }
 0x143   : > { %v10120_v57 = vpop.f32.mrf.mxu1  ;;  %v10232_v59 = vpop.f32.mrf.mxu0 }
 0x144   : > { %v13393_v62 = vadd.f32 %v10230_v39, %v2410_v48  ;;  %v10121_v63 = vadd.f32 %v10120_v57, %v10119_v40  ;;  %v10233_v1 = vadd.f32 %v10232_v59, %v10231_v42  ;;  %v2260_v39 = vadd.f32 %v13286_v46, %v13241_v58 }
 0x145   : > { %v10122_v2 = vpop.f32.mrf.mxu1  ;;  %v10234_v4 = vpop.f32.mrf.mxu0  ;;  %2802 = vmatmul.mubr.bf16.gmra.mxu1 %v11285_v43  ;;  %2963 = vmatmul.mubr.bf16.gmra.mxu0 %v11288_v47  ;;  %v2265_v46 = vadd.f32 %v13291_v53, %v13241_v58 }
 0x146   : > { %v2413_v7 = vadd.f32 %v10121_v63, %v2252_v18  ;;  %2809 = vmatprep.mubr.bf16.mxu1 %v11293_v49  ;;  %2970 = vmatprep.mubr.bf16.mxu0 %v11296_v54 }
 0x147   : > { %v10123_v10 = vpop.f32.mrf.mxu1  ;;  %v10235_v11 = vpop.f32.mrf.mxu0 }
 0x148   : > { %v13397_v14 = vadd.f32 %v10233_v1, %v2413_v7  ;;  %v10124_v16 = vadd.f32 %v10123_v10, %v10122_v2  ;;  %v10236_v17 = vadd.f32 %v10235_v11, %v10234_v4  ;;  %v11298_v1 = vld [vmem:[%s12915_s26 + $0x3d8] ss:$40 sps:$4 sm:$0xff]   ;;  %v11306_v7 = vld [vmem:[%s12915_s26 + $0x42c] ss:$40 sps:$4 sm:$0xff]  }
 0x149   : > { %v10125_v22 = vpop.f32.mrf.mxu1  ;;  %v10237_v23 = vpop.f32.mrf.mxu0  ;;  %v11301_v2 = vld [vmem:[%s12915_s26 + $0x3e0] ss:$40 sps:$4 sm:$0xff]   ;;  %v11309_v10 = vld [vmem:[%s12915_s26 + $0x434] ss:$40 sps:$4 sm:$0xff]  }
 0x14a   : > { %v2418_v29 = vadd.f32 %v10124_v16, %v2257_v28  ;;  %v2268_v16 = vadd.f32 %v13303_v3, %v13241_v58  ;;  %v2273_v3 = vadd.f32 %v13308_v12, %v13241_v58 }
 0x14b   : > { %v10126_v9 = vpop.f32.mrf.mxu1  ;;  %v10238_v36 = vpop.f32.mrf.mxu0 }
 0x14c   : > { %v13405_v40 = vadd.f32 %v10236_v17, %v2418_v29  ;;  %v10127_v42 = vadd.f32 %v10126_v9, %v10125_v22  ;;  %v10239_v37 = vadd.f32 %v10238_v36, %v10237_v23 }
 0x14d   : > { %v10128_v43 = vpop.f32.mrf.mxu1  ;;  %v10240_v47 = vpop.f32.mrf.mxu0  ;;  %2810 = vmatmul.mubr.bf16.gmra.mxu1 %v11291_v0  ;;  %2971 = vmatmul.mubr.bf16.gmra.mxu0 %v11294_v27 }
 0x14e   : > { %v2421_v48 = vadd.f32 %v10127_v42, %v2260_v39  ;;  %2817 = vmatprep.mubr.bf16.mxu1 %v11300_v30  ;;  %2978 = vmatprep.mubr.bf16.mxu0 %v11303_v33 }
 0x14f   : > { %v10129_v49 = vpop.f32.mrf.mxu1  ;;  %v10241_v54 = vpop.f32.mrf.mxu0 }
 0x150   : > { %v13409_v55 = vadd.f32 %v10239_v37, %v2421_v48  ;;  %v10130_v57 = vadd.f32 %v10129_v49, %v10128_v43  ;;  %v10242_v59 = vadd.f32 %v10241_v54, %v10240_v47  ;;  %v11304_v37 = vld [vmem:[%s12915_s26 + $0x428] ss:$40 sps:$4 sm:$0xff]   ;;  %v11313_v48 = vld [vmem:[%s12915_s26 + $0x47c] ss:$40 sps:$4 sm:$0xff]  }
 0x151   : > { %v10131_v18 = vpop.f32.mrf.mxu1  ;;  %v10243_v63 = vpop.f32.mrf.mxu0  ;;  %v11307_v43 = vld [vmem:[%s12915_s26 + $0x430] ss:$40 sps:$4 sm:$0xff]   ;;  %v11316_v49 = vld [vmem:[%s12915_s26 + $0x484] ss:$40 sps:$4 sm:$0xff]  }
 0x152   : > { %v2426_v4 = vadd.f32 %v10130_v57, %v2265_v46  ;;  %v2276_v57 = vadd.f32 %v13317_v26, %v13241_v58  ;;  %v2281_v26 = vadd.f32 %v13322_v35, %v13241_v58 }
 0x153   : > { %v10132_v11 = vpop.f32.mrf.mxu1  ;;  %v10244_v28 = vpop.f32.mrf.mxu0 }
 0x154   : > { %v13417_v17 = vadd.f32 %v10242_v59, %v2426_v4  ;;  %v10133_v22 = vadd.f32 %v10132_v11, %v10131_v18  ;;  %v10245_v53 = vadd.f32 %v10244_v28, %v10243_v63 }
 0x155   : > { %v10134_v23 = vpop.f32.mrf.mxu1  ;;  %v10246_v0 = vpop.f32.mrf.mxu0  ;;  %2818 = vmatmul.mubr.bf16.gmra.mxu1 %v11298_v1  ;;  %2979 = vmatmul.mubr.bf16.gmra.mxu0 %v11301_v2 }
 0x156   : > { %v2429_v27 = vadd.f32 %v10133_v22, %v2268_v16  ;;  %2825 = vmatprep.mubr.bf16.mxu1 %v11306_v7  ;;  %2986 = vmatprep.mubr.bf16.mxu0 %v11309_v10 }
 0x157   : > { %v10135_v29 = vpop.f32.mrf.mxu1  ;;  %v10247_v30 = vpop.f32.mrf.mxu0 }
 0x158   : > { %v13421_v33 = vadd.f32 %v10245_v53, %v2429_v27  ;;  %v10136_v9 = vadd.f32 %v10135_v29, %v10134_v23  ;;  %v10248_v36 = vadd.f32 %v10247_v30, %v10246_v0  ;;  %v11311_v53 = vld [vmem:[%s12915_s26 + $0x478] ss:$40 sps:$4 sm:$0xff]   ;;  %v11319_v27 = vld [vmem:[%s12915_s26 + $0x4cc] ss:$40 sps:$4 sm:$0xff]  }
 0x159   : > { %v10137_v39 = vpop.f32.mrf.mxu1  ;;  %v10249_v42 = vpop.f32.mrf.mxu0  ;;  %v11314_v23 = vld [vmem:[%s12915_s26 + $0x480] ss:$40 sps:$4 sm:$0xff]   ;;  %v11322_v29 = vld [vmem:[%s12915_s26 + $0x4d4] ss:$40 sps:$4 sm:$0xff]  }
 0x15a   : > { %v2434_v47 = vadd.f32 %v10136_v9, %v2273_v3  ;;  %v2284_v9 = vadd.f32 %v13334_v51, %v13241_v58 }
 0x15b   : > { %v10138_v54 = vpop.f32.mrf.mxu1  ;;  %v10250_v46 = vpop.f32.mrf.mxu0 }
 0x15c   : > { %v13429_v59 = vadd.f32 %v10248_v36, %v2434_v47  ;;  %v10139_v18 = vadd.f32 %v10138_v54, %v10137_v39  ;;  %v10251_v2 = vadd.f32 %v10250_v46, %v10249_v42 }
 0x15d   : > { %v10140_v12 = vpop.f32.mrf.mxu1  ;;  %v10252_v63 = vpop.f32.mrf.mxu0  ;;  %2826 = vmatmul.mubr.bf16.gmra.mxu1 %v11304_v37  ;;  %2987 = vmatmul.mubr.bf16.gmra.mxu0 %v11307_v43 }
 0x15e   : > { %v2437_v1 = vadd.f32 %v10139_v18, %v2276_v57  ;;  %2833 = vmatprep.mubr.bf16.mxu1 %v11313_v48  ;;  %2994 = vmatprep.mubr.bf16.mxu0 %v11316_v49  ;;  %v2289_v49 = vadd.f32 %v13339_v60, %v13241_v58 }
 0x15f   : > { %v10141_v4 = vpop.f32.mrf.mxu1  ;;  %v10253_v7 = vpop.f32.mrf.mxu0 }
 0x160   : > { %v13433_v10 = vadd.f32 %v10251_v2, %v2437_v1  ;;  %v10142_v11 = vadd.f32 %v10141_v4, %v10140_v12  ;;  %v10254_v28 = vadd.f32 %v10253_v7, %v10252_v63  ;;  %v11317_v12 = vld [vmem:[%s12915_s26 + $0x4c8] ss:$40 sps:$4 sm:$0xff]   ;;  %v2292_v7 = vadd.f32 %v13348_v15, %v13241_v58 }
 0x161   : > { %v10143_v16 = vpop.f32.mrf.mxu1  ;;  %v10255_v22 = vpop.f32.mrf.mxu0  ;;  %v11320_v63 = vld [vmem:[%s12915_s26 + $0x4d0] ss:$40 sps:$4 sm:$0xff]  }
 0x162   : > { %v2442_v0 = vadd.f32 %v10142_v11, %v2281_v26 }
 0x163   : > { %v10144_v30 = vpop.f32.mrf.mxu1  ;;  %v10256_v3 = vpop.f32.mrf.mxu0 }
 0x164   : > { %v13441_v36 = vadd.f32 %v10254_v28, %v2442_v0  ;;  %v10145_v39 = vadd.f32 %v10144_v30, %v10143_v16  ;;  %v10257_v43 = vadd.f32 %v10256_v3, %v10255_v22  ;;  %v2297_v0 = vadd.f32 %v13353_v24, %v13241_v58 }
 0x165   : > { %v10146_v35 = vpop.f32.mrf.mxu1  ;;  %v10258_v42 = vpop.f32.mrf.mxu0  ;;  %2834 = vmatmul.mubr.bf16.gmra.mxu1 %v11311_v53  ;;  %2995 = vmatmul.mubr.bf16.gmra.mxu0 %v11314_v23 }
 0x166   : > { %v2445_v37 = vadd.f32 %v10145_v39, %v2284_v9  ;;  %2841 = vmatprep.mubr.bf16.mxu1 %v11319_v27  ;;  %3002 = vmatprep.mubr.bf16.mxu0 %v11322_v29 }
 0x167   : > { %v10147_v47 = vpop.f32.mrf.mxu1  ;;  %v10259_v48 = vpop.f32.mrf.mxu0 }
 0x168   : > { %v13445_v54 = vadd.f32 %v10257_v43, %v2445_v37  ;;  %v10148_v51 = vadd.f32 %v10147_v47, %v10146_v35  ;;  %v10260_v46 = vadd.f32 %v10259_v48, %v10258_v42  ;;  %v2300_v42 = vadd.f32 %v13365_v45, %v13241_v58 }
 0x169   : > { %v10149_v57 = vpop.f32.mrf.mxu1  ;;  %v10261_v18 = vpop.f32.mrf.mxu0 }
 0x16a   : > { %v2450_v1 = vadd.f32 %v10148_v51, %v2289_v49 }
 0x16b   : > { %v10150_v2 = vpop.f32.mrf.mxu1  ;;  %v10262_v4 = vpop.f32.mrf.mxu0 }
 0x16c   : > { %v13451_v26 = vadd.f32 %v10260_v46, %v2450_v1  ;;  %v10151_v11 = vadd.f32 %v10150_v2, %v10149_v57  ;;  %v10263_v22 = vadd.f32 %v10262_v4, %v10261_v18 }
 0x16d   : > { %v10152_v28 = vpop.f32.mrf.mxu1  ;;  %v10264_v16 = vpop.f32.mrf.mxu0  ;;  %2842 = vmatmul.mubr.bf16.gmra.mxu1 %v11317_v12  ;;  %3003 = vmatmul.mubr.bf16.gmra.mxu0 %v11320_v63 }
 0x16e   : > { %v2453_v60 = vadd.f32 %v10151_v11, %v2292_v7 }
 0x16f   : > { %v10153_v53 = vpop.f32.mrf.mxu1  ;;  %v10265_v23 = vpop.f32.mrf.mxu0 }
 0x170   : > { %v13455_v27 = vadd.f32 %v10263_v22, %v2453_v60  ;;  %v10154_v29 = vadd.f32 %v10153_v53, %v10152_v28  ;;  %v10266_v30 = vadd.f32 %v10265_v23, %v10264_v16 }
 0x171   : > { %v10155_v3 = vpop.f32.mrf.mxu1  ;;  %v10267_v15 = vpop.f32.mrf.mxu0 }
 0x172   : > { %v2458_v9 = vadd.f32 %v10154_v29, %v2297_v0 }
 0x173   : > { %v10156_v39 = vpop.f32.mrf.mxu1  ;;  %v10268_v35 = vpop.f32.mrf.mxu0 }
 0x174   : > { %v13459_v37 = vadd.f32 %v10266_v30, %v2458_v9  ;;  %v10157_v43 = vadd.f32 %v10156_v39, %v10155_v3  ;;  %v10269_v51 = vadd.f32 %v10268_v35, %v10267_v15 }
 0x175   : > { %v10158_v47 = vpop.f32.mrf.mxu1  ;;  %v10270_v48 = vpop.f32.mrf.mxu0 }
 0x176   : > { %v2461_v49 = vadd.f32 %v10157_v43, %v2300_v42 }
 0x177   : > { %v10159_v24 = vpop.f32.mrf.mxu1  ;;  %v10271_v46 = vpop.f32.mrf.mxu0 }
 0x178   : > { %v13461_v57 = vadd.f32 %v10269_v51, %v2461_v49  ;;  %v10160_v18 = vadd.f32 %v10159_v24, %v10158_v47  ;;  %v10272_v12 = vadd.f32 %v10271_v46, %v10270_v48 }
 0x179   : > { %v10161_v63 = vpop.f32.mrf.mxu1  ;;  %v10273_v1 = vpop.f32.mrf.mxu0 }
 0x17a   : > { %v2466_v2 = vadd.f32 %v10160_v18, %v13253_v6 }
 0x17b   : > { %v10162_v4 = vpop.f32.mrf.mxu1  ;;  %v10274_v7 = vpop.f32.mrf.mxu0 }
 0x17c   : > { %v13464_v58 = vadd.f32 %v10272_v12, %v2466_v2  ;;  %v10163_v45 = vadd.f32 %v10162_v4, %v10161_v63  ;;  %v10275_v60 = vadd.f32 %v10274_v7, %v10273_v1 }
 0x17d   : > { %v10164_v11 = vpop.f32.mrf.mxu1  ;;  %v10276_v28 = vpop.f32.mrf.mxu0 }
 0x17e   : > { %v2469_v16 = vadd.f32 %v10163_v45, %v13258_v13 }
 0x17f   : > { %v10165_v22 = vpop.f32.mrf.mxu1  ;;  %v10277_v53 = vpop.f32.mrf.mxu0 }
 0x180   : > { %v13467_v23 = vadd.f32 %v10275_v60, %v2469_v16  ;;  %v10166_v0 = vadd.f32 %v10165_v22, %v10164_v11  ;;  %v10278_v29 = vadd.f32 %v10277_v53, %v10276_v28 }
 0x181   : > { %v10167_v30 = vpop.f32.mrf.mxu1  ;;  %v10279_v3 = vpop.f32.mrf.mxu0 }
 0x182   : > { %v2474_v6 = vadd.f32 %v10166_v0, %v13270_v25 }
 0x183   : > { %v10168_v15 = vpop.f32.mrf.mxu1  ;;  %v10280_v9 = vpop.f32.mrf.mxu0 }
 0x184   : > { %v13470_v39 = vadd.f32 %v10278_v29, %v2474_v6  ;;  %v10169_v35 = vadd.f32 %v10168_v15, %v10167_v30  ;;  %v10281_v47 = vadd.f32 %v10280_v9, %v10279_v3 }
 0x185   : > { %v10170_v42 = vpop.f32.mrf.mxu1  ;;  %v10282_v43 = vpop.f32.mrf.mxu0 }
 0x186   : > { %v2477_v13 = vadd.f32 %v10169_v35, %v13275_v32 }
 0x187   : > { %v10171_v48 = vpop.f32.mrf.mxu1  ;;  %v10283_v49 = vpop.f32.mrf.mxu0 }
 0x188   : > { %v13473_v51 = vadd.f32 %v10281_v47, %v2477_v13  ;;  %v10172_v24 = vadd.f32 %v10171_v48, %v10170_v42  ;;  %v10284_v46 = vadd.f32 %v10283_v49, %v10282_v43 }
 0x189   : > { %v10173_v18 = vpop.f32.mrf.mxu1  ;;  %v10285_v12 = vpop.f32.mrf.mxu0 }
 0x18a   : > { %v2482_v25 = vadd.f32 %v10172_v24, %v13282_v41 }
 0x18b   : > { %v10174_v63 = vpop.f32.mrf.mxu1  ;;  %v10286_v1 = vpop.f32.mrf.mxu0 }
 0x18c   : > { %v13476_v2 = vadd.f32 %v10284_v46, %v2482_v25  ;;  %v10175_v4 = vadd.f32 %v10174_v63, %v10173_v18  ;;  %v10287_v11 = vadd.f32 %v10286_v1, %v10285_v12 }
 0x18d   : > { %v10176_v7 = vpop.f32.mrf.mxu1  ;;  %v10288_v45 = vpop.f32.mrf.mxu0 }
 0x18e   : > { %v2485_v32 = vadd.f32 %v10175_v4, %v13289_v50 }
 0x18f   : > { %v10177_v28 = vpop.f32.mrf.mxu1  ;;  %v10289_v16 = vpop.f32.mrf.mxu0 }
 0x190   : > { %v13479_v60 = vadd.f32 %v10287_v11, %v2485_v32  ;;  %v10178_v22 = vadd.f32 %v10177_v28, %v10176_v7  ;;  %v10290_v53 = vadd.f32 %v10289_v16, %v10288_v45 }
 0x191   : > { %v10179_v0 = vpop.f32.mrf.mxu1  ;;  %v10291_v29 = vpop.f32.mrf.mxu0 }
 0x192   : > { %v2490_v41 = vadd.f32 %v10178_v22, %v13299_v61 }
 0x193   : > { %v10180_v30 = vpop.f32.mrf.mxu1  ;;  %v10292_v3 = vpop.f32.mrf.mxu0 }
 0x194   : > { %v13482_v6 = vadd.f32 %v10290_v53, %v2490_v41  ;;  %v10181_v15 = vadd.f32 %v10180_v30, %v10179_v0  ;;  %v10293_v42 = vadd.f32 %v10292_v3, %v10291_v29 }
 0x195   : > { %v10182_v9 = vpop.f32.mrf.mxu1  ;;  %v10294_v35 = vpop.f32.mrf.mxu0 }
 0x196   : > { %v2493_v50 = vadd.f32 %v10181_v15, %v13306_v8 }
 0x197   : > { %v10183_v43 = vpop.f32.mrf.mxu1  ;;  %v10295_v13 = vpop.f32.mrf.mxu0 }
 0x198   : > { %v13485_v47 = vadd.f32 %v10293_v42, %v2493_v50  ;;  %v10184_v48 = vadd.f32 %v10183_v43, %v10182_v9  ;;  %v10296_v49 = vadd.f32 %v10295_v13, %v10294_v35 }
 0x199   : > { %v10185_v24 = vpop.f32.mrf.mxu1  ;;  %v10297_v46 = vpop.f32.mrf.mxu0 }
 0x19a   : > { %v2498_v61 = vadd.f32 %v10184_v48, %v13313_v20 }
 0x19b   : > { %v10186_v18 = vpop.f32.mrf.mxu1  ;;  %v10298_v12 = vpop.f32.mrf.mxu0 }
 0x19c   : > { %v13488_v25 = vadd.f32 %v10296_v49, %v2498_v61  ;;  %v10187_v63 = vadd.f32 %v10186_v18, %v10185_v24  ;;  %v10299_v7 = vadd.f32 %v10298_v12, %v10297_v46 }
 0x19d   : > { %v10188_v1 = vpop.f32.mrf.mxu1  ;;  %v10300_v4 = vpop.f32.mrf.mxu0 }
 0x19e   : > { %v2501_v8 = vadd.f32 %v10187_v63, %v13320_v31 }
 0x19f   : > { %v10189_v45 = vpop.f32.mrf.mxu1  ;;  %v10301_v32 = vpop.f32.mrf.mxu0 }
 0x1a0   : > { %v13491_v11 = vadd.f32 %v10299_v7, %v2501_v8  ;;  %v10190_v28 = vadd.f32 %v10189_v45, %v10188_v1  ;;  %v10302_v16 = vadd.f32 %v10301_v32, %v10300_v4 }
 0x1a1   : > { %v10191_v22 = vpop.f32.mrf.mxu1  ;;  %v10303_v53 = vpop.f32.mrf.mxu0 }
 0x1a2   : > { %v2506_v20 = vadd.f32 %v10190_v28, %v13330_v44 }
 0x1a3   : > { %v10192_v0 = vpop.f32.mrf.mxu1  ;;  %v10304_v29 = vpop.f32.mrf.mxu0 }
 0x1a4   : > { %v13494_v41 = vadd.f32 %v10302_v16, %v2506_v20  ;;  %v10193_v30 = vadd.f32 %v10192_v0, %v10191_v22  ;;  %v10305_v9 = vadd.f32 %v10304_v29, %v10303_v53 }
 0x1a5   : > { %v10194_v3 = vpop.f32.mrf.mxu1  ;;  %v10306_v15 = vpop.f32.mrf.mxu0 }
 0x1a6   : > { %v2509_v31 = vadd.f32 %v10193_v30, %v13337_v56 }
 0x1a7   : > { %v10195_v35 = vpop.f32.mrf.mxu1  ;;  %v10307_v50 = vpop.f32.mrf.mxu0 }
 0x1a8   : > { %v13497_v42 = vadd.f32 %v10305_v9, %v2509_v31  ;;  %v10196_v43 = vadd.f32 %v10195_v35, %v10194_v3  ;;  %v10308_v13 = vadd.f32 %v10307_v50, %v10306_v15 }
 0x1a9   : > { %v10197_v48 = vpop.f32.mrf.mxu1  ;;  %v10309_v49 = vpop.f32.mrf.mxu0 }
 0x1aa   : > { %v2514_v44 = vadd.f32 %v10196_v43, %v13344_v5 }
 0x1ab   : > { %v10198_v24 = vpop.f32.mrf.mxu1  ;;  %v10310_v46 = vpop.f32.mrf.mxu0 }
 0x1ac   : > { %v13500_v61 = vadd.f32 %v10308_v13, %v2514_v44  ;;  %v10199_v18 = vadd.f32 %v10198_v24, %v10197_v48  ;;  %v10311_v1 = vadd.f32 %v10310_v46, %v10309_v49 }
 0x1ad   : > { %v10200_v12 = vpop.f32.mrf.mxu1  ;;  %v10312_v63 = vpop.f32.mrf.mxu0 }
 0x1ae   : > { %v2517_v56 = vadd.f32 %v10199_v18, %v13351_v21 }
 0x1af   : > { %v10201_v4 = vpop.f32.mrf.mxu1  ;;  %v10313_v8 = vpop.f32.mrf.mxu0 }
 0x1b0   : > { %v13503_v7 = vadd.f32 %v10311_v1, %v2517_v56  ;;  %v10202_v45 = vadd.f32 %v10201_v4, %v10200_v12  ;;  %v10314_v32 = vadd.f32 %v10313_v8, %v10312_v63  ;;  %v11329_v63 = vld [vmem:[%s17346_s5 + $0x38] sm:$0xff]  }
 0x1b1   : > { %v10203_v28 = vpop.f32.mrf.mxu1  ;;  %v10315_v16 = vpop.f32.mrf.mxu0  ;;  %10734 = vmatprep.subr.bf16.mxu1 %v11329_v63 }
 0x1b2   : > { %v2522_v5 = vadd.f32 %v10202_v45, %v13361_v38 }
 0x1b3   : > { %v10204_v22 = vpop.f32.mrf.mxu1  ;;  %v10316_v53 = vpop.f32.mrf.mxu0 }
 0x1b4   : > { %v13506_v20 = vadd.f32 %v10314_v32, %v2522_v5  ;;  %v10205_v0 = vadd.f32 %v10204_v22, %v10203_v28  ;;  %v10317_v3 = vadd.f32 %v10316_v53, %v10315_v16 }
 0x1b5   : > { %v10334_v29 = vpop.f32.mrf.mxu1  ;;  %v10446_v30 = vpop.f32.mrf.mxu0 }
 0x1b6   : > { %v2525_v21 = vadd.f32 %v10205_v0, %v13368_v52 }
 0x1b7   : > { %v10335_v15 = vpop.f32.mrf.mxu1  ;;  %v10447_v31 = vpop.f32.mrf.mxu0 }
 0x1b8   : > { %v13509_v9 = vadd.f32 %v10317_v3, %v2525_v21  ;;  %v10336_v35 = vadd.f32 %v10335_v15, %v10334_v29  ;;  %v10448_v49 = vadd.f32 %v10447_v31, %v10446_v30 }
 0x1b9   : > { %v10337_v50 = vpop.f32.mrf.mxu1  ;;  %v10449_v43 = vpop.f32.mrf.mxu0 }
 0x1ba   : > { %v2724_v13 = vadd.f32 %v10336_v35, %v13378_v19 }
 0x1bb   : > { %v10338_v38 = vpop.f32.mrf.mxu1  ;;  %v10450_v48 = vpop.f32.mrf.mxu0 }
 0x1bc   : > { %v10339_v44 = vadd.f32 %v10338_v38, %v10337_v50  ;;  %v13512_v18 = vadd.f32 %v10448_v49, %v2724_v13  ;;  %v10451_v12 = vadd.f32 %v10450_v48, %v10449_v43 }
 0x1bd   : > { %v10340_v24 = vpop.f32.mrf.mxu1  ;;  %v10452_v46 = vpop.f32.mrf.mxu0 }
 0x1be   : > { %v2727_v52 = vadd.f32 %v10339_v44, %v13382_v34  ;;  %v3011_v32 = vmax.f32 %v13512_v18, 0.0 }
 0x1bf   : > { %v10341_v56 = vpop.f32.mrf.mxu1  ;;  %v10453_v1 = vpop.f32.mrf.mxu0 }
 0x1c0   : > { %v13518_v4 = vadd.f32 %v10451_v12, %v2727_v52  ;;  %v10342_v19 = vadd.f32 %v10341_v56, %v10340_v24  ;;  %v10454_v22 = vadd.f32 %v10453_v1, %v10452_v46  ;;  %v11330_v12 = vld [vmem:[%s17346_s5 + $0x30] sm:$0xff]  }
 0x1c1   : > { %v10343_v8 = vpop.f32.mrf.mxu1  ;;  %v10455_v45 = vpop.f32.mrf.mxu0 }
 0x1c2   : > { %v3012_v28 = vmax.f32 %v13518_v4, 0.0  ;;  %v2732_v16 = vadd.f32 %v10342_v19, %v13393_v62  ;;  %v11350_v4 = vld [vmem:[%s17350_s9 + $0x10] sm:$0xff]  }
 0x1c3   : > { %v10344_v34 = vpop.f32.mrf.mxu1  ;;  %v10456_v5 = vpop.f32.mrf.mxu0 }
 0x1c4   : > { %v10345_v53 = vadd.f32 %v10344_v34, %v10343_v8  ;;  %v3043_v0 = vpack.c.bf16 %v3012_v28, %v3011_v32  ;;  %v13527_v21 = vadd.f32 %v10454_v22, %v2732_v16  ;;  %v10457_v15 = vadd.f32 %v10456_v5, %v10455_v45  ;;  %v11331_v22 = vld [vmem:[%s17346_s5 + $0x28] sm:$0xff]  }
 0x1c5   : > { %v10346_v29 = vpop.f32.mrf.mxu1  ;;  %v10458_v30 = vpop.f32.mrf.mxu0 }
 0x1c6   : > { %v2735_v3 = vadd.f32 %v10345_v53, %v13397_v14  ;;  %10702 = vmatprep.mubr.bf16.mxu1 %v3043_v0  ;;  %v3013_v38 = vmax.f32 %v13527_v21, 0.0 }
 0x1c7   : > { %v10347_v31 = vpop.f32.mrf.mxu1  ;;  %v10459_v35 = vpop.f32.mrf.mxu0 }
 0x1c8   : > { %v13530_v62 = vadd.f32 %v10457_v15, %v2735_v3  ;;  %v10348_v50 = vadd.f32 %v10347_v31, %v10346_v29  ;;  %v10460_v46 = vadd.f32 %v10459_v35, %v10458_v30 }
 0x1c9   : > { %v10349_v43 = vpop.f32.mrf.mxu1  ;;  %v10461_v13 = vpop.f32.mrf.mxu0 }
 0x1ca   : > { %v3014_v48 = vmax.f32 %v13530_v62, 0.0  ;;  %v2740_v49 = vadd.f32 %v10348_v50, %v13405_v40  ;;  %v11332_v50 = vld [vmem:[%s17346_s5 + $0x20] sm:$0xff]  }
 0x1cb   : > { %v10350_v44 = vpop.f32.mrf.mxu1  ;;  %v10462_v24 = vpop.f32.mrf.mxu0 }
 0x1cc   : > { %v3044_v14 = vpack.c.bf16 %v3014_v48, %v3013_v38  ;;  %v10351_v52 = vadd.f32 %v10350_v44, %v10349_v43  ;;  %v13542_v19 = vadd.f32 %v10460_v46, %v2740_v49  ;;  %v10463_v40 = vadd.f32 %v10462_v24, %v10461_v13 }
 0x1cd   : > { %v10352_v56 = vpop.f32.mrf.mxu1  ;;  %v10464_v1 = vpop.f32.mrf.mxu0 }
 0x1ce   : > { %v2743_v8 = vadd.f32 %v10351_v52, %v13409_v55  ;;  %10703 = vmatmul.mubr.bf16.vlgmr.msra.gmra.mxu1 %v3044_v14  ;;  %v3015_v29 = vmax.f32 %v13542_v19, 0.0 }
 0x1cf   : > { %v10353_v45 = vpop.f32.mrf.mxu1  ;;  %v10465_v16 = vpop.f32.mrf.mxu0  ;;  %10735 = vmatpush3.bf16.msra.mxu1 %v11329_v63 }
 0x1d0   : > { %v13545_v34 = vadd.f32 %v10463_v40, %v2743_v8  ;;  %v10354_v5 = vadd.f32 %v10353_v45, %v10352_v56  ;;  %10736 = vmatprep.subr.bf16.mxu1 %v11330_v12  ;;  %v10466_v63 = vadd.f32 %v10465_v16, %v10464_v1 }
 0x1d1   : > { %v10355_v53 = vpop.f32.mrf.mxu1  ;;  %v10467_v0 = vpop.f32.mrf.mxu0 }
 0x1d2   : > { %v3016_v30 = vmax.f32 %v13545_v34, 0.0  ;;  %v2748_v55 = vadd.f32 %v10354_v5, %v13417_v17 }
 0x1d3   : > { %v10356_v3 = vpop.f32.mrf.mxu1  ;;  %v10468_v15 = vpop.f32.mrf.mxu0  ;;  %10737 = vmatpush3.bf16.msra.mxu1 %v11330_v12  ;;  %v11333_v12 = vld [vmem:[%s17346_s5 + $0x18] sm:$0xff]  }
 0x1d4   : > { %v10357_v31 = vadd.f32 %v10356_v3, %v10355_v53  ;;  %v3045_v35 = vpack.c.bf16 %v3016_v30, %v3015_v29  ;;  %10738 = vmatprep.subr.bf16.mxu1 %v11331_v22  ;;  %v13560_v49 = vadd.f32 %v10466_v63, %v2748_v55  ;;  %v10469_v44 = vadd.f32 %v10468_v15, %v10467_v0  ;;  %v11334_v0 = vld [vmem:[%s17346_s5 + $0x10] sm:$0xff]  }
 0x1d5   : > { %v10358_v43 = vpop.f32.mrf.mxu1  ;;  %v10470_v13 = vpop.f32.mrf.mxu0 }
 0x1d6   : > { %v2751_v17 = vadd.f32 %v10357_v31, %v13421_v33  ;;  %10706 = vmatprep.mubr.bf16.mxu1 %v3045_v35  ;;  %v3017_v8 = vmax.f32 %v13560_v49, 0.0 }
 0x1d7   : > { %v10359_v24 = vpop.f32.mrf.mxu1  ;;  %v10471_v14 = vpop.f32.mrf.mxu0  ;;  %10739 = vmatpush3.bf16.msra.mxu1 %v11331_v22 }
 0x1d8   : > { %v13563_v46 = vadd.f32 %v10469_v44, %v2751_v17  ;;  %v10360_v52 = vadd.f32 %v10359_v24, %v10358_v43  ;;  %10740 = vmatprep.subr.bf16.mxu1 %v11332_v50  ;;  %v10472_v22 = vadd.f32 %v10471_v14, %v10470_v13  ;;  %v11335_v13 = vld [vmem:[%s17346_s5 + $0x8] sm:$0xff]  }
 0x1d9   : > { %v10361_v56 = vpop.f32.mrf.mxu1  ;;  %v10473_v1 = vpop.f32.mrf.mxu0 }
 0x1da   : > { %v3018_v40 = vmax.f32 %v13563_v46, 0.0  ;;  %v2756_v33 = vadd.f32 %v10360_v52, %v13429_v59 }
 0x1db   : > { %v10362_v45 = vpop.f32.mrf.mxu1  ;;  %v10474_v16 = vpop.f32.mrf.mxu0  ;;  %10741 = vmatpush3.bf16.msra.mxu1 %v11332_v50 }
 0x1dc   : > { %v3046_v5 = vpack.c.bf16 %v3018_v40, %v3017_v8  ;;  %v10363_v53 = vadd.f32 %v10362_v45, %v10361_v56  ;;  %10742 = vmatprep.subr.bf16.mxu1 %v11333_v12  ;;  %v13578_v15 = vadd.f32 %v10472_v22, %v2756_v33  ;;  %v10475_v63 = vadd.f32 %v10474_v16, %v10473_v1 }
 0x1dd   : > { %v10364_v55 = vpop.f32.mrf.mxu1  ;;  %v10476_v3 = vpop.f32.mrf.mxu0 }
 0x1de   : > { %v2759_v59 = vadd.f32 %v10363_v53, %v13433_v10  ;;  %10707 = vmatmul.mubr.bf16.gmra.mxu1 %v3046_v5  ;;  %v3019_v24 = vmax.f32 %v13578_v15, 0.0 }
 0x1df   : > { %v10365_v31 = vpop.f32.mrf.mxu1  ;;  %v10477_v35 = vpop.f32.mrf.mxu0  ;;  %10743 = vmatpush3.bf16.msra.mxu1 %v11333_v12 }
 0x1e0   : > { %v13581_v50 = vadd.f32 %v10475_v63, %v2759_v59  ;;  %v10366_v43 = vadd.f32 %v10365_v31, %v10364_v55  ;;  %10744 = vmatprep.subr.bf16.mxu1 %v11334_v0  ;;  %v10478_v12 = vadd.f32 %v10477_v35, %v10476_v3 }
 0x1e1   : > { %v10367_v17 = vpop.f32.mrf.mxu1  ;;  %v10479_v44 = vpop.f32.mrf.mxu0 }
 0x1e2   : > { %v17361_v14 = vmax.f32 %v13581_v50, 0.0  ;;  %v2764_v10 = vadd.f32 %v10366_v43, %v13441_v36 }
 0x1e3   : > { %v10368_v52 = vpop.f32.mrf.mxu1  ;;  %v10480_v56 = vpop.f32.mrf.mxu0  ;;  %10745 = vmatpush3.bf16.msra.mxu1 %v11334_v0 }
 0x1e4   : > { %v10369_v1 = vadd.f32 %v10368_v52, %v10367_v17  ;;  %v3047_v33 = vpack.c.bf16 %v17361_v14, %v3019_v24  ;;  %10746 = vmatprep.subr.bf16.mxu1 %v11335_v13  ;;  %v13593_v5 = vadd.f32 %v10478_v12, %v2764_v10  ;;  %v10481_v53 = vadd.f32 %v10480_v56, %v10479_v44 }
 0x1e5   : > { %v10370_v45 = vpop.f32.mrf.mxu1  ;;  %v10482_v16 = vpop.f32.mrf.mxu0 }
 0x1e6   : > { %v2767_v22 = vadd.f32 %v10369_v1, %v13445_v54  ;;  %10710 = vmatprep.mubr.bf16.mxu1 %v3047_v33  ;;  %v17364_v31 = vmax.f32 %v13593_v5, 0.0 }
 0x1e7   : > { %v10371_v36 = vpop.f32.mrf.mxu1  ;;  %v10483_v55 = vpop.f32.mrf.mxu0  ;;  %10747 = vmatpush3.bf16.msra.mxu1 %v11335_v13 }
 0x1e8   : > { %v13596_v0 = vadd.f32 %v10481_v53, %v2767_v22  ;;  %v10372_v3 = vadd.f32 %v10371_v36, %v10370_v45  ;;  %v10484_v44 = vadd.f32 %v10483_v55, %v10482_v16 }
 0x1e9   : > { %v10373_v59 = vpop.f32.mrf.mxu1  ;;  %v10485_v63 = vpop.f32.mrf.mxu0 }
 0x1ea   : > { %v17365_v35 = vmax.f32 %v13596_v0, 0.0  ;;  %v2772_v43 = vadd.f32 %v10372_v3, %v13451_v26 }
 0x1eb   : > { %v10374_v17 = vpop.f32.mrf.mxu1  ;;  %v10486_v10 = vpop.f32.mrf.mxu0 }
 0x1ec   : > { %v3048_v54 = vpack.c.bf16 %v17365_v35, %v17364_v31  ;;  %v10375_v13 = vadd.f32 %v10374_v17, %v10373_v59  ;;  %v13605_v12 = vadd.f32 %v10484_v44, %v2772_v43  ;;  %v10487_v33 = vadd.f32 %v10486_v10, %v10485_v63 }
 0x1ed   : > { %v10376_v52 = vpop.f32.mrf.mxu1  ;;  %v10488_v56 = vpop.f32.mrf.mxu0 }
 0x1ee   : > { %v2775_v1 = vadd.f32 %v10375_v13, %v13455_v27  ;;  %10711 = vmatmul.mubr.bf16.gmra.mxu1 %v3048_v54  ;;  %v17363_v14 = vmax.f32 %v13605_v12, 0.0 }
 0x1ef   : > { %v10377_v45 = vpop.f32.mrf.mxu1  ;;  %v10489_v22 = vpop.f32.mrf.mxu0 }
 0x1f0   : > { %v13608_v26 = vadd.f32 %v10487_v33, %v2775_v1  ;;  %v10378_v53 = vadd.f32 %v10377_v45, %v10376_v52  ;;  %v10490_v17 = vadd.f32 %v10489_v22, %v10488_v56 }
 0x1f1   : > { %v10379_v36 = vpop.f32.mrf.mxu1  ;;  %v10491_v3 = vpop.f32.mrf.mxu0 }
 0x1f2   : > { %v17362_v16 = vmax.f32 %v13608_v26, 0.0  ;;  %v2780_v55 = vadd.f32 %v10378_v53, %v13459_v37 }
 0x1f3   : > { %v10380_v59 = vpop.f32.mrf.mxu1  ;;  %v10492_v43 = vpop.f32.mrf.mxu0 }
 0x1f4   : > { %v10381_v44 = vadd.f32 %v10380_v59, %v10379_v36  ;;  %v3049_v27 = vpack.c.bf16 %v17362_v16, %v17363_v14  ;;  %v13617_v54 = vadd.f32 %v10490_v17, %v2780_v55  ;;  %v10493_v52 = vadd.f32 %v10492_v43, %v10491_v3 }
 0x1f5   : > { %v10382_v63 = vpop.f32.mrf.mxu1  ;;  %v10494_v10 = vpop.f32.mrf.mxu0 }
 0x1f6   : > { %v2783_v13 = vadd.f32 %v10381_v44, %v13461_v57  ;;  %10714 = vmatprep.mubr.bf16.mxu1 %v3049_v27  ;;  %v17368_v53 = vmax.f32 %v13617_v54, 0.0 }
 0x1f7   : > { %v10383_v1 = vpop.f32.mrf.mxu1  ;;  %v10495_v33 = vpop.f32.mrf.mxu0 }
 0x1f8   : > { %v13620_v37 = vadd.f32 %v10493_v52, %v2783_v13  ;;  %v10384_v45 = vadd.f32 %v10383_v1, %v10382_v63  ;;  %v10496_v3 = vadd.f32 %v10495_v33, %v10494_v10 }
 0x1f9   : > { %v10385_v56 = vpop.f32.mrf.mxu1  ;;  %v10497_v22 = vpop.f32.mrf.mxu0 }
 0x1fa   : > { %v17369_v36 = vmax.f32 %v13620_v37, 0.0  ;;  %v2788_v59 = vadd.f32 %v10384_v45, %v13464_v58 }
 0x1fb   : > { %v10386_v16 = vpop.f32.mrf.mxu1  ;;  %v10498_v55 = vpop.f32.mrf.mxu0 }
 0x1fc   : > { %v3050_v57 = vpack.c.bf16 %v17369_v36, %v17368_v53  ;;  %v10387_v43 = vadd.f32 %v10386_v16, %v10385_v56  ;;  %v13629_v27 = vadd.f32 %v10496_v3, %v2788_v59  ;;  %v10499_v13 = vadd.f32 %v10498_v55, %v10497_v22 }
 0x1fd   : > { %v10388_v17 = vpop.f32.mrf.mxu1  ;;  %v10500_v44 = vpop.f32.mrf.mxu0 }
 0x1fe   : > { %v2791_v63 = vadd.f32 %v10387_v43, %v13467_v23  ;;  %10715 = vmatmul.mubr.bf16.gmra.mxu1 %v3050_v57  ;;  %v17367_v35 = vmax.f32 %v13629_v27, 0.0 }
 0x1ff   : > { %v10389_v52 = vpop.f32.mrf.mxu1  ;;  %v10501_v1 = vpop.f32.mrf.mxu0 }
 0x200   : > { %v13632_v58 = vadd.f32 %v10499_v13, %v2791_v63  ;;  %v10390_v45 = vadd.f32 %v10389_v52, %v10388_v17  ;;  %v10502_v59 = vadd.f32 %v10501_v1, %v10500_v44 }
 0x201   : > { %v10391_v14 = vpop.f32.mrf.mxu1  ;;  %v10503_v31 = vpop.f32.mrf.mxu0 }
 0x202   : > { %v17366_v10 = vmax.f32 %v13632_v58, 0.0  ;;  %v2796_v16 = vadd.f32 %v10390_v45, %v13470_v39 }
 0x203   : > { %v10392_v33 = vpop.f32.mrf.mxu1  ;;  %v10504_v56 = vpop.f32.mrf.mxu0 }
 0x204   : > { %v10393_v3 = vadd.f32 %v10392_v33, %v10391_v14  ;;  %v3051_v23 = vpack.c.bf16 %v17366_v10, %v17367_v35  ;;  %v13641_v57 = vadd.f32 %v10502_v59, %v2796_v16  ;;  %v10505_v17 = vadd.f32 %v10504_v56, %v10503_v31 }
 0x205   : > { %v10394_v22 = vpop.f32.mrf.mxu1  ;;  %v10506_v55 = vpop.f32.mrf.mxu0 }
 0x206   : > { %v2799_v43 = vadd.f32 %v10393_v3, %v13473_v51  ;;  %10718 = vmatprep.mubr.bf16.mxu1 %v3051_v23  ;;  %v17372_v1 = vmax.f32 %v13641_v57, 0.0 }
 0x207   : > { %v10395_v63 = vpop.f32.mrf.mxu1  ;;  %v10507_v13 = vpop.f32.mrf.mxu0 }
 0x208   : > { %v13644_v39 = vadd.f32 %v10505_v17, %v2799_v43  ;;  %v10396_v52 = vadd.f32 %v10395_v63, %v10394_v22  ;;  %v10508_v31 = vadd.f32 %v10507_v13, %v10506_v55 }
 0x209   : > { %v10397_v44 = vpop.f32.mrf.mxu1  ;;  %v10509_v14 = vpop.f32.mrf.mxu0 }
 0x20a   : > { %v17373_v45 = vmax.f32 %v13644_v39, 0.0  ;;  %v2804_v33 = vadd.f32 %v10396_v52, %v13476_v2 }
 0x20b   : > { %v10398_v10 = vpop.f32.mrf.mxu1  ;;  %v10510_v16 = vpop.f32.mrf.mxu0 }
 0x20c   : > { %v3052_v51 = vpack.c.bf16 %v17373_v45, %v17372_v1  ;;  %v10399_v56 = vadd.f32 %v10398_v10, %v10397_v44  ;;  %v13653_v23 = vadd.f32 %v10508_v31, %v2804_v33  ;;  %v10511_v43 = vadd.f32 %v10510_v16, %v10509_v14 }
 0x20d   : > { %v10400_v59 = vpop.f32.mrf.mxu1  ;;  %v10512_v3 = vpop.f32.mrf.mxu0 }
 0x20e   : > { %v2807_v22 = vadd.f32 %v10399_v56, %v13479_v60  ;;  %10719 = vmatmul.mubr.bf16.gmra.mxu1 %v3052_v51  ;;  %v17371_v36 = vmax.f32 %v13653_v23, 0.0 }
 0x20f   : > { %v10401_v17 = vpop.f32.mrf.mxu1  ;;  %v10513_v63 = vpop.f32.mrf.mxu0 }
 0x210   : > { %v13656_v2 = vadd.f32 %v10511_v43, %v2807_v22  ;;  %v10402_v52 = vadd.f32 %v10401_v17, %v10400_v59  ;;  %v10514_v33 = vadd.f32 %v10513_v63, %v10512_v3 }
 0x211   : > { %v10403_v35 = vpop.f32.mrf.mxu1  ;;  %v10515_v53 = vpop.f32.mrf.mxu0 }
 0x212   : > { %v17370_v55 = vmax.f32 %v13656_v2, 0.0  ;;  %v2812_v10 = vadd.f32 %v10402_v52, %v13482_v6  ;;  %v11336_v6 = vld [vmem:[%s17346_s5] sm:$0xff]  }
 0x213   : > { %v10404_v13 = vpop.f32.mrf.mxu1  ;;  %v10516_v44 = vpop.f32.mrf.mxu0  ;;  %10748 = vmatprep.subr.bf16.mxu1 %v11336_v6 }
 0x214   : > { %v10405_v31 = vadd.f32 %v10404_v13, %v10403_v35  ;;  %v3053_v60 = vpack.c.bf16 %v17370_v55, %v17371_v36  ;;  %v13665_v51 = vadd.f32 %v10514_v33, %v2812_v10  ;;  %v10517_v59 = vadd.f32 %v10516_v44, %v10515_v53  ;;  %10749 = vmatpush3.bf16.msra.mxu1 %v11336_v6 }
 0x215   : > { %v10406_v14 = vpop.f32.mrf.mxu1  ;;  %v10518_v16 = vpop.f32.mrf.mxu0 }
 0x216   : > { %v2815_v56 = vadd.f32 %v10405_v31, %v13485_v47  ;;  %10722 = vmatprep.mubr.bf16.mxu1 %v3053_v60  ;;  %v17376_v52 = vmax.f32 %v13665_v51, 0.0 }
 0x217   : > { %v10407_v22 = vpop.f32.mrf.mxu1  ;;  %v10519_v3 = vpop.f32.mrf.mxu0 }
 0x218   : > { %v13671_v35 = vadd.f32 %v10517_v59, %v2815_v56  ;;  %v10408_v43 = vadd.f32 %v10407_v22, %v10406_v14  ;;  %v10520_v33 = vadd.f32 %v10519_v3, %v10518_v16 }
 0x219   : > { %v10409_v17 = vpop.f32.mrf.mxu1  ;;  %v10521_v63 = vpop.f32.mrf.mxu0 }
 0x21a   : > { %v17377_v10 = vmax.f32 %v13671_v35, 0.0  ;;  %v2820_v47 = vadd.f32 %v10408_v43, %v13488_v25 }
 0x21b   : > { %v10410_v53 = vpop.f32.mrf.mxu1  ;;  %v10522_v13 = vpop.f32.mrf.mxu0 }
 0x21c   : > { %v3054_v44 = vpack.c.bf16 %v17377_v10, %v17376_v52  ;;  %v10411_v31 = vadd.f32 %v10410_v53, %v10409_v17  ;;  %v13680_v56 = vadd.f32 %v10520_v33, %v2820_v47  ;;  %v10523_v6 = vadd.f32 %v10522_v13, %v10521_v63 }
 0x21d   : > { %v10412_v60 = vpop.f32.mrf.mxu1  ;;  %v10524_v14 = vpop.f32.mrf.mxu0 }
 0x21e   : > { %v2823_v59 = vadd.f32 %v10411_v31, %v13491_v11  ;;  %10723 = vmatmul.mubr.bf16.gmra.mxu1 %v3054_v44  ;;  %v17375_v45 = vmax.f32 %v13680_v56, 0.0 }
 0x21f   : > { %v10413_v22 = vpop.f32.mrf.mxu1  ;;  %v10525_v55 = vpop.f32.mrf.mxu0 }
 0x220   : > { %v13683_v25 = vadd.f32 %v10523_v6, %v2823_v59  ;;  %v10414_v43 = vadd.f32 %v10413_v22, %v10412_v60  ;;  %v10526_v53 = vadd.f32 %v10525_v55, %v10524_v14 }
 0x221   : > { %v10415_v36 = vpop.f32.mrf.mxu1  ;;  %v10527_v1 = vpop.f32.mrf.mxu0 }
 0x222   : > { %v17374_v16 = vmax.f32 %v13683_v25, 0.0  ;;  %v2828_v3 = vadd.f32 %v10414_v43, %v13494_v41 }
 0x223   : > { %v10416_v17 = vpop.f32.mrf.mxu1  ;;  %v10528_v47 = vpop.f32.mrf.mxu0 }
 0x224   : > { %v10417_v33 = vadd.f32 %v10416_v17, %v10415_v36  ;;  %v3055_v11 = vpack.c.bf16 %v17374_v16, %v17375_v45  ;;  %v13692_v44 = vadd.f32 %v10526_v53, %v2828_v3  ;;  %v10529_v60 = vadd.f32 %v10528_v47, %v10527_v1 }
 0x225   : > { %v10418_v63 = vpop.f32.mrf.mxu1  ;;  %v10530_v13 = vpop.f32.mrf.mxu0 }
 0x226   : > { %v2831_v31 = vadd.f32 %v10417_v33, %v13497_v42  ;;  %10726 = vmatprep.mubr.bf16.mxu1 %v3055_v11  ;;  %v3037_v14 = vmax.f32 %v13692_v44, 0.0 }
 0x227   : > { %v10419_v59 = vpop.f32.mrf.mxu1  ;;  %v10531_v6 = vpop.f32.mrf.mxu0 }
 0x228   : > { %v13695_v41 = vadd.f32 %v10529_v60, %v2831_v31  ;;  %v10420_v22 = vadd.f32 %v10419_v59, %v10418_v63  ;;  %v10532_v1 = vadd.f32 %v10531_v6, %v10530_v13 }
 0x229   : > { %v10421_v55 = vpop.f32.mrf.mxu1  ;;  %v10533_v36 = vpop.f32.mrf.mxu0 }
 0x22a   : > { %v3038_v43 = vmax.f32 %v13695_v41, 0.0  ;;  %v2836_v17 = vadd.f32 %v10420_v22, %v13500_v61 }
 0x22b   : > { %v10422_v16 = vpop.f32.mrf.mxu1  ;;  %v10534_v3 = vpop.f32.mrf.mxu0 }
 0x22c   : > { %v3056_v42 = vpack.c.bf16 %v3038_v43, %v3037_v14  ;;  %v10423_v47 = vadd.f32 %v10422_v16, %v10421_v55  ;;  %v13704_v11 = vadd.f32 %v10532_v1, %v2836_v17  ;;  %v10535_v31 = vadd.f32 %v10534_v3, %v10533_v36 }
 0x22d   : > { %v10424_v53 = vpop.f32.mrf.mxu1  ;;  %v10536_v33 = vpop.f32.mrf.mxu0 }
 0x22e   : > { %v2839_v63 = vadd.f32 %v10423_v47, %v13503_v7  ;;  %10727 = vmatmul.mubr.bf16.gmra.mxu1 %v3056_v42  ;;  %v3039_v10 = vmax.f32 %v13704_v11, 0.0  ;;  %v11354_v11 = vld [vmem:[%s17352_s11 + $0x30] sm:$0xff]  }
 0x22f   : > { %v10425_v60 = vpop.f32.mrf.mxu1  ;;  %v10537_v59 = vpop.f32.mrf.mxu0 }
 0x230   : > { %v13707_v61 = vadd.f32 %v10535_v31, %v2839_v63  ;;  %v10426_v22 = vadd.f32 %v10425_v60, %v10424_v53  ;;  %v10538_v17 = vadd.f32 %v10537_v59, %v10536_v33  ;;  %v11337_v33 = vld [vmem:[%s17348_s7 + $0x38] sm:$0xff]   ;;  %v11340_v63 = vld [vmem:[%s17348_s7 + $0x20] sm:$0xff]  }
 0x231   : > { %v10427_v45 = vpop.f32.mrf.mxu1  ;;  %v10539_v52 = vpop.f32.mrf.mxu0  ;;  %10782 = vmatprep.subr.bf16.mxu0 %v11337_v33  ;;  %v11341_v59 = vld [vmem:[%s17348_s7 + $0x18] sm:$0xff]  }
 0x232   : > { %v17378_v13 = vmax.f32 %v13707_v61, 0.0  ;;  %v2844_v16 = vadd.f32 %v10426_v22, %v13506_v20  ;;  %10783 = vmatpush3.bf16.msra.mxu0 %v11337_v33  ;;  %v13745_v22 = vld [vmem:[%s17345_s4] ss:$0 sm:$0xff] }
 0x233   : > { %v10428_v6 = vpop.f32.mrf.mxu1  ;;  %v10540_v55 = vpop.f32.mrf.mxu0 }
 0x234   : > { %v10429_v1 = vadd.f32 %v10428_v6, %v10427_v45  ;;  %v3057_v7 = vpack.c.bf16 %v17378_v13, %v3039_v10  ;;  %v13716_v36 = vadd.f32 %v10538_v17, %v2844_v16  ;;  %v10541_v42 = vadd.f32 %v10540_v55, %v10539_v52  ;;  %v11339_v52 = vld [vmem:[%s17348_s7 + $0x28] sm:$0xff]  }
 0x236   : > { %v2847_v3 = vadd.f32 %v10429_v1, %v13509_v9  ;;  %10730 = vmatprep.mubr.bf16.mxu1 %v3057_v7  ;;  %v17379_v53 = vmax.f32 %v13716_v36, 0.0  ;;  %v11338_v9 = vld [vmem:[%s17348_s7 + $0x30] sm:$0xff]  }
 0x237   : > { %10784 = vmatprep.subr.bf16.mxu0 %v11338_v9  ;;  %v11342_v7 = vld [vmem:[%s17348_s7 + $0x10] sm:$0xff]  }
 0x238   : > { %v13719_v47 = vadd.f32 %v10541_v42, %v2847_v3  ;;  %10785 = vmatpush3.bf16.msra.mxu0 %v11338_v9 }
 0x239   : > { %10786 = vmatprep.subr.bf16.mxu0 %v11339_v52 }
 0x23a   : > { %v3042_v20 = vmax.f32 %v13719_v47, 0.0  ;;  %v11355_v47 = vld [vmem:[%s17352_s11 + $0x28] sm:$0xff]  }
 0x23c   : > { %v3058_v45 = vpack.c.bf16 %v3042_v20, %v17379_v53  ;;  %10787 = vmatpush3.bf16.msra.mxu0 %v11339_v52  ;;  %v11343_v52 = vld [vmem:[%s17348_s7 + $0x8] sm:$0xff]  }
 0x23d   : > { %10788 = vmatprep.subr.bf16.mxu0 %v11340_v63 }
 0x23e   : > { %10731 = vmatmul.mubr.bf16.gmra.mxu1 %v3058_v45 }
 0x240   : > { %10789 = vmatpush3.bf16.msra.mxu0 %v11340_v63 }
 0x241   : > { %10790 = vmatprep.subr.bf16.mxu0 %v11341_v59 }
 0x244   : > { %10791 = vmatpush3.bf16.msra.mxu0 %v11341_v59 }
 0x245   : > { %10792 = vmatprep.subr.bf16.mxu0 %v11342_v7 }
 0x248   : > { %10793 = vmatpush3.bf16.msra.mxu0 %v11342_v7 }
 0x249   : > { %10794 = vmatprep.subr.bf16.mxu0 %v11343_v52 }
 0x24c   : > { %10795 = vmatpush3.bf16.msra.mxu0 %v11343_v52 }
 0x28e   : > { %v10704_v31 = vpop.f32.mrf.mxu1 }
 0x28f   : > { %v3173_v17 = vadd.f32 %v10704_v31, %v13745_v22 }
 0x290   : > { %v3164_v60 = vpop.f32.mrf.mxu1 }
 0x291   : > { %v3165_v6 = vadd.f32 %v13745_v22, %v3164_v60  ;;  %v3293_v9 = vmax.f32 %v3173_v17, 0.0 }
 0x292   : > { %v10705_v16 = vpop.f32.mrf.mxu1 }
 0x293   : > { %v3176_v55 = vadd.f32 %v10705_v16, %v13745_v22  ;;  %v3291_v45 = vmax.f32 %v3165_v6, 0.0 }
 0x294   : > { %v3167_v1 = vpop.f32.mrf.mxu1 }
 0x295   : > { %v3168_v3 = vadd.f32 %v13745_v22, %v3167_v1  ;;  %v3294_v42 = vmax.f32 %v3176_v55, 0.0 }
 0x297   : > { %v3292_v33 = vmax.f32 %v3168_v3, 0.0  ;;  %v3324_v31 = vpack.c.bf16 %v3294_v42, %v3293_v9 }
 0x299   : > { %v3323_v63 = vpack.c.bf16 %v3292_v33, %v3291_v45 }
 0x29b   : > { %10750 = vmatprep.mubr.bf16.mxu1 %v3323_v63 }
 0x29c   : > { %10751 = vmatmul.mubr.bf16.vlgmr.msra.gmra.mxu1 %v3324_v31 }
 0x29e   : > { %v10708_v60 = vpop.f32.mrf.mxu1 }
 0x29f   : > { %v3189_v55 = vadd.f32 %v10708_v60, %v13745_v22 }
 0x2a0   : > { %v3180_v16 = vpop.f32.mrf.mxu1 }
 0x2a1   : > { %v3181_v6 = vadd.f32 %v13745_v22, %v3180_v16  ;;  %v3297_v33 = vmax.f32 %v3189_v55, 0.0 }
 0x2a2   : > { %v10709_v1 = vpop.f32.mrf.mxu1 }
 0x2a3   : > { %v3192_v59 = vadd.f32 %v10709_v1, %v13745_v22  ;;  %v3295_v45 = vmax.f32 %v3181_v6, 0.0 }
 0x2a4   : > { %v3183_v17 = vpop.f32.mrf.mxu1 }
 0x2a5   : > { %v3184_v3 = vadd.f32 %v13745_v22, %v3183_v17  ;;  %v3298_v13 = vmax.f32 %v3192_v59, 0.0 }
 0x2a7   : > { %v3296_v42 = vmax.f32 %v3184_v3, 0.0  ;;  %v3326_v9 = vpack.c.bf16 %v3298_v13, %v3297_v33 }
 0x2a9   : > { %v3325_v7 = vpack.c.bf16 %v3296_v42, %v3295_v45 }
 0x2ab   : > { %10754 = vmatprep.mubr.bf16.mxu1 %v3325_v7 }
 0x2ac   : > { %10755 = vmatmul.mubr.bf16.gmra.mxu1 %v3326_v9 }
 0x2ae   : > { %v10712_v52 = vpop.f32.mrf.mxu1 }
 0x2af   : > { %v3205_v60 = vadd.f32 %v10712_v52, %v13745_v22 }
 0x2b0   : > { %v3196_v63 = vpop.f32.mrf.mxu1 }
 0x2b1   : > { %v3197_v16 = vadd.f32 %v13745_v22, %v3196_v63  ;;  %v3301_v55 = vmax.f32 %v3205_v60, 0.0 }
 0x2b2   : > { %v10713_v31 = vpop.f32.mrf.mxu1 }
 0x2b3   : > { %v3208_v1 = vadd.f32 %v10713_v31, %v13745_v22  ;;  %v3299_v6 = vmax.f32 %v3197_v16, 0.0 }
 0x2b4   : > { %v3199_v53 = vpop.f32.mrf.mxu1 }
 0x2b5   : > { %v3200_v17 = vadd.f32 %v13745_v22, %v3199_v53  ;;  %v3302_v59 = vmax.f32 %v3208_v1, 0.0 }
 0x2b7   : > { %v3300_v3 = vmax.f32 %v3200_v17, 0.0  ;;  %v3328_v13 = vpack.c.bf16 %v3302_v59, %v3301_v55 }
 0x2b9   : > { %v3327_v45 = vpack.c.bf16 %v3300_v3, %v3299_v6 }
 0x2bb   : > { %10758 = vmatprep.mubr.bf16.mxu1 %v3327_v45 }
 0x2bc   : > { %10759 = vmatmul.mubr.bf16.gmra.mxu1 %v3328_v13 }
 0x2be   : > { %v10716_v42 = vpop.f32.mrf.mxu1 }
 0x2bf   : > { %v3221_v52 = vadd.f32 %v10716_v42, %v13745_v22 }
 0x2c0   : > { %v3212_v33 = vpop.f32.mrf.mxu1 }
 0x2c1   : > { %v3213_v9 = vadd.f32 %v13745_v22, %v3212_v33  ;;  %v3305_v60 = vmax.f32 %v3221_v52, 0.0 }
 0x2c2   : > { %v10717_v7 = vpop.f32.mrf.mxu1 }
 0x2c3   : > { %v3224_v63 = vadd.f32 %v10717_v7, %v13745_v22  ;;  %v3303_v16 = vmax.f32 %v3213_v9, 0.0 }
 0x2c4   : > { %v3215_v31 = vpop.f32.mrf.mxu1 }
 0x2c5   : > { %v3216_v53 = vadd.f32 %v13745_v22, %v3215_v31  ;;  %v3306_v1 = vmax.f32 %v3224_v63, 0.0 }
 0x2c7   : > { %v3304_v17 = vmax.f32 %v3216_v53, 0.0  ;;  %v3330_v59 = vpack.c.bf16 %v3306_v1, %v3305_v60 }
 0x2c9   : > { %v3329_v6 = vpack.c.bf16 %v3304_v17, %v3303_v16 }
 0x2cb   : > { %10762 = vmatprep.mubr.bf16.mxu1 %v3329_v6  ;;  %v11344_v6 = vld [vmem:[%s17348_s7] sm:$0xff]  }
 0x2cc   : > { %10763 = vmatmul.mubr.bf16.gmra.mxu1 %v3330_v59  ;;  %10796 = vmatprep.subr.bf16.mxu0 %v11344_v6 }
 0x2cd   : > { %10797 = vmatpush3.bf16.msra.mxu0 %v11344_v6 }
 0x2ce   : > { %v10720_v3 = vpop.f32.mrf.mxu1 }
 0x2cf   : > { %v3237_v42 = vadd.f32 %v10720_v3, %v13745_v22 }
 0x2d0   : > { %v3228_v55 = vpop.f32.mrf.mxu1 }
 0x2d1   : > { %v3229_v13 = vadd.f32 %v13745_v22, %v3228_v55  ;;  %v3309_v52 = vmax.f32 %v3237_v42, 0.0 }
 0x2d2   : > { %v10721_v45 = vpop.f32.mrf.mxu1 }
 0x2d3   : > { %v3240_v33 = vadd.f32 %v10721_v45, %v13745_v22  ;;  %v3307_v9 = vmax.f32 %v3229_v13, 0.0 }
 0x2d4   : > { %v3231_v7 = vpop.f32.mrf.mxu1 }
 0x2d5   : > { %v3232_v31 = vadd.f32 %v13745_v22, %v3231_v7  ;;  %v3310_v63 = vmax.f32 %v3240_v33, 0.0 }
 0x2d7   : > { %v3308_v53 = vmax.f32 %v3232_v31, 0.0  ;;  %v3332_v1 = vpack.c.bf16 %v3310_v63, %v3309_v52 }
 0x2d9   : > { %v3331_v16 = vpack.c.bf16 %v3308_v53, %v3307_v9 }
 0x2db   : > { %10766 = vmatprep.mubr.bf16.mxu1 %v3331_v16 }
 0x2dc   : > { %10767 = vmatmul.mubr.bf16.gmra.mxu1 %v3332_v1 }
 0x2de   : > { %v10724_v17 = vpop.f32.mrf.mxu1 }
 0x2df   : > { %v3253_v45 = vadd.f32 %v10724_v17, %v13745_v22 }
 0x2e0   : > { %v3244_v60 = vpop.f32.mrf.mxu1 }
 0x2e1   : > { %v3245_v3 = vadd.f32 %v13745_v22, %v3244_v60  ;;  %v3313_v63 = vmax.f32 %v3253_v45, 0.0 }
 0x2e2   : > { %v10725_v59 = vpop.f32.mrf.mxu1 }
 0x2e3   : > { %v3256_v55 = vadd.f32 %v10725_v59, %v13745_v22  ;;  %v3311_v7 = vmax.f32 %v3245_v3, 0.0 }
 0x2e4   : > { %v3247_v13 = vpop.f32.mrf.mxu1 }
 0x2e5   : > { %v3248_v33 = vadd.f32 %v13745_v22, %v3247_v13  ;;  %v3314_v42 = vmax.f32 %v3256_v55, 0.0 }
 0x2e7   : > { %v3312_v31 = vmax.f32 %v3248_v33, 0.0  ;;  %v3334_v53 = vpack.c.bf16 %v3314_v42, %v3313_v63 }
 0x2e9   : > { %v3333_v9 = vpack.c.bf16 %v3312_v31, %v3311_v7 }
 0x2eb   : > { %10770 = vmatprep.mubr.bf16.mxu1 %v3333_v9 }
 0x2ec   : > { %10771 = vmatmul.mubr.bf16.gmra.mxu1 %v3334_v53 }
 0x2ee   : > { %v10728_v52 = vpop.f32.mrf.mxu1 }
 0x2ef   : > { %v3269_v17 = vadd.f32 %v10728_v52, %v13745_v22 }
 0x2f0   : > { %v3260_v16 = vpop.f32.mrf.mxu1 }
 0x2f1   : > { %v3261_v60 = vadd.f32 %v13745_v22, %v3260_v16  ;;  %v3317_v45 = vmax.f32 %v3269_v17, 0.0 }
 0x2f2   : > { %v10729_v1 = vpop.f32.mrf.mxu1 }
 0x2f3   : > { %v3272_v59 = vadd.f32 %v10729_v1, %v13745_v22  ;;  %v3315_v3 = vmax.f32 %v3261_v60, 0.0 }
 0x2f4   : > { %v3263_v6 = vpop.f32.mrf.mxu1 }
 0x2f5   : > { %v3264_v13 = vadd.f32 %v13745_v22, %v3263_v6  ;;  %v3318_v55 = vmax.f32 %v3272_v59, 0.0 }
 0x2f7   : > { %v3316_v33 = vmax.f32 %v3264_v13, 0.0  ;;  %v3336_v42 = vpack.c.bf16 %v3318_v55, %v3317_v45  ;;  %v11345_v45 = vld [vmem:[%s17350_s9 + $0x38] sm:$0xff]  }
 0x2f8   : > { %10830 = vmatprep.subr.bf16.mxu1 %v11345_v45 }
 0x2f9   : > { %v3335_v7 = vpack.c.bf16 %v3316_v33, %v3315_v3  ;;  %10831 = vmatpush3.bf16.msra.mxu1 %v11345_v45 }
 0x2fb   : > { %10774 = vmatprep.mubr.bf16.mxu1 %v3335_v7  ;;  %v11346_v7 = vld [vmem:[%s17350_s9 + $0x30] sm:$0xff]  }
 0x2fc   : > { %10775 = vmatmul.mubr.bf16.gmra.mxu1 %v3336_v42  ;;  %10832 = vmatprep.subr.bf16.mxu1 %v11346_v7 }
 0x2fd   : > { %10833 = vmatpush3.bf16.msra.mxu1 %v11346_v7 }
 0x2fe   : > { %v10732_v31 = vpop.f32.mrf.mxu1 }
 0x2ff   : > { %v3285_v52 = vadd.f32 %v10732_v31, %v13745_v22 }
 0x300   : > { %v3276_v63 = vpop.f32.mrf.mxu1 }
 0x301   : > { %v3277_v53 = vadd.f32 %v13745_v22, %v3276_v63  ;;  %v3321_v17 = vmax.f32 %v3285_v52, 0.0 }
 0x302   : > { %v10733_v9 = vpop.f32.mrf.mxu1 }
 0x303   : > { %v3288_v16 = vadd.f32 %v10733_v9, %v13745_v22  ;;  %v3319_v60 = vmax.f32 %v3277_v53, 0.0  ;;  %v11347_v53 = vld [vmem:[%s17350_s9 + $0x28] sm:$0xff]  }
 0x304   : > { %v3279_v1 = vpop.f32.mrf.mxu1  ;;  %10834 = vmatprep.subr.bf16.mxu1 %v11347_v53 }
 0x305   : > { %v3280_v6 = vadd.f32 %v13745_v22, %v3279_v1  ;;  %v3322_v59 = vmax.f32 %v3288_v16, 0.0  ;;  %v13797_v22 = vld [vmem:[%s17347_s6] ss:$0 sm:$0xff]  ;;  %10835 = vmatpush3.bf16.msra.mxu1 %v11347_v53 }
 0x307   : > { %v3320_v13 = vmax.f32 %v3280_v6, 0.0  ;;  %v3338_v55 = vpack.c.bf16 %v3322_v59, %v3321_v17 }
 0x309   : > { %v3337_v3 = vpack.c.bf16 %v3320_v13, %v3319_v60  ;;  %v11348_v13 = vld [vmem:[%s17350_s9 + $0x20] sm:$0xff]  }
 0x30a   : > { %10836 = vmatprep.subr.bf16.mxu1 %v11348_v13 }
 0x30b   : > { %10778 = vmatprep.mubr.bf16.mxu1 %v3337_v3  ;;  %10837 = vmatpush3.bf16.msra.mxu1 %v11348_v13 }
 0x30c   : > { %10779 = vmatmul.mubr.bf16.gmra.mxu1 %v3338_v55 }
 0x35c   : > { %v10752_v33 = vpop.f32.mrf.mxu1 }
 0x35d   : > { %v3453_v63 = vadd.f32 %v10752_v33, %v13797_v22 }
 0x35e   : > { %v3444_v42 = vpop.f32.mrf.mxu1 }
 0x35f   : > { %v3445_v31 = vadd.f32 %v13797_v22, %v3444_v42  ;;  %v3573_v60 = vadd.f32 %v3453_v63, %v3013_v38  ;;  %v11351_v42 = vld [vmem:[%s17350_s9 + $0x8] sm:$0xff]  }
 0x360   : > { %v10753_v9 = vpop.f32.mrf.mxu1 }
 0x361   : > { %v3456_v16 = vadd.f32 %v10753_v9, %v13797_v22  ;;  %v3571_v1 = vadd.f32 %v3445_v31, %v3011_v32  ;;  %v3605_v62 = vmax.f32 %v3573_v60, 0.0 }
 0x362   : > { %v3447_v52 = vpop.f32.mrf.mxu1 }
 0x363   : > { %v3574_v6 = vadd.f32 %v3456_v16, %v3014_v48  ;;  %v3448_v59 = vadd.f32 %v13797_v22, %v3447_v52  ;;  %v3603_v18 = vmax.f32 %v3571_v1, 0.0  ;;  %v11349_v48 = vld [vmem:[%s17350_s9 + $0x18] sm:$0xff]  }
 0x364   : > { %10838 = vmatprep.subr.bf16.mxu1 %v11349_v48 }
 0x365   : > { %v3572_v17 = vadd.f32 %v3448_v59, %v3012_v28  ;;  %v3606_v3 = vmax.f32 %v3574_v6, 0.0  ;;  %10839 = vmatpush3.bf16.msra.mxu1 %v11349_v48  ;;  %v17426_v48 = vmax.f32 %v13593_v5, 0.0 }
 0x366   : > { %10840 = vmatprep.subr.bf16.mxu1 %v11350_v4 }
 0x367   : > { %v3604_v32 = vmax.f32 %v3572_v17, 0.0  ;;  %v3636_v38 = vpack.c.bf16 %v3606_v3, %v3605_v62 }
 0x369   : > { %v3635_v21 = vpack.c.bf16 %v3604_v32, %v3603_v18  ;;  %10841 = vmatpush3.bf16.msra.mxu1 %v11350_v4  ;;  %v17425_v18 = vmax.f32 %v13596_v0, 0.0 }
 0x36a   : > { %10842 = vmatprep.subr.bf16.mxu1 %v11351_v42 }
 0x36b   : > { %10798 = vmatprep.mubr.bf16.mxu0 %v3635_v21 }
 0x36c   : > { %v10756_v55 = vpop.f32.mrf.mxu1  ;;  %10799 = vmatmul.mubr.bf16.vlgmr.msra.gmra.mxu0 %v3636_v38  ;;  %v17427_v38 = vmax.f32 %v13581_v50, 0.0  ;;  %v17428_v50 = vmax.f32 %v13605_v12, 0.0 }
 0x36d   : > { %v3469_v45 = vadd.f32 %v10756_v55, %v13797_v22  ;;  %10843 = vmatpush3.bf16.msra.mxu1 %v11351_v42 }
 0x36e   : > { %v3460_v28 = vpop.f32.mrf.mxu1 }
 0x36f   : > { %v3461_v33 = vadd.f32 %v13797_v22, %v3460_v28  ;;  %v3577_v52 = vadd.f32 %v3469_v45, %v3017_v8 }
 0x370   : > { %v10757_v7 = vpop.f32.mrf.mxu1 }
 0x371   : > { %v3472_v31 = vadd.f32 %v10757_v7, %v13797_v22  ;;  %v3575_v9 = vadd.f32 %v3461_v33, %v3015_v29  ;;  %v3609_v13 = vmax.f32 %v3577_v52, 0.0 }
 0x372   : > { %v3463_v63 = vpop.f32.mrf.mxu1 }
 0x373   : > { %v3578_v53 = vadd.f32 %v3472_v31, %v3018_v40  ;;  %v3464_v16 = vadd.f32 %v13797_v22, %v3463_v63  ;;  %v3607_v59 = vmax.f32 %v3575_v9, 0.0 }
 0x375   : > { %v3576_v1 = vadd.f32 %v3464_v16, %v3016_v30  ;;  %v3610_v6 = vmax.f32 %v3578_v53, 0.0  ;;  %v17429_v16 = vmax.f32 %v13620_v37, 0.0 }
 0x377   : > { %v3608_v60 = vmax.f32 %v3576_v1, 0.0  ;;  %v3638_v29 = vpack.c.bf16 %v3610_v6, %v3609_v13  ;;  %v17430_v6 = vmax.f32 %v13617_v54, 0.0 }
 0x379   : > { %v3637_v19 = vpack.c.bf16 %v3608_v60, %v3607_v59  ;;  %v17431_v60 = vmax.f32 %v13608_v26, 0.0  ;;  %v17432_v26 = vmax.f32 %v13629_v27, 0.0 }
 0x37b   : > { %10802 = vmatprep.mubr.bf16.mxu0 %v3637_v19 }
 0x37c   : > { %v10760_v46 = vpop.f32.mrf.mxu1  ;;  %10803 = vmatmul.mubr.bf16.gmra.mxu0 %v3638_v29 }
 0x37d   : > { %v3485_v49 = vadd.f32 %v10760_v46, %v13797_v22 }
 0x37e   : > { %v3476_v40 = vpop.f32.mrf.mxu1 }
 0x37f   : > { %v3477_v17 = vadd.f32 %v13797_v22, %v3476_v40  ;;  %v3581_v21 = vadd.f32 %v3485_v49, %v17426_v48 }
 0x380   : > { %v10761_v8 = vpop.f32.mrf.mxu1 }
 0x381   : > { %v3488_v3 = vadd.f32 %v10761_v8, %v13797_v22  ;;  %v3579_v30 = vadd.f32 %v3477_v17, %v3019_v24  ;;  %v3613_v45 = vmax.f32 %v3581_v21, 0.0  ;;  %v17434_v21 = vmax.f32 %v13641_v57, 0.0 }
 0x382   : > { %v3479_v34 = vpop.f32.mrf.mxu1 }
 0x383   : > { %v3582_v32 = vadd.f32 %v3488_v3, %v17425_v18  ;;  %v3480_v62 = vadd.f32 %v13797_v22, %v3479_v34  ;;  %v3611_v28 = vmax.f32 %v3579_v30, 0.0 }
 0x385   : > { %v3580_v55 = vadd.f32 %v3480_v62, %v17427_v38  ;;  %v3614_v4 = vmax.f32 %v3582_v32, 0.0  ;;  %v17433_v32 = vmax.f32 %v13644_v39, 0.0 }
 0x387   : > { %v3612_v33 = vmax.f32 %v3580_v55, 0.0  ;;  %v3640_v42 = vpack.c.bf16 %v3614_v4, %v3613_v45  ;;  %v17435_v55 = vmax.f32 %v13632_v58, 0.0  ;;  %v11352_v58 = vld [vmem:[%s17350_s9] sm:$0xff]  }
 0x388   : > { %10844 = vmatprep.subr.bf16.mxu1 %v11352_v58 }
 0x389   : > { %v3639_v7 = vpack.c.bf16 %v3612_v33, %v3611_v28  ;;  %10845 = vmatpush3.bf16.msra.mxu1 %v11352_v58 }
 0x38b   : > { %10806 = vmatprep.mubr.bf16.mxu0 %v3639_v7 }
 0x38c   : > { %v10764_v15 = vpop.f32.mrf.mxu1  ;;  %10807 = vmatmul.mubr.bf16.gmra.mxu0 %v3640_v42 }
 0x38d   : > { %v3501_v31 = vadd.f32 %v10764_v15, %v13797_v22 }
 0x38e   : > { %v3492_v24 = vpop.f32.mrf.mxu1 }
 0x38f   : > { %v3493_v0 = vadd.f32 %v13797_v22, %v3492_v24  ;;  %v3585_v59 = vadd.f32 %v3501_v31, %v17430_v6  ;;  %v17439_v6 = vmax.f32 %v13656_v2, 0.0 }
 0x390   : > { %v10765_v63 = vpop.f32.mrf.mxu1 }
 0x391   : > { %v3504_v5 = vadd.f32 %v10765_v63, %v13797_v22  ;;  %v3583_v53 = vadd.f32 %v3493_v0, %v17428_v50  ;;  %v3617_v40 = vmax.f32 %v3585_v59, 0.0  ;;  %v17437_v50 = vmax.f32 %v13671_v35, 0.0 }
 0x392   : > { %v3495_v9 = vpop.f32.mrf.mxu1 }
 0x393   : > { %v3586_v52 = vadd.f32 %v3504_v5, %v17429_v16  ;;  %v3496_v1 = vadd.f32 %v13797_v22, %v3495_v9  ;;  %v3615_v29 = vmax.f32 %v3583_v53, 0.0  ;;  %v17436_v5 = vmax.f32 %v13653_v23, 0.0 }
 0x395   : > { %v3584_v13 = vadd.f32 %v3496_v1, %v17431_v60  ;;  %v3618_v19 = vmax.f32 %v3586_v52, 0.0  ;;  %v17438_v52 = vmax.f32 %v13665_v51, 0.0 }
 0x397   : > { %v3616_v46 = vmax.f32 %v3584_v13, 0.0  ;;  %v3642_v49 = vpack.c.bf16 %v3618_v19, %v3617_v40 }
 0x399   : > { %v3641_v17 = vpack.c.bf16 %v3616_v46, %v3615_v29 }
 0x39b   : > { %10810 = vmatprep.mubr.bf16.mxu0 %v3641_v17 }
 0x39c   : > { %v10768_v12 = vpop.f32.mrf.mxu1  ;;  %10811 = vmatmul.mubr.bf16.gmra.mxu0 %v3642_v49 }
 0x39d   : > { %v3517_v3 = vadd.f32 %v10768_v12, %v13797_v22 }
 0x39e   : > { %v3508_v8 = vpop.f32.mrf.mxu1 }
 0x39f   : > { %v3509_v37 = vadd.f32 %v13797_v22, %v3508_v8  ;;  %v3589_v38 = vadd.f32 %v3517_v3, %v17434_v21  ;;  %v17440_v8 = vmax.f32 %v13680_v56, 0.0 }
 0x3a0   : > { %v10769_v34 = vpop.f32.mrf.mxu1 }
 0x3a1   : > { %v3520_v54 = vadd.f32 %v10769_v34, %v13797_v22  ;;  %v3587_v18 = vadd.f32 %v3509_v37, %v17432_v26  ;;  %v3621_v7 = vmax.f32 %v3589_v38, 0.0 }
 0x3a2   : > { %v3511_v30 = vpop.f32.mrf.mxu1 }
 0x3a3   : > { %v3590_v62 = vadd.f32 %v3520_v54, %v17433_v32  ;;  %v3512_v48 = vadd.f32 %v13797_v22, %v3511_v30  ;;  %v3619_v33 = vmax.f32 %v3587_v18, 0.0  ;;  %v17441_v30 = vmax.f32 %v13683_v25, 0.0 }
 0x3a5   : > { %v3588_v4 = vadd.f32 %v3512_v48, %v17435_v55  ;;  %v3622_v28 = vmax.f32 %v3590_v62, 0.0 }
 0x3a7   : > { %v3620_v45 = vmax.f32 %v3588_v4, 0.0  ;;  %v3644_v15 = vpack.c.bf16 %v3622_v28, %v3621_v7 }
 0x3a9   : > { %v3643_v42 = vpack.c.bf16 %v3620_v45, %v3619_v33  ;;  %v17442_v45 = vmax.f32 %v13716_v36, 0.0 }
 0x3ab   : > { %10814 = vmatprep.mubr.bf16.mxu0 %v3643_v42  ;;  %v17443_v42 = vmax.f32 %v13707_v61, 0.0  ;;  %v13923_v61 = vld [vmem:[%s17349_s8] ss:$0 sm:$0xff] }
 0x3ac   : > { %v10772_v27 = vpop.f32.mrf.mxu1  ;;  %10815 = vmatmul.mubr.bf16.gmra.mxu0 %v3644_v15 }
 0x3ad   : > { %v3533_v0 = vadd.f32 %v10772_v27, %v13797_v22 }
 0x3ae   : > { %v3524_v24 = vpop.f32.mrf.mxu1 }
 0x3af   : > { %v3525_v39 = vadd.f32 %v13797_v22, %v3524_v24  ;;  %v3593_v1 = vadd.f32 %v3533_v0, %v17438_v52 }
 0x3b0   : > { %v10773_v31 = vpop.f32.mrf.mxu1 }
 0x3b1   : > { %v3536_v57 = vadd.f32 %v10773_v31, %v13797_v22  ;;  %v3591_v9 = vadd.f32 %v3525_v39, %v17436_v5  ;;  %v3625_v29 = vmax.f32 %v3593_v1, 0.0  ;;  %v11356_v5 = vld [vmem:[%s17352_s11 + $0x20] sm:$0xff]  }
 0x3b2   : > { %v3527_v63 = vpop.f32.mrf.mxu1 }
 0x3b3   : > { %v3594_v53 = vadd.f32 %v3536_v57, %v17437_v50  ;;  %v3528_v16 = vadd.f32 %v13797_v22, %v3527_v63  ;;  %v3623_v13 = vmax.f32 %v3591_v9, 0.0 }
 0x3b5   : > { %v3592_v59 = vadd.f32 %v3528_v16, %v17439_v6  ;;  %v3626_v60 = vmax.f32 %v3594_v53, 0.0  ;;  %v11357_v16 = vld [vmem:[%s17352_s11 + $0x18] sm:$0xff]   ;;  %v11358_v6 = vld [vmem:[%s17352_s11 + $0x10] sm:$0xff]  }
 0x3b7   : > { %v3624_v19 = vmax.f32 %v3592_v59, 0.0  ;;  %v3646_v23 = vpack.c.bf16 %v3626_v60, %v3625_v29  ;;  %v11359_v60 = vld [vmem:[%s17352_s11 + $0x8] sm:$0xff]  }
 0x3b9   : > { %v3645_v46 = vpack.c.bf16 %v3624_v19, %v3623_v13 }
 0x3bb   : > { %10818 = vmatprep.mubr.bf16.mxu0 %v3645_v46 }
 0x3bc   : > { %v10776_v40 = vpop.f32.mrf.mxu1  ;;  %10819 = vmatmul.mubr.bf16.gmra.mxu0 %v3646_v23 }
 0x3bd   : > { %v3549_v51 = vadd.f32 %v10776_v40, %v13797_v22 }
 0x3be   : > { %v3540_v35 = vpop.f32.mrf.mxu1 }
 0x3bf   : > { %v3541_v17 = vadd.f32 %v13797_v22, %v3540_v35  ;;  %v3597_v54 = vadd.f32 %v3549_v51, %v3037_v14 }
 0x3c0   : > { %v10777_v49 = vpop.f32.mrf.mxu1 }
 0x3c1   : > { %v3552_v12 = vadd.f32 %v10777_v49, %v13797_v22  ;;  %v3595_v37 = vadd.f32 %v3541_v17, %v17440_v8  ;;  %v3629_v48 = vmax.f32 %v3597_v54, 0.0 }
 0x3c2   : > { %v3543_v2 = vpop.f32.mrf.mxu1 }
 0x3c3   : > { %v3598_v3 = vadd.f32 %v3552_v12, %v3038_v43  ;;  %v3544_v34 = vadd.f32 %v13797_v22, %v3543_v2  ;;  %v3627_v32 = vmax.f32 %v3595_v37, 0.0 }
 0x3c5   : > { %v3596_v26 = vadd.f32 %v3544_v34, %v17441_v30  ;;  %v3630_v18 = vmax.f32 %v3598_v3, 0.0 }
 0x3c7   : > { %v3628_v62 = vmax.f32 %v3596_v26, 0.0  ;;  %v3648_v38 = vpack.c.bf16 %v3630_v18, %v3629_v48 }
 0x3c9   : > { %v3647_v21 = vpack.c.bf16 %v3628_v62, %v3627_v32 }
 0x3cb   : > { %10822 = vmatprep.mubr.bf16.mxu0 %v3647_v21 }
 0x3cc   : > { %v10780_v56 = vpop.f32.mrf.mxu1  ;;  %10823 = vmatmul.mubr.bf16.gmra.mxu0 %v3648_v38 }
 0x3cd   : > { %v3565_v43 = vadd.f32 %v10780_v56, %v13797_v22 }
 0x3ce   : > { %v3556_v55 = vpop.f32.mrf.mxu1 }
 0x3cf   : > { %v3557_v41 = vadd.f32 %v13797_v22, %v3556_v55  ;;  %v3601_v7 = vadd.f32 %v3565_v43, %v17442_v45 }
 0x3d0   : > { %v10781_v4 = vpop.f32.mrf.mxu1 }
 0x3d1   : > { %v3568_v44 = vadd.f32 %v10781_v4, %v13797_v22  ;;  %v3599_v25 = vadd.f32 %v3557_v41, %v3039_v10  ;;  %v3633_v0 = vmax.f32 %v3601_v7, 0.0  ;;  %v11353_v10 = vld [vmem:[%s17352_s11 + $0x38] sm:$0xff]  }
 0x3d2   : > { %v3559_v14 = vpop.f32.mrf.mxu1  ;;  %10878 = vmatprep.subr.bf16.mxu0 %v11353_v10 }
 0x3d3   : > { %v3602_v28 = vadd.f32 %v3568_v44, %v3042_v20  ;;  %v3560_v33 = vadd.f32 %v13797_v22, %v3559_v14  ;;  %v3631_v24 = vmax.f32 %v3599_v25, 0.0  ;;  %10879 = vmatpush3.bf16.msra.mxu0 %v11353_v10 }
 0x3d4   : > { %10880 = vmatprep.subr.bf16.mxu0 %v11354_v11 }
 0x3d5   : > { %v3600_v15 = vadd.f32 %v3560_v33, %v17443_v42  ;;  %v3634_v27 = vmax.f32 %v3602_v28, 0.0 }
 0x3d7   : > { %v3632_v39 = vmax.f32 %v3600_v15, 0.0  ;;  %v3650_v57 = vpack.c.bf16 %v3634_v27, %v3633_v0  ;;  %10881 = vmatpush3.bf16.msra.mxu0 %v11354_v11 }
 0x3d8   : > { %10882 = vmatprep.subr.bf16.mxu0 %v11355_v47 }
 0x3d9   : > { %v3649_v31 = vpack.c.bf16 %v3632_v39, %v3631_v24 }
 0x3db   : > { %10826 = vmatprep.mubr.bf16.mxu0 %v3649_v31  ;;  %10883 = vmatpush3.bf16.msra.mxu0 %v11355_v47 }
 0x3dc   : > { %10827 = vmatmul.mubr.bf16.gmra.mxu0 %v3650_v57  ;;  %10884 = vmatprep.subr.bf16.mxu0 %v11356_v5  ;;  %v11360_v57 = vld [vmem:[%s17352_s11] sm:$0xff]  }
 0x3df   : > { %10885 = vmatpush3.bf16.msra.mxu0 %v11356_v5 }
 0x3e0   : > { %10886 = vmatprep.subr.bf16.mxu0 %v11357_v16 }
 0x3e3   : > { %10887 = vmatpush3.bf16.msra.mxu0 %v11357_v16 }
 0x3e4   : > { %10888 = vmatprep.subr.bf16.mxu0 %v11358_v6 }
 0x3e7   : > { %10889 = vmatpush3.bf16.msra.mxu0 %v11358_v6 }
 0x3e8   : > { %10890 = vmatprep.subr.bf16.mxu0 %v11359_v60 }
 0x3eb   : > { %10891 = vmatpush3.bf16.msra.mxu0 %v11359_v60 }
 0x3ec   : > { %10892 = vmatprep.subr.bf16.mxu0 %v11360_v57 }
 0x3ef   : > { %10893 = vmatpush3.bf16.msra.mxu0 %v11360_v57 }
 0x42c   : > { %v10800_v36 = vpop.f32.mrf.mxu0 }
 0x42d   : > { %v3765_v20 = vadd.f32 %v10800_v36, %v13923_v61 }
 0x42e   : > { %v3756_v22 = vpop.f32.mrf.mxu0 }
 0x42f   : > { %3885 = vst [vmem:[%s13928_s2 + $0x10] sm:$0xff] %v3765_v20  ;;  %v3757_v63 = vadd.f32 %v13923_v61, %v3756_v22 }
 0x430   : > { %v10801_v58 = vpop.f32.mrf.mxu0 }
 0x431   : > { %3883 = vst [vmem:[%s13928_s2] sm:$0xff] %v3757_v63  ;;  %v3768_v9 = vadd.f32 %v10801_v58, %v13923_v61 }
 0x432   : > { %v3759_v50 = vpop.f32.mrf.mxu0 }
 0x433   : > { %3886 = vst [vmem:[%s13928_s2 + $0x18] sm:$0xff] %v3768_v9  ;;  %v3760_v53 = vadd.f32 %v13923_v61, %v3759_v50  ;;  %v3916_v1 = vpack.c.bf16 %v3768_v9, %v3765_v20 }
 0x435   : > { %3884 = vst [vmem:[%s13928_s2 + $0x8] sm:$0xff] %v3760_v53  ;;  %v3915_v52 = vpack.c.bf16 %v3760_v53, %v3757_v63 }
 0x437   : > { %10846 = vmatprep.mubr.bf16.mxu1 %v3915_v52 }
 0x438   : > { %10847 = vmatmul.mubr.bf16.vlgmr.msra.gmra.mxu1 %v3916_v1 }
 0x43c   : > { %v10804_v59 = vpop.f32.mrf.mxu0 }
 0x43d   : > { %v3781_v13 = vadd.f32 %v10804_v59, %v13923_v61 }
 0x43e   : > { %v3772_v19 = vpop.f32.mrf.mxu0 }
 0x43f   : > { %3889 = vst [vmem:[%s13928_s2 + $0x30] sm:$0xff] %v3781_v13  ;;  %v3773_v29 = vadd.f32 %v13923_v61, %v3772_v19 }
 0x440   : > { %v10805_v46 = vpop.f32.mrf.mxu0 }
 0x441   : > { %3887 = vst [vmem:[%s13928_s2 + $0x20] sm:$0xff] %v3773_v29  ;;  %v3784_v23 = vadd.f32 %v10805_v46, %v13923_v61 }
 0x442   : > { %v3775_v40 = vpop.f32.mrf.mxu0 }
 0x443   : > { %3890 = vst [vmem:[%s13928_s2 + $0x38] sm:$0xff] %v3784_v23  ;;  %v3776_v35 = vadd.f32 %v13923_v61, %v3775_v40  ;;  %v3918_v51 = vpack.c.bf16 %v3784_v23, %v3781_v13 }
 0x445   : > { %3888 = vst [vmem:[%s13928_s2 + $0x28] sm:$0xff] %v3776_v35  ;;  %v3917_v17 = vpack.c.bf16 %v3776_v35, %v3773_v29 }
 0x447   : > { %10850 = vmatprep.mubr.bf16.mxu1 %v3917_v17  ;;  %v11361_v17 = vld [vmem:[%s17354_s13 + $0x38] sm:$0xff]  }
 0x448   : > { %10851 = vmatmul.mubr.bf16.gmra.mxu1 %v3918_v51  ;;  %v11362_v51 = vld [vmem:[%s17354_s13 + $0x30] sm:$0xff]   ;;  %10926 = vmatprep.subr.bf16.mxu1 %v11361_v17 }
 0x449   : > { %10927 = vmatpush3.bf16.msra.mxu1 %v11361_v17 }
 0x44a   : > { %10928 = vmatprep.subr.bf16.mxu1 %v11362_v51 }
 0x44c   : > { %v10808_v49 = vpop.f32.mrf.mxu0 }
 0x44d   : > { %v3797_v12 = vadd.f32 %v10808_v49, %v13923_v61  ;;  %10929 = vmatpush3.bf16.msra.mxu1 %v11362_v51 }
 0x44e   : > { %v3788_v2 = vpop.f32.mrf.mxu0 }
 0x44f   : > { %3893 = vst [vmem:[%s13928_s2 + $0x50] sm:$0xff] %v3797_v12  ;;  %v3789_v8 = vadd.f32 %v13923_v61, %v3788_v2  ;;  %v14024_v2 = vld [vmem:[%s17351_s10] ss:$0 sm:$0xff] }
 0x450   : > { %v10809_v37 = vpop.f32.mrf.mxu0 }
 0x451   : > { %3891 = vst [vmem:[%s13928_s2 + $0x40] sm:$0xff] %v3789_v8  ;;  %v3800_v3 = vadd.f32 %v10809_v37, %v13923_v61 }
 0x452   : > { %v3791_v34 = vpop.f32.mrf.mxu0 }
 0x453   : > { %3894 = vst [vmem:[%s13928_s2 + $0x58] sm:$0xff] %v3800_v3  ;;  %v3792_v54 = vadd.f32 %v13923_v61, %v3791_v34  ;;  %v3920_v26 = vpack.c.bf16 %v3800_v3, %v3797_v12 }
 0x455   : > { %3892 = vst [vmem:[%s13928_s2 + $0x48] sm:$0xff] %v3792_v54  ;;  %v3919_v30 = vpack.c.bf16 %v3792_v54, %v3789_v8 }
 0x457   : > { %10854 = vmatprep.mubr.bf16.mxu1 %v3919_v30  ;;  %v11364_v30 = vld [vmem:[%s17354_s13 + $0x20] sm:$0xff]  }
 0x458   : > { %10855 = vmatmul.mubr.bf16.gmra.mxu1 %v3920_v26 }
 0x45c   : > { %v10812_v18 = vpop.f32.mrf.mxu0 }
 0x45d   : > { %v3813_v32 = vadd.f32 %v10812_v18, %v13923_v61 }
 0x45e   : > { %v3804_v62 = vpop.f32.mrf.mxu0 }
 0x45f   : > { %3897 = vst [vmem:[%s13928_s2 + $0x70] sm:$0xff] %v3813_v32  ;;  %v3805_v48 = vadd.f32 %v13923_v61, %v3804_v62 }
 0x460   : > { %v10813_v21 = vpop.f32.mrf.mxu0 }
 0x461   : > { %3895 = vst [vmem:[%s13928_s2 + $0x60] sm:$0xff] %v3805_v48  ;;  %v3816_v38 = vadd.f32 %v10813_v21, %v13923_v61  ;;  %v11365_v21 = vld [vmem:[%s17354_s13 + $0x18] sm:$0xff]  }
 0x462   : > { %v3807_v56 = vpop.f32.mrf.mxu0 }
 0x463   : > { %3898 = vst [vmem:[%s13928_s2 + $0x78] sm:$0xff] %v3816_v38  ;;  %v3808_v55 = vadd.f32 %v13923_v61, %v3807_v56  ;;  %v3922_v43 = vpack.c.bf16 %v3816_v38, %v3813_v32 }
 0x465   : > { %3896 = vst [vmem:[%s13928_s2 + $0x68] sm:$0xff] %v3808_v55  ;;  %v3921_v41 = vpack.c.bf16 %v3808_v55, %v3805_v48  ;;  %v11366_v55 = vld [vmem:[%s17354_s13 + $0x10] sm:$0xff]  }
 0x467   : > { %10858 = vmatprep.mubr.bf16.mxu1 %v3921_v41 }
 0x468   : > { %10859 = vmatmul.mubr.bf16.gmra.mxu1 %v3922_v43 }
 0x46c   : > { %v10816_v4 = vpop.f32.mrf.mxu0 }
 0x46d   : > { %v3829_v44 = vadd.f32 %v10816_v4, %v13923_v61  ;;  %v11367_v4 = vld [vmem:[%s17354_s13 + $0x8] sm:$0xff]  }
 0x46e   : > { %v3820_v14 = vpop.f32.mrf.mxu0 }
 0x46f   : > { %3901 = vst [vmem:[%s13928_s2 + $0x90] sm:$0xff] %v3829_v44  ;;  %v3821_v25 = vadd.f32 %v13923_v61, %v3820_v14 }
 0x470   : > { %v10817_v28 = vpop.f32.mrf.mxu0 }
 0x471   : > { %3899 = vst [vmem:[%s13928_s2 + $0x80] sm:$0xff] %v3821_v25  ;;  %v3832_v33 = vadd.f32 %v10817_v28, %v13923_v61 }
 0x472   : > { %v3823_v45 = vpop.f32.mrf.mxu0 }
 0x473   : > { %3902 = vst [vmem:[%s13928_s2 + $0x98] sm:$0xff] %v3832_v33  ;;  %v3824_v7 = vadd.f32 %v13923_v61, %v3823_v45  ;;  %v3924_v15 = vpack.c.bf16 %v3832_v33, %v3829_v44 }
 0x475   : > { %3900 = vst [vmem:[%s13928_s2 + $0x88] sm:$0xff] %v3824_v7  ;;  %v3923_v42 = vpack.c.bf16 %v3824_v7, %v3821_v25 }
 0x477   : > { %10862 = vmatprep.mubr.bf16.mxu1 %v3923_v42 }
 0x478   : > { %10863 = vmatmul.mubr.bf16.gmra.mxu1 %v3924_v15 }
 0x47c   : > { %v10820_v27 = vpop.f32.mrf.mxu0 }
 0x47d   : > { %v3845_v24 = vadd.f32 %v10820_v27, %v13923_v61 }
 0x47e   : > { %v3836_v39 = vpop.f32.mrf.mxu0 }
 0x47f   : > { %3905 = vst [vmem:[%s13928_s2 + $0xb0] sm:$0xff] %v3845_v24  ;;  %v3837_v0 = vadd.f32 %v13923_v61, %v3836_v39 }
 0x480   : > { %v10821_v31 = vpop.f32.mrf.mxu0 }
 0x481   : > { %3903 = vst [vmem:[%s13928_s2 + $0xa0] sm:$0xff] %v3837_v0  ;;  %v3848_v10 = vadd.f32 %v10821_v31, %v13923_v61 }
 0x482   : > { %v3839_v11 = vpop.f32.mrf.mxu0 }
 0x483   : > { %3906 = vst [vmem:[%s13928_s2 + $0xb8] sm:$0xff] %v3848_v10  ;;  %v3840_v36 = vadd.f32 %v13923_v61, %v3839_v11  ;;  %v3926_v20 = vpack.c.bf16 %v3848_v10, %v3845_v24 }
 0x485   : > { %3904 = vst [vmem:[%s13928_s2 + $0xa8] sm:$0xff] %v3840_v36  ;;  %v3925_v47 = vpack.c.bf16 %v3840_v36, %v3837_v0 }
 0x487   : > { %10866 = vmatprep.mubr.bf16.mxu1 %v3925_v47 }
 0x488   : > { %10867 = vmatmul.mubr.bf16.gmra.mxu1 %v3926_v20 }
 0x48c   : > { %v10824_v22 = vpop.f32.mrf.mxu0 }
 0x48d   : > { %v3861_v63 = vadd.f32 %v10824_v22, %v13923_v61 }
 0x48e   : > { %v3852_v58 = vpop.f32.mrf.mxu0 }
 0x48f   : > { %3909 = vst [vmem:[%s13928_s2 + $0xd0] sm:$0xff] %v3861_v63  ;;  %v3853_v5 = vadd.f32 %v13923_v61, %v3852_v58 }
 0x490   : > { %v10825_v9 = vpop.f32.mrf.mxu0 }
 0x491   : > { %3907 = vst [vmem:[%s13928_s2 + $0xc0] sm:$0xff] %v3853_v5  ;;  %v3864_v50 = vadd.f32 %v10825_v9, %v13923_v61 }
 0x492   : > { %v3855_v53 = vpop.f32.mrf.mxu0 }
 0x493   : > { %3910 = vst [vmem:[%s13928_s2 + $0xd8] sm:$0xff] %v3864_v50  ;;  %v3856_v16 = vadd.f32 %v13923_v61, %v3855_v53  ;;  %v3928_v1 = vpack.c.bf16 %v3864_v50, %v3861_v63 }
 0x495   : > { %3908 = vst [vmem:[%s13928_s2 + $0xc8] sm:$0xff] %v3856_v16  ;;  %v3927_v52 = vpack.c.bf16 %v3856_v16, %v3853_v5 }
 0x497   : > { %10870 = vmatprep.mubr.bf16.mxu1 %v3927_v52 }
 0x498   : > { %10871 = vmatmul.mubr.bf16.gmra.mxu1 %v3928_v1 }
 0x49c   : > { %v10828_v6 = vpop.f32.mrf.mxu0 }
 0x49d   : > { %v3877_v59 = vadd.f32 %v10828_v6, %v13923_v61 }
 0x49e   : > { %v3868_v60 = vpop.f32.mrf.mxu0 }
 0x49f   : > { %3913 = vst [vmem:[%s13928_s2 + $0xf0] sm:$0xff] %v3877_v59  ;;  %v3869_v13 = vadd.f32 %v13923_v61, %v3868_v60 }
 0x4a0   : > { %v10829_v19 = vpop.f32.mrf.mxu0 }
 0x4a1   : > { %3911 = vst [vmem:[%s13928_s2 + $0xe0] sm:$0xff] %v3869_v13  ;;  %v3880_v29 = vadd.f32 %v10829_v19, %v13923_v61 }
 0x4a2   : > { %v3871_v46 = vpop.f32.mrf.mxu0 }
 0x4a3   : > { %3914 = vst [vmem:[%s13928_s2 + $0xf8] sm:$0xff] %v3880_v29  ;;  %v3872_v23 = vadd.f32 %v13923_v61, %v3871_v46  ;;  %v3930_v35 = vpack.c.bf16 %v3880_v29, %v3877_v59  ;;  %v11363_v61 = vld [vmem:[%s17354_s13 + $0x28] sm:$0xff]  }
 0x4a4   : > { %10930 = vmatprep.subr.bf16.mxu1 %v11363_v61 }
 0x4a5   : > { %3912 = vst [vmem:[%s13928_s2 + $0xe8] sm:$0xff] %v3872_v23  ;;  %v3929_v40 = vpack.c.bf16 %v3872_v23, %v3869_v13  ;;  %10931 = vmatpush3.bf16.msra.mxu1 %v11363_v61  ;;  %s14908_s2 = scalar_lea.vmem %s17358_s17, %s10991_s30 }
 0x4a6   : > { %10932 = vmatprep.subr.bf16.mxu1 %v11364_v30 }
 0x4a7   : > { %10874 = vmatprep.mubr.bf16.mxu1 %v3929_v40 }
 0x4a8   : > { %10875 = vmatmul.mubr.bf16.gmra.mxu1 %v3930_v35 }
 0x4a9   : > { %10933 = vmatpush3.bf16.msra.mxu1 %v11364_v30 }
 0x4aa   : > { %10934 = vmatprep.subr.bf16.mxu1 %v11365_v21 }
 0x4ad   : > { %10935 = vmatpush3.bf16.msra.mxu1 %v11365_v21 }
 0x4ae   : > { %10936 = vmatprep.subr.bf16.mxu1 %v11366_v55 }
 0x4b1   : > { %10937 = vmatpush3.bf16.msra.mxu1 %v11366_v55 }
 0x4b2   : > { %10938 = vmatprep.subr.bf16.mxu1 %v11367_v4 }
 0x4b5   : > { %10939 = vmatpush3.bf16.msra.mxu1 %v11367_v4 }
 0x4f8   : > { %v10848_v49 = vpop.f32.mrf.mxu1 }
 0x4f9   : > { %v14033_v34 = vadd.f32 %v10848_v49, %v14024_v2 }
 0x4fa   : > { %v4036_v12 = vpop.f32.mrf.mxu1 }
 0x4fb   : > { %v14027_v37 = vadd.f32 %v14024_v2, %v4036_v12  ;;  %v4165_v48 = vmax.f32 %v14033_v34, 0.0  ;;  %v11425_v34 = vld [vmem:[%s17356_s15 + $0x1a4] ss:$40 sps:$4 sm:$0xff]  }
 0x4fc   : > { %v10849_v8 = vpop.f32.mrf.mxu1 }
 0x4fd   : > { %v14030_v3 = vadd.f32 %v10849_v8, %v14024_v2  ;;  %v4163_v32 = vmax.f32 %v14027_v37, 0.0 }
 0x4fe   : > { %v4039_v54 = vpop.f32.mrf.mxu1 }
 0x4ff   : > { %v14039_v26 = vadd.f32 %v14024_v2, %v4039_v54  ;;  %v4166_v18 = vmax.f32 %v14030_v3, 0.0  ;;  %v11443_v3 = vld [vmem:[%s17356_s15 + $0x1fc] ss:$40 sps:$4 sm:$0xff]  }
 0x501   : > { %v4164_v62 = vmax.f32 %v14039_v26, 0.0  ;;  %v4196_v56 = vpack.c.bf16 %v4166_v18, %v4165_v48  ;;  %v11438_v26 = vld [vmem:[%s17356_s15 + $0x248] ss:$40 sps:$4 sm:$0xff]  }
 0x503   : > { %v4195_v38 = vpack.c.bf16 %v4164_v62, %v4163_v32 }
 0x505   : > { %10894 = vmatprep.mubr.bf16.mxu0 %v4195_v38 }
 0x506   : > { %10895 = vmatmul.mubr.bf16.vlgmr.msra.gmra.mxu0 %v4196_v56 }
 0x508   : > { %v10852_v41 = vpop.f32.mrf.mxu1 }
 0x509   : > { %v14069_v28 = vadd.f32 %v10852_v41, %v14024_v2 }
 0x50a   : > { %v4052_v43 = vpop.f32.mrf.mxu1 }
 0x50b   : > { %v14063_v14 = vadd.f32 %v14024_v2, %v4052_v43  ;;  %v4169_v27 = vmax.f32 %v14069_v28, 0.0  ;;  %v11432_v28 = vld [vmem:[%s17356_s15 + $0xb0] ss:$40 sps:$4 sm:$0xff]  }
 0x50c   : > { %v10853_v44 = vpop.f32.mrf.mxu1 }
 0x50d   : > { %v14066_v25 = vadd.f32 %v10853_v44, %v14024_v2  ;;  %v4167_v42 = vmax.f32 %v14063_v14, 0.0 }
 0x50e   : > { %v4055_v33 = vpop.f32.mrf.mxu1 }
 0x50f   : > { %v14072_v45 = vadd.f32 %v14024_v2, %v4055_v33  ;;  %v4170_v7 = vmax.f32 %v14066_v25, 0.0  ;;  %v11453_v25 = vld [vmem:[%s17356_s15 + $0x108] ss:$40 sps:$4 sm:$0xff]  }
 0x511   : > { %v4168_v15 = vmax.f32 %v14072_v45, 0.0  ;;  %v4198_v39 = vpack.c.bf16 %v4170_v7, %v4169_v27 }
 0x513   : > { %v4197_v24 = vpack.c.bf16 %v4168_v15, %v4167_v42 }
 0x515   : > { %10898 = vmatprep.mubr.bf16.mxu0 %v4197_v24 }
 0x516   : > { %10899 = vmatmul.mubr.bf16.gmra.mxu0 %v4198_v39 }
 0x518   : > { %v10856_v0 = vpop.f32.mrf.mxu1 }
 0x519   : > { %v14093_v36 = vadd.f32 %v10856_v0, %v14024_v2 }
 0x51a   : > { %v4068_v31 = vpop.f32.mrf.mxu1 }
 0x51b   : > { %v14087_v10 = vadd.f32 %v14024_v2, %v4068_v31  ;;  %v4173_v5 = vmax.f32 %v14093_v36, 0.0 }
 0x51c   : > { %v10857_v57 = vpop.f32.mrf.mxu1 }
 0x51d   : > { %v14090_v11 = vadd.f32 %v10857_v57, %v14024_v2  ;;  %v4171_v63 = vmax.f32 %v14087_v10, 0.0  ;;  %v11368_v57 = vld [vmem:[%s17354_s13] sm:$0xff]  }
 0x51e   : > { %v4071_v47 = vpop.f32.mrf.mxu1  ;;  %10940 = vmatprep.subr.bf16.mxu1 %v11368_v57 }
 0x51f   : > { %v14096_v20 = vadd.f32 %v14024_v2, %v4071_v47  ;;  %v4174_v22 = vmax.f32 %v14090_v11, 0.0  ;;  %10941 = vmatpush3.bf16.msra.mxu1 %v11368_v57 }
 0x521   : > { %v4172_v58 = vmax.f32 %v14096_v20, 0.0  ;;  %v4200_v50 = vpack.c.bf16 %v4174_v22, %v4173_v5 }
 0x523   : > { %v4199_v9 = vpack.c.bf16 %v4172_v58, %v4171_v63 }
 0x525   : > { %10902 = vmatprep.mubr.bf16.mxu0 %v4199_v9 }
 0x526   : > { %10903 = vmatmul.mubr.bf16.gmra.mxu0 %v4200_v50 }
 0x528   : > { %v10860_v53 = vpop.f32.mrf.mxu1 }
 0x529   : > { %v14117_v59 = vadd.f32 %v10860_v53, %v14024_v2 }
 0x52a   : > { %v4084_v16 = vpop.f32.mrf.mxu1 }
 0x52b   : > { %v14111_v1 = vadd.f32 %v14024_v2, %v4084_v16  ;;  %v17396_v23 = vmax.f32 %v14117_v59, 0.0 }
 0x52c   : > { %v10861_v52 = vpop.f32.mrf.mxu1 }
 0x52d   : > { %v14114_v6 = vadd.f32 %v10861_v52, %v14024_v2  ;;  %v17399_v29 = vmax.f32 %v14111_v1, 0.0  ;;  %v17447_v36 = vmax.f32 %v14111_v1, 0.0 }
 0x52e   : > { %v4087_v60 = vpop.f32.mrf.mxu1 }
 0x52f   : > { %v14120_v13 = vadd.f32 %v14024_v2, %v4087_v60  ;;  %v17397_v19 = vmax.f32 %v14114_v6, 0.0 }
 0x531   : > { %v17398_v46 = vmax.f32 %v14120_v13, 0.0  ;;  %v4202_v35 = vpack.c.bf16 %v17397_v19, %v17396_v23 }
 0x533   : > { %v4201_v40 = vpack.c.bf16 %v17398_v46, %v17399_v29 }
 0x535   : > { %10906 = vmatprep.mubr.bf16.mxu0 %v4201_v40 }
 0x536   : > { %10907 = vmatmul.mubr.bf16.gmra.mxu0 %v4202_v35 }
 0x538   : > { %v10864_v17 = vpop.f32.mrf.mxu1 }
 0x539   : > { %v14141_v8 = vadd.f32 %v10864_v17, %v14024_v2 }
 0x53a   : > { %v4100_v51 = vpop.f32.mrf.mxu1 }
 0x53b   : > { %v14135_v12 = vadd.f32 %v14024_v2, %v4100_v51  ;;  %v17392_v55 = vmax.f32 %v14141_v8, 0.0 }
 0x53c   : > { %v10865_v49 = vpop.f32.mrf.mxu1 }
 0x53d   : > { %v14138_v61 = vadd.f32 %v10865_v49, %v14024_v2  ;;  %v17395_v38 = vmax.f32 %v14135_v12, 0.0 }
 0x53e   : > { %v4103_v54 = vpop.f32.mrf.mxu1 }
 0x53f   : > { %v14144_v30 = vadd.f32 %v14024_v2, %v4103_v54  ;;  %v17393_v21 = vmax.f32 %v14138_v61, 0.0 }
 0x541   : > { %v17394_v56 = vmax.f32 %v14144_v30, 0.0  ;;  %v4204_v43 = vpack.c.bf16 %v17393_v21, %v17392_v55  ;;  %v11380_v55 = vld [vmem:[%s17356_s15 + $0x144] ss:$40 sps:$4 sm:$0xff]  }
 0x543   : > { %v4203_v41 = vpack.c.bf16 %v17394_v56, %v17395_v38  ;;  %v11384_v38 = vld [vmem:[%s17356_s15 + $0x238] ss:$40 sps:$4 sm:$0xff]  }
 0x545   : > { %10910 = vmatprep.mubr.bf16.mxu0 %v4203_v41 }
 0x546   : > { %10911 = vmatmul.mubr.bf16.gmra.mxu0 %v4204_v43 }
 0x548   : > { %v10868_v4 = vpop.f32.mrf.mxu1 }
 0x549   : > { %v14165_v0 = vadd.f32 %v10868_v4, %v14024_v2 }
 0x54a   : > { %v4116_v44 = vpop.f32.mrf.mxu1 }
 0x54b   : > { %v14159_v24 = vadd.f32 %v14024_v2, %v4116_v44  ;;  %v17380_v16 = vmax.f32 %v14165_v0, 0.0 }
 0x54c   : > { %v10869_v33 = vpop.f32.mrf.mxu1 }
 0x54d   : > { %v14162_v39 = vadd.f32 %v10869_v33, %v14024_v2  ;;  %v17391_v50 = vmax.f32 %v14159_v24, 0.0 }
 0x54e   : > { %v4119_v31 = vpop.f32.mrf.mxu1 }
 0x54f   : > { %v14171_v47 = vadd.f32 %v14024_v2, %v4119_v31  ;;  %v17389_v9 = vmax.f32 %v14162_v39, 0.0 }
 0x551   : > { %v17390_v53 = vmax.f32 %v14171_v47, 0.0  ;;  %v4206_v60 = vpack.c.bf16 %v17389_v9, %v17380_v16 }
 0x553   : > { %v4205_v52 = vpack.c.bf16 %v17390_v53, %v17391_v50 }
 0x555   : > { %10914 = vmatprep.mubr.bf16.mxu0 %v4205_v52 }
 0x556   : > { %10915 = vmatmul.mubr.bf16.gmra.mxu0 %v4206_v60 }
 0x558   : > { %v10872_v40 = vpop.f32.mrf.mxu1 }
 0x559   : > { %v14192_v54 = vadd.f32 %v10872_v40, %v14024_v2 }
 0x55a   : > { %v4132_v35 = vpop.f32.mrf.mxu1 }
 0x55b   : > { %v14186_v51 = vadd.f32 %v14024_v2, %v4132_v35  ;;  %v17383_v31 = vmax.f32 %v14192_v54, 0.0 }
 0x55c   : > { %v10873_v17 = vpop.f32.mrf.mxu1 }
 0x55d   : > { %v14189_v49 = vadd.f32 %v10873_v17, %v14024_v2  ;;  %v17382_v44 = vmax.f32 %v14186_v51, 0.0 }
 0x55e   : > { %v4135_v41 = vpop.f32.mrf.mxu1 }
 0x55f   : > { %v14195_v43 = vadd.f32 %v14024_v2, %v4135_v41  ;;  %v17384_v4 = vmax.f32 %v14189_v49, 0.0 }
 0x561   : > { %v17381_v33 = vmax.f32 %v14195_v43, 0.0  ;;  %v4208_v52 = vpack.c.bf16 %v17384_v4, %v17383_v31 }
 0x563   : > { %v4207_v57 = vpack.c.bf16 %v17381_v33, %v17382_v44 }
 0x565   : > { %10918 = vmatprep.mubr.bf16.mxu0 %v4207_v57 }
 0x566   : > { %10919 = vmatmul.mubr.bf16.gmra.mxu0 %v4208_v52 }
 0x568   : > { %v10876_v60 = vpop.f32.mrf.mxu1 }
 0x569   : > { %v14216_v16 = vadd.f32 %v10876_v60, %v14024_v2 }
 0x56a   : > { %v4148_v40 = vpop.f32.mrf.mxu1 }
 0x56b   : > { %v14210_v17 = vadd.f32 %v14024_v2, %v4148_v40  ;;  %v17386_v4 = vmax.f32 %v14216_v16, 0.0 }
 0x56c   : > { %v10877_v35 = vpop.f32.mrf.mxu1 }
 0x56d   : > { %v14213_v41 = vadd.f32 %v10877_v35, %v14024_v2  ;;  %v17388_v57 = vmax.f32 %v14210_v17, 0.0  ;;  %v11374_v35 = vld [vmem:[%s17356_s15 + $0x1e4] ss:$40 sps:$4 sm:$0xff]  }
 0x56e   : > { %v4151_v33 = vpop.f32.mrf.mxu1 }
 0x56f   : > { %v14219_v44 = vadd.f32 %v14024_v2, %v4151_v33  ;;  %v17387_v31 = vmax.f32 %v14213_v41, 0.0  ;;  %v11369_v2 = vld [vmem:[%s17356_s15 + $0x230] ss:$40 sps:$4 sm:$0xff]   ;;  %v11371_v33 = vld [vmem:[%s17356_s15 + $0x234] ss:$40 sps:$4 sm:$0xff]  }
 0x570   : > { %5337 = vmatprep.subr.bf16.mxu0 %v11371_v33 }
 0x571   : > { %v17385_v52 = vmax.f32 %v14219_v44, 0.0  ;;  %v4210_v60 = vpack.c.bf16 %v17387_v31, %v17386_v4  ;;  %5338 = vmatpush1.bf16.msra.mxu0 %v11369_v2  ;;  %v11377_v31 = vld [vmem:[%s17356_s15 + $0x194] ss:$40 sps:$4 sm:$0xff]  }
 0x572   : > { %5339 = vmatprep.subr.bf16.mxu0 %v11374_v35  ;;  %v11375_v35 = vld [vmem:[%s17356_s15 + $0x190] ss:$40 sps:$4 sm:$0xff]  }
 0x573   : > { %v4209_v40 = vpack.c.bf16 %v17385_v52, %v17388_v57  ;;  %v14254_v57 = vld [vmem:[%s17353_s12] ss:$0 sm:$0xff] }
 0x575   : > { %10922 = vmatprep.mubr.bf16.mxu0 %v4209_v40  ;;  %v11372_v40 = vld [vmem:[%s17356_s15 + $0x1e0] ss:$40 sps:$4 sm:$0xff]  }
 0x576   : > { %10923 = vmatmul.mubr.bf16.gmra.mxu0 %v4210_v60  ;;  %v11386_v60 = vld [vmem:[%s17356_s15 + $0x23c] ss:$40 sps:$4 sm:$0xff]  }
 0x577   : > { %5530 = vmatprep.subr.bf16.mxu1 %v11386_v60  ;;  %5340 = vmatpush1.bf16.msra.mxu0 %v11372_v40  ;;  %v11378_v40 = vld [vmem:[%s17356_s15 + $0x140] ss:$40 sps:$4 sm:$0xff]  }
 0x578   : > { %5341 = vmatprep.subr.bf16.mxu0 %v11377_v31  ;;  %v11383_v31 = vld [vmem:[%s17356_s15 + $0xf4] ss:$40 sps:$4 sm:$0xff]  }
 0x57b   : > { %5342 = vmatpush1.bf16.msra.mxu0 %v11375_v35  ;;  %v11390_v35 = vld [vmem:[%s17356_s15 + $0xa0] ss:$40 sps:$4 sm:$0xff]  }
 0x57c   : > { %5343 = vmatprep.subr.bf16.mxu0 %v11380_v55  ;;  %v11381_v55 = vld [vmem:[%s17356_s15 + $0xf0] ss:$40 sps:$4 sm:$0xff]  }
 0x57f   : > { %5344 = vmatpush1.bf16.msra.mxu0 %v11378_v40 }
 0x580   : > { %5345 = vmatprep.subr.bf16.mxu0 %v11383_v31 }
 0x583   : > { %5346 = vmatpush1.bf16.msra.mxu0 %v11381_v55 }
 0x5c6   : > { %v10896_v52 = vpop.f32.mrf.mxu0 }
 0x5c7   : > { %v4325_v53 = vadd.f32 %v10896_v52, %v14254_v57 }
 0x5c8   : > { %v4316_v4 = vpop.f32.mrf.mxu0 }
 0x5c9   : > { %v4317_v33 = vadd.f32 %v14254_v57, %v4316_v4 }
 0x5ca   : > { %v10897_v2 = vpop.f32.mrf.mxu0 }
 0x5cb   : > { %v4328_v9 = vadd.f32 %v10897_v2, %v14254_v57  ;;  %v4443_v56 = vmax.f32 %v4317_v33, 0.0  ;;  %v4445_v2 = vmax.f32 %v4325_v53, 0.0  ;;  %v11395_v33 = vld [vmem:[%s17356_s15 + $0x19c] ss:$40 sps:$4 sm:$0xff]  }
 0x5cc   : > { %v4319_v50 = vpop.f32.mrf.mxu0 }
 0x5cd   : > { %v4320_v60 = vadd.f32 %v14254_v57, %v4319_v50  ;;  %v4446_v21 = vmax.f32 %v4328_v9, 0.0  ;;  %v11389_v9 = vld [vmem:[%s17356_s15 + $0x1ec] ss:$40 sps:$4 sm:$0xff]  }
 0x5cf   : > { %v4444_v4 = vmax.f32 %v4320_v60, 0.0  ;;  %v4476_v50 = vpack.c.bf16 %v4446_v21, %v4445_v2  ;;  %v11387_v21 = vld [vmem:[%s17356_s15 + $0x1e8] ss:$40 sps:$4 sm:$0xff]   ;;  %v11398_v2 = vld [vmem:[%s17356_s15 + $0x14c] ss:$40 sps:$4 sm:$0xff]  }
 0x5d1   : > { %v4475_v52 = vpack.c.bf16 %v4444_v4, %v4443_v56  ;;  %v11392_v56 = vld [vmem:[%s17356_s15 + $0xa4] ss:$40 sps:$4 sm:$0xff]   ;;  %v11393_v4 = vld [vmem:[%s17356_s15 + $0x198] ss:$40 sps:$4 sm:$0xff]  }
 0x5d2   : > { %5347 = vmatprep.subr.bf16.mxu0 %v11392_v56 }
 0x5d3   : > { %10942 = vmatprep.mubr.bf16.mxu1 %v4475_v52  ;;  %5348 = vmatpush1.bf16.msra.mxu0 %v11390_v35  ;;  %v11404_v35 = vld [vmem:[%s17356_s15 + $0xfc] ss:$40 sps:$4 sm:$0xff]  }
 0x5d4   : > { %10943 = vmatmul.mubr.bf16.vlgmr.msra.gmra.mxu1 %v4476_v50  ;;  %v11399_v50 = vld [vmem:[%s17356_s15 + $0x50] ss:$40 sps:$4 sm:$0xff]  }
 0x5d5   : > { %5531 = vmatpush1.bf16.msra.mxu1 %v11384_v38  ;;  %v11401_v38 = vld [vmem:[%s17356_s15 + $0x54] ss:$40 sps:$4 sm:$0xff]  }
 0x5d6   : > { %v10900_v53 = vpop.f32.mrf.mxu0  ;;  %5532 = vmatprep.subr.bf16.mxu1 %v11389_v9  ;;  %5349 = vmatprep.subr.bf16.mxu0 %v11401_v38  ;;  %v11402_v38 = vld [vmem:[%s17356_s15 + $0xf8] ss:$40 sps:$4 sm:$0xff]  }
 0x5d7   : > { %v4341_v9 = vadd.f32 %v10900_v53, %v14254_v57  ;;  %5350 = vmatpush1.bf16.msra.mxu0 %v11399_v50 }
 0x5d8   : > { %v4332_v60 = vpop.f32.mrf.mxu0 }
 0x5d9   : > { %5533 = vmatpush1.bf16.msra.mxu1 %v11387_v21  ;;  %v4333_v31 = vadd.f32 %v14254_v57, %v4332_v60  ;;  %v11396_v21 = vld [vmem:[%s17356_s15 + $0x148] ss:$40 sps:$4 sm:$0xff]   ;;  %v4449_v23 = vmax.f32 %v4341_v9, 0.0 }
 0x5da   : > { %v10901_v40 = vpop.f32.mrf.mxu0  ;;  %5534 = vmatprep.subr.bf16.mxu1 %v11395_v33 }
 0x5db   : > { %v4344_v52 = vadd.f32 %v10901_v40, %v14254_v57  ;;  %v4447_v60 = vmax.f32 %v4333_v31, 0.0 }
 0x5dc   : > { %v4335_v55 = vpop.f32.mrf.mxu0 }
 0x5dd   : > { %v4336_v56 = vadd.f32 %v14254_v57, %v4335_v55  ;;  %5535 = vmatpush1.bf16.msra.mxu1 %v11393_v4  ;;  %v4450_v33 = vmax.f32 %v4344_v52, 0.0 }
 0x5de   : > { %5536 = vmatprep.subr.bf16.mxu1 %v11398_v2 }
 0x5df   : > { %v4448_v40 = vmax.f32 %v4336_v56, 0.0  ;;  %v4478_v4 = vpack.c.bf16 %v4450_v33, %v4449_v23 }
 0x5e1   : > { %v4477_v53 = vpack.c.bf16 %v4448_v40, %v4447_v60  ;;  %5537 = vmatpush1.bf16.msra.mxu1 %v11396_v21 }
 0x5e2   : > { %5538 = vmatprep.subr.bf16.mxu1 %v11404_v35 }
 0x5e3   : > { %10946 = vmatprep.mubr.bf16.mxu1 %v4477_v53 }
 0x5e4   : > { %10947 = vmatmul.mubr.bf16.gmra.mxu1 %v4478_v4 }
 0x5e5   : > { %5539 = vmatpush1.bf16.msra.mxu1 %v11402_v38 }
 0x5e6   : > { %v10904_v2 = vpop.f32.mrf.mxu0 }
 0x5e7   : > { %v4357_v50 = vadd.f32 %v10904_v2, %v14254_v57 }
 0x5e8   : > { %v4348_v52 = vpop.f32.mrf.mxu0 }
 0x5e9   : > { %v4349_v19 = vadd.f32 %v14254_v57, %v4348_v52  ;;  %v4453_v23 = vmax.f32 %v4357_v50, 0.0 }
 0x5ea   : > { %v10905_v55 = vpop.f32.mrf.mxu0 }
 0x5eb   : > { %v4360_v31 = vadd.f32 %v10905_v55, %v14254_v57  ;;  %v4451_v60 = vmax.f32 %v4349_v19, 0.0 }
 0x5ec   : > { %v4351_v9 = vpop.f32.mrf.mxu0 }
 0x5ed   : > { %v4352_v56 = vadd.f32 %v14254_v57, %v4351_v9  ;;  %v4454_v21 = vmax.f32 %v4360_v31, 0.0 }
 0x5ef   : > { %v4452_v40 = vmax.f32 %v4352_v56, 0.0  ;;  %v4480_v35 = vpack.c.bf16 %v4454_v21, %v4453_v23 }
 0x5f1   : > { %v4479_v33 = vpack.c.bf16 %v4452_v40, %v4451_v60 }
 0x5f3   : > { %10950 = vmatprep.mubr.bf16.mxu1 %v4479_v33 }
 0x5f4   : > { %10951 = vmatmul.mubr.bf16.gmra.mxu1 %v4480_v35 }
 0x5f6   : > { %v10908_v53 = vpop.f32.mrf.mxu0 }
 0x5f7   : > { %v4373_v2 = vadd.f32 %v10908_v53, %v14254_v57 }
 0x5f8   : > { %v4364_v38 = vpop.f32.mrf.mxu0 }
 0x5f9   : > { %v4365_v52 = vadd.f32 %v14254_v57, %v4364_v38  ;;  %v4457_v50 = vmax.f32 %v4373_v2, 0.0 }
 0x5fa   : > { %v10909_v4 = vpop.f32.mrf.mxu0 }
 0x5fb   : > { %v4376_v55 = vadd.f32 %v10909_v4, %v14254_v57  ;;  %v4455_v19 = vmax.f32 %v4365_v52, 0.0 }
 0x5fc   : > { %v4367_v46 = vpop.f32.mrf.mxu0 }
 0x5fd   : > { %v4368_v9 = vadd.f32 %v14254_v57, %v4367_v46  ;;  %v4458_v31 = vmax.f32 %v4376_v55, 0.0 }
 0x5ff   : > { %v4456_v56 = vmax.f32 %v4368_v9, 0.0  ;;  %v4482_v21 = vpack.c.bf16 %v4458_v31, %v4457_v50 }
 0x601   : > { %v4481_v60 = vpack.c.bf16 %v4456_v56, %v4455_v19  ;;  %v11407_v56 = vld [vmem:[%s17356_s15 + $0xac] ss:$40 sps:$4 sm:$0xff]  }
 0x602   : > { %5540 = vmatprep.subr.bf16.mxu1 %v11407_v56 }
 0x603   : > { %10954 = vmatprep.mubr.bf16.mxu1 %v4481_v60  ;;  %v11405_v60 = vld [vmem:[%s17356_s15 + $0xa8] ss:$40 sps:$4 sm:$0xff]  }
 0x604   : > { %10955 = vmatmul.mubr.bf16.gmra.mxu1 %v4482_v21 }
 0x605   : > { %5541 = vmatpush1.bf16.msra.mxu1 %v11405_v60 }
 0x606   : > { %v10912_v40 = vpop.f32.mrf.mxu0 }
 0x607   : > { %v4389_v53 = vadd.f32 %v10912_v40, %v14254_v57  ;;  %v11413_v40 = vld [vmem:[%s17356_s15 + $0x5c] ss:$40 sps:$4 sm:$0xff]  }
 0x608   : > { %v4380_v23 = vpop.f32.mrf.mxu0  ;;  %5542 = vmatprep.subr.bf16.mxu1 %v11413_v40  ;;  %v17402_v40 = vmov 0  }
 0x609   : > { %v4381_v35 = vadd.f32 %v14254_v57, %v4380_v23  ;;  %v4461_v2 = vmax.f32 %v4389_v53, 0.0  ;;  %5369 = vmatprep.mubr.bf16.mxu0 %v17402_v40 }
 0x60a   : > { %v10913_v33 = vpop.f32.mrf.mxu0 }
 0x60b   : > { %v4392_v38 = vadd.f32 %v10913_v33, %v14254_v57  ;;  %v4459_v52 = vmax.f32 %v4381_v35, 0.0  ;;  %v11411_v33 = vld [vmem:[%s17356_s15 + $0x58] ss:$40 sps:$4 sm:$0xff]  }
 0x60c   : > { %v4383_v4 = vpop.f32.mrf.mxu0  ;;  %5543 = vmatpush1.bf16.msra.mxu1 %v11411_v33 }
 0x60d   : > { %v4384_v46 = vadd.f32 %v14254_v57, %v4383_v4  ;;  %v4462_v55 = vmax.f32 %v4392_v38, 0.0 }
 0x60f   : > { %v4460_v9 = vmax.f32 %v4384_v46, 0.0  ;;  %v4484_v31 = vpack.c.bf16 %v4462_v55, %v4461_v2  ;;  %v11410_v55 = vld [vmem:[%s17356_s15 + $0x4] ss:$40 sps:$4 sm:$0xff]   ;;  %v11408_v2 = vld [vmem:[%s17356_s15] ss:$40 sps:$4 sm:$0xff]  }
 0x610   : > { %5351 = vmatprep.subr.bf16.mxu0 %v11410_v55 }
 0x611   : > { %v4483_v19 = vpack.c.bf16 %v4460_v9, %v4459_v52  ;;  %v11416_v52 = vld [vmem:[%s17356_s15 + $0xc] ss:$40 sps:$4 sm:$0xff]   ;;  %5352 = vmatpush1.bf16.msra.mxu0 %v11408_v2 }
 0x612   : > { %5544 = vmatprep.subr.bf16.mxu1 %v11416_v52 }
 0x613   : > { %10958 = vmatprep.mubr.bf16.mxu1 %v4483_v19  ;;  %v11414_v19 = vld [vmem:[%s17356_s15 + $0x8] ss:$40 sps:$4 sm:$0xff]  }
 0x614   : > { %10959 = vmatmul.mubr.bf16.gmra.mxu1 %v4484_v31 }
 0x615   : > { %5545 = vmatpush1.bf16.msra.mxu1 %v11414_v19 }
 0x616   : > { %v10916_v50 = vpop.f32.mrf.mxu0 }
 0x617   : > { %v4405_v53 = vadd.f32 %v10916_v50, %v14254_v57 }
 0x618   : > { %v4396_v21 = vpop.f32.mrf.mxu0 }
 0x619   : > { %v4397_v35 = vadd.f32 %v14254_v57, %v4396_v21  ;;  %v4465_v50 = vmax.f32 %v4405_v53, 0.0 }
 0x61a   : > { %v10917_v23 = vpop.f32.mrf.mxu0 }
 0x61b   : > { %v4408_v38 = vadd.f32 %v10917_v23, %v14254_v57  ;;  %v4463_v31 = vmax.f32 %v4397_v35, 0.0  ;;  %v11419_v23 = vld [vmem:[%s17356_s15 + $0x244] ss:$40 sps:$4 sm:$0xff]  }
 0x61c   : > { %v4399_v4 = vpop.f32.mrf.mxu0  ;;  %5723 = vmatprep.subr.bf16.mxu0 %v11419_v23 }
 0x61d   : > { %v4400_v46 = vadd.f32 %v14254_v57, %v4399_v4  ;;  %v4466_v9 = vmax.f32 %v4408_v38, 0.0 }
 0x61f   : > { %v4464_v56 = vmax.f32 %v4400_v46, 0.0  ;;  %v4486_v21 = vpack.c.bf16 %v4466_v9, %v4465_v50 }
 0x621   : > { %v4485_v60 = vpack.c.bf16 %v4464_v56, %v4463_v31 }
 0x623   : > { %10962 = vmatprep.mubr.bf16.mxu1 %v4485_v60 }
 0x624   : > { %10963 = vmatmul.mubr.bf16.gmra.mxu1 %v4486_v21 }
 0x626   : > { %v10920_v33 = vpop.f32.mrf.mxu0 }
 0x627   : > { %v4421_v46 = vadd.f32 %v10920_v33, %v14254_v57 }
 0x628   : > { %v4412_v35 = vpop.f32.mrf.mxu0 }
 0x629   : > { %v4413_v4 = vadd.f32 %v14254_v57, %v4412_v35  ;;  %v4469_v31 = vmax.f32 %v4421_v46, 0.0 }
 0x62a   : > { %v10921_v38 = vpop.f32.mrf.mxu0 }
 0x62b   : > { %v4424_v53 = vadd.f32 %v10921_v38, %v14254_v57  ;;  %v4467_v2 = vmax.f32 %v4413_v4, 0.0 }
 0x62c   : > { %v4415_v55 = vpop.f32.mrf.mxu0 }
 0x62d   : > { %v4416_v52 = vadd.f32 %v14254_v57, %v4415_v55  ;;  %v4470_v9 = vmax.f32 %v4424_v53, 0.0 }
 0x62f   : > { %v4468_v19 = vmax.f32 %v4416_v52, 0.0  ;;  %v4488_v50 = vpack.c.bf16 %v4470_v9, %v4469_v31 }
 0x631   : > { %v4487_v56 = vpack.c.bf16 %v4468_v19, %v4467_v2  ;;  %v11440_v19 = vld [vmem:[%s17356_s15 + $0x24c] ss:$40 sps:$4 sm:$0xff]  }
 0x632   : > { %5916 = vmatprep.subr.bf16.mxu1 %v11440_v19 }
 0x633   : > { %10966 = vmatprep.mubr.bf16.mxu1 %v4487_v56 }
 0x634   : > { %10967 = vmatmul.mubr.bf16.gmra.mxu1 %v4488_v50 }
 0x636   : > { %v10924_v60 = vpop.f32.mrf.mxu0 }
 0x637   : > { %v4437_v33 = vadd.f32 %v10924_v60, %v14254_v57 }
 0x638   : > { %v4428_v21 = vpop.f32.mrf.mxu0 }
 0x639   : > { %v4429_v35 = vadd.f32 %v14254_v57, %v4428_v21  ;;  %v4473_v46 = vmax.f32 %v4437_v33, 0.0 }
 0x63a   : > { %v10925_v23 = vpop.f32.mrf.mxu0 }
 0x63b   : > { %v4440_v38 = vadd.f32 %v10925_v23, %v14254_v57  ;;  %v4471_v4 = vmax.f32 %v4429_v35, 0.0 }
 0x63c   : > { %v4431_v29 = vpop.f32.mrf.mxu0 }
 0x63d   : > { %v4432_v55 = vadd.f32 %v14254_v57, %v4431_v29  ;;  %v4474_v53 = vmax.f32 %v4440_v38, 0.0  ;;  %v14377_v29 = vld [vmem:[%s17355_s14] ss:$0 sm:$0xff] }
 0x63f   : > { %v4472_v52 = vmax.f32 %v4432_v55, 0.0  ;;  %v4490_v9 = vpack.c.bf16 %v4474_v53, %v4473_v46  ;;  %v11420_v46 = vld [vmem:[%s17356_s15 + $0x1f0] ss:$40 sps:$4 sm:$0xff]  }
 0x641   : > { %v4489_v2 = vpack.c.bf16 %v4472_v52, %v4471_v4  ;;  %v11417_v4 = vld [vmem:[%s17356_s15 + $0x240] ss:$40 sps:$4 sm:$0xff]  }
 0x643   : > { %10970 = vmatprep.mubr.bf16.mxu1 %v4489_v2 }
 0x644   : > { %10971 = vmatmul.mubr.bf16.gmra.mxu1 %v4490_v9  ;;  %v11441_v9 = vld [vmem:[%s17356_s15 + $0x1f8] ss:$40 sps:$4 sm:$0xff]  }
 0x645   : > { %5562 = vmatprep.mubr.bf16.mxu1 %v17402_v40 }
 0x694   : > { %v10944_v31 = vpop.f32.mrf.mxu1 }
 0x695   : > { %v4605_v33 = vadd.f32 %v10944_v31, %v14377_v29 }
 0x696   : > { %v4596_v57 = vpop.f32.mrf.mxu1 }
 0x697   : > { %v4597_v56 = vadd.f32 %v14377_v29, %v4596_v57 }
 0x698   : > { %v10945_v50 = vpop.f32.mrf.mxu1 }
 0x699   : > { %v4723_v21 = vadd.f32 %v4597_v56, %v4163_v32  ;;  %v4608_v35 = vadd.f32 %v10945_v50, %v14377_v29  ;;  %v11422_v32 = vld [vmem:[%s17356_s15 + $0x1f4] ss:$40 sps:$4 sm:$0xff]   ;;  %v11423_v50 = vld [vmem:[%s17356_s15 + $0x1a0] ss:$40 sps:$4 sm:$0xff]  }
 0x69a   : > { %v4599_v60 = vpop.f32.mrf.mxu1 }
 0x69b   : > { %v4600_v23 = vadd.f32 %v14377_v29, %v4599_v60  ;;  %v4755_v55 = vmax.f32 %v4723_v21, 0.0  ;;  %v4726_v52 = vadd.f32 %v4608_v35, %v4166_v18  ;;  %v11446_v60 = vld [vmem:[%s17356_s15 + $0x1ac] ss:$40 sps:$4 sm:$0xff]   ;;  %v11444_v35 = vld [vmem:[%s17356_s15 + $0x1a8] ss:$40 sps:$4 sm:$0xff]  }
 0x69d   : > { %v4724_v38 = vadd.f32 %v4600_v23, %v4164_v62  ;;  %v4725_v62 = vadd.f32 %v4605_v33, %v4165_v48  ;;  %v4758_v2 = vmax.f32 %v4726_v52, 0.0  ;;  %v11428_v23 = vld [vmem:[%s17356_s15 + $0x154] ss:$40 sps:$4 sm:$0xff]   ;;  %v11447_v52 = vld [vmem:[%s17356_s15 + $0x158] ss:$40 sps:$4 sm:$0xff]  }
 0x69f   : > { %v4756_v53 = vmax.f32 %v4724_v38, 0.0  ;;  %v4757_v19 = vmax.f32 %v4725_v62, 0.0 }
 0x6a1   : > { %v14392_v37 = vpack.c.bf16 %v4756_v53, %v4755_v55  ;;  %v14419_v56 = vpack.c.bf16 %v4758_v2, %v4757_v19  ;;  %v11449_v55 = vld [vmem:[%s17356_s15 + $0x15c] ss:$40 sps:$4 sm:$0xff]   ;;  %v11456_v19 = vld [vmem:[%s17356_s15 + $0xb8] ss:$40 sps:$4 sm:$0xff]  }
 0x6a2   : > { %v11458_v2 = vld [vmem:[%s17356_s15 + $0xbc] ss:$40 sps:$4 sm:$0xff]  }
 0x6a3   : > { %5370 = vmatmul.mubr.bf16.vlgmr.msra.gmra.mxu0 %v14392_v37  ;;  %5563 = vmatmul.mubr.bf16.vlgmr.msra.gmra.mxu1 %v14392_v37 }
 0x6a4   : > { %v10948_v18 = vpop.f32.mrf.mxu1  ;;  %5724 = vmatpush1.bf16.msra.mxu0 %v11417_v4  ;;  %5379 = vmatprep.mubr.bf16.mxu0 %v17402_v40  ;;  %v11431_v4 = vld [vmem:[%s17356_s15 + $0x104] ss:$40 sps:$4 sm:$0xff]  }
 0x6a5   : > { %5572 = vmatprep.mubr.bf16.mxu1 %v17402_v40  ;;  %5725 = vmatprep.subr.bf16.mxu0 %v11422_v32  ;;  %v4621_v32 = vadd.f32 %v10948_v18, %v14377_v29  ;;  %v11434_v18 = vld [vmem:[%s17356_s15 + $0xb4] ss:$40 sps:$4 sm:$0xff]  }
 0x6a6   : > { %v4612_v48 = vpop.f32.mrf.mxu1  ;;  %5917 = vmatpush1.bf16.msra.mxu1 %v11438_v26 }
 0x6a7   : > { %v4613_v31 = vadd.f32 %v14377_v29, %v4612_v48  ;;  %5918 = vmatprep.subr.bf16.mxu1 %v11443_v3  ;;  %v11429_v3 = vld [vmem:[%s17356_s15 + $0x100] ss:$40 sps:$4 sm:$0xff]  }
 0x6a8   : > { %v10949_v57 = vpop.f32.mrf.mxu1  ;;  %5726 = vmatpush1.bf16.msra.mxu0 %v11420_v46  ;;  %v11455_v46 = vld [vmem:[%s17356_s15 + $0x10c] ss:$40 sps:$4 sm:$0xff]  }
 0x6a9   : > { %5727 = vmatprep.subr.bf16.mxu0 %v11425_v34  ;;  %v4727_v38 = vadd.f32 %v4613_v31, %v4167_v42  ;;  %v4624_v53 = vadd.f32 %v10949_v57, %v14377_v29  ;;  %v11426_v42 = vld [vmem:[%s17356_s15 + $0x150] ss:$40 sps:$4 sm:$0xff]  }
 0x6aa   : > { %v4615_v21 = vpop.f32.mrf.mxu1  ;;  %5919 = vmatpush1.bf16.msra.mxu1 %v11441_v9  ;;  %v11437_v9 = vld [vmem:[%s17356_s15 + $0x64] ss:$40 sps:$4 sm:$0xff]  }
 0x6ab   : > { %v4616_v33 = vadd.f32 %v14377_v29, %v4615_v21  ;;  %5380 = vmatmul.mubr.bf16.gmra.mxu0 %v14419_v56  ;;  %5573 = vmatmul.mubr.bf16.gmra.mxu1 %v14419_v56  ;;  %v4759_v45 = vmax.f32 %v4727_v38, 0.0  ;;  %v4730_v26 = vadd.f32 %v4624_v53, %v4170_v7  ;;  %v4729_v7 = vadd.f32 %v4621_v32, %v4169_v27  ;;  %v11435_v21 = vld [vmem:[%s17356_s15 + $0x60] ss:$40 sps:$4 sm:$0xff]   ;;  %v11452_v38 = vld [vmem:[%s17356_s15 + $0x14] ss:$40 sps:$4 sm:$0xff]  }
 0x6ac   : > { %5389 = vmatprep.mubr.bf16.mxu0 %v17402_v40  ;;  %5582 = vmatprep.mubr.bf16.mxu1 %v17402_v40 }
 0x6ad   : > { %v4728_v14 = vadd.f32 %v4616_v33, %v4168_v15  ;;  %5728 = vmatpush1.bf16.msra.mxu0 %v11423_v50  ;;  %5920 = vmatprep.subr.bf16.mxu1 %v11446_v60  ;;  %v4762_v48 = vmax.f32 %v4730_v26, 0.0  ;;  %v4761_v31 = vmax.f32 %v4729_v7, 0.0  ;;  %v11459_v33 = vld [vmem:[%s17356_s15 + $0x68] ss:$40 sps:$4 sm:$0xff]  }
 0x6ae   : > { %5729 = vmatprep.subr.bf16.mxu0 %v11428_v23  ;;  %5921 = vmatpush1.bf16.msra.mxu1 %v11444_v35  ;;  %v11461_v23 = vld [vmem:[%s17356_s15 + $0x6c] ss:$40 sps:$4 sm:$0xff]  }
 0x6af   : > { %v4760_v15 = vmax.f32 %v4728_v14, 0.0  ;;  %5922 = vmatprep.subr.bf16.mxu1 %v11449_v55  ;;  %v14491_v60 = vpack.c.bf16 %v4762_v48, %v4761_v31  ;;  %v11464_v14 = vld [vmem:[%s17356_s15 + $0x1c] ss:$40 sps:$4 sm:$0xff]   ;;  %v17449_v31 = vmax.f32 %v14114_v6, 0.0 }
 0x6b1   : > { %v14458_v62 = vpack.c.bf16 %v4760_v15, %v4759_v45  ;;  %5730 = vmatpush1.bf16.msra.mxu0 %v11426_v42  ;;  %17444 = vst [vmem:[#allocation2_spill] sm:$0xff] %v14491_v60 }
 0x6b2   : > { %5731 = vmatprep.subr.bf16.mxu0 %v11431_v4  ;;  %5923 = vmatpush1.bf16.msra.mxu1 %v11447_v52  ;;  %v11462_v4 = vld [vmem:[%s17356_s15 + $0x18] ss:$40 sps:$4 sm:$0xff]   ;;  %v11467_v52 = vld [vmem:[%s17356_s15 + $0x254] ss:$40 sps:$4 sm:$0xff]  }
 0x6b3   : > { %5390 = vmatmul.mubr.bf16.gmra.mxu0 %v14458_v62  ;;  %5583 = vmatmul.mubr.bf16.gmra.mxu1 %v14458_v62 }
 0x6b4   : > { %v10952_v34 = vpop.f32.mrf.mxu1  ;;  %5399 = vmatprep.mubr.bf16.mxu0 %v17402_v40  ;;  %5592 = vmatprep.mubr.bf16.mxu1 %v17402_v40 }
 0x6b5   : > { %5732 = vmatpush1.bf16.msra.mxu0 %v11429_v3  ;;  %5924 = vmatprep.subr.bf16.mxu1 %v11455_v46  ;;  %v4637_v32 = vadd.f32 %v10952_v34, %v14377_v29 }
 0x6b6   : > { %v4628_v27 = vpop.f32.mrf.mxu1  ;;  %5733 = vmatprep.subr.bf16.mxu0 %v11434_v18  ;;  %5925 = vmatpush1.bf16.msra.mxu1 %v11453_v25 }
 0x6b7   : > { %v4629_v57 = vadd.f32 %v14377_v29, %v4628_v27  ;;  %5926 = vmatprep.subr.bf16.mxu1 %v11458_v2  ;;  %v4733_v26 = vadd.f32 %v4637_v32, %v4173_v5 }
 0x6b8   : > { %v10953_v50 = vpop.f32.mrf.mxu1 }
 0x6b9   : > { %5734 = vmatpush1.bf16.msra.mxu0 %v11432_v28  ;;  %v4731_v55 = vadd.f32 %v4629_v57, %v4171_v63  ;;  %v4640_v42 = vadd.f32 %v10953_v50, %v14377_v29  ;;  %v11450_v63 = vld [vmem:[%s17356_s15 + $0x10] ss:$40 sps:$4 sm:$0xff]   ;;  %v17448_v28 = vmax.f32 %v14120_v13, 0.0 }
 0x6ba   : > { %v4631_v35 = vpop.f32.mrf.mxu1  ;;  %5735 = vmatprep.subr.bf16.mxu0 %v11437_v9  ;;  %5927 = vmatpush1.bf16.msra.mxu1 %v11456_v19 }
 0x6bb   : > { %v4632_v53 = vadd.f32 %v14377_v29, %v4631_v35  ;;  %5400 = vmatmul.mubr.bf16.gmra.mxu0 %v14491_v60  ;;  %5593 = vmatmul.mubr.bf16.gmra.mxu1 %v14491_v60  ;;  %v4763_v20 = vmax.f32 %v4731_v55, 0.0  ;;  %v4734_v45 = vadd.f32 %v4640_v42, %v4174_v22  ;;  %v4765_v22 = vmax.f32 %v4733_v26, 0.0 }
 0x6bc   : > { %5409 = vmatprep.mubr.bf16.mxu0 %v17402_v40  ;;  %5602 = vmatprep.mubr.bf16.mxu1 %v17402_v40 }
 0x6bd   : > { %v4732_v10 = vadd.f32 %v4632_v53, %v4172_v58  ;;  %5736 = vmatpush1.bf16.msra.mxu0 %v11435_v21  ;;  %5928 = vmatprep.subr.bf16.mxu1 %v11461_v23  ;;  %v4766_v46 = vmax.f32 %v4734_v45, 0.0  ;;  %v17451_v21 = vmax.f32 %v14117_v59, 0.0  ;;  %v17453_v59 = vmax.f32 %v14135_v12, 0.0 }
 0x6be   : > { %5737 = vmatprep.subr.bf16.mxu0 %v11452_v38  ;;  %5929 = vmatpush1.bf16.msra.mxu1 %v11459_v33 }
 0x6bf   : > { %v4764_v58 = vmax.f32 %v4732_v10, 0.0  ;;  %5930 = vmatprep.subr.bf16.mxu1 %v11464_v14  ;;  %v14539_v7 = vpack.c.bf16 %v4766_v46, %v4765_v22 }
 0x6c1   : > { %v14530_v15 = vpack.c.bf16 %v4764_v58, %v4763_v20  ;;  %5738 = vmatpush1.bf16.msra.mxu0 %v11450_v63  ;;  %17446 = vst [vmem:[#allocation4_spill] sm:$0xff] %v14539_v7  ;;  %v17455_v58 = vmax.f32 %v14138_v61, 0.0 }
 0x6c2   : > { %5931 = vmatpush1.bf16.msra.mxu1 %v11462_v4  ;;  %6109 = vmatprep.subr.bf16.mxu0 %v11467_v52  ;;  %v17454_v4 = vmax.f32 %v14144_v30, 0.0 }
 0x6c3   : > { %17445 = vst [vmem:[#allocation3_spill] sm:$0xff] %v14530_v15  ;;  %5410 = vmatmul.mubr.bf16.gmra.mxu0 %v14530_v15  ;;  %5603 = vmatmul.mubr.bf16.gmra.mxu1 %v14530_v15 }
 0x6c4   : > { %v10956_v3 = vpop.f32.mrf.mxu1  ;;  %5419 = vmatprep.mubr.bf16.mxu0 %v17402_v40  ;;  %5612 = vmatprep.mubr.bf16.mxu1 %v17402_v40 }
 0x6c5   : > { %v4653_v9 = vadd.f32 %v10956_v3, %v14377_v29  ;;  %v17457_v3 = vmax.f32 %v14141_v8, 0.0  ;;  %v17459_v8 = vmax.f32 %v14159_v24, 0.0 }
 0x6c6   : > { %v4644_v11 = vpop.f32.mrf.mxu1 }
 0x6c7   : > { %v4645_v18 = vadd.f32 %v14377_v29, %v4644_v11  ;;  %v4737_v23 = vadd.f32 %v4653_v9, %v17451_v21  ;;  %v17463_v21 = vmax.f32 %v14165_v0, 0.0  ;;  %v17465_v0 = vmax.f32 %v14186_v51, 0.0 }
 0x6c8   : > { %v10957_v25 = vpop.f32.mrf.mxu1 }
 0x6c9   : > { %v4735_v5 = vadd.f32 %v4645_v18, %v17447_v36  ;;  %v4656_v48 = vadd.f32 %v10957_v25, %v14377_v29  ;;  %v4769_v33 = vmax.f32 %v4737_v23, 0.0 }
 0x6ca   : > { %v4647_v2 = vpop.f32.mrf.mxu1 }
 0x6cb   : > { %v4648_v34 = vadd.f32 %v14377_v29, %v4647_v2  ;;  %5420 = vmatmul.mubr.bf16.gmra.mxu0 %v14539_v7  ;;  %5613 = vmatmul.mubr.bf16.gmra.mxu1 %v14539_v7  ;;  %v4767_v19 = vmax.f32 %v4735_v5, 0.0  ;;  %v4738_v57 = vadd.f32 %v4656_v48, %v17449_v31 }
 0x6cc   : > { %5429 = vmatprep.mubr.bf16.mxu0 %v17402_v40  ;;  %5622 = vmatprep.mubr.bf16.mxu1 %v17402_v40 }
 0x6cd   : > { %v4736_v27 = vadd.f32 %v4648_v34, %v17448_v28  ;;  %v4770_v13 = vmax.f32 %v4738_v57, 0.0  ;;  %v17460_v28 = vmax.f32 %v14171_v47, 0.0 }
 0x6cf   : > { %v4768_v1 = vmax.f32 %v4736_v27, 0.0  ;;  %v14563_v53 = vpack.c.bf16 %v4770_v13, %v4769_v33 }
 0x6d1   : > { %v14554_v50 = vpack.c.bf16 %v4768_v1, %v4767_v19  ;;  %17452 = vst [vmem:[#allocation6_spill] sm:$0xff] %v14563_v53  ;;  %v17461_v1 = vmax.f32 %v14162_v39, 0.0 }
 0x6d3   : > { %17450 = vst [vmem:[#allocation5_spill] sm:$0xff] %v14554_v50  ;;  %5430 = vmatmul.mubr.bf16.gmra.mxu0 %v14554_v50  ;;  %5623 = vmatmul.mubr.bf16.gmra.mxu1 %v14554_v50 }
 0x6d4   : > { %v10960_v35 = vpop.f32.mrf.mxu1  ;;  %5439 = vmatprep.mubr.bf16.mxu0 %v17402_v40  ;;  %5632 = vmatprep.mubr.bf16.mxu1 %v17402_v40 }
 0x6d5   : > { %v4669_v32 = vadd.f32 %v10960_v35, %v14377_v29 }
 0x6d6   : > { %v4660_v38 = vpop.f32.mrf.mxu1 }
 0x6d7   : > { %v4661_v6 = vadd.f32 %v14377_v29, %v4660_v38  ;;  %v4741_v46 = vadd.f32 %v4669_v32, %v17457_v3  ;;  %v17467_v32 = vmax.f32 %v14189_v49, 0.0 }
 0x6d8   : > { %v10961_v55 = vpop.f32.mrf.mxu1 }
 0x6d9   : > { %v4739_v42 = vadd.f32 %v4661_v6, %v17453_v59  ;;  %v4672_v63 = vadd.f32 %v10961_v55, %v14377_v29  ;;  %v4773_v18 = vmax.f32 %v4741_v46, 0.0 }
 0x6da   : > { %v4663_v14 = vpop.f32.mrf.mxu1 }
 0x6db   : > { %v4664_v10 = vadd.f32 %v14377_v29, %v4663_v14  ;;  %5440 = vmatmul.mubr.bf16.gmra.mxu0 %v14563_v53  ;;  %5633 = vmatmul.mubr.bf16.gmra.mxu1 %v14563_v53  ;;  %v4771_v20 = vmax.f32 %v4739_v42, 0.0  ;;  %v4742_v45 = vadd.f32 %v4672_v63, %v17455_v58  ;;  %v17469_v58 = vmax.f32 %v14192_v54, 0.0 }
 0x6dc   : > { %5449 = vmatprep.mubr.bf16.mxu0 %v17402_v40  ;;  %5642 = vmatprep.mubr.bf16.mxu1 %v17402_v40  ;;  %v17471_v54 = vmax.f32 %v14210_v17, 0.0 }
 0x6dd   : > { %v4740_v52 = vadd.f32 %v4664_v10, %v17454_v4  ;;  %v4774_v30 = vmax.f32 %v4742_v45, 0.0  ;;  %v17466_v10 = vmax.f32 %v14195_v43, 0.0 }
 0x6df   : > { %v4772_v12 = vmax.f32 %v4740_v52, 0.0  ;;  %v14587_v2 = vpack.c.bf16 %v4774_v30, %v4773_v18 }
 0x6e1   : > { %v14578_v26 = vpack.c.bf16 %v4772_v12, %v4771_v20  ;;  %17458 = vst [vmem:[#allocation8_spill] sm:$0xff] %v14587_v2 }
 0x6e3   : > { %17456 = vst [vmem:[#allocation7_spill] sm:$0xff] %v14578_v26  ;;  %5450 = vmatmul.mubr.bf16.gmra.mxu0 %v14578_v26  ;;  %5643 = vmatmul.mubr.bf16.gmra.mxu1 %v14578_v26 }
 0x6e4   : > { %v10964_v11 = vpop.f32.mrf.mxu1  ;;  %5459 = vmatprep.mubr.bf16.mxu0 %v17402_v40  ;;  %5652 = vmatprep.mubr.bf16.mxu1 %v17402_v40 }
 0x6e5   : > { %v4685_v9 = vadd.f32 %v10964_v11, %v14377_v29 }
 0x6e6   : > { %v4676_v22 = vpop.f32.mrf.mxu1 }
 0x6e7   : > { %v4677_v61 = vadd.f32 %v14377_v29, %v4676_v22  ;;  %v4745_v23 = vadd.f32 %v4685_v9, %v17463_v21  ;;  %v11473_v21 = vld [vmem:[%s17356_s15 + $0x1b4] ss:$40 sps:$4 sm:$0xff]  }
 0x6e8   : > { %v10965_v25 = vpop.f32.mrf.mxu1 }
 0x6e9   : > { %v4743_v5 = vadd.f32 %v4677_v61, %v17459_v8  ;;  %v4688_v48 = vadd.f32 %v10965_v25, %v14377_v29  ;;  %v4777_v38 = vmax.f32 %v4745_v23, 0.0  ;;  %v17472_v8 = vmax.f32 %v14219_v44, 0.0  ;;  %v11471_v23 = vld [vmem:[%s17356_s15 + $0x1b0] ss:$40 sps:$4 sm:$0xff]  }
 0x6ea   : > { %v4679_v36 = vpop.f32.mrf.mxu1 }
 0x6eb   : > { %v4680_v34 = vadd.f32 %v14377_v29, %v4679_v36  ;;  %5460 = vmatmul.mubr.bf16.gmra.mxu0 %v14587_v2  ;;  %5653 = vmatmul.mubr.bf16.gmra.mxu1 %v14587_v2  ;;  %v4775_v19 = vmax.f32 %v4743_v5, 0.0  ;;  %v4746_v31 = vadd.f32 %v4688_v48, %v17461_v1 }
 0x6ec   : > { %5469 = vmatprep.mubr.bf16.mxu0 %v17402_v40  ;;  %5662 = vmatprep.mubr.bf16.mxu1 %v17402_v40 }
 0x6ed   : > { %v4744_v27 = vadd.f32 %v4680_v34, %v17460_v28  ;;  %v4778_v47 = vmax.f32 %v4746_v31, 0.0  ;;  %v17473_v28 = vmax.f32 %v14213_v41, 0.0  ;;  %v11470_v41 = vld [vmem:[%s17356_s15 + $0x204] ss:$40 sps:$4 sm:$0xff]   ;;  %v11468_v31 = vld [vmem:[%s17356_s15 + $0x200] ss:$40 sps:$4 sm:$0xff]  }
 0x6ef   : > { %v4776_v24 = vmax.f32 %v4744_v27, 0.0  ;;  %v14611_v6 = vpack.c.bf16 %v4778_v47, %v4777_v38  ;;  %v11474_v47 = vld [vmem:[%s17356_s15 + $0x160] ss:$40 sps:$4 sm:$0xff]   ;;  %v11477_v38 = vld [vmem:[%s17356_s15 + $0x110] ss:$40 sps:$4 sm:$0xff]  }
 0x6f1   : > { %v14602_v57 = vpack.c.bf16 %v4776_v24, %v4775_v19  ;;  %17464 = vst [vmem:[#allocation10_spill] sm:$0xff] %v14611_v6  ;;  %v17475_v19 = vmax.f32 %v14216_v16, 0.0  ;;  %v11465_v16 = vld [vmem:[%s17356_s15 + $0x250] ss:$40 sps:$4 sm:$0xff]  }
 0x6f3   : > { %17462 = vst [vmem:[#allocation9_spill] sm:$0xff] %v14602_v57  ;;  %5470 = vmatmul.mubr.bf16.gmra.mxu0 %v14602_v57  ;;  %5663 = vmatmul.mubr.bf16.gmra.mxu1 %v14602_v57 }
 0x6f4   : > { %v10968_v35 = vpop.f32.mrf.mxu1  ;;  %5479 = vmatprep.mubr.bf16.mxu0 %v17402_v40  ;;  %5672 = vmatprep.mubr.bf16.mxu1 %v17402_v40 }
 0x6f5   : > { %v4701_v4 = vadd.f32 %v10968_v35, %v14377_v29  ;;  %v11476_v35 = vld [vmem:[%s17356_s15 + $0x164] ss:$40 sps:$4 sm:$0xff]  }
 0x6f6   : > { %v4692_v13 = vpop.f32.mrf.mxu1 }
 0x6f7   : > { %v4693_v39 = vadd.f32 %v14377_v29, %v4692_v13  ;;  %v4749_v45 = vadd.f32 %v4701_v4, %v17469_v58  ;;  %v11479_v13 = vld [vmem:[%s17356_s15 + $0x114] ss:$40 sps:$4 sm:$0xff]   ;;  %v4883_v4 = vld [vmem:[%s17357_s16] sm:$0xff] }
 0x6f8   : > { %v10969_v33 = vpop.f32.mrf.mxu1 }
 0x6f9   : > { %v4747_v14 = vadd.f32 %v4693_v39, %v17465_v0  ;;  %v4704_v42 = vadd.f32 %v10969_v33, %v14377_v29  ;;  %v4781_v11 = vmax.f32 %v4749_v45, 0.0  ;;  %v11482_v39 = vld [vmem:[%s17356_s15 + $0xc4] ss:$40 sps:$4 sm:$0xff]   ;;  %v11480_v33 = vld [vmem:[%s17356_s15 + $0xc0] ss:$40 sps:$4 sm:$0xff]  }
 0x6fa   : > { %v4695_v55 = vpop.f32.mrf.mxu1  ;;  %v11483_v0 = vld [vmem:[%s17356_s15 + $0x70] ss:$40 sps:$4 sm:$0xff]  }
 0x6fb   : > { %v4696_v59 = vadd.f32 %v14377_v29, %v4695_v55  ;;  %5480 = vmatmul.mubr.bf16.gmra.mxu0 %v14611_v6  ;;  %5673 = vmatmul.mubr.bf16.gmra.mxu1 %v14611_v6  ;;  %v4779_v52 = vmax.f32 %v4747_v14, 0.0  ;;  %v4750_v20 = vadd.f32 %v4704_v42, %v17467_v32  ;;  %v11485_v55 = vld [vmem:[%s17356_s15 + $0x74] ss:$40 sps:$4 sm:$0xff]   ;;  %v4887_v14 = vlaneseq }
 0x6fc   : > { %5489 = vmatprep.mubr.bf16.mxu0 %v17402_v40  ;;  %5682 = vmatprep.mubr.bf16.mxu1 %v17402_v40 }
 0x6fd   : > { %v4748_v63 = vadd.f32 %v4696_v59, %v17466_v10  ;;  %v4782_v43 = vmax.f32 %v4750_v20, 0.0  ;;  %v14731_v59 = vshrl.u32 %v4887_v14, 7 }
 0x6ff   : > { %v4780_v51 = vmax.f32 %v4748_v63, 0.0  ;;  %v14635_v22 = vpack.c.bf16 %v4782_v43, %v4781_v11  ;;  %17477 = vst [vmem:[#allocation15_spill] sm:$0xff] %v14731_v59  ;;  %v17401_v42 = vsub.s32 0, %v14731_v59  ;;  %v4897_v10 = vsub.s32 2, %v14731_v59  ;;  %v11488_v63 = vld [vmem:[%s17356_s15 + $0x24] ss:$40 sps:$4 sm:$0xff]  }
 0x700   : > { %v4901_v32 = vsub.s32 3, %v14731_v59 }
 0x701   : > { %v14626_v12 = vpack.c.bf16 %v4780_v51, %v4779_v52  ;;  %17470 = vst [vmem:[#allocation12_spill] sm:$0xff] %v14635_v22  ;;  %v11486_v52 = vld [vmem:[%s17356_s15 + $0x20] ss:$40 sps:$4 sm:$0xff]   ;;  %v17400_v51 = vsub.s32 1, %v14731_v59  ;;  %v14752_v20 = vrot.slane %v4883_v4, %v17401_v42  ;;  %v14754_v58 = vrot.slane %v4883_v4, %v4897_v10 }
 0x703   : > { %17468 = vst [vmem:[#allocation11_spill] sm:$0xff] %v14626_v12  ;;  %5490 = vmatmul.mubr.bf16.gmra.mxu0 %v14626_v12  ;;  %5683 = vmatmul.mubr.bf16.gmra.mxu1 %v14626_v12  ;;  %v14760_v43 = vrot.slane %v4883_v4, %v17400_v51 }
 0x704   : > { %v10972_v3 = vpop.f32.mrf.mxu1  ;;  %5499 = vmatprep.mubr.bf16.mxu0 %v17402_v40  ;;  %5692 = vmatprep.mubr.bf16.mxu1 %v17402_v40 }
 0x705   : > { %v4717_v34 = vadd.f32 %v10972_v3, %v14377_v29 }
 0x706   : > { %v4708_v46 = vpop.f32.mrf.mxu1 }
 0x707   : > { %v4709_v49 = vadd.f32 %v14377_v29, %v4708_v46  ;;  %v4753_v24 = vadd.f32 %v4717_v34, %v17475_v19  ;;  %v14762_v46 = vrot.slane %v4883_v4, %v4901_v32 }
 0x708   : > { %v10973_v30 = vpop.f32.mrf.mxu1 }
 0x709   : > { %v4751_v61 = vadd.f32 %v4709_v49, %v17471_v54  ;;  %v4720_v36 = vadd.f32 %v10973_v30, %v14377_v29 }
 0x70a   : > { %v4711_v18 = vpop.f32.mrf.mxu1 }
 0x70b   : > { %v4712_v25 = vadd.f32 %v14377_v29, %v4711_v18  ;;  %5500 = vmatmul.mubr.bf16.gmra.mxu0 %v14635_v22  ;;  %5693 = vmatmul.mubr.bf16.gmra.mxu1 %v14635_v22  ;;  %v4783_v48 = vmax.f32 %v4751_v61, 0.0  ;;  %v4754_v27 = vadd.f32 %v4720_v36, %v17473_v28  ;;  %v4785_v29 = vmax.f32 %v4753_v24, 0.0 }
 0x70c   : > { %5509 = vmatprep.mubr.bf16.mxu0 %v17402_v40  ;;  %5702 = vmatprep.mubr.bf16.mxu1 %v17402_v40 }
 0x70d   : > { %v4752_v5 = vadd.f32 %v4712_v25, %v17472_v8  ;;  %v4786_v44 = vmax.f32 %v4754_v27, 0.0 }
 0x70f   : > { %v4784_v17 = vmax.f32 %v4752_v5, 0.0  ;;  %v14658_v1 = vpack.c.bf16 %v4786_v44, %v4785_v29 }
 0x711   : > { %v14650_v9 = vpack.c.bf16 %v4784_v17, %v4783_v48  ;;  %17476 = vst [vmem:[#allocation14_spill] sm:$0xff] %v14658_v1 }
 0x713   : > { %17474 = vst [vmem:[#allocation13_spill] sm:$0xff] %v14650_v9  ;;  %5510 = vmatmul.mubr.bf16.gmra.mxu0 %v14650_v9  ;;  %5703 = vmatmul.mubr.bf16.gmra.mxu1 %v14650_v9 }
 0x714   : > { %5519 = vmatprep.mubr.bf16.mxu0 %v17402_v40  ;;  %5712 = vmatprep.mubr.bf16.mxu1 %v17402_v40 }
 0x71b   : > { %5520 = vmatmul.mubr.bf16.gmra.mxu0 %v14658_v1  ;;  %5713 = vmatmul.mubr.bf16.gmra.mxu1 %v14658_v1 }
 0x71c   : > { %5755 = vmatprep.mubr.bf16.mxu0 %v17402_v40  ;;  %5948 = vmatprep.mubr.bf16.mxu1 %v17402_v40 }
 0x723   : > { %5756 = vmatmul.mubr.bf16.vlgmr.msra.gmra.mxu0 %v14392_v37  ;;  %5949 = vmatmul.mubr.bf16.vlgmr.msra.gmra.mxu1 %v14392_v37 }
 0x724   : > { %6110 = vmatpush1.bf16.msra.mxu0 %v11465_v16  ;;  %5765 = vmatprep.mubr.bf16.mxu0 %v17402_v40 }
 0x725   : > { %5958 = vmatprep.mubr.bf16.mxu1 %v17402_v40  ;;  %6111 = vmatprep.subr.bf16.mxu0 %v11470_v41 }
 0x728   : > { %6112 = vmatpush1.bf16.msra.mxu0 %v11468_v31 }
 0x729   : > { %6113 = vmatprep.subr.bf16.mxu0 %v11473_v21 }
 0x72b   : > { %5766 = vmatmul.mubr.bf16.gmra.mxu0 %v14419_v56  ;;  %5959 = vmatmul.mubr.bf16.gmra.mxu1 %v14419_v56 }
 0x72c   : > { %5775 = vmatprep.mubr.bf16.mxu0 %v17402_v40  ;;  %5968 = vmatprep.mubr.bf16.mxu1 %v17402_v40 }
 0x72d   : > { %6114 = vmatpush1.bf16.msra.mxu0 %v11471_v23 }
 0x72e   : > { %6115 = vmatprep.subr.bf16.mxu0 %v11476_v35 }
 0x731   : > { %6116 = vmatpush1.bf16.msra.mxu0 %v11474_v47 }
 0x732   : > { %6117 = vmatprep.subr.bf16.mxu0 %v11479_v13 }
 0x733   : > { %5776 = vmatmul.mubr.bf16.gmra.mxu0 %v14458_v62  ;;  %5969 = vmatmul.mubr.bf16.gmra.mxu1 %v14458_v62 }
 0x734   : > { %5785 = vmatprep.mubr.bf16.mxu0 %v17402_v40  ;;  %5978 = vmatprep.mubr.bf16.mxu1 %v17402_v40 }
 0x735   : > { %6118 = vmatpush1.bf16.msra.mxu0 %v11477_v38 }
 0x736   : > { %6119 = vmatprep.subr.bf16.mxu0 %v11482_v39 }
 0x739   : > { %6120 = vmatpush1.bf16.msra.mxu0 %v11480_v33 }
 0x73a   : > { %6121 = vmatprep.subr.bf16.mxu0 %v11485_v55 }
 0x73b   : > { %5786 = vmatmul.mubr.bf16.gmra.mxu0 %v14491_v60  ;;  %5979 = vmatmul.mubr.bf16.gmra.mxu1 %v14491_v60 }
 0x73c   : > { %5795 = vmatprep.mubr.bf16.mxu0 %v17402_v40  ;;  %5988 = vmatprep.mubr.bf16.mxu1 %v17402_v40 }
 0x73d   : > { %6122 = vmatpush1.bf16.msra.mxu0 %v11483_v0 }
 0x73e   : > { %6123 = vmatprep.subr.bf16.mxu0 %v11488_v63 }
 0x741   : > { %6124 = vmatpush1.bf16.msra.mxu0 %v11486_v52 }
 0x743   : > { %5796 = vmatmul.mubr.bf16.gmra.mxu0 %v14530_v15  ;;  %5989 = vmatmul.mubr.bf16.gmra.mxu1 %v14530_v15 }
 0x744   : > { %5805 = vmatprep.mubr.bf16.mxu0 %v17402_v40  ;;  %5998 = vmatprep.mubr.bf16.mxu1 %v17402_v40 }
 0x74b   : > { %5806 = vmatmul.mubr.bf16.gmra.mxu0 %v14539_v7  ;;  %5999 = vmatmul.mubr.bf16.gmra.mxu1 %v14539_v7 }
 0x74c   : > { %5815 = vmatprep.mubr.bf16.mxu0 %v17402_v40  ;;  %6008 = vmatprep.mubr.bf16.mxu1 %v17402_v40 }
 0x753   : > { %5816 = vmatmul.mubr.bf16.gmra.mxu0 %v14554_v50  ;;  %6009 = vmatmul.mubr.bf16.gmra.mxu1 %v14554_v50 }
 0x754   : > { %5825 = vmatprep.mubr.bf16.mxu0 %v17402_v40  ;;  %6018 = vmatprep.mubr.bf16.mxu1 %v17402_v40 }
 0x75b   : > { %5826 = vmatmul.mubr.bf16.gmra.mxu0 %v14563_v53  ;;  %6019 = vmatmul.mubr.bf16.gmra.mxu1 %v14563_v53 }
 0x75c   : > { %5835 = vmatprep.mubr.bf16.mxu0 %v17402_v40  ;;  %6028 = vmatprep.mubr.bf16.mxu1 %v17402_v40 }
 0x763   : > { %v5371_v45 = vpop.f32.mrf.mxu0  ;;  %v5564_v3 = vpop.f32.mrf.mxu1  ;;  %5836 = vmatmul.mubr.bf16.gmra.mxu0 %v14578_v26  ;;  %6029 = vmatmul.mubr.bf16.gmra.mxu1 %v14578_v26 }
 0x764   : > { %v14765_v11 = vadd.f32 %v5371_v45, %v14752_v20  ;;  %v14768_v49 = vadd.f32 %v5564_v3, %v14754_v58  ;;  %5845 = vmatprep.mubr.bf16.mxu0 %v17402_v40  ;;  %6038 = vmatprep.mubr.bf16.mxu1 %v17402_v40 }
 0x765   : > { %v5373_v30 = vpop.f32.mrf.mxu0  ;;  %v5566_v18 = vpop.f32.mrf.mxu1 }
 0x766   : > { %v6622_v54 = vand.u32 2147483647, %v14765_v11  ;;  %v6624_v61 = vand.u32 2147483647, %v14768_v49  ;;  %v14775_v25 = vadd.f32 %v5373_v30, %v14760_v43  ;;  %v14778_v36 = vadd.f32 %v5566_v18, %v14762_v46 }
 0x767   : > { %v5375_v8 = vpop.f32.mrf.mxu0  ;;  %v5568_v5 = vpop.f32.mrf.mxu1 }
 0x768   : > { %v6942_v34 = vsub.f32 0.0, %v6622_v54  ;;  %v6944_v48 = vsub.f32 0.0, %v6624_v61  ;;  %v14781_v17 = vadd.f32 %v5375_v8, %v14752_v20  ;;  %v14784_v28 = vadd.f32 %v5568_v5, %v14754_v58 }
 0x769   : > { %v6623_v27 = vand.u32 2147483647, %v14775_v25  ;;  %v6625_v19 = vand.u32 2147483647, %v14778_v36  ;;  %v5377_v24 = vpop.f32.mrf.mxu0  ;;  %v5570_v44 = vpop.f32.mrf.mxu1 }
 0x76a   : > { %v7262_v29 = vmul.f32 1.442695, %v6942_v34  ;;  %v7266_v16 = vmul.f32 1.442695, %v6944_v48  ;;  %v6632_v21 = vand.u32 2147483647, %v14781_v17  ;;  %v14793_v13 = vadd.f32 %v5377_v24, %v14760_v43 }
 0x76b   : > { %v6943_v41 = vsub.f32 0.0, %v6623_v27  ;;  %v6945_v31 = vsub.f32 0.0, %v6625_v19  ;;  %v6634_v23 = vand.u32 2147483647, %v14784_v28  ;;  %v5381_v35 = vpop.f32.mrf.mxu0  ;;  %v5574_v47 = vpop.f32.mrf.mxu1  ;;  %5846 = vmatmul.mubr.bf16.gmra.mxu0 %v14587_v2  ;;  %6039 = vmatmul.mubr.bf16.gmra.mxu1 %v14587_v2  ;;  %v14796_v38 = vadd.f32 %v5570_v44, %v14762_v46 }
 0x76c   : > { %11489 = vpow2.f32 %v7262_v29  ;;  %v14799_v39 = vadd.f32 %v5381_v35, %v14752_v20  ;;  %5855 = vmatprep.mubr.bf16.mxu0 %v17402_v40  ;;  %6048 = vmatprep.mubr.bf16.mxu1 %v17402_v40  ;;  %v6952_v0 = vsub.f32 0.0, %v6632_v21  ;;  %v6633_v63 = vand.u32 2147483647, %v14793_v13 }
 0x76d   : > { %11491 = vpow2.f32 %v7266_v16  ;;  %v7264_v33 = vmul.f32 1.442695, %v6943_v41  ;;  %v7268_v55 = vmul.f32 1.442695, %v6945_v31  ;;  %v5383_v14 = vpop.f32.mrf.mxu0  ;;  %v6954_v10 = vsub.f32 0.0, %v6634_v23  ;;  %v5576_v32 = vpop.f32.mrf.mxu1 }
 0x76e   : > { %v7282_v4 = vmul.f32 1.442695, %v6952_v0  ;;  %v6635_v52 = vand.u32 2147483647, %v14796_v38  ;;  %v6953_v30 = vsub.f32 0.0, %v6633_v63  ;;  %v14807_v61 = vadd.f32 %v5574_v47, %v14754_v58 }
 0x76f   : > { %11493 = vpow2.f32 %v7264_v33  ;;  %v5385_v45 = vpop.f32.mrf.mxu0  ;;  %v7286_v3 = vmul.f32 1.442695, %v6954_v10  ;;  %v6642_v18 = vand.u32 2147483647, %v14799_v39  ;;  %v14810_v8 = vadd.f32 %v5383_v14, %v14760_v43  ;;  %v5578_v44 = vpop.f32.mrf.mxu1 }
 0x770   : > { %11495 = vpow2.f32 %v7268_v55  ;;  %v6955_v54 = vsub.f32 0.0, %v6635_v52  ;;  %v7284_v34 = vmul.f32 1.442695, %v6953_v30  ;;  %v14813_v27 = vadd.f32 %v5576_v32, %v14762_v46 }
 0x771   : > { %11497 = vpow2.f32 %v7282_v4  ;;  %v5387_v5 = vpop.f32.mrf.mxu0  ;;  %v6962_v48 = vsub.f32 0.0, %v6642_v18  ;;  %v6644_v24 = vand.u32 2147483647, %v14807_v61  ;;  %v6643_v41 = vand.u32 2147483647, %v14810_v8  ;;  %v5580_v63 = vpop.f32.mrf.mxu1 }
 0x772   : > { %11499 = vpow2.f32 %v7286_v3  ;;  %v7288_v19 = vmul.f32 1.442695, %v6955_v54  ;;  %v6645_v21 = vand.u32 2147483647, %v14813_v27  ;;  %v14823_v23 = vadd.f32 %v5385_v45, %v14752_v20 }
 0x773   : > { %v5391_v29 = vpop.f32.mrf.mxu0  ;;  %5856 = vmatmul.mubr.bf16.gmra.mxu0 %v14602_v57  ;;  %6049 = vmatmul.mubr.bf16.gmra.mxu1 %v14602_v57  ;;  %11501 = vpow2.f32 %v7284_v34  ;;  %v7302_v16 = vmul.f32 1.442695, %v6962_v48  ;;  %v6964_v31 = vsub.f32 0.0, %v6644_v24  ;;  %v6963_v47 = vsub.f32 0.0, %v6643_v41 }
 0x774   : > { %5865 = vmatprep.mubr.bf16.mxu0 %v17402_v40  ;;  %6058 = vmatprep.mubr.bf16.mxu1 %v17402_v40  ;;  %11503 = vpow2.f32 %v7288_v19  ;;  %v14828_v33 = vadd.f32 %v5578_v44, %v14754_v58  ;;  %v14831_v55 = vadd.f32 %v5387_v5, %v14760_v43  ;;  %v6965_v14 = vsub.f32 0.0, %v6645_v21  ;;  %v5584_v21 = vpop.f32.mrf.mxu1 }
 0x775   : > { %v14825_v35 = vpop.f32.mrf.mxu0  ;;  %11505 = vpow2.f32 %v7302_v16  ;;  %v7306_v0 = vmul.f32 1.442695, %v6964_v31  ;;  %v6652_v10 = vand.u32 2147483647, %v14823_v23  ;;  %v7304_v45 = vmul.f32 1.442695, %v6963_v47 }
 0x776   : > { %v6654_v3 = vand.u32 2147483647, %v14828_v33  ;;  %v7308_v54 = vmul.f32 1.442695, %v6965_v14  ;;  %v6653_v24 = vand.u32 2147483647, %v14831_v55  ;;  %v14844_v44 = vadd.f32 %v5580_v63, %v14762_v46 }
 0x777   : > { %v14834_v4 = vpop.f32.mrf.mxu0  ;;  %11507 = vpow2.f32 %v7306_v0  ;;  %v6972_v5 = vsub.f32 0.0, %v6652_v10  ;;  %v14862_v42 = vadd.f32 %v5584_v21, %v14754_v58  ;;  %v14872_v21 = vadd.f32 %v14825_v35, %v14760_v43 }
 0x778   : > { %11509 = vpow2.f32 %v7304_v45  ;;  %v6974_v31 = vsub.f32 0.0, %v6654_v3  ;;  %v6655_v63 = vand.u32 2147483647, %v14844_v44  ;;  %v6973_v51 = vsub.f32 0.0, %v6653_v24 }
 0x779   : > { %v11490_v30 = vpop.eup %11489  ;;  %v14840_v34 = vpop.f32.mrf.mxu0  ;;  %11511 = vpow2.f32 %v7308_v54  ;;  %v7322_v41 = vmul.f32 1.442695, %v6972_v5  ;;  %v14857_v54 = vadd.f32 %v5391_v29, %v14752_v20 }
 0x77a   : > { %v11492_v48 = vpop.eup %11491  ;;  %v7902_v19 = vadd.f32 1.0, %v11490_v30  ;;  %v7326_v18 = vmul.f32 1.442695, %v6974_v31  ;;  %v7324_v24 = vmul.f32 1.442695, %v6973_v51 }
 0x77b   : > { %v7904_v16 = vadd.f32 1.0, %v11492_v48  ;;  %v14846_v47 = vpop.f32.mrf.mxu0  ;;  %5866 = vmatmul.mubr.bf16.gmra.mxu0 %v14611_v6  ;;  %6059 = vmatmul.mubr.bf16.gmra.mxu1 %v14611_v6  ;;  %v6662_v52 = vand.u32 2147483647, %v14857_v54 }
 0x77c   : > { %v11494_v0 = vpop.eup %11493  ;;  %11513 = vlog2.f32 %v7902_v19  ;;  %5875 = vmatprep.mubr.bf16.mxu0 %v17402_v40  ;;  %6068 = vmatprep.mubr.bf16.mxu1 %v17402_v40 }
 0x77d   : > { %v11496_v45 = vpop.eup %11495  ;;  %11515 = vlog2.f32 %v7904_v16  ;;  %v7903_v3 = vadd.f32 1.0, %v11494_v0  ;;  %v14859_v5 = vpop.f32.mrf.mxu0  ;;  %v6975_v16 = vsub.f32 0.0, %v6655_v63 }
 0x77e   : > { %v11498_v48 = vpop.eup %11497  ;;  %v7905_v19 = vadd.f32 1.0, %v11496_v45  ;;  %11517 = vpow2.f32 %v7322_v41  ;;  %v5586_v0 = vpop.f32.mrf.mxu1  ;;  %v6664_v41 = vand.u32 2147483647, %v14862_v42 }
 0x77f   : > { %v11500_v10 = vpop.eup %11499  ;;  %11519 = vlog2.f32 %v7903_v3  ;;  %v7912_v14 = vadd.f32 1.0, %v11498_v48  ;;  %v14864_v32 = vpop.f32.mrf.mxu0  ;;  %v14881_v48 = vadd.f32 %v14834_v4, %v14752_v20  ;;  %v7328_v30 = vmul.f32 1.442695, %v6975_v16 }
 0x780   : > { %11521 = vlog2.f32 %v7905_v19  ;;  %v7914_v29 = vadd.f32 1.0, %v11500_v10  ;;  %v11502_v45 = vpop.eup %11501  ;;  %v14877_v10 = vadd.f32 %v5586_v0, %v14762_v46  ;;  %v6663_v0 = vand.u32 2147483647, %v14872_v21 }
 0x781   : > { %11523 = vlog2.f32 %v7912_v14  ;;  %v14874_v31 = vpop.f32.mrf.mxu0  ;;  %v11504_v63 = vpop.eup %11503  ;;  %v7913_v3 = vadd.f32 1.0, %v11502_v45  ;;  %v17478_v4 = vmov 0  }
 0x782   : > { %11525 = vlog2.f32 %v7914_v29  ;;  %v11506_v14 = vpop.eup %11505  ;;  %v7915_v19 = vadd.f32 1.0, %v11504_v63  ;;  %v6982_v29 = vsub.f32 0.0, %v6662_v52  ;;  %v5588_v45 = vpop.f32.mrf.mxu1  ;;  %v6665_v16 = vand.u32 2147483647, %v14877_v10 }
 0x783   : > { %11527 = vpow2.f32 %v7326_v18  ;;  %v14883_v40 = vpop.f32.mrf.mxu0  ;;  %5876 = vmatmul.mubr.bf16.gmra.mxu0 %v14626_v12  ;;  %6069 = vmatmul.mubr.bf16.gmra.mxu1 %v14626_v12  ;;  %v7922_v35 = vadd.f32 1.0, %v11506_v14  ;;  %v6984_v18 = vsub.f32 0.0, %v6664_v41  ;;  %v6672_v14 = vand.u32 2147483647, %v14881_v48 }
 0x784   : > { %11529 = vlog2.f32 %v7913_v3  ;;  %5885 = vmatprep.mubr.bf16.mxu0 %v17478_v4  ;;  %6078 = vmatprep.mubr.bf16.mxu1 %v17478_v4  ;;  %v11508_v59 = vpop.eup %11507  ;;  %v6983_v3 = vsub.f32 0.0, %v6663_v0  ;;  %v6985_v57 = vsub.f32 0.0, %v6665_v16  ;;  %v7342_v26 = vmul.f32 1.442695, %v6982_v29  ;;  %v5590_v15 = vpop.f32.mrf.mxu1 }
 0x785   : > { %11531 = vlog2.f32 %v7915_v19  ;;  %v14892_v63 = vpop.f32.mrf.mxu0  ;;  %v11510_v12 = vpop.eup %11509  ;;  %v7924_v6 = vadd.f32 1.0, %v11508_v59  ;;  %v14898_v19 = vadd.f32 %v5588_v45, %v14754_v58  ;;  %v7346_v52 = vmul.f32 1.442695, %v6984_v18 }
 0x786   : > { %11533 = vlog2.f32 %v7922_v35  ;;  %v11512_v51 = vpop.eup %11511  ;;  %v7923_v2 = vadd.f32 1.0, %v11510_v12  ;;  %v6992_v35 = vsub.f32 0.0, %v6672_v14  ;;  %v7344_v50 = vmul.f32 1.442695, %v6983_v3 }
 0x787   : > { %11535 = vpow2.f32 %v7324_v24  ;;  %v14900_v41 = vpop.f32.mrf.mxu0  ;;  %v7925_v0 = vadd.f32 1.0, %v11512_v51  ;;  %v7348_v16 = vmul.f32 1.442695, %v6985_v57  ;;  %v6674_v45 = vand.u32 2147483647, %v14898_v19 }
 0x788   : > { %11537 = vpow2.f32 %v7328_v30  ;;  %v14912_v30 = vadd.f32 %v14840_v34, %v14760_v43  ;;  %v17480_v3 = vmax.f32 %v14768_v49, 0.0  ;;  %v17481_v49 = vmax.f32 %v14775_v25, 0.0 }
 0x789   : > { %v11514_v53 = vpop.eup %11513  ;;  %11539 = vlog2.f32 %v7924_v6  ;;  %v14902_v7 = vpop.f32.mrf.mxu0  ;;  %v7362_v6 = vmul.f32 1.442695, %v6992_v35  ;;  %v6994_v18 = vsub.f32 0.0, %v6674_v45  ;;  %v17483_v25 = vmax.f32 %v14781_v17, 0.0 }
 0x78a   : > { %v11516_v59 = vpop.eup %11515  ;;  %v8223_v24 = vmul.f32 0.6931472, %v11514_v53  ;;  %11541 = vlog2.f32 %v7923_v2  ;;  %v17479_v2 = vmax.f32 %v14765_v11, 0.0 }
 0x78b   : > { %v11518_v60 = vpop.eup %11517  ;;  %v8227_v12 = vmul.f32 0.6931472, %v11516_v59  ;;  %11543 = vlog2.f32 %v7925_v0  ;;  %v14914_v29 = vpop.f32.mrf.mxu0  ;;  %5886 = vmatmul.mubr.bf16.gmra.mxu0 %v14635_v22  ;;  %6079 = vmatmul.mubr.bf16.gmra.mxu1 %v14635_v22  ;;  %v14925_v0 = vadd.f32 %v5590_v15, %v14762_v46 }
 0x78c   : > { %v11520_v53 = vpop.eup %11519  ;;  %v8862_v57 = vadd.f32 %v8223_v24, %v17479_v2  ;;  %v7932_v51 = vadd.f32 1.0, %v11518_v60  ;;  %11545 = vpow2.f32 %v7342_v26  ;;  %5895 = vmatprep.mubr.bf16.mxu0 %v17478_v4  ;;  %6088 = vmatprep.mubr.bf16.mxu1 %v17478_v4  ;;  %v7366_v26 = vmul.f32 1.442695, %v6994_v18  ;;  %v5594_v15 = vpop.f32.mrf.mxu1 }
 0x78d   : > { %v11522_v34 = vpop.eup %11521  ;;  %v8864_v14 = vadd.f32 %v8227_v12, %v17480_v3  ;;  %v8225_v35 = vmul.f32 0.6931472, %v11520_v53  ;;  %11547 = vpow2.f32 %v7346_v52  ;;  %v14927_v59 = vpop.f32.mrf.mxu0  ;;  %v6673_v24 = vand.u32 2147483647, %v14912_v30 }
 0x78e   : > { %v11524_v11 = vpop.eup %11523  ;;  %9182 = vst [vmem:[%s14908_s2] sm:$0xff] %v8862_v57  ;;  %v8229_v60 = vmul.f32 0.6931472, %v11522_v34  ;;  %11549 = vlog2.f32 %v7932_v51  ;;  %v17482_v51 = vmax.f32 %v14778_v36, 0.0  ;;  %v17484_v36 = vmax.f32 %v14784_v28, 0.0 }
 0x78f   : > { %v11526_v45 = vpop.eup %11525  ;;  %9184 = vst [vmem:[%s14908_s2 + $0x10] sm:$0xff] %v8864_v14  ;;  %v8863_v12 = vadd.f32 %v8225_v35, %v17481_v49  ;;  %v8243_v53 = vmul.f32 0.6931472, %v11524_v11  ;;  %11551 = vpow2.f32 %v7344_v50  ;;  %v14935_v2 = vpop.f32.mrf.mxu0  ;;  %v6993_v3 = vsub.f32 0.0, %v6673_v24 }
 0x790   : > { %v11528_v57 = vpop.eup %11527  ;;  %v8865_v18 = vadd.f32 %v8229_v60, %v17482_v51  ;;  %v8247_v34 = vmul.f32 0.6931472, %v11526_v45  ;;  %11553 = vpow2.f32 %v7348_v16  ;;  %v6675_v50 = vand.u32 2147483647, %v14925_v0 }
 0x791   : > { %v11530_v14 = vpop.eup %11529  ;;  %9183 = vst [vmem:[%s14908_s2 + $0x8] sm:$0xff] %v8863_v12  ;;  %v8872_v35 = vadd.f32 %v8243_v53, %v17483_v25  ;;  %v7934_v11 = vadd.f32 1.0, %v11528_v57  ;;  %11555 = vpow2.f32 %v7362_v6  ;;  %v14943_v49 = vpop.f32.mrf.mxu0  ;;  %v7364_v24 = vmul.f32 1.442695, %v6993_v3 }
 0x792   : > { %v11532_v52 = vpop.eup %11531  ;;  %9185 = vst [vmem:[%s14908_s2 + $0x18] sm:$0xff] %v8865_v18  ;;  %v8874_v60 = vadd.f32 %v8247_v34, %v17484_v36  ;;  %v8245_v16 = vmul.f32 0.6931472, %v11530_v14  ;;  %11557 = vpow2.f32 %v7366_v26  ;;  %v6995_v17 = vsub.f32 0.0, %v6675_v50  ;;  %v5596_v53 = vpop.f32.mrf.mxu1 }
 0x793   : > { %v11534_v45 = vpop.eup %11533  ;;  %9192 = vst [vmem:[%s14908_s2 + $0x50] sm:$0xff] %v8872_v35  ;;  %v8249_v12 = vmul.f32 0.6931472, %v11532_v52  ;;  %11559 = vlog2.f32 %v7934_v11  ;;  %v14951_v6 = vadd.f32 %v14846_v47, %v14752_v20  ;;  %v14953_v57 = vpop.f32.mrf.mxu0  ;;  %5896 = vmatmul.mubr.bf16.gmra.mxu0 %v14650_v9  ;;  %6089 = vmatmul.mubr.bf16.gmra.mxu1 %v14650_v9  ;;  %v17485_v26 = vmax.f32 %v14793_v13, 0.0 }
 0x794   : > { %v11536_v28 = vpop.eup %11535  ;;  %9194 = vst [vmem:[%s14908_s2 + $0x60] sm:$0xff] %v8874_v60  ;;  %v8263_v52 = vmul.f32 0.6931472, %v11534_v45  ;;  %11561 = vpow2.f32 %v7364_v24  ;;  %v14961_v18 = vadd.f32 %v5594_v15, %v14754_v58  ;;  %5905 = vmatprep.mubr.bf16.mxu0 %v17478_v4  ;;  %6098 = vmatprep.mubr.bf16.mxu1 %v17478_v4  ;;  %v17486_v34 = vmax.f32 %v14796_v38, 0.0 }
 0x795   : > { %v8873_v51 = vadd.f32 %v8245_v16, %v17485_v26  ;;  %v11538_v47 = vpop.eup %11537  ;;  %v6325_v14 = vmax.f32 %v14813_v27, 0.0  ;;  %v7933_v25 = vadd.f32 1.0, %v11536_v28  ;;  %v7368_v35 = vmul.f32 1.442695, %v6995_v17  ;;  %v14968_v13 = vpop.f32.mrf.mxu0 }
 0x796   : > { %v8875_v3 = vadd.f32 %v8249_v12, %v17486_v34  ;;  %v11540_v11 = vpop.eup %11539  ;;  %v17487_v15 = vmax.f32 %v14799_v39, 0.0  ;;  %v6332_v36 = vmax.f32 %v14823_v23, 0.0  ;;  %v7935_v60 = vadd.f32 1.0, %v11538_v47  ;;  %v14981_v12 = vpop.f32.mrf.mxu1 }
 0x797   : > { %9193 = vst [vmem:[%s14908_s2 + $0x58] sm:$0xff] %v8873_v51  ;;  %v6682_v16 = vand.u32 2147483647, %v14951_v6  ;;  %v11542_v24 = vpop.eup %11541  ;;  %v8267_v38 = vmul.f32 0.6931472, %v11540_v11  ;;  %11563 = vlog2.f32 %v7933_v25  ;;  %v14979_v45 = vadd.f32 %v14859_v5, %v14760_v43  ;;  %v14983_v17 = vpop.f32.mrf.mxu0 }
 0x798   : > { %v8882_v50 = vadd.f32 %v8263_v52, %v17487_v15  ;;  %9195 = vst [vmem:[%s14908_s2 + $0x68] sm:$0xff] %v8875_v3  ;;  %v6684_v27 = vand.u32 2147483647, %v14961_v18  ;;  %v11544_v39 = vpop.eup %11543  ;;  %v8265_v23 = vmul.f32 0.6931472, %v11542_v24  ;;  %11565 = vlog2.f32 %v7935_v60 }
 0x799   : > { %v7002_v28 = vsub.f32 0.0, %v6682_v16  ;;  %v14987_v26 = vadd.f32 %v5596_v53, %v14762_v46  ;;  %v11546_v51 = vpop.eup %11545  ;;  %v17488_v52 = vmax.f32 %v14807_v61, 0.0  ;;  %v8269_v34 = vmul.f32 0.6931472, %v11544_v39  ;;  %v14992_v3 = vpop.f32.mrf.mxu0 }
 0x79a   : > { %9202 = vst [vmem:[%s14908_s2 + $0xa0] sm:$0xff] %v8882_v50  ;;  %v6334_v5 = vmax.f32 %v14828_v33, 0.0  ;;  %11567 = vpow2.f32 %v7368_v35  ;;  %v11548_v25 = vpop.eup %11547  ;;  %v17489_v11 = vmax.f32 %v14810_v8, 0.0  ;;  %v7942_v60 = vadd.f32 1.0, %v11546_v51  ;;  %v5600_v35 = vpop.f32.mrf.mxu1 }
 0x79b   : > { %v8884_v47 = vadd.f32 %v8267_v38, %v17488_v52  ;;  %v7382_v53 = vmul.f32 1.442695, %v7002_v28  ;;  %v11550_v16 = vpop.eup %11549  ;;  %v8885_v24 = vadd.f32 %v8269_v34, %v6325_v14  ;;  %v7944_v61 = vadd.f32 1.0, %v11548_v25  ;;  %v14999_v39 = vpop.f32.mrf.mxu0  ;;  %5906 = vmatmul.mubr.bf16.gmra.mxu0 %v14658_v1  ;;  %6099 = vmatmul.mubr.bf16.gmra.mxu1 %v14658_v1 }
 0x79c   : > { %v8883_v15 = vadd.f32 %v8265_v23, %v17489_v11  ;;  %v7004_v38 = vsub.f32 0.0, %v6684_v27  ;;  %v6683_v33 = vand.u32 2147483647, %v14979_v45  ;;  %v11552_v8 = vpop.eup %11551  ;;  %v8283_v23 = vmul.f32 0.6931472, %v11550_v16  ;;  %6141 = vmatprep.mubr.bf16.mxu0 %v17478_v4 }
 0x79d   : > { %9204 = vst [vmem:[%s14908_s2 + $0xb0] sm:$0xff] %v8884_v47  ;;  %11569 = vlog2.f32 %v7942_v60  ;;  %v6685_v14 = vand.u32 2147483647, %v14987_v26  ;;  %v11554_v27 = vpop.eup %11553  ;;  %9205 = vst [vmem:[%s14908_s2 + $0xb8] sm:$0xff] %v8885_v24  ;;  %v7943_v51 = vadd.f32 1.0, %v11552_v8  ;;  %v15010_v47 = vadd.f32 %v14864_v32, %v14752_v20  ;;  %v15012_v34 = vpop.f32.mrf.mxu0 }
 0x79e   : > { %9203 = vst [vmem:[%s14908_s2 + $0xa8] sm:$0xff] %v8883_v15  ;;  %11571 = vlog2.f32 %v7944_v61  ;;  %v7003_v52 = vsub.f32 0.0, %v6683_v33  ;;  %v11556_v25 = vpop.eup %11555  ;;  %v8892_v11 = vadd.f32 %v8283_v23, %v6332_v36  ;;  %v7945_v15 = vadd.f32 1.0, %v11554_v27 }
 0x79f   : > { %11573 = vpow2.f32 %v7382_v53  ;;  %v7005_v60 = vsub.f32 0.0, %v6685_v14  ;;  %v11558_v16 = vpop.eup %11557  ;;  %v7952_v28 = vadd.f32 1.0, %v11556_v25  ;;  %v7386_v50 = vmul.f32 1.442695, %v7004_v38  ;;  %v15014_v61 = vpop.f32.mrf.mxu0 }
 0x7a0   : > { %11575 = vlog2.f32 %v7943_v51  ;;  %v7384_v24 = vmul.f32 1.442695, %v7003_v52  ;;  %v11560_v8 = vpop.eup %11559  ;;  %9212 = vst [vmem:[%s14908_s2 + $0xf0] sm:$0xff] %v8892_v11  ;;  %v7954_v33 = vadd.f32 1.0, %v11558_v16  ;;  %v6692_v1 = vand.u32 2147483647, %v15010_v47 }
 0x7a1   : > { %11577 = vlog2.f32 %v7945_v15  ;;  %v7388_v32 = vmul.f32 1.442695, %v7005_v60  ;;  %v11562_v9 = vpop.eup %11561  ;;  %v8287_v22 = vmul.f32 0.6931472, %v11560_v8  ;;  %v15020_v36 = vadd.f32 %v14981_v12, %v14754_v58  ;;  %v15026_v38 = vpop.f32.mrf.mxu0 }
 0x7a2   : > { %11579 = vlog2.f32 %v7952_v28  ;;  %v15024_v53 = vadd.f32 %v14874_v31, %v14760_v43  ;;  %v7953_v23 = vadd.f32 1.0, %v11562_v9  ;;  %v7012_v14 = vsub.f32 0.0, %v6692_v1  ;;  %v5604_v60 = vpop.f32.mrf.mxu1 }
 0x7a3   : > { %11581 = vlog2.f32 %v7954_v33  ;;  %v15029_v27 = vadd.f32 %v5600_v35, %v14762_v46  ;;  %v8894_v51 = vadd.f32 %v8287_v22, %v6334_v5  ;;  %v6342_v28 = vmax.f32 %v14857_v54, 0.0  ;;  %v15033_v52 = vpop.f32.mrf.mxu0  ;;  %6142 = vmatmul.mubr.bf16.vlgmr.msra.gmra.mxu0 %v14392_v37 }
 0x7a4   : > { %11583 = vpow2.f32 %v7386_v50  ;;  %v6694_v12 = vand.u32 2147483647, %v15020_v36  ;;  %v11564_v31 = vpop.eup %11563  ;;  %v6344_v25 = vmax.f32 %v14862_v42, 0.0  ;;  %v7402_v9 = vmul.f32 1.442695, %v7012_v14  ;;  %6151 = vmatprep.mubr.bf16.mxu0 %v17478_v4 }
 0x7a5   : > { %11585 = vlog2.f32 %v7953_v23  ;;  %v6693_v1 = vand.u32 2147483647, %v15024_v53  ;;  %v11566_v35 = vpop.eup %11565  ;;  %9214 = vst [vmem:[%s14908_s2 + $0x100] sm:$0xff] %v8894_v51  ;;  %v8285_v22 = vmul.f32 0.6931472, %v11564_v31  ;;  %v6343_v54 = vmax.f32 %v14872_v21, 0.0  ;;  %v15041_v50 = vpop.f32.mrf.mxu0 }
 0x7a6   : > { %11587 = vpow2.f32 %v7384_v24  ;;  %v7014_v5 = vsub.f32 0.0, %v6694_v12  ;;  %v8289_v37 = vmul.f32 0.6931472, %v11566_v35  ;;  %v6695_v15 = vand.u32 2147483647, %v15029_v27 }
 0x7a7   : > { %v11568_v11 = vpop.eup %11567  ;;  %11589 = vpow2.f32 %v7388_v32  ;;  %v7013_v42 = vsub.f32 0.0, %v6693_v1  ;;  %v17490_v16 = vmax.f32 %v14831_v55, 0.0  ;;  %v15046_v21 = vpop.f32.mrf.mxu0  ;;  %v17491_v24 = vmax.f32 %v14844_v44, 0.0 }
 0x7a8   : > { %v7955_v33 = vadd.f32 1.0, %v11568_v11  ;;  %11591 = vpow2.f32 %v7402_v9  ;;  %v7406_v23 = vmul.f32 1.442695, %v7014_v5  ;;  %v7015_v12 = vsub.f32 0.0, %v6695_v15  ;;  %v5606_v11 = vpop.f32.mrf.mxu1 }
 0x7a9   : > { %v8893_v8 = vadd.f32 %v8285_v22, %v17490_v16  ;;  %v8895_v14 = vadd.f32 %v8289_v37, %v17491_v24  ;;  %v7404_v51 = vmul.f32 1.442695, %v7013_v42  ;;  %v15052_v32 = vadd.f32 %v14883_v40, %v14752_v20  ;;  %v15060_v35 = vpop.f32.mrf.mxu0 }
 0x7aa   : > { %v11570_v31 = vpop.eup %11569  ;;  %v6345_v55 = vmax.f32 %v14877_v10, 0.0  ;;  %v6352_v1 = vmax.f32 %v14881_v48, 0.0  ;;  %11593 = vlog2.f32 %v7955_v33  ;;  %v15058_v9 = vadd.f32 %v5604_v60, %v14754_v58 }
 0x7ab   : > { %9213 = vst [vmem:[%s14908_s2 + $0xf8] sm:$0xff] %v8893_v8  ;;  %v11572_v44 = vpop.eup %11571  ;;  %9215 = vst [vmem:[%s14908_s2 + $0x108] sm:$0xff] %v8895_v14  ;;  %v8303_v22 = vmul.f32 0.6931472, %v11570_v31  ;;  %11595 = vpow2.f32 %v7406_v23  ;;  %v7408_v5 = vmul.f32 1.442695, %v7015_v12  ;;  %v15065_v40 = vadd.f32 %v14892_v63, %v14760_v43  ;;  %v15069_v15 = vpop.f32.mrf.mxu0  ;;  %6152 = vmatmul.mubr.bf16.gmra.mxu0 %v14419_v56 }
 0x7ac   : > { %v11574_v37 = vpop.eup %11573  ;;  %v8307_v10 = vmul.f32 0.6931472, %v11572_v44  ;;  %v6354_v48 = vmax.f32 %v14898_v19, 0.0  ;;  %11597 = vpow2.f32 %v7404_v51  ;;  %v6702_v42 = vand.u32 2147483647, %v15052_v32  ;;  %17492 = vst [vmem:[#allocation16_spill] sm:$0xff] %v15069_v15  ;;  %6161 = vmatprep.mubr.bf16.mxu0 %v17478_v4 }
 0x7ad   : > { %v11576_v60 = vpop.eup %11575  ;;  %v8902_v16 = vadd.f32 %v8303_v22, %v6342_v28  ;;  %v7962_v8 = vadd.f32 1.0, %v11574_v37  ;;  %11599 = vpow2.f32 %v7408_v5  ;;  %v6704_v63 = vand.u32 2147483647, %v15058_v9  ;;  %v15077_v51 = vpop.f32.mrf.mxu0 }
 0x7ae   : > { %v11578_v33 = vpop.eup %11577  ;;  %v8904_v23 = vadd.f32 %v8307_v10, %v6344_v25  ;;  %v8305_v19 = vmul.f32 0.6931472, %v11576_v60  ;;  %v7022_v24 = vsub.f32 0.0, %v6702_v42  ;;  %v15075_v14 = vadd.f32 %v5606_v11, %v14762_v46  ;;  %17493 = vst [vmem:[#allocation17_spill] sm:$0xff] %v15077_v51 }
 0x7af   : > { %v11580_v12 = vpop.eup %11579  ;;  %9222 = vst [vmem:[%s14908_s2 + $0x140] sm:$0xff] %v8902_v16  ;;  %v8309_v56 = vmul.f32 0.6931472, %v11578_v33  ;;  %11601 = vlog2.f32 %v7962_v8  ;;  %v7024_v28 = vsub.f32 0.0, %v6704_v63  ;;  %v6703_v31 = vand.u32 2147483647, %v15065_v40  ;;  %v15083_v11 = vpop.f32.mrf.mxu0 }
 0x7b0   : > { %v11582_v44 = vpop.eup %11581  ;;  %9224 = vst [vmem:[%s14908_s2 + $0x150] sm:$0xff] %v8904_v23  ;;  %v8903_v22 = vadd.f32 %v8305_v19, %v6343_v54  ;;  %v8323_v5 = vmul.f32 0.6931472, %v11580_v12  ;;  %v6353_v25 = vmax.f32 %v14912_v30, 0.0  ;;  %v7422_v37 = vmul.f32 1.442695, %v7022_v24  ;;  %v5608_v8 = vpop.f32.mrf.mxu1 }
 0x7b1   : > { %v11584_v10 = vpop.eup %11583  ;;  %v8905_v42 = vadd.f32 %v8309_v56, %v6345_v55  ;;  %v8327_v60 = vmul.f32 0.6931472, %v11582_v44  ;;  %v7426_v16 = vmul.f32 1.442695, %v7024_v28  ;;  %v7023_v33 = vsub.f32 0.0, %v6703_v31  ;;  %v15087_v23 = vpop.f32.mrf.mxu0 }
 0x7b2   : > { %v11586_v63 = vpop.eup %11585  ;;  %9223 = vst [vmem:[%s14908_s2 + $0x148] sm:$0xff] %v8903_v22  ;;  %v8912_v51 = vadd.f32 %v8323_v5, %v6352_v1  ;;  %v7964_v15 = vadd.f32 1.0, %v11584_v10  ;;  %11603 = vpow2.f32 %v7422_v37  ;;  %v6705_v54 = vand.u32 2147483647, %v15075_v14 }
 0x7b3   : > { %v11588_v30 = vpop.eup %11587  ;;  %9225 = vst [vmem:[%s14908_s2 + $0x158] sm:$0xff] %v8905_v42  ;;  %v8914_v19 = vadd.f32 %v8327_v60, %v6354_v48  ;;  %v8325_v24 = vmul.f32 0.6931472, %v11586_v63  ;;  %11605 = vpow2.f32 %v7426_v16  ;;  %v7424_v55 = vmul.f32 1.442695, %v7023_v33  ;;  %v15095_v31 = vpop.f32.mrf.mxu0  ;;  %6162 = vmatmul.mubr.bf16.gmra.mxu0 %v14458_v62 }
 0x7b4   : > { %v11590_v12 = vpop.eup %11589  ;;  %9232 = vst [vmem:[%s14908_s2 + $0x190] sm:$0xff] %v8912_v51  ;;  %11607 = vlog2.f32 %v7964_v15  ;;  %v7963_v56 = vadd.f32 1.0, %v11588_v30  ;;  %v7025_v28 = vsub.f32 0.0, %v6705_v54  ;;  %v15093_v1 = vadd.f32 %v14900_v41, %v14752_v20  ;;  %v5610_v15 = vpop.f32.mrf.mxu1  ;;  %6171 = vmatprep.mubr.bf16.mxu0 %v17478_v4 }
 0x7b5   : > { %v11592_v44 = vpop.eup %11591  ;;  %9234 = vst [vmem:[%s14908_s2 + $0x1a0] sm:$0xff] %v8914_v19  ;;  %v8913_v48 = vadd.f32 %v8325_v24, %v6353_v25  ;;  %v7965_v22 = vadd.f32 1.0, %v11590_v12  ;;  %11609 = vpow2.f32 %v7424_v55  ;;  %v15100_v5 = vadd.f32 %v5608_v8, %v14754_v58  ;;  %v15104_v10 = vpop.f32.mrf.mxu0 }
 0x7b6   : > { %v6355_v51 = vmax.f32 %v14925_v0, 0.0  ;;  %11611 = vlog2.f32 %v7963_v56  ;;  %v7972_v41 = vadd.f32 1.0, %v11592_v44  ;;  %v7428_v37 = vmul.f32 1.442695, %v7025_v28 }
 0x7b7   : > { %v11594_v42 = vpop.eup %11593  ;;  %9233 = vst [vmem:[%s14908_s2 + $0x198] sm:$0xff] %v8913_v48  ;;  %v6362_v62 = vmax.f32 %v14951_v6, 0.0  ;;  %11613 = vlog2.f32 %v7965_v22  ;;  %v6712_v25 = vand.u32 2147483647, %v15093_v1  ;;  %v6714_v60 = vand.u32 2147483647, %v15100_v5  ;;  %v15117_v63 = vpop.f32.mrf.mxu0 }
 0x7b8   : > { %v11596_v16 = vpop.eup %11595  ;;  %v8329_v33 = vmul.f32 0.6931472, %v11594_v42  ;;  %11615 = vlog2.f32 %v7972_v41  ;;  %v15112_v0 = vadd.f32 %v14902_v7, %v14760_v43  ;;  %v15115_v8 = vadd.f32 %v5610_v15, %v14762_v46  ;;  %v5614_v7 = vpop.f32.mrf.mxu1 }
 0x7b9   : > { %v11598_v54 = vpop.eup %11597  ;;  %v7974_v6 = vadd.f32 1.0, %v11596_v16  ;;  %11617 = vpow2.f32 %v7428_v37  ;;  %v7032_v30 = vsub.f32 0.0, %v6712_v25  ;;  %v7034_v19 = vsub.f32 0.0, %v6714_v60  ;;  %v15124_v25 = vpop.f32.mrf.mxu0 }
 0x7ba   : > { %v11600_v24 = vpop.eup %11599  ;;  %v8915_v55 = vadd.f32 %v8329_v33, %v6355_v51  ;;  %v6364_v12 = vmax.f32 %v14961_v18, 0.0  ;;  %v7973_v56 = vadd.f32 1.0, %v11598_v54  ;;  %v6713_v28 = vand.u32 2147483647, %v15112_v0  ;;  %v17494_v51 = vld [vmem:[#allocation2_spill] sm:$0xff] }
 0x7bb   : > { %11619 = vlog2.f32 %v7974_v6  ;;  %v7975_v44 = vadd.f32 1.0, %v11600_v24  ;;  %v7442_v48 = vmul.f32 1.442695, %v7032_v30  ;;  %v7446_v22 = vmul.f32 1.442695, %v7034_v19  ;;  %6172 = vmatmul.mubr.bf16.gmra.mxu0 %v17494_v51  ;;  %v5616_v24 = vpop.f32.mrf.mxu1 }
 0x7bc   : > { %v11602_v15 = vpop.eup %11601  ;;  %9235 = vst [vmem:[%s14908_s2 + $0x1a8] sm:$0xff] %v8915_v55  ;;  %v6363_v41 = vmax.f32 %v14979_v45, 0.0  ;;  %11621 = vlog2.f32 %v7973_v56  ;;  %v7033_v37 = vsub.f32 0.0, %v6713_v28  ;;  %v6715_v42 = vand.u32 2147483647, %v15115_v8  ;;  %6181 = vmatprep.mubr.bf16.mxu0 %v17478_v4 }
 0x7bd   : > { %v8343_v18 = vmul.f32 0.6931472, %v11602_v15  ;;  %11623 = vlog2.f32 %v7975_v44  ;;  %v15129_v60 = vadd.f32 %v14914_v29, %v14752_v20  ;;  %v15132_v16 = vadd.f32 %v5614_v7, %v14754_v58  ;;  %v15142_v44 = vpop.f32.mrf.mxu0 }
 0x7be   : > { %11625 = vpow2.f32 %v7442_v48  ;;  %v7444_v45 = vmul.f32 1.442695, %v7033_v37  ;;  %v7035_v33 = vsub.f32 0.0, %v6715_v42  ;;  %v15137_v54 = vadd.f32 %v14927_v59, %v14760_v43  ;;  %17495 = vst [vmem:[#allocation2_spill] sm:$0xff] %v15142_v44 }
 0x7bf   : > { %v11604_v6 = vpop.eup %11603  ;;  %v8922_v30 = vadd.f32 %v8343_v18, %v6362_v62  ;;  %v6365_v19 = vmax.f32 %v14987_v26, 0.0  ;;  %11627 = vpow2.f32 %v7446_v22  ;;  %v6722_v29 = vand.u32 2147483647, %v15129_v60 }
 0x7c0   : > { %v11606_v55 = vpop.eup %11605  ;;  %v6372_v56 = vmax.f32 %v15010_v47, 0.0  ;;  %v7982_v28 = vadd.f32 1.0, %v11604_v6  ;;  %11629 = vpow2.f32 %v7444_v45  ;;  %v7448_v7 = vmul.f32 1.442695, %v7035_v33 }
 0x7c1   : > { %v11608_v48 = vpop.eup %11607  ;;  %9242 = vst [vmem:[%s14908_s2 + $0x1e0] sm:$0xff] %v8922_v30  ;;  %v6374_v59 = vmax.f32 %v15020_v36, 0.0  ;;  %v7984_v15 = vadd.f32 1.0, %v11606_v55  ;;  %v7042_v62 = vsub.f32 0.0, %v6722_v29  ;;  %v6724_v26 = vand.u32 2147483647, %v15132_v16  ;;  %v15151_v55 = vpop.f32.mrf.mxu0 }
 0x7c2   : > { %v11610_v22 = vpop.eup %11609  ;;  %v8347_v37 = vmul.f32 0.6931472, %v11608_v48  ;;  %11631 = vlog2.f32 %v7982_v28  ;;  %v6723_v42 = vand.u32 2147483647, %v15137_v54  ;;  %v15149_v47 = vadd.f32 %v5616_v24, %v14762_v46  ;;  %v17496_v48 = vld [vmem:[#allocation3_spill] sm:$0xff] }
 0x7c3   : > { %v11612_v51 = vpop.eup %11611  ;;  %11633 = vlog2.f32 %v7984_v15  ;;  %v7983_v18 = vadd.f32 1.0, %v11610_v22  ;;  %v7462_v45 = vmul.f32 1.442695, %v7042_v62  ;;  %v7044_v33 = vsub.f32 0.0, %v6724_v26  ;;  %6182 = vmatmul.mubr.bf16.gmra.mxu0 %v17496_v48  ;;  %v5618_v22 = vpop.f32.mrf.mxu1 }
 0x7c4   : > { %v11614_v6 = vpop.eup %11613  ;;  %v8924_v36 = vadd.f32 %v8347_v37, %v6364_v12  ;;  %v8345_v30 = vmul.f32 0.6931472, %v11612_v51  ;;  %11635 = vpow2.f32 %v7448_v7  ;;  %v7043_v29 = vsub.f32 0.0, %v6723_v42  ;;  %6191 = vmatprep.mubr.bf16.mxu0 %v17478_v4 }
 0x7c5   : > { %v11616_v28 = vpop.eup %11615  ;;  %v8349_v44 = vmul.f32 0.6931472, %v11614_v6  ;;  %v6373_v24 = vmax.f32 %v15024_v53, 0.0  ;;  %11637 = vlog2.f32 %v7983_v18  ;;  %v7466_v15 = vmul.f32 1.442695, %v7044_v33  ;;  %v15166_v6 = vpop.f32.mrf.mxu0 }
 0x7c6   : > { %v11618_v62 = vpop.eup %11617  ;;  %9244 = vst [vmem:[%s14908_s2 + $0x1f0] sm:$0xff] %v8924_v36  ;;  %v8923_v12 = vadd.f32 %v8345_v30, %v6363_v41  ;;  %v8363_v7 = vmul.f32 0.6931472, %v11616_v28  ;;  %11639 = vpow2.f32 %v7462_v45  ;;  %v7464_v26 = vmul.f32 1.442695, %v7043_v29  ;;  %v5620_v28 = vpop.f32.mrf.mxu1 }
 0x7c7   : > { %v8925_v37 = vadd.f32 %v8349_v44, %v6365_v19  ;;  %v7985_v42 = vadd.f32 1.0, %v11618_v62  ;;  %11641 = vpow2.f32 %v7466_v15  ;;  %v6725_v51 = vand.u32 2147483647, %v15149_v47 }
 0x7c8   : > { %v11620_v53 = vpop.eup %11619  ;;  %9243 = vst [vmem:[%s14908_s2 + $0x1e8] sm:$0xff] %v8923_v12  ;;  %v8932_v18 = vadd.f32 %v8363_v7, %v6372_v56  ;;  %11643 = vpow2.f32 %v7464_v26  ;;  %v15161_v33 = vadd.f32 %v14935_v2, %v14752_v20  ;;  %v15164_v41 = vadd.f32 %v5618_v22, %v14754_v58 }
 0x7c9   : > { %v11622_v45 = vpop.eup %11621  ;;  %9245 = vst [vmem:[%s14908_s2 + $0x1f8] sm:$0xff] %v8925_v37  ;;  %v8367_v19 = vmul.f32 0.6931472, %v11620_v53  ;;  %v6375_v44 = vmax.f32 %v15029_v27, 0.0  ;;  %11645 = vlog2.f32 %v7985_v42  ;;  %v7045_v36 = vsub.f32 0.0, %v6725_v51  ;;  %v15179_v51 = vpop.f32.mrf.mxu0  ;;  %v17497_v53 = vld [vmem:[#allocation4_spill] sm:$0xff] }
 0x7ca   : > { %v11624_v30 = vpop.eup %11623  ;;  %9252 = vst [vmem:[%s14908_s2 + $0x230] sm:$0xff] %v8932_v18  ;;  %v8365_v56 = vmul.f32 0.6931472, %v11622_v45  ;;  %v6382_v29 = vmax.f32 %v15052_v32, 0.0  ;;  %v6732_v2 = vand.u32 2147483647, %v15161_v33  ;;  %v15175_v48 = vadd.f32 %v14943_v49, %v14760_v43 }
 0x7cb   : > { %v11626_v15 = vpop.eup %11625  ;;  %v8934_v22 = vadd.f32 %v8367_v19, %v6374_v59  ;;  %v8369_v62 = vmul.f32 0.6931472, %v11624_v30  ;;  %v7468_v12 = vmul.f32 1.442695, %v7045_v36  ;;  %v6734_v27 = vand.u32 2147483647, %v15164_v41  ;;  %6192 = vmatmul.mubr.bf16.gmra.mxu0 %v17497_v53  ;;  %v5624_v36 = vpop.f32.mrf.mxu1 }
 0x7cc   : > { %v11628_v7 = vpop.eup %11627  ;;  %v8933_v26 = vadd.f32 %v8365_v56, %v6373_v24  ;;  %v6384_v37 = vmax.f32 %v15058_v9, 0.0  ;;  %v7992_v32 = vadd.f32 1.0, %v11626_v15  ;;  %v7052_v42 = vsub.f32 0.0, %v6732_v2  ;;  %6201 = vmatprep.mubr.bf16.mxu0 %v17478_v4 }
 0x7cd   : > { %v11630_v49 = vpop.eup %11629  ;;  %9254 = vst [vmem:[%s14908_s2 + $0x240] sm:$0xff] %v8934_v22  ;;  %v8935_v18 = vadd.f32 %v8369_v62, %v6375_v44  ;;  %v7994_v59 = vadd.f32 1.0, %v11628_v7  ;;  %11647 = vpow2.f32 %v7468_v12  ;;  %v7054_v45 = vsub.f32 0.0, %v6734_v27  ;;  %v15195_v27 = vpop.f32.mrf.mxu0 }
 0x7ce   : > { %9253 = vst [vmem:[%s14908_s2 + $0x238] sm:$0xff] %v8933_v26  ;;  %11649 = vlog2.f32 %v7992_v32  ;;  %v7993_v24 = vadd.f32 1.0, %v11630_v49  ;;  %v7482_v19 = vmul.f32 1.442695, %v7052_v42  ;;  %v6733_v9 = vand.u32 2147483647, %v15175_v48 }
 0x7cf   : > { %v11632_v30 = vpop.eup %11631  ;;  %9255 = vst [vmem:[%s14908_s2 + $0x248] sm:$0xff] %v8935_v18  ;;  %v6383_v56 = vmax.f32 %v15065_v40, 0.0  ;;  %11651 = vlog2.f32 %v7994_v59  ;;  %v7486_v2 = vmul.f32 1.442695, %v7054_v45  ;;  %v15189_v44 = vadd.f32 %v5620_v28, %v14762_v46 }
 0x7d0   : > { %v11634_v15 = vpop.eup %11633  ;;  %v8383_v22 = vmul.f32 0.6931472, %v11632_v30  ;;  %11653 = vlog2.f32 %v7993_v24  ;;  %v7053_v62 = vsub.f32 0.0, %v6733_v9  ;;  %v15193_v12 = vadd.f32 %v14953_v57, %v14752_v20 }
 0x7d1   : > { %v11636_v7 = vpop.eup %11635  ;;  %v8387_v26 = vmul.f32 0.6931472, %v11634_v15  ;;  %11655 = vpow2.f32 %v7482_v19  ;;  %v6735_v40 = vand.u32 2147483647, %v15189_v44  ;;  %v15199_v32 = vadd.f32 %v5624_v36, %v14754_v58  ;;  %v15205_v15 = vpop.f32.mrf.mxu0 }
 0x7d2   : > { %v11638_v28 = vpop.eup %11637  ;;  %v8942_v42 = vadd.f32 %v8383_v22, %v6382_v29  ;;  %v7995_v53 = vadd.f32 1.0, %v11636_v7  ;;  %11657 = vpow2.f32 %v7486_v2  ;;  %v7484_v49 = vmul.f32 1.442695, %v7053_v62  ;;  %v5626_v29 = vpop.f32.mrf.mxu1  ;;  %v17498_v2 = vld [vmem:[#allocation5_spill] sm:$0xff] }
 0x7d3   : > { %v11640_v18 = vpop.eup %11639  ;;  %v8944_v57 = vadd.f32 %v8387_v26, %v6384_v37  ;;  %v8385_v59 = vmul.f32 0.6931472, %v11638_v28  ;;  %v6385_v45 = vmax.f32 %v15075_v14, 0.0  ;;  %v7055_v24 = vsub.f32 0.0, %v6735_v40  ;;  %6202 = vmatmul.mubr.bf16.gmra.mxu0 %v17498_v2 }
 0x7d4   : > { %v11642_v9 = vpop.eup %11641  ;;  %9262 = vst [vmem:[%s14908_s2 + $0x280] sm:$0xff] %v8942_v42  ;;  %v6392_v19 = vmax.f32 %v15093_v1, 0.0  ;;  %11659 = vlog2.f32 %v7995_v53  ;;  %v8002_v30 = vadd.f32 1.0, %v11640_v18  ;;  %v6742_v36 = vand.u32 2147483647, %v15193_v12  ;;  %6211 = vmatprep.mubr.bf16.mxu0 %v17478_v4 }
 0x7d5   : > { %v11644_v22 = vpop.eup %11643  ;;  %9264 = vst [vmem:[%s14908_s2 + $0x290] sm:$0xff] %v8944_v57  ;;  %v8943_v37 = vadd.f32 %v8385_v59, %v6383_v56  ;;  %v8004_v62 = vadd.f32 1.0, %v11642_v9  ;;  %11661 = vpow2.f32 %v7484_v49  ;;  %v7488_v14 = vmul.f32 1.442695, %v7055_v24  ;;  %v15223_v57 = vpop.f32.mrf.mxu0 }
 0x7d6   : > { %v11646_v7 = vpop.eup %11645  ;;  %11663 = vlog2.f32 %v8002_v30  ;;  %v8003_v1 = vadd.f32 1.0, %v11644_v22  ;;  %v7062_v26 = vsub.f32 0.0, %v6742_v36  ;;  %v6744_v40 = vand.u32 2147483647, %v15199_v32  ;;  %v5628_v9 = vpop.f32.mrf.mxu1 }
 0x7d7   : > { %9263 = vst [vmem:[%s14908_s2 + $0x288] sm:$0xff] %v8943_v37  ;;  %v8389_v28 = vmul.f32 0.6931472, %v11646_v7  ;;  %11665 = vlog2.f32 %v8004_v62  ;;  %v15214_v42 = vadd.f32 %v14968_v13, %v14760_v43  ;;  %v15217_v56 = vadd.f32 %v5626_v29, %v14762_v46 }
 0x7d8   : > { %11667 = vlog2.f32 %v8003_v1  ;;  %v7502_v53 = vmul.f32 1.442695, %v7062_v26  ;;  %v7064_v49 = vsub.f32 0.0, %v6744_v40  ;;  %v15221_v18 = vadd.f32 %v14983_v17, %v14752_v20  ;;  %v17500_v26 = vld [vmem:[#allocation6_spill] sm:$0xff] }
 0x7d9   : > { %v8945_v59 = vadd.f32 %v8389_v28, %v6385_v45  ;;  %v6394_v24 = vmax.f32 %v15100_v5, 0.0  ;;  %11669 = vpow2.f32 %v7488_v14  ;;  %v6743_v13 = vand.u32 2147483647, %v15214_v42 }
 0x7da   : > { %v11648_v30 = vpop.eup %11647  ;;  %v6393_v36 = vmax.f32 %v15112_v0, 0.0  ;;  %11671 = vpow2.f32 %v7502_v53  ;;  %v7506_v29 = vmul.f32 1.442695, %v7064_v49  ;;  %v6745_v2 = vand.u32 2147483647, %v15217_v56  ;;  %v15235_v0 = vpop.f32.mrf.mxu0 }
 0x7db   : > { %v11650_v22 = vpop.eup %11649  ;;  %9265 = vst [vmem:[%s14908_s2 + $0x298] sm:$0xff] %v8945_v59  ;;  %v6395_v17 = vmax.f32 %v15115_v8, 0.0  ;;  %v8005_v37 = vadd.f32 1.0, %v11648_v30  ;;  %v7063_v62 = vsub.f32 0.0, %v6743_v13  ;;  %v6752_v45 = vand.u32 2147483647, %v15221_v18  ;;  %6212 = vmatmul.mubr.bf16.gmra.mxu0 %v17500_v26  ;;  %v5630_v49 = vpop.f32.mrf.mxu1 }
 0x7dc   : > { %v11652_v5 = vpop.eup %11651  ;;  %v8403_v14 = vmul.f32 0.6931472, %v11650_v22  ;;  %11673 = vpow2.f32 %v7506_v29  ;;  %v7065_v7 = vsub.f32 0.0, %v6745_v2  ;;  %v15233_v1 = vadd.f32 %v5628_v9, %v14754_v58  ;;  %17499 = vst [vmem:[#allocation3_spill] sm:$0xff] %v15235_v0  ;;  %6221 = vmatprep.mubr.bf16.mxu0 %v17478_v4  ;;  %v15242_v26 = vpop.f32.mrf.mxu0 }
 0x7dd   : > { %v11654_v40 = vpop.eup %11653  ;;  %v8407_v28 = vmul.f32 0.6931472, %v11652_v5  ;;  %11675 = vlog2.f32 %v8005_v37  ;;  %v7504_v8 = vmul.f32 1.442695, %v7063_v62  ;;  %v7072_v53 = vsub.f32 0.0, %v6752_v45 }
 0x7de   : > { %v11656_v59 = vpop.eup %11655  ;;  %v8952_v13 = vadd.f32 %v8403_v14, %v6392_v19  ;;  %v8405_v30 = vmul.f32 0.6931472, %v11654_v40  ;;  %v6402_v9 = vmax.f32 %v15129_v60, 0.0  ;;  %v7508_v29 = vmul.f32 1.442695, %v7065_v7  ;;  %v5634_v7 = vpop.f32.mrf.mxu1 }
 0x7df   : > { %v11658_v2 = vpop.eup %11657  ;;  %v8954_v22 = vadd.f32 %v8407_v28, %v6394_v24  ;;  %v8012_v0 = vadd.f32 1.0, %v11656_v59  ;;  %11677 = vpow2.f32 %v7504_v8  ;;  %v7522_v5 = vmul.f32 1.442695, %v7072_v53 }
 0x7e0   : > { %9272 = vst [vmem:[%s14908_s2 + $0x2d0] sm:$0xff] %v8952_v13  ;;  %v8953_v37 = vadd.f32 %v8405_v30, %v6393_v36  ;;  %v8014_v62 = vadd.f32 1.0, %v11658_v2  ;;  %11679 = vpow2.f32 %v7508_v29  ;;  %v6754_v45 = vand.u32 2147483647, %v15233_v1  ;;  %v17501_v2 = vld [vmem:[#allocation7_spill] sm:$0xff] }
 0x7e1   : > { %v11660_v19 = vpop.eup %11659  ;;  %9274 = vst [vmem:[%s14908_s2 + $0x2e0] sm:$0xff] %v8954_v22  ;;  %v6404_v14 = vmax.f32 %v15132_v16, 0.0  ;;  %11681 = vlog2.f32 %v8012_v0  ;;  %v15248_v60 = vadd.f32 %v14992_v3, %v14760_v43  ;;  %v15251_v24 = vadd.f32 %v5630_v49, %v14762_v46 }
 0x7e2   : > { %v11662_v36 = vpop.eup %11661  ;;  %9273 = vst [vmem:[%s14908_s2 + $0x2d8] sm:$0xff] %v8953_v37  ;;  %v8409_v40 = vmul.f32 0.6931472, %v11660_v19  ;;  %v6403_v28 = vmax.f32 %v15137_v54, 0.0  ;;  %11683 = vlog2.f32 %v8014_v62  ;;  %v7074_v8 = vsub.f32 0.0, %v6754_v45  ;;  %v15263_v54 = vpop.f32.mrf.mxu0 }
 0x7e3   : > { %v11664_v53 = vpop.eup %11663  ;;  %v8013_v59 = vadd.f32 1.0, %v11662_v36  ;;  %11685 = vpow2.f32 %v7522_v5  ;;  %v6753_v16 = vand.u32 2147483647, %v15248_v60  ;;  %v15258_v3 = vadd.f32 %v14999_v39, %v14752_v20  ;;  %6222 = vmatmul.mubr.bf16.gmra.mxu0 %v17501_v2 }
 0x7e4   : > { %v11666_v0 = vpop.eup %11665  ;;  %v8955_v49 = vadd.f32 %v8409_v40, %v6395_v17  ;;  %v8423_v13 = vmul.f32 0.6931472, %v11664_v53  ;;  %v7526_v30 = vmul.f32 1.442695, %v7074_v8  ;;  %v15261_v29 = vadd.f32 %v5634_v7, %v14754_v58  ;;  %6231 = vmatprep.mubr.bf16.mxu0 %v17478_v4 }
 0x7e5   : > { %v11668_v22 = vpop.eup %11667  ;;  %v8427_v5 = vmul.f32 0.6931472, %v11666_v0  ;;  %11687 = vlog2.f32 %v8013_v59  ;;  %v7073_v37 = vsub.f32 0.0, %v6753_v16  ;;  %v6755_v62 = vand.u32 2147483647, %v15251_v24  ;;  %v5636_v59 = vpop.f32.mrf.mxu1 }
 0x7e6   : > { %v11670_v39 = vpop.eup %11669  ;;  %9275 = vst [vmem:[%s14908_s2 + $0x2e8] sm:$0xff] %v8955_v49  ;;  %v8962_v17 = vadd.f32 %v8423_v13, %v6402_v9  ;;  %v8425_v45 = vmul.f32 0.6931472, %v11668_v22  ;;  %v6405_v19 = vmax.f32 %v15149_v47, 0.0  ;;  %11689 = vpow2.f32 %v7526_v30  ;;  %v15273_v9 = vpop.f32.mrf.mxu0 }
 0x7e7   : > { %v11672_v7 = vpop.eup %11671  ;;  %v8964_v36 = vadd.f32 %v8427_v5, %v6404_v14  ;;  %v8015_v40 = vadd.f32 1.0, %v11670_v39  ;;  %v7524_v8 = vmul.f32 1.442695, %v7073_v37  ;;  %v7075_v53 = vsub.f32 0.0, %v6755_v62 }
 0x7e8   : > { %9282 = vst [vmem:[%s14908_s2 + $0x320] sm:$0xff] %v8962_v17  ;;  %v8963_v16 = vadd.f32 %v8425_v45, %v6403_v28  ;;  %v6412_v0 = vmax.f32 %v15161_v33, 0.0  ;;  %v8022_v2 = vadd.f32 1.0, %v11672_v7  ;;  %v6762_v49 = vand.u32 2147483647, %v15258_v3 }
 0x7e9   : > { %v11674_v13 = vpop.eup %11673  ;;  %9284 = vst [vmem:[%s14908_s2 + $0x330] sm:$0xff] %v8964_v36  ;;  %11691 = vlog2.f32 %v8015_v40  ;;  %v7528_v47 = vmul.f32 1.442695, %v7075_v53  ;;  %v6764_v14 = vand.u32 2147483647, %v15261_v29  ;;  %v15279_v30 = vadd.f32 %v15012_v34, %v14760_v43  ;;  %v5638_v36 = vpop.f32.mrf.mxu1  ;;  %v17502_v53 = vld [vmem:[#allocation8_spill] sm:$0xff] }
 0x7ea   : > { %v11676_v22 = vpop.eup %11675  ;;  %9283 = vst [vmem:[%s14908_s2 + $0x328] sm:$0xff] %v8963_v16  ;;  %11693 = vlog2.f32 %v8022_v2  ;;  %v8024_v28 = vadd.f32 1.0, %v11674_v13  ;;  %v7082_v33 = vsub.f32 0.0, %v6762_v49  ;;  %v15283_v5 = vadd.f32 %v5636_v59, %v14762_v46  ;;  %v15288_v40 = vpop.f32.mrf.mxu0 }
 0x7eb   : > { %v8429_v37 = vmul.f32 0.6931472, %v11676_v22  ;;  %v6414_v62 = vmax.f32 %v15164_v41, 0.0  ;;  %11695 = vpow2.f32 %v7524_v8  ;;  %v7084_v39 = vsub.f32 0.0, %v6764_v14  ;;  %6232 = vmatmul.mubr.bf16.gmra.mxu0 %v17502_v53 }
 0x7ec   : > { %v11678_v17 = vpop.eup %11677  ;;  %v6413_v45 = vmax.f32 %v15175_v48, 0.0  ;;  %11697 = vlog2.f32 %v8024_v28  ;;  %v7542_v7 = vmul.f32 1.442695, %v7082_v33  ;;  %v6763_v34 = vand.u32 2147483647, %v15279_v30  ;;  %6241 = vmatprep.mubr.bf16.mxu0 %v17478_v4 }
 0x7ed   : > { %v11680_v59 = vpop.eup %11679  ;;  %v8965_v16 = vadd.f32 %v8429_v37, %v6405_v19  ;;  %v8023_v2 = vadd.f32 1.0, %v11678_v17  ;;  %11699 = vpow2.f32 %v7528_v47  ;;  %v7546_v41 = vmul.f32 1.442695, %v7084_v39 }
 0x7ee   : > { %v11682_v8 = vpop.eup %11681  ;;  %v8025_v49 = vadd.f32 1.0, %v11680_v59  ;;  %11701 = vpow2.f32 %v7542_v7  ;;  %v7083_v48 = vsub.f32 0.0, %v6763_v34  ;;  %v6765_v13 = vand.u32 2147483647, %v15283_v5 }
 0x7ef   : > { %v11684_v14 = vpop.eup %11683  ;;  %9285 = vst [vmem:[%s14908_s2 + $0x338] sm:$0xff] %v8965_v16  ;;  %v8443_v22 = vmul.f32 0.6931472, %v11682_v8  ;;  %11703 = vlog2.f32 %v8023_v2  ;;  %v15296_v28 = vadd.f32 %v15014_v61, %v14752_v20  ;;  %v15299_v19 = vadd.f32 %v5638_v36, %v14754_v58  ;;  %v5640_v36 = vpop.f32.mrf.mxu1 }
 0x7f0   : > { %v11686_v47 = vpop.eup %11685  ;;  %v8447_v33 = vmul.f32 0.6931472, %v11684_v14  ;;  %11705 = vlog2.f32 %v8025_v49  ;;  %v7544_v37 = vmul.f32 1.442695, %v7083_v48  ;;  %v7085_v39 = vsub.f32 0.0, %v6765_v13  ;;  %v15306_v48 = vpop.f32.mrf.mxu0 }
 0x7f1   : > { %v8972_v17 = vadd.f32 %v8443_v22, %v6412_v0  ;;  %v6415_v7 = vmax.f32 %v15189_v44, 0.0  ;;  %v8032_v34 = vadd.f32 1.0, %v11686_v47  ;;  %11707 = vpow2.f32 %v7546_v41 }
 0x7f2   : > { %v11688_v53 = vpop.eup %11687  ;;  %v8974_v59 = vadd.f32 %v8447_v33, %v6414_v62  ;;  %11709 = vpow2.f32 %v7544_v37  ;;  %v7548_v61 = vmul.f32 1.442695, %v7085_v39  ;;  %v6772_v16 = vand.u32 2147483647, %v15296_v28 }
 0x7f3   : > { %v11690_v2 = vpop.eup %11689  ;;  %9292 = vst [vmem:[%s14908_s2 + $0x370] sm:$0xff] %v8972_v17  ;;  %v8445_v8 = vmul.f32 0.6931472, %v11688_v53  ;;  %v6422_v49 = vmax.f32 %v15193_v12, 0.0  ;;  %11711 = vlog2.f32 %v8032_v34  ;;  %v6774_v0 = vand.u32 2147483647, %v15299_v19 }
 0x7f4   : > { %9294 = vst [vmem:[%s14908_s2 + $0x380] sm:$0xff] %v8974_v59  ;;  %v8034_v44 = vadd.f32 1.0, %v11690_v2  ;;  %11713 = vpow2.f32 %v7548_v61  ;;  %v7092_v62 = vsub.f32 0.0, %v6772_v16  ;;  %v15311_v41 = vadd.f32 %v15026_v38, %v14760_v43  ;;  %v15325_v59 = vpop.f32.mrf.mxu0 }
 0x7f5   : > { %v8973_v13 = vadd.f32 %v8445_v8, %v6413_v45  ;;  %v7094_v14 = vsub.f32 0.0, %v6774_v0  ;;  %v15314_v22 = vadd.f32 %v5640_v36, %v14762_v46  ;;  %v15318_v12 = vadd.f32 %v15033_v52, %v14752_v20  ;;  %v5644_v36 = vpop.f32.mrf.mxu1 }
 0x7f6   : > { %v11692_v47 = vpop.eup %11691  ;;  %v6424_v33 = vmax.f32 %v15199_v32, 0.0  ;;  %11715 = vlog2.f32 %v8034_v44  ;;  %v7562_v37 = vmul.f32 1.442695, %v7092_v62  ;;  %v6773_v39 = vand.u32 2147483647, %v15311_v41 }
 0x7f7   : > { %v11694_v17 = vpop.eup %11693  ;;  %9293 = vst [vmem:[%s14908_s2 + $0x378] sm:$0xff] %v8973_v13  ;;  %v8449_v38 = vmul.f32 0.6931472, %v11692_v47  ;;  %v6423_v45 = vmax.f32 %v15214_v42, 0.0  ;;  %v6425_v34 = vmax.f32 %v15217_v56, 0.0 }
 0x7f8   : > { %v7566_v53 = vmul.f32 1.442695, %v7094_v14  ;;  %v11696_v61 = vpop.eup %11695  ;;  %v8463_v52 = vmul.f32 0.6931472, %v11694_v17  ;;  %11717 = vpow2.f32 %v7562_v37  ;;  %v7093_v16 = vsub.f32 0.0, %v6773_v39 }
 0x7f9   : > { %v6775_v32 = vand.u32 2147483647, %v15314_v22  ;;  %v11698_v2 = vpop.eup %11697  ;;  %v8975_v8 = vadd.f32 %v8449_v38, %v6415_v7  ;;  %v8033_v0 = vadd.f32 1.0, %v11696_v61  ;;  %v6782_v42 = vand.u32 2147483647, %v15318_v12  ;;  %v15333_v7 = vpop.f32.mrf.mxu0 }
 0x7fa   : > { %11719 = vpow2.f32 %v7566_v53  ;;  %v11700_v44 = vpop.eup %11699  ;;  %v8982_v56 = vadd.f32 %v8463_v52, %v6422_v49  ;;  %v8467_v62 = vmul.f32 0.6931472, %v11698_v2  ;;  %v7564_v13 = vmul.f32 1.442695, %v7093_v16  ;;  %v5646_v52 = vpop.f32.mrf.mxu1 }
 0x7fb   : > { %v7095_v14 = vsub.f32 0.0, %v6775_v32  ;;  %v11702_v47 = vpop.eup %11701  ;;  %9295 = vst [vmem:[%s14908_s2 + $0x388] sm:$0xff] %v8975_v8  ;;  %11721 = vlog2.f32 %v8033_v0  ;;  %v8035_v37 = vadd.f32 1.0, %v11700_v44  ;;  %v7102_v39 = vsub.f32 0.0, %v6782_v42 }
 0x7fc   : > { %v15331_v17 = vadd.f32 %v5644_v36, %v14754_v58  ;;  %v11704_v38 = vpop.eup %11703  ;;  %9302 = vst [vmem:[%s14908_s2 + $0x3c0] sm:$0xff] %v8982_v56  ;;  %v8984_v53 = vadd.f32 %v8467_v62, %v6424_v33  ;;  %v8042_v61 = vadd.f32 1.0, %v11702_v47  ;;  %11723 = vpow2.f32 %v7564_v13 }
 0x7fd   : > { %v7568_v49 = vmul.f32 1.442695, %v7095_v14  ;;  %v11706_v16 = vpop.eup %11705  ;;  %v8465_v32 = vmul.f32 0.6931472, %v11704_v38  ;;  %v6432_v2 = vmax.f32 %v15221_v18, 0.0  ;;  %11725 = vlog2.f32 %v8035_v37  ;;  %v15346_v18 = vpop.f32.mrf.mxu0  ;;  %v17503_v14 = vld [vmem:[#allocation9_spill] sm:$0xff] }
 0x7fe   : > { %v7582_v8 = vmul.f32 1.442695, %v7102_v39  ;;  %v11708_v0 = vpop.eup %11707  ;;  %9304 = vst [vmem:[%s14908_s2 + $0x3d0] sm:$0xff] %v8984_v53  ;;  %v8469_v42 = vmul.f32 0.6931472, %v11706_v16  ;;  %11727 = vlog2.f32 %v8042_v61  ;;  %v15341_v33 = vadd.f32 %v15041_v50, %v14760_v43  ;;  %6242 = vmatmul.mubr.bf16.gmra.mxu0 %v17503_v14 }
 0x7ff   : > { %v6784_v36 = vand.u32 2147483647, %v15331_v17  ;;  %v11710_v44 = vpop.eup %11709  ;;  %v8983_v56 = vadd.f32 %v8465_v32, %v6423_v45  ;;  %v8044_v62 = vadd.f32 1.0, %v11708_v0  ;;  %11729 = vpow2.f32 %v7568_v49  ;;  %6251 = vmatprep.mubr.bf16.mxu0 %v17478_v4  ;;  %v5648_v49 = vpop.f32.mrf.mxu1 }
 0x800   : > { %v15344_v13 = vadd.f32 %v5646_v52, %v14762_v46  ;;  %v11712_v47 = vpop.eup %11711  ;;  %v8985_v37 = vadd.f32 %v8469_v42, %v6425_v34  ;;  %v8043_v39 = vadd.f32 1.0, %v11710_v44  ;;  %11731 = vpow2.f32 %v7582_v8 }
 0x801   : > { %v7104_v38 = vsub.f32 0.0, %v6784_v36  ;;  %v11714_v50 = vpop.eup %11713  ;;  %9303 = vst [vmem:[%s14908_s2 + $0x3c8] sm:$0xff] %v8983_v56  ;;  %v8483_v45 = vmul.f32 0.6931472, %v11712_v47  ;;  %v6434_v53 = vmax.f32 %v15233_v1, 0.0  ;;  %11733 = vlog2.f32 %v8044_v62 }
 0x802   : > { %v6783_v61 = vand.u32 2147483647, %v15341_v33  ;;  %9305 = vst [vmem:[%s14908_s2 + $0x3d8] sm:$0xff] %v8985_v37  ;;  %v6433_v52 = vmax.f32 %v15248_v60, 0.0  ;;  %11735 = vlog2.f32 %v8043_v39  ;;  %v8045_v34 = vadd.f32 1.0, %v11714_v50  ;;  %v5650_v50 = vpop.f32.mrf.mxu1 }
 0x803   : > { %v7586_v16 = vmul.f32 1.442695, %v7104_v38  ;;  %v11716_v32 = vpop.eup %11715  ;;  %v8992_v8 = vadd.f32 %v8483_v45, %v6432_v2  ;;  %v6785_v42 = vand.u32 2147483647, %v15344_v13  ;;  %v15358_v36 = vadd.f32 %v15046_v21, %v14752_v20 }
 0x804   : > { %v7103_v0 = vsub.f32 0.0, %v6783_v61  ;;  %v8487_v1 = vmul.f32 0.6931472, %v11716_v32  ;;  %11737 = vlog2.f32 %v8045_v34  ;;  %v15361_v44 = vadd.f32 %v5648_v49, %v14754_v58  ;;  %v15372_v49 = vpop.f32.mrf.mxu0 }
 0x805   : > { %v15365_v60 = vadd.f32 %v15060_v35, %v14760_v43  ;;  %v11718_v56 = vpop.eup %11717  ;;  %9312 = vst [vmem:[%s14908_s2 + $0x410] sm:$0xff] %v8992_v8  ;;  %v6435_v2 = vmax.f32 %v15251_v24, 0.0  ;;  %11739 = vpow2.f32 %v7586_v16  ;;  %v7105_v14 = vsub.f32 0.0, %v6785_v42  ;;  %17504 = vst [vmem:[#allocation4_spill] sm:$0xff] %v15372_v49 }
 0x806   : > { %v7584_v62 = vmul.f32 1.442695, %v7103_v0  ;;  %v8994_v21 = vadd.f32 %v8487_v1, %v6434_v53  ;;  %v6442_v37 = vmax.f32 %v15258_v3, 0.0  ;;  %v8052_v39 = vadd.f32 1.0, %v11718_v56  ;;  %v15381_v49 = vpop.f32.mrf.mxu0 }
 0x807   : > { %v11720_v47 = vpop.eup %11719  ;;  %v6792_v38 = vand.u32 2147483647, %v15358_v36  ;;  %v7588_v35 = vmul.f32 1.442695, %v7105_v14  ;;  %v6794_v61 = vand.u32 2147483647, %v15361_v44  ;;  %v15378_v0 = vadd.f32 %v5650_v50, %v14762_v46 }
 0x808   : > { %v8054_v45 = vadd.f32 1.0, %v11720_v47  ;;  %11741 = vpow2.f32 %v7584_v62  ;;  %v11722_v24 = vpop.eup %11721  ;;  %9314 = vst [vmem:[%s14908_s2 + $0x420] sm:$0xff] %v8994_v21  ;;  %v6444_v34 = vmax.f32 %v15261_v29, 0.0  ;;  %v6793_v53 = vand.u32 2147483647, %v15365_v60 }
 0x809   : > { %11743 = vlog2.f32 %v8052_v39  ;;  %v7112_v16 = vsub.f32 0.0, %v6792_v38  ;;  %v11724_v3 = vpop.eup %11723  ;;  %v8485_v32 = vmul.f32 0.6931472, %v11722_v24  ;;  %v7114_v8 = vsub.f32 0.0, %v6794_v61  ;;  %v5654_v38 = vpop.f32.mrf.mxu1 }
 0x80a   : > { %11745 = vlog2.f32 %v8054_v45  ;;  %v11726_v42 = vpop.eup %11725  ;;  %v8053_v1 = vadd.f32 1.0, %v11724_v3  ;;  %v7113_v62 = vsub.f32 0.0, %v6793_v53  ;;  %v6443_v21 = vmax.f32 %v15279_v30, 0.0 }
 0x80b   : > { %11747 = vpow2.f32 %v7588_v35  ;;  %v7602_v56 = vmul.f32 1.442695, %v7112_v16  ;;  %v11728_v14 = vpop.eup %11727  ;;  %v8993_v47 = vadd.f32 %v8485_v32, %v6433_v52  ;;  %v8489_v29 = vmul.f32 0.6931472, %v11726_v42  ;;  %v17505_v52 = vld [vmem:[#allocation16_spill] sm:$0xff] }
 0x80c   : > { %v7606_v39 = vmul.f32 1.442695, %v7114_v8  ;;  %v11730_v45 = vpop.eup %11729  ;;  %v8503_v61 = vmul.f32 0.6931472, %v11728_v14  ;;  %11749 = vlog2.f32 %v8053_v1  ;;  %v7604_v50 = vmul.f32 1.442695, %v7113_v62 }
 0x80d   : > { %v6795_v24 = vand.u32 2147483647, %v15378_v0  ;;  %v11732_v35 = vpop.eup %11731  ;;  %9313 = vst [vmem:[%s14908_s2 + $0x418] sm:$0xff] %v8993_v47  ;;  %v8995_v16 = vadd.f32 %v8489_v29, %v6435_v2  ;;  %v8055_v53 = vadd.f32 1.0, %v11730_v45  ;;  %11751 = vpow2.f32 %v7602_v56  ;;  %v5656_v47 = vpop.f32.mrf.mxu1 }
 0x80e   : > { %v15387_v30 = vadd.f32 %v17505_v52, %v14752_v20  ;;  %v11734_v3 = vpop.eup %11733  ;;  %v9002_v32 = vadd.f32 %v8503_v61, %v6442_v37  ;;  %v8062_v8 = vadd.f32 1.0, %v11732_v35  ;;  %11753 = vpow2.f32 %v7606_v39  ;;  %v15392_v29 = vpop.f32.mrf.mxu0 }
 0x80f   : > { %v7115_v42 = vsub.f32 0.0, %v6795_v24  ;;  %v11736_v14 = vpop.eup %11735  ;;  %9315 = vst [vmem:[%s14908_s2 + $0x428] sm:$0xff] %v8995_v16  ;;  %v8507_v1 = vmul.f32 0.6931472, %v11734_v3  ;;  %v6445_v62 = vmax.f32 %v15283_v5, 0.0  ;;  %11755 = vlog2.f32 %v8055_v53  ;;  %v17506_v5 = vld [vmem:[#allocation17_spill] sm:$0xff] }
 0x810   : > { %v6802_v2 = vand.u32 2147483647, %v15387_v30  ;;  %9322 = vst [vmem:[%s14908_s2 + $0x460] sm:$0xff] %v9002_v32  ;;  %v8505_v56 = vmul.f32 0.6931472, %v11736_v14  ;;  %11757 = vlog2.f32 %v8062_v8  ;;  %v15396_v37 = vadd.f32 %v5654_v38, %v14754_v58  ;;  %v17507_v14 = vld [vmem:[#allocation10_spill] sm:$0xff] }
 0x811   : > { %v7608_v45 = vmul.f32 1.442695, %v7115_v42  ;;  %v11738_v39 = vpop.eup %11737  ;;  %v9004_v61 = vadd.f32 %v8507_v1, %v6444_v34  ;;  %11759 = vpow2.f32 %v7604_v50  ;;  %v15400_v35 = vadd.f32 %v17506_v5, %v14760_v43  ;;  %v5658_v50 = vpop.f32.mrf.mxu1 }
 0x812   : > { %v7122_v24 = vsub.f32 0.0, %v6802_v2  ;;  %v11740_v16 = vpop.eup %11739  ;;  %v9003_v53 = vadd.f32 %v8505_v56, %v6443_v21  ;;  %v8509_v52 = vmul.f32 0.6931472, %v11738_v39  ;;  %v6452_v3 = vmax.f32 %v15296_v28, 0.0  ;;  %v15406_v42 = vpop.f32.mrf.mxu0  ;;  %6252 = vmatmul.mubr.bf16.gmra.mxu0 %v17507_v14 }
 0x813   : > { %11761 = vpow2.f32 %v7608_v45  ;;  %9324 = vst [vmem:[%s14908_s2 + $0x470] sm:$0xff] %v9004_v61  ;;  %v6454_v32 = vmax.f32 %v15299_v19, 0.0  ;;  %v8064_v38 = vadd.f32 1.0, %v11740_v16  ;;  %v6804_v34 = vand.u32 2147483647, %v15396_v37  ;;  %6261 = vmatprep.mubr.bf16.mxu0 %v17478_v4 }
 0x814   : > { %v7622_v8 = vmul.f32 1.442695, %v7122_v24  ;;  %9323 = vst [vmem:[%s14908_s2 + $0x468] sm:$0xff] %v9003_v53  ;;  %v9005_v21 = vadd.f32 %v8509_v52, %v6445_v62  ;;  %v6453_v2 = vmax.f32 %v15311_v41, 0.0  ;;  %v6803_v28 = vand.u32 2147483647, %v15400_v35 }
 0x815   : > { %v11742_v1 = vpop.eup %11741  ;;  %v15413_v56 = vadd.f32 %v5656_v47, %v14762_v46  ;;  %11763 = vlog2.f32 %v8064_v38  ;;  %v7124_v39 = vsub.f32 0.0, %v6804_v34  ;;  %v15418_v61 = vadd.f32 %v15083_v11, %v14752_v20 }
 0x816   : > { %v11744_v19 = vpop.eup %11743  ;;  %v8063_v45 = vadd.f32 1.0, %v11742_v1  ;;  %9325 = vst [vmem:[%s14908_s2 + $0x478] sm:$0xff] %v9005_v21  ;;  %11765 = vpow2.f32 %v7622_v8  ;;  %v7123_v41 = vsub.f32 0.0, %v6803_v28  ;;  %v15422_v5 = vadd.f32 %v5658_v50, %v14754_v58  ;;  %v5660_v28 = vpop.f32.mrf.mxu1 }
 0x817   : > { %v11746_v24 = vpop.eup %11745  ;;  %v8523_v62 = vmul.f32 0.6931472, %v11744_v19  ;;  %v7626_v53 = vmul.f32 1.442695, %v7124_v39  ;;  %v6805_v52 = vand.u32 2147483647, %v15413_v56 }
 0x818   : > { %v11748_v47 = vpop.eup %11747  ;;  %v8527_v16 = vmul.f32 0.6931472, %v11746_v24  ;;  %11767 = vlog2.f32 %v8063_v45  ;;  %v6455_v34 = vmax.f32 %v15314_v22, 0.0  ;;  %v7624_v14 = vmul.f32 1.442695, %v7123_v41 }
 0x819   : > { %v9012_v38 = vadd.f32 %v8523_v62, %v6452_v3  ;;  %v8065_v11 = vadd.f32 1.0, %v11748_v47  ;;  %v11750_v1 = vpop.eup %11749  ;;  %11769 = vpow2.f32 %v7626_v53  ;;  %v7125_v8 = vsub.f32 0.0, %v6805_v52 }
 0x81a   : > { %v9014_v21 = vadd.f32 %v8527_v16, %v6454_v32  ;;  %v6812_v50 = vand.u32 2147483647, %v15418_v61  ;;  %v11752_v19 = vpop.eup %11751  ;;  %v8525_v24 = vmul.f32 0.6931472, %v11750_v1  ;;  %v6462_v45 = vmax.f32 %v15318_v12, 0.0 }
 0x81b   : > { %9332 = vst [vmem:[%s14908_s2 + $0x4b0] sm:$0xff] %v9012_v38  ;;  %11771 = vlog2.f32 %v8065_v11  ;;  %v6814_v3 = vand.u32 2147483647, %v15422_v5  ;;  %v11754_v39 = vpop.eup %11753  ;;  %v8072_v22 = vadd.f32 1.0, %v11752_v19  ;;  %v7628_v62 = vmul.f32 1.442695, %v7125_v8 }
 0x81c   : > { %9334 = vst [vmem:[%s14908_s2 + $0x4c0] sm:$0xff] %v9014_v21  ;;  %11773 = vpow2.f32 %v7624_v14  ;;  %v7132_v32 = vsub.f32 0.0, %v6812_v50  ;;  %v11756_v41 = vpop.eup %11755  ;;  %v9013_v47 = vadd.f32 %v8525_v24, %v6453_v2  ;;  %v8074_v16 = vadd.f32 1.0, %v11754_v39  ;;  %v5664_v21 = vpop.f32.mrf.mxu1 }
 0x81d   : > { %v7134_v53 = vsub.f32 0.0, %v6814_v3  ;;  %v15433_v52 = vadd.f32 %v15087_v23, %v14760_v43  ;;  %v11758_v38 = vpop.eup %11757  ;;  %v8529_v12 = vmul.f32 0.6931472, %v11756_v41  ;;  %11775 = vlog2.f32 %v8072_v22  ;;  %v15440_v50 = vpop.f32.mrf.mxu0 }
 0x81e   : > { %v7642_v11 = vmul.f32 1.442695, %v7132_v32  ;;  %v15436_v1 = vadd.f32 %v5660_v28, %v14762_v46  ;;  %v11760_v19 = vpop.eup %11759  ;;  %9333 = vst [vmem:[%s14908_s2 + $0x4b8] sm:$0xff] %v9013_v47  ;;  %v8543_v14 = vmul.f32 0.6931472, %v11758_v38  ;;  %v6464_v2 = vmax.f32 %v15331_v17, 0.0 }
 0x81f   : > { %11777 = vlog2.f32 %v8074_v16  ;;  %v7646_v8 = vmul.f32 1.442695, %v7134_v53  ;;  %v9015_v24 = vadd.f32 %v8529_v12, %v6455_v34  ;;  %v8073_v3 = vadd.f32 1.0, %v11760_v19  ;;  %v5666_v16 = vpop.f32.mrf.mxu1  ;;  %v15459_v53 = vpop.f32.mrf.mxu0 }
 0x820   : > { %v11762_v23 = vpop.eup %11761  ;;  %11779 = vpow2.f32 %v7628_v62  ;;  %v6813_v39 = vand.u32 2147483647, %v15433_v52  ;;  %v9022_v28 = vadd.f32 %v8543_v14, %v6462_v45  ;;  %v6463_v22 = vmax.f32 %v15341_v33, 0.0 }
 0x821   : > { %v8075_v32 = vadd.f32 1.0, %v11762_v23  ;;  %11781 = vpow2.f32 %v7642_v11  ;;  %9335 = vst [vmem:[%s14908_s2 + $0x4c8] sm:$0xff] %v9015_v24  ;;  %v6815_v17 = vand.u32 2147483647, %v15436_v1  ;;  %v15448_v47 = vadd.f32 %v15095_v31, %v14752_v20 }
 0x822   : > { %11783 = vlog2.f32 %v8073_v3  ;;  %v7133_v41 = vsub.f32 0.0, %v6813_v39  ;;  %v11764_v34 = vpop.eup %11763  ;;  %9342 = vst [vmem:[%s14908_s2 + $0x500] sm:$0xff] %v9022_v28  ;;  %v6465_v62 = vmax.f32 %v15344_v13, 0.0  ;;  %v15453_v45 = vadd.f32 %v5664_v21, %v14754_v58 }
 0x823   : > { %11785 = vlog2.f32 %v8075_v32  ;;  %v15457_v33 = vadd.f32 %v15104_v10, %v14760_v43  ;;  %v11766_v38 = vpop.eup %11765  ;;  %v8547_v12 = vmul.f32 0.6931472, %v11764_v34  ;;  %v7135_v11 = vsub.f32 0.0, %v6815_v17 }
 0x824   : > { %11787 = vpow2.f32 %v7646_v8  ;;  %v7644_v31 = vmul.f32 1.442695, %v7133_v41  ;;  %v6472_v14 = vmax.f32 %v15358_v36, 0.0  ;;  %v8082_v13 = vadd.f32 1.0, %v11766_v38  ;;  %v15468_v41 = vpop.f32.mrf.mxu0 }
 0x825   : > { %v11768_v19 = vpop.eup %11767  ;;  %v6822_v23 = vand.u32 2147483647, %v15448_v47  ;;  %v15464_v21 = vadd.f32 %v5666_v16, %v14762_v46  ;;  %v9024_v24 = vadd.f32 %v8547_v12, %v6464_v2  ;;  %v7648_v3 = vmul.f32 1.442695, %v7135_v11 }
 0x826   : > { %v8545_v10 = vmul.f32 0.6931472, %v11768_v19  ;;  %11789 = vpow2.f32 %v7644_v31  ;;  %v11770_v39 = vpop.eup %11769  ;;  %v6474_v28 = vmax.f32 %v15361_v44, 0.0  ;;  %v6824_v32 = vand.u32 2147483647, %v15453_v45 }
 0x827   : > { %11791 = vlog2.f32 %v8082_v13  ;;  %v7142_v8 = vsub.f32 0.0, %v6822_v23  ;;  %9344 = vst [vmem:[%s14908_s2 + $0x510] sm:$0xff] %v9024_v24  ;;  %v8084_v34 = vadd.f32 1.0, %v11770_v39  ;;  %v6823_v2 = vand.u32 2147483647, %v15457_v33  ;;  %v5668_v23 = vpop.f32.mrf.mxu1  ;;  %v15479_v39 = vpop.f32.mrf.mxu0 }
 0x828   : > { %v11772_v36 = vpop.eup %11771  ;;  %v9023_v17 = vadd.f32 %v8545_v10, %v6463_v22  ;;  %11793 = vpow2.f32 %v7648_v3  ;;  %v6473_v12 = vmax.f32 %v15365_v60, 0.0  ;;  %v7144_v44 = vsub.f32 0.0, %v6824_v32  ;;  %v17508_v60 = vld [vmem:[#allocation11_spill] sm:$0xff] }
 0x829   : > { %v11774_v16 = vpop.eup %11773  ;;  %v8549_v38 = vmul.f32 0.6931472, %v11772_v36  ;;  %v7662_v31 = vmul.f32 1.442695, %v7142_v8  ;;  %11795 = vlog2.f32 %v8084_v34  ;;  %v7143_v19 = vsub.f32 0.0, %v6823_v2  ;;  %6262 = vmatmul.mubr.bf16.gmra.mxu0 %v17508_v60 }
 0x82a   : > { %9343 = vst [vmem:[%s14908_s2 + $0x508] sm:$0xff] %v9023_v17  ;;  %v8083_v11 = vadd.f32 1.0, %v11774_v16  ;;  %v6825_v13 = vand.u32 2147483647, %v15464_v21  ;;  %v11776_v24 = vpop.eup %11775  ;;  %v7666_v10 = vmul.f32 1.442695, %v7144_v44  ;;  %v15477_v3 = vadd.f32 %v15117_v63, %v14752_v20  ;;  %6271 = vmatprep.mubr.bf16.mxu0 %v17478_v4 }
 0x82b   : > { %v9025_v22 = vadd.f32 %v8549_v38, %v6465_v62  ;;  %11797 = vpow2.f32 %v7662_v31  ;;  %v8563_v32 = vmul.f32 0.6931472, %v11776_v24  ;;  %v7664_v36 = vmul.f32 1.442695, %v7143_v19 }
 0x82c   : > { %v11778_v8 = vpop.eup %11777  ;;  %11799 = vlog2.f32 %v8083_v11  ;;  %v7145_v17 = vsub.f32 0.0, %v6825_v13  ;;  %v6475_v2 = vmax.f32 %v15378_v0, 0.0  ;;  %v6832_v63 = vand.u32 2147483647, %v15477_v3  ;;  %v5670_v11 = vpop.f32.mrf.mxu1 }
 0x82d   : > { %v11780_v34 = vpop.eup %11779  ;;  %9345 = vst [vmem:[%s14908_s2 + $0x518] sm:$0xff] %v9025_v22  ;;  %v8567_v62 = vmul.f32 0.6931472, %v11778_v8  ;;  %11801 = vpow2.f32 %v7666_v10  ;;  %v9032_v38 = vadd.f32 %v8563_v32, %v6472_v14  ;;  %v15487_v22 = vadd.f32 %v5668_v23, %v14754_v58 }
 0x82e   : > { %v11782_v16 = vpop.eup %11781  ;;  %v8085_v31 = vadd.f32 1.0, %v11780_v34  ;;  %11803 = vpow2.f32 %v7664_v36  ;;  %v7668_v44 = vmul.f32 1.442695, %v7145_v17  ;;  %v7152_v60 = vsub.f32 0.0, %v6832_v63 }
 0x82f   : > { %v11784_v19 = vpop.eup %11783  ;;  %v9034_v13 = vadd.f32 %v8567_v62, %v6474_v28  ;;  %v8092_v24 = vadd.f32 1.0, %v11782_v16  ;;  %9352 = vst [vmem:[%s14908_s2 + $0x550] sm:$0xff] %v9032_v38  ;;  %v6482_v10 = vmax.f32 %v15387_v30, 0.0  ;;  %v15493_v14 = vadd.f32 %v15124_v25, %v14760_v43  ;;  %v15500_v62 = vpop.f32.mrf.mxu0 }
 0x830   : > { %v11786_v8 = vpop.eup %11785  ;;  %v8565_v0 = vmul.f32 0.6931472, %v11784_v19  ;;  %11805 = vlog2.f32 %v8085_v31  ;;  %v7682_v28 = vmul.f32 1.442695, %v7152_v60  ;;  %v15497_v17 = vadd.f32 %v5670_v11, %v14762_v46  ;;  %v5674_v31 = vpop.f32.mrf.mxu1 }
 0x831   : > { %v11788_v32 = vpop.eup %11787  ;;  %9354 = vst [vmem:[%s14908_s2 + $0x560] sm:$0xff] %v9034_v13  ;;  %v8569_v36 = vmul.f32 0.6931472, %v11786_v8  ;;  %11807 = vlog2.f32 %v8092_v24  ;;  %v6834_v30 = vand.u32 2147483647, %v15487_v22  ;;  %v6484_v16 = vmax.f32 %v15396_v37, 0.0 }
 0x832   : > { %v9033_v23 = vadd.f32 %v8565_v0, %v6473_v12  ;;  %v8094_v34 = vadd.f32 1.0, %v11788_v32  ;;  %11809 = vpow2.f32 %v7668_v44  ;;  %v6833_v38 = vand.u32 2147483647, %v15493_v14 }
 0x833   : > { %v11790_v63 = vpop.eup %11789  ;;  %v9035_v25 = vadd.f32 %v8569_v36, %v6475_v2  ;;  %11811 = vpow2.f32 %v7682_v28  ;;  %v6483_v11 = vmax.f32 %v15400_v35, 0.0  ;;  %v7154_v44 = vsub.f32 0.0, %v6834_v30  ;;  %v17509_v2 = vld [vmem:[#allocation2_spill] sm:$0xff]  ;;  %v15515_v35 = vpop.f32.mrf.mxu0 }
 0x834   : > { %v11792_v19 = vpop.eup %11791  ;;  %9353 = vst [vmem:[%s14908_s2 + $0x558] sm:$0xff] %v9033_v23  ;;  %11813 = vlog2.f32 %v8094_v34  ;;  %v8093_v12 = vadd.f32 1.0, %v11790_v63  ;;  %v7153_v60 = vsub.f32 0.0, %v6833_v38  ;;  %v6835_v8 = vand.u32 2147483647, %v15497_v17  ;;  %17510 = vst [vmem:[#allocation5_spill] sm:$0xff] %v15515_v35 }
 0x835   : > { %v11794_v13 = vpop.eup %11793  ;;  %9355 = vst [vmem:[%s14908_s2 + $0x568] sm:$0xff] %v9035_v25  ;;  %v8583_v24 = vmul.f32 0.6931472, %v11792_v19  ;;  %v15510_v37 = vadd.f32 %v17509_v2, %v14752_v20  ;;  %v7686_v32 = vmul.f32 1.442695, %v7154_v44  ;;  %v15513_v36 = vadd.f32 %v5674_v31, %v14754_v58 }
 0x836   : > { %11815 = vlog2.f32 %v8093_v12  ;;  %v8095_v0 = vadd.f32 1.0, %v11794_v13  ;;  %v11796_v28 = vpop.eup %11795  ;;  %v6485_v34 = vmax.f32 %v15413_v56, 0.0  ;;  %v7684_v30 = vmul.f32 1.442695, %v7153_v60  ;;  %v5676_v13 = vpop.f32.mrf.mxu1 }
 0x837   : > { %v9042_v23 = vadd.f32 %v8583_v24, %v6482_v10  ;;  %v7155_v63 = vsub.f32 0.0, %v6835_v8  ;;  %v8587_v38 = vmul.f32 0.6931472, %v11796_v28  ;;  %v6492_v19 = vmax.f32 %v15418_v61, 0.0  ;;  %v15522_v28 = vpop.f32.mrf.mxu0 }
 0x838   : > { %v11798_v25 = vpop.eup %11797  ;;  %11817 = vlog2.f32 %v8095_v0  ;;  %v6842_v12 = vand.u32 2147483647, %v15510_v37  ;;  %v6844_v10 = vand.u32 2147483647, %v15513_v36 }
 0x839   : > { %v11800_v44 = vpop.eup %11799  ;;  %9362 = vst [vmem:[%s14908_s2 + $0x5a0] sm:$0xff] %v9042_v23  ;;  %v8102_v31 = vadd.f32 1.0, %v11798_v25  ;;  %11819 = vpow2.f32 %v7686_v32  ;;  %v7688_v2 = vmul.f32 1.442695, %v7155_v63  ;;  %v9044_v56 = vadd.f32 %v8587_v38, %v6484_v16  ;;  %v5678_v16 = vpop.f32.mrf.mxu1 }
 0x83a   : > { %v11802_v24 = vpop.eup %11801  ;;  %v8585_v60 = vmul.f32 0.6931472, %v11800_v44  ;;  %11821 = vpow2.f32 %v7684_v30  ;;  %v7162_v8 = vsub.f32 0.0, %v6842_v12  ;;  %v7164_v35 = vsub.f32 0.0, %v6844_v10 }
 0x83b   : > { %v11804_v61 = vpop.eup %11803  ;;  %11823 = vlog2.f32 %v8102_v31  ;;  %v8104_v0 = vadd.f32 1.0, %v11802_v24  ;;  %v15526_v23 = vadd.f32 %v15151_v55, %v14760_v43  ;;  %9364 = vst [vmem:[%s14908_s2 + $0x5b0] sm:$0xff] %v9044_v56  ;;  %v6494_v30 = vmax.f32 %v15422_v5, 0.0  ;;  %v17511_v24 = vld [vmem:[#allocation12_spill] sm:$0xff] }
 0x83c   : > { %v9043_v32 = vadd.f32 %v8585_v60, %v6483_v11  ;;  %v8103_v63 = vadd.f32 1.0, %v11804_v61  ;;  %11825 = vpow2.f32 %v7688_v2  ;;  %v7702_v25 = vmul.f32 1.442695, %v7162_v8  ;;  %v15539_v2 = vpop.f32.mrf.mxu0  ;;  %6272 = vmatmul.mubr.bf16.gmra.mxu0 %v17511_v24  ;;  %v5680_v24 = vpop.f32.mrf.mxu1 }
 0x83d   : > { %v11806_v38 = vpop.eup %11805  ;;  %11827 = vlog2.f32 %v8104_v0  ;;  %v7706_v12 = vmul.f32 1.442695, %v7164_v35  ;;  %v6843_v44 = vand.u32 2147483647, %v15526_v23  ;;  %v15533_v55 = vadd.f32 %v5676_v13, %v14762_v46  ;;  %6281 = vmatprep.mubr.bf16.mxu0 %v17478_v4 }
 0x83e   : > { %v11808_v31 = vpop.eup %11807  ;;  %9363 = vst [vmem:[%s14908_s2 + $0x5a8] sm:$0xff] %v9043_v32  ;;  %v8589_v10 = vmul.f32 0.6931472, %v11806_v38  ;;  %11829 = vlog2.f32 %v8103_v63  ;;  %v15537_v11 = vadd.f32 %v15166_v6, %v14752_v20  ;;  %v15543_v60 = vadd.f32 %v5678_v16, %v14754_v58 }
 0x83f   : > { %v11810_v5 = vpop.eup %11809  ;;  %v8603_v35 = vmul.f32 0.6931472, %v11808_v31  ;;  %11831 = vpow2.f32 %v7702_v25  ;;  %v7163_v56 = vsub.f32 0.0, %v6843_v44  ;;  %v6493_v6 = vmax.f32 %v15433_v52, 0.0 }
 0x840   : > { %v11812_v13 = vpop.eup %11811  ;;  %v9045_v8 = vadd.f32 %v8589_v10, %v6485_v34  ;;  %v8105_v61 = vadd.f32 1.0, %v11810_v5  ;;  %11833 = vpow2.f32 %v7706_v12  ;;  %v6845_v31 = vand.u32 2147483647, %v15533_v55 }
 0x841   : > { %v11814_v0 = vpop.eup %11813  ;;  %v9052_v32 = vadd.f32 %v8603_v35, %v6492_v19  ;;  %v8112_v63 = vadd.f32 1.0, %v11812_v13  ;;  %v7704_v38 = vmul.f32 1.442695, %v7163_v56  ;;  %v6495_v16 = vmax.f32 %v15436_v1, 0.0 }
 0x842   : > { %9365 = vst [vmem:[%s14908_s2 + $0x5b8] sm:$0xff] %v9045_v8  ;;  %v8607_v25 = vmul.f32 0.6931472, %v11814_v0  ;;  %11835 = vlog2.f32 %v8105_v61  ;;  %v6852_v44 = vand.u32 2147483647, %v15537_v11  ;;  %v6502_v52 = vmax.f32 %v15448_v47, 0.0 }
 0x843   : > { %v11816_v34 = vpop.eup %11815  ;;  %9372 = vst [vmem:[%s14908_s2 + $0x5f0] sm:$0xff] %v9052_v32  ;;  %11837 = vlog2.f32 %v8112_v63  ;;  %v7165_v12 = vsub.f32 0.0, %v6845_v31  ;;  %v6854_v19 = vand.u32 2147483647, %v15543_v60  ;;  %v15556_v8 = vadd.f32 %v15179_v51, %v14760_v43 }
 0x844   : > { %v9054_v10 = vadd.f32 %v8607_v25, %v6494_v30  ;;  %v8605_v5 = vmul.f32 0.6931472, %v11816_v34  ;;  %11839 = vpow2.f32 %v7704_v38  ;;  %v7172_v35 = vsub.f32 0.0, %v6852_v44  ;;  %v15563_v38 = vpop.f32.mrf.mxu0 }
 0x845   : > { %v11818_v56 = vpop.eup %11817  ;;  %v7708_v13 = vmul.f32 1.442695, %v7165_v12  ;;  %v7174_v1 = vsub.f32 0.0, %v6854_v19  ;;  %v15559_v61 = vadd.f32 %v5680_v24, %v14762_v46  ;;  %v6504_v30 = vmax.f32 %v15453_v45, 0.0 }
 0x846   : > { %v11820_v47 = vpop.eup %11819  ;;  %9374 = vst [vmem:[%s14908_s2 + $0x600] sm:$0xff] %v9054_v10  ;;  %v9053_v0 = vadd.f32 %v8605_v5, %v6493_v6  ;;  %v8609_v32 = vmul.f32 0.6931472, %v11818_v56  ;;  %v7722_v63 = vmul.f32 1.442695, %v7172_v35  ;;  %v15567_v51 = vadd.f32 %v15195_v27, %v14752_v20  ;;  %v5684_v35 = vpop.f32.mrf.mxu1 }
 0x847   : > { %v11822_v31 = vpop.eup %11821  ;;  %v8114_v25 = vadd.f32 1.0, %v11820_v47  ;;  %11841 = vpow2.f32 %v7708_v13  ;;  %v7726_v44 = vmul.f32 1.442695, %v7174_v1  ;;  %v6853_v6 = vand.u32 2147483647, %v15556_v8  ;;  %v15575_v1 = vpop.f32.mrf.mxu0 }
 0x848   : > { %v11824_v24 = vpop.eup %11823  ;;  %9373 = vst [vmem:[%s14908_s2 + $0x5f8] sm:$0xff] %v9053_v0  ;;  %v9055_v34 = vadd.f32 %v8609_v32, %v6495_v16  ;;  %v8113_v12 = vadd.f32 1.0, %v11822_v31  ;;  %11843 = vpow2.f32 %v7722_v63  ;;  %v6503_v10 = vmax.f32 %v15457_v33, 0.0 }
 0x849   : > { %v11826_v45 = vpop.eup %11825  ;;  %v8623_v19 = vmul.f32 0.6931472, %v11824_v24  ;;  %11845 = vlog2.f32 %v8114_v25  ;;  %v6855_v5 = vand.u32 2147483647, %v15559_v61  ;;  %v6505_v27 = vmax.f32 %v15464_v21, 0.0 }
 0x84a   : > { %v11828_v56 = vpop.eup %11827  ;;  %9375 = vst [vmem:[%s14908_s2 + $0x608] sm:$0xff] %v9055_v34  ;;  %11847 = vlog2.f32 %v8113_v12  ;;  %v8115_v13 = vadd.f32 1.0, %v11826_v45  ;;  %v7173_v16 = vsub.f32 0.0, %v6853_v6  ;;  %v6862_v24 = vand.u32 2147483647, %v15567_v51 }
 0x84b   : > { %v11830_v47 = vpop.eup %11829  ;;  %v9062_v0 = vadd.f32 %v8623_v19, %v6502_v52  ;;  %v8627_v32 = vmul.f32 0.6931472, %v11828_v56  ;;  %11849 = vpow2.f32 %v7726_v44  ;;  %v7175_v63 = vsub.f32 0.0, %v6855_v5  ;;  %v5686_v52 = vpop.f32.mrf.mxu1 }
 0x84c   : > { %v11832_v33 = vpop.eup %11831  ;;  %v8625_v31 = vmul.f32 0.6931472, %v11830_v47  ;;  %11851 = vlog2.f32 %v8115_v13  ;;  %v7724_v25 = vmul.f32 1.442695, %v7173_v16  ;;  %v15580_v45 = vadd.f32 %v5684_v35, %v14754_v58  ;;  %v15582_v56 = vpop.f32.mrf.mxu0 }
 0x84d   : > { %v11834_v34 = vpop.eup %11833  ;;  %9382 = vst [vmem:[%s14908_s2 + $0x640] sm:$0xff] %v9062_v0  ;;  %v9064_v21 = vadd.f32 %v8627_v32, %v6504_v30  ;;  %v8122_v12 = vadd.f32 1.0, %v11832_v33  ;;  %v7728_v6 = vmul.f32 1.442695, %v7175_v63  ;;  %v7182_v5 = vsub.f32 0.0, %v6862_v24 }
 0x84e   : > { %v9063_v19 = vadd.f32 %v8625_v31, %v6503_v10  ;;  %v8124_v44 = vadd.f32 1.0, %v11834_v34  ;;  %11853 = vpow2.f32 %v7724_v25  ;;  %v6512_v16 = vmax.f32 %v15477_v3, 0.0  ;;  %v5688_v25 = vpop.f32.mrf.mxu1 }
 0x84f   : > { %v11836_v13 = vpop.eup %11835  ;;  %9384 = vst [vmem:[%s14908_s2 + $0x650] sm:$0xff] %v9064_v21  ;;  %11855 = vlog2.f32 %v8122_v12  ;;  %v6864_v30 = vand.u32 2147483647, %v15580_v45  ;;  %v15589_v47 = vadd.f32 %v15205_v15, %v14760_v43  ;;  %v7742_v10 = vmul.f32 1.442695, %v7182_v5  ;;  %v15597_v21 = vpop.f32.mrf.mxu0  ;;  %v17512_v12 = vld [vmem:[#allocation13_spill] sm:$0xff] }
 0x850   : > { %v11838_v35 = vpop.eup %11837  ;;  %9383 = vst [vmem:[%s14908_s2 + $0x648] sm:$0xff] %v9063_v19  ;;  %v8629_v0 = vmul.f32 0.6931472, %v11836_v13  ;;  %11857 = vlog2.f32 %v8124_v44  ;;  %v15593_v32 = vadd.f32 %v5686_v52, %v14762_v46  ;;  %v6514_v31 = vmax.f32 %v15487_v22, 0.0  ;;  %6282 = vmatmul.mubr.bf16.gmra.mxu0 %v17512_v12 }
 0x851   : > { %v11840_v63 = vpop.eup %11839  ;;  %v8643_v33 = vmul.f32 0.6931472, %v11838_v35  ;;  %11859 = vpow2.f32 %v7728_v6  ;;  %v7184_v3 = vsub.f32 0.0, %v6864_v30  ;;  %v6863_v15 = vand.u32 2147483647, %v15589_v47  ;;  %6291 = vmatprep.mubr.bf16.mxu0 %v17478_v4 }
 0x852   : > { %v9065_v24 = vadd.f32 %v8629_v0, %v6505_v27  ;;  %v8123_v34 = vadd.f32 1.0, %v11840_v63  ;;  %11861 = vpow2.f32 %v7742_v10  ;;  %v6513_v19 = vmax.f32 %v15493_v14, 0.0 }
 0x853   : > { %v9072_v52 = vadd.f32 %v8643_v33, %v6512_v16  ;;  %v7746_v44 = vmul.f32 1.442695, %v7184_v3  ;;  %v6865_v22 = vand.u32 2147483647, %v15593_v32  ;;  %v7183_v27 = vsub.f32 0.0, %v6863_v15  ;;  %v5690_v3 = vpop.f32.mrf.mxu1 }
 0x854   : > { %v11842_v6 = vpop.eup %11841  ;;  %9385 = vst [vmem:[%s14908_s2 + $0x658] sm:$0xff] %v9065_v24  ;;  %11863 = vlog2.f32 %v8123_v34  ;;  %v15606_v5 = vadd.f32 %v15223_v57, %v14752_v20  ;;  %v15609_v13 = vadd.f32 %v5688_v25, %v14754_v58  ;;  %v6515_v14 = vmax.f32 %v15497_v17, 0.0  ;;  %v17513_v34 = vld [vmem:[#allocation3_spill] sm:$0xff] }
 0x855   : > { %v11844_v30 = vpop.eup %11843  ;;  %9392 = vst [vmem:[%s14908_s2 + $0x690] sm:$0xff] %v9072_v52  ;;  %v8125_v16 = vadd.f32 1.0, %v11842_v6  ;;  %11865 = vpow2.f32 %v7746_v44  ;;  %v7185_v35 = vsub.f32 0.0, %v6865_v22  ;;  %v6522_v4 = vmax.f32 %v15510_v37, 0.0 }
 0x856   : > { %v11846_v0 = vpop.eup %11845  ;;  %v8132_v10 = vadd.f32 1.0, %v11844_v30  ;;  %v7744_v63 = vmul.f32 1.442695, %v7183_v27  ;;  %v6872_v33 = vand.u32 2147483647, %v15606_v5  ;;  %v15617_v15 = vadd.f32 %v17513_v34, %v14760_v43  ;;  %v15621_v30 = vpop.f32.mrf.mxu0 }
 0x857   : > { %v11848_v57 = vpop.eup %11847  ;;  %v8647_v24 = vmul.f32 0.6931472, %v11846_v0  ;;  %11867 = vlog2.f32 %v8125_v16  ;;  %v7748_v25 = vmul.f32 1.442695, %v7185_v35  ;;  %v6874_v37 = vand.u32 2147483647, %v15609_v13  ;;  %v5694_v34 = vpop.f32.mrf.mxu1 }
 0x858   : > { %v11850_v17 = vpop.eup %11849  ;;  %v8645_v12 = vmul.f32 0.6931472, %v11848_v57  ;;  %11869 = vlog2.f32 %v8132_v10  ;;  %v7192_v52 = vsub.f32 0.0, %v6872_v33  ;;  %v6524_v6 = vmax.f32 %v15513_v36, 0.0 }
 0x859   : > { %v11852_v44 = vpop.eup %11851  ;;  %v9074_v22 = vadd.f32 %v8647_v24, %v6514_v31  ;;  %v8134_v27 = vadd.f32 1.0, %v11850_v17  ;;  %11871 = vpow2.f32 %v7744_v63  ;;  %v7194_v10 = vsub.f32 0.0, %v6874_v37 }
 0x85a   : > { %v9073_v16 = vadd.f32 %v8645_v12, %v6513_v19  ;;  %v8649_v35 = vmul.f32 0.6931472, %v11852_v44  ;;  %11873 = vpow2.f32 %v7748_v25  ;;  %v7762_v0 = vmul.f32 1.442695, %v7192_v52  ;;  %v15634_v44 = vpop.f32.mrf.mxu0 }
 0x85b   : > { %v11854_v57 = vpop.eup %11853  ;;  %9394 = vst [vmem:[%s14908_s2 + $0x6a0] sm:$0xff] %v9074_v22  ;;  %11875 = vlog2.f32 %v8134_v27  ;;  %v6873_v33 = vand.u32 2147483647, %v15617_v15  ;;  %v15626_v31 = vadd.f32 %v5690_v3, %v14762_v46  ;;  %v15631_v19 = vadd.f32 %v15242_v26, %v14752_v20 }
 0x85c   : > { %v11856_v36 = vpop.eup %11855  ;;  %9393 = vst [vmem:[%s14908_s2 + $0x698] sm:$0xff] %v9073_v16  ;;  %v9075_v63 = vadd.f32 %v8649_v35, %v6515_v14  ;;  %v8133_v24 = vadd.f32 1.0, %v11854_v57  ;;  %11877 = vpow2.f32 %v7762_v0  ;;  %v6523_v12 = vmax.f32 %v15526_v23, 0.0  ;;  %v5696_v16 = vpop.f32.mrf.mxu1 }
 0x85d   : > { %v11858_v25 = vpop.eup %11857  ;;  %v8663_v17 = vmul.f32 0.6931472, %v11856_v36  ;;  %v7766_v52 = vmul.f32 1.442695, %v7194_v10  ;;  %v7193_v37 = vsub.f32 0.0, %v6873_v33  ;;  %v6525_v14 = vmax.f32 %v15533_v55, 0.0 }
 0x85e   : > { %v11860_v22 = vpop.eup %11859  ;;  %9395 = vst [vmem:[%s14908_s2 + $0x6a8] sm:$0xff] %v9075_v63  ;;  %v8667_v3 = vmul.f32 0.6931472, %v11858_v25  ;;  %11879 = vlog2.f32 %v8133_v24  ;;  %v6875_v27 = vand.u32 2147483647, %v15626_v31  ;;  %v15642_v55 = vadd.f32 %v5694_v34, %v14754_v58  ;;  %v15651_v25 = vpop.f32.mrf.mxu0 }
 0x85f   : > { %v11862_v26 = vpop.eup %11861  ;;  %v9082_v35 = vadd.f32 %v8663_v17, %v6522_v4  ;;  %v8135_v0 = vadd.f32 1.0, %v11860_v22  ;;  %11881 = vpow2.f32 %v7766_v52  ;;  %v7764_v23 = vmul.f32 1.442695, %v7193_v37  ;;  %17514 = vst [vmem:[#allocation6_spill] sm:$0xff] %v15651_v25 }
 0x860   : > { %v9084_v57 = vadd.f32 %v8667_v3, %v6524_v6  ;;  %v8142_v10 = vadd.f32 1.0, %v11862_v26  ;;  %v7195_v33 = vsub.f32 0.0, %v6875_v27  ;;  %v6882_v36 = vand.u32 2147483647, %v15631_v19 }
 0x861   : > { %v11864_v63 = vpop.eup %11863  ;;  %9402 = vst [vmem:[%s14908_s2 + $0x6e0] sm:$0xff] %v9082_v35  ;;  %11883 = vlog2.f32 %v8135_v0  ;;  %v15646_v24 = vadd.f32 %v15263_v54, %v14760_v43  ;;  %v15649_v4 = vadd.f32 %v5696_v16, %v14762_v46  ;;  %v6532_v22 = vmax.f32 %v15537_v11, 0.0  ;;  %v17516_v11 = vld [vmem:[#allocation14_spill] sm:$0xff] }
 0x862   : > { %v11866_v6 = vpop.eup %11865  ;;  %9404 = vst [vmem:[%s14908_s2 + $0x6f0] sm:$0xff] %v9084_v57  ;;  %v8665_v17 = vmul.f32 0.6931472, %v11864_v63  ;;  %11885 = vlog2.f32 %v8142_v10  ;;  %v7768_v52 = vmul.f32 1.442695, %v7195_v33  ;;  %v7202_v37 = vsub.f32 0.0, %v6882_v36  ;;  %v15658_v33 = vpop.f32.mrf.mxu0  ;;  %6292 = vmatmul.mubr.bf16.gmra.mxu0 %v17516_v11 }
 0x863   : > { %v8144_v3 = vadd.f32 1.0, %v11866_v6  ;;  %11887 = vpow2.f32 %v7764_v23  ;;  %v6884_v34 = vand.u32 2147483647, %v15642_v55  ;;  %v6534_v16 = vmax.f32 %v15543_v60, 0.0  ;;  %17515 = vst [vmem:[#allocation7_spill] sm:$0xff] %v15658_v33  ;;  %v5698_v63 = vpop.f32.mrf.mxu1 }
 0x864   : > { %v11868_v54 = vpop.eup %11867  ;;  %v9083_v27 = vadd.f32 %v8665_v17, %v6523_v12  ;;  %11889 = vpow2.f32 %v7768_v52  ;;  %v7782_v26 = vmul.f32 1.442695, %v7202_v37  ;;  %v6883_v10 = vand.u32 2147483647, %v15646_v24 }
 0x865   : > { %v11870_v35 = vpop.eup %11869  ;;  %v8669_v0 = vmul.f32 0.6931472, %v11868_v54  ;;  %11891 = vlog2.f32 %v8144_v3  ;;  %v7204_v57 = vsub.f32 0.0, %v6884_v34  ;;  %v6533_v12 = vmax.f32 %v15556_v8, 0.0 }
 0x866   : > { %v11872_v36 = vpop.eup %11871  ;;  %9403 = vst [vmem:[%s14908_s2 + $0x6e8] sm:$0xff] %v9083_v27  ;;  %v8683_v23 = vmul.f32 0.6931472, %v11870_v35  ;;  %11893 = vpow2.f32 %v7782_v26  ;;  %v6885_v60 = vand.u32 2147483647, %v15649_v4  ;;  %v7203_v3 = vsub.f32 0.0, %v6883_v10 }
 0x867   : > { %v11874_v6 = vpop.eup %11873  ;;  %v9085_v17 = vadd.f32 %v8669_v0, %v6525_v14  ;;  %v8143_v52 = vadd.f32 1.0, %v11872_v36  ;;  %v7786_v37 = vmul.f32 1.442695, %v7204_v57  ;;  %v15666_v27 = vadd.f32 %v15273_v9, %v14752_v20 }
 0x868   : > { %v11876_v34 = vpop.eup %11875  ;;  %v9092_v54 = vadd.f32 %v8683_v23, %v6532_v22  ;;  %v8145_v33 = vadd.f32 1.0, %v11874_v6  ;;  %v7205_v11 = vsub.f32 0.0, %v6885_v60  ;;  %v7784_v26 = vmul.f32 1.442695, %v7203_v3  ;;  %v5700_v23 = vpop.f32.mrf.mxu1 }
 0x869   : > { %v11878_v35 = vpop.eup %11877  ;;  %9405 = vst [vmem:[%s14908_s2 + $0x6f8] sm:$0xff] %v9085_v17  ;;  %v8687_v8 = vmul.f32 0.6931472, %v11876_v34  ;;  %11895 = vlog2.f32 %v8143_v52  ;;  %v15670_v25 = vadd.f32 %v5698_v63, %v14754_v58  ;;  %v6535_v14 = vmax.f32 %v15559_v61, 0.0 }
 0x86a   : > { %9412 = vst [vmem:[%s14908_s2 + $0x730] sm:$0xff] %v9092_v54  ;;  %11897 = vlog2.f32 %v8145_v33  ;;  %v8152_v22 = vadd.f32 1.0, %v11878_v35  ;;  %v7788_v0 = vmul.f32 1.442695, %v7205_v11  ;;  %v6542_v9 = vmax.f32 %v15567_v51, 0.0 }
 0x86b   : > { %v11880_v57 = vpop.eup %11879  ;;  %v9094_v10 = vadd.f32 %v8687_v8, %v6534_v16  ;;  %11899 = vpow2.f32 %v7786_v37  ;;  %v6892_v36 = vand.u32 2147483647, %v15666_v27  ;;  %v6894_v63 = vand.u32 2147483647, %v15670_v25 }
 0x86c   : > { %v11882_v60 = vpop.eup %11881  ;;  %v8685_v6 = vmul.f32 0.6931472, %v11880_v57  ;;  %11901 = vlog2.f32 %v8152_v22  ;;  %v15679_v17 = vadd.f32 %v15288_v40, %v14760_v43  ;;  %v6544_v61 = vmax.f32 %v15580_v45, 0.0  ;;  %v5704_v22 = vpop.f32.mrf.mxu1 }
 0x86d   : > { %9414 = vst [vmem:[%s14908_s2 + $0x740] sm:$0xff] %v9094_v10  ;;  %v8154_v16 = vadd.f32 1.0, %v11882_v60  ;;  %11903 = vpow2.f32 %v7784_v26  ;;  %v7212_v51 = vsub.f32 0.0, %v6892_v36  ;;  %v7214_v37 = vsub.f32 0.0, %v6894_v63 }
 0x86e   : > { %v11884_v33 = vpop.eup %11883  ;;  %v9093_v52 = vadd.f32 %v8685_v6, %v6533_v12  ;;  %11905 = vpow2.f32 %v7788_v0  ;;  %v15684_v3 = vadd.f32 %v5700_v23, %v14762_v46  ;;  %v6893_v40 = vand.u32 2147483647, %v15679_v17 }
 0x86f   : > { %v11886_v34 = vpop.eup %11885  ;;  %v8689_v54 = vmul.f32 0.6931472, %v11884_v33  ;;  %11907 = vlog2.f32 %v8154_v16  ;;  %v7802_v11 = vmul.f32 1.442695, %v7212_v51  ;;  %v6543_v45 = vmax.f32 %v15589_v47, 0.0 }
 0x870   : > { %v11888_v35 = vpop.eup %11887  ;;  %9413 = vst [vmem:[%s14908_s2 + $0x738] sm:$0xff] %v9093_v52  ;;  %v8703_v8 = vmul.f32 0.6931472, %v11886_v34  ;;  %v7806_v26 = vmul.f32 1.442695, %v7214_v37  ;;  %v15691_v12 = vadd.f32 %v15306_v48, %v14752_v20  ;;  %v7213_v36 = vsub.f32 0.0, %v6893_v40  ;;  %v5706_v37 = vpop.f32.mrf.mxu1 }
 0x871   : > { %v11890_v0 = vpop.eup %11889  ;;  %v9095_v57 = vadd.f32 %v8689_v54, %v6535_v14  ;;  %v8153_v10 = vadd.f32 1.0, %v11888_v35  ;;  %11909 = vpow2.f32 %v7802_v11  ;;  %v6895_v63 = vand.u32 2147483647, %v15684_v3 }
 0x872   : > { %v11892_v23 = vpop.eup %11891  ;;  %v9102_v60 = vadd.f32 %v8703_v8, %v6542_v9  ;;  %v8155_v6 = vadd.f32 1.0, %v11890_v0  ;;  %11911 = vpow2.f32 %v7806_v26  ;;  %v6545_v51 = vmax.f32 %v15593_v32, 0.0 }
 0x873   : > { %v11894_v16 = vpop.eup %11893  ;;  %9415 = vst [vmem:[%s14908_s2 + $0x748] sm:$0xff] %v9095_v57  ;;  %v8707_v47 = vmul.f32 0.6931472, %v11892_v23  ;;  %11913 = vlog2.f32 %v8153_v10  ;;  %v7804_v48 = vmul.f32 1.442695, %v7213_v36  ;;  %v7215_v33 = vsub.f32 0.0, %v6895_v63 }
 0x874   : > { %9422 = vst [vmem:[%s14908_s2 + $0x780] sm:$0xff] %v9102_v60  ;;  %11915 = vlog2.f32 %v8155_v6  ;;  %v8162_v14 = vadd.f32 1.0, %v11894_v16  ;;  %v6902_v52 = vand.u32 2147483647, %v15691_v12  ;;  %v15699_v34 = vadd.f32 %v5704_v22, %v14754_v58 }
 0x875   : > { %v9104_v9 = vadd.f32 %v8707_v47, %v6544_v61  ;;  %11917 = vpow2.f32 %v7804_v48  ;;  %v15703_v54 = vadd.f32 %v15325_v59, %v14760_v43  ;;  %v6552_v11 = vmax.f32 %v15606_v5, 0.0 }
 0x876   : > { %v11896_v32 = vpop.eup %11895  ;;  %11919 = vlog2.f32 %v8162_v14  ;;  %v7808_v40 = vmul.f32 1.442695, %v7215_v33  ;;  %v7222_v35 = vsub.f32 0.0, %v6902_v52  ;;  %v6554_v0 = vmax.f32 %v15609_v13, 0.0  ;;  %v5708_v14 = vpop.f32.mrf.mxu1 }
 0x877   : > { %v11898_v8 = vpop.eup %11897  ;;  %9424 = vst [vmem:[%s14908_s2 + $0x790] sm:$0xff] %v9104_v9  ;;  %v8705_v26 = vmul.f32 0.6931472, %v11896_v32  ;;  %v6904_v61 = vand.u32 2147483647, %v15699_v34  ;;  %v15710_v22 = vadd.f32 %v5706_v37, %v14762_v46  ;;  %v6553_v60 = vmax.f32 %v15617_v15, 0.0 }
 0x878   : > { %v11900_v57 = vpop.eup %11899  ;;  %v8709_v10 = vmul.f32 0.6931472, %v11898_v8  ;;  %11921 = vpow2.f32 %v7808_v40  ;;  %v7822_v59 = vmul.f32 1.442695, %v7222_v35  ;;  %v6903_v5 = vand.u32 2147483647, %v15703_v54 }
 0x879   : > { %v11902_v36 = vpop.eup %11901  ;;  %v9103_v23 = vadd.f32 %v8705_v26, %v6543_v45  ;;  %v8164_v6 = vadd.f32 1.0, %v11900_v57  ;;  %v7224_v63 = vsub.f32 0.0, %v6904_v61  ;;  %v6905_v9 = vand.u32 2147483647, %v15710_v22 }
 0x87a   : > { %v11904_v13 = vpop.eup %11903  ;;  %v9105_v16 = vadd.f32 %v8709_v10, %v6545_v51  ;;  %v8723_v47 = vmul.f32 0.6931472, %v11902_v36  ;;  %11923 = vpow2.f32 %v7822_v59  ;;  %v7223_v48 = vsub.f32 0.0, %v6903_v5 }
 0x87b   : > { %v11906_v33 = vpop.eup %11905  ;;  %9423 = vst [vmem:[%s14908_s2 + $0x788] sm:$0xff] %v9103_v23  ;;  %11925 = vlog2.f32 %v8164_v6  ;;  %v8163_v52 = vadd.f32 1.0, %v11904_v13  ;;  %v7826_v37 = vmul.f32 1.442695, %v7224_v63  ;;  %v15719_v51 = vadd.f32 %v15333_v7, %v14752_v20  ;;  %v5710_v23 = vpop.f32.mrf.mxu1 }
 0x87c   : > { %v11908_v45 = vpop.eup %11907  ;;  %9425 = vst [vmem:[%s14908_s2 + $0x798] sm:$0xff] %v9105_v16  ;;  %v9112_v15 = vadd.f32 %v8723_v47, %v6552_v11  ;;  %v8165_v32 = vadd.f32 1.0, %v11906_v33  ;;  %v7824_v40 = vmul.f32 1.442695, %v7223_v48  ;;  %v7225_v8 = vsub.f32 0.0, %v6905_v9 }
 0x87d   : > { %v8727_v35 = vmul.f32 0.6931472, %v11908_v45  ;;  %11927 = vlog2.f32 %v8163_v52  ;;  %v15722_v26 = vadd.f32 %v5708_v14, %v14754_v58  ;;  %v6555_v57 = vmax.f32 %v15626_v31, 0.0 }
 0x87e   : > { %v11910_v61 = vpop.eup %11909  ;;  %9432 = vst [vmem:[%s14908_s2 + $0x7d0] sm:$0xff] %v9112_v15  ;;  %11929 = vlog2.f32 %v8165_v32  ;;  %v6912_v11 = vand.u32 2147483647, %v15719_v51  ;;  %v15729_v10 = vadd.f32 %v15346_v18, %v14760_v43  ;;  %v7828_v36 = vmul.f32 1.442695, %v7225_v8  ;;  %v5714_v15 = vpop.f32.mrf.mxu1 }
 0x87f   : > { %v11912_v7 = vpop.eup %11911  ;;  %v9114_v59 = vadd.f32 %v8727_v35, %v6554_v0  ;;  %v8172_v5 = vadd.f32 1.0, %v11910_v61  ;;  %11931 = vpow2.f32 %v7826_v37  ;;  %v6562_v63 = vmax.f32 %v15631_v19, 0.0 }
 0x880   : > { %v11914_v6 = vpop.eup %11913  ;;  %v8174_v13 = vadd.f32 1.0, %v11912_v7  ;;  %11933 = vpow2.f32 %v7824_v40  ;;  %v7232_v31 = vsub.f32 0.0, %v6912_v11  ;;  %v6564_v48 = vmax.f32 %v15642_v55, 0.0  ;;  %v17517_v11 = vld [vmem:[#allocation4_spill] sm:$0xff] }
 0x881   : > { %v11916_v16 = vpop.eup %11915  ;;  %9434 = vst [vmem:[%s14908_s2 + $0x7e0] sm:$0xff] %v9114_v59  ;;  %v8725_v47 = vmul.f32 0.6931472, %v11914_v6  ;;  %11935 = vlog2.f32 %v8172_v5  ;;  %v6914_v18 = vand.u32 2147483647, %v15722_v26  ;;  %v15738_v61 = vadd.f32 %v5710_v23, %v14762_v46 }
 0x882   : > { %v11918_v14 = vpop.eup %11917  ;;  %v8729_v0 = vmul.f32 0.6931472, %v11916_v16  ;;  %11937 = vlog2.f32 %v8174_v13  ;;  %v7842_v33 = vmul.f32 1.442695, %v7232_v31  ;;  %v6913_v52 = vand.u32 2147483647, %v15729_v10  ;;  %v5716_v31 = vpop.f32.mrf.mxu1 }
 0x883   : > { %v11920_v37 = vpop.eup %11919  ;;  %v9113_v19 = vadd.f32 %v8725_v47, %v6553_v60  ;;  %v8173_v9 = vadd.f32 1.0, %v11918_v14  ;;  %11939 = vpow2.f32 %v7828_v36  ;;  %v7234_v45 = vsub.f32 0.0, %v6914_v18 }
 0x884   : > { %v9115_v32 = vadd.f32 %v8729_v0, %v6555_v57  ;;  %v8743_v40 = vmul.f32 0.6931472, %v11920_v37  ;;  %11941 = vpow2.f32 %v7842_v33  ;;  %v7233_v55 = vsub.f32 0.0, %v6913_v52 }
 0x885   : > { %v11922_v35 = vpop.eup %11921  ;;  %9433 = vst [vmem:[%s14908_s2 + $0x7d8] sm:$0xff] %v9113_v19  ;;  %11943 = vlog2.f32 %v8173_v9  ;;  %v7846_v8 = vmul.f32 1.442695, %v7234_v45  ;;  %v15742_v7 = vadd.f32 %v17517_v11, %v14752_v20  ;;  %v15746_v57 = vadd.f32 %v5714_v15, %v14754_v58 }
 0x886   : > { %9435 = vst [vmem:[%s14908_s2 + $0x7e8] sm:$0xff] %v9115_v32  ;;  %v9122_v60 = vadd.f32 %v8743_v40, %v6562_v63  ;;  %v8175_v59 = vadd.f32 1.0, %v11922_v35  ;;  %v7844_v5 = vmul.f32 1.442695, %v7233_v55  ;;  %v6563_v6 = vmax.f32 %v15646_v24, 0.0 }
 0x887   : > { %v11924_v36 = vpop.eup %11923  ;;  %v6565_v13 = vmax.f32 %v15649_v4, 0.0  ;;  %11945 = vpow2.f32 %v7846_v8  ;;  %v6915_v23 = vand.u32 2147483647, %v15738_v61  ;;  %v6572_v47 = vmax.f32 %v15666_v27, 0.0 }
 0x888   : > { %v11926_v16 = vpop.eup %11925  ;;  %9442 = vst [vmem:[%s14908_s2 + $0x820] sm:$0xff] %v9122_v60  ;;  %11947 = vlog2.f32 %v8175_v59  ;;  %v8182_v63 = vadd.f32 1.0, %v11924_v36  ;;  %v6922_v18 = vand.u32 2147483647, %v15742_v7  ;;  %v6924_v33 = vand.u32 2147483647, %v15746_v57 }
 0x889   : > { %v8747_v14 = vmul.f32 0.6931472, %v11926_v16  ;;  %11949 = vpow2.f32 %v7844_v5  ;;  %v7235_v0 = vsub.f32 0.0, %v6915_v23  ;;  %v15757_v52 = vadd.f32 %v15381_v49, %v14760_v43  ;;  %v5718_v5 = vpop.f32.mrf.mxu1 }
 0x88a   : > { %v11928_v24 = vpop.eup %11927  ;;  %11951 = vlog2.f32 %v8182_v63  ;;  %v7242_v4 = vsub.f32 0.0, %v6922_v18  ;;  %v15760_v37 = vadd.f32 %v5716_v31, %v14762_v46  ;;  %v7244_v15 = vsub.f32 0.0, %v6924_v33 }
 0x88b   : > { %v11930_v27 = vpop.eup %11929  ;;  %v9124_v19 = vadd.f32 %v8747_v14, %v6564_v48  ;;  %v8745_v9 = vmul.f32 0.6931472, %v11928_v24  ;;  %v7848_v45 = vmul.f32 1.442695, %v7235_v0  ;;  %v6574_v55 = vmax.f32 %v15670_v25, 0.0 }
 0x88c   : > { %v11932_v32 = vpop.eup %11931  ;;  %v8749_v40 = vmul.f32 0.6931472, %v11930_v27  ;;  %v6573_v35 = vmax.f32 %v15679_v17, 0.0  ;;  %v7862_v8 = vmul.f32 1.442695, %v7242_v4  ;;  %v15774_v14 = vadd.f32 %v5718_v5, %v14754_v58 }
 0x88d   : > { %v11934_v11 = vpop.eup %11933  ;;  %9444 = vst [vmem:[%s14908_s2 + $0x830] sm:$0xff] %v9124_v19  ;;  %v9123_v49 = vadd.f32 %v8745_v9, %v6563_v6  ;;  %v8184_v60 = vadd.f32 1.0, %v11932_v32  ;;  %11953 = vpow2.f32 %v7848_v45  ;;  %v7866_v59 = vmul.f32 1.442695, %v7244_v15 }
 0x88e   : > { %v11936_v48 = vpop.eup %11935  ;;  %v9125_v36 = vadd.f32 %v8749_v40, %v6565_v13  ;;  %v8183_v23 = vadd.f32 1.0, %v11934_v11  ;;  %11955 = vpow2.f32 %v7862_v8  ;;  %v6923_v31 = vand.u32 2147483647, %v15757_v52 }
 0x88f   : > { %v11938_v16 = vpop.eup %11937  ;;  %9443 = vst [vmem:[%s14908_s2 + $0x828] sm:$0xff] %v9123_v49  ;;  %v8763_v25 = vmul.f32 0.6931472, %v11936_v48  ;;  %11957 = vlog2.f32 %v8184_v60  ;;  %v6925_v17 = vand.u32 2147483647, %v15760_v37  ;;  %v15770_v6 = vadd.f32 %v15392_v29, %v14752_v20  ;;  %v5720_v60 = vpop.f32.mrf.mxu1 }
 0x890   : > { %v11940_v63 = vpop.eup %11939  ;;  %9445 = vst [vmem:[%s14908_s2 + $0x838] sm:$0xff] %v9125_v36  ;;  %v8767_v18 = vmul.f32 0.6931472, %v11938_v16  ;;  %11959 = vlog2.f32 %v8183_v23  ;;  %v7243_v13 = vsub.f32 0.0, %v6923_v31  ;;  %v6575_v20 = vmax.f32 %v15684_v3, 0.0 }
 0x891   : > { %v11942_v0 = vpop.eup %11941  ;;  %v9132_v33 = vadd.f32 %v8763_v25, %v6572_v47  ;;  %v8185_v24 = vadd.f32 1.0, %v11940_v63  ;;  %11961 = vpow2.f32 %v7866_v59  ;;  %v7245_v4 = vsub.f32 0.0, %v6925_v17  ;;  %v17518_v63 = vld [vmem:[#allocation15_spill] sm:$0xff] }
 0x892   : > { %v11944_v27 = vpop.eup %11943  ;;  %v9134_v19 = vadd.f32 %v8767_v18, %v6574_v55  ;;  %v8192_v29 = vadd.f32 1.0, %v11942_v0  ;;  %v7864_v9 = vmul.f32 1.442695, %v7243_v13  ;;  %v6932_v32 = vand.u32 2147483647, %v15770_v6 }
 0x893   : > { %9452 = vst [vmem:[%s14908_s2 + $0x870] sm:$0xff] %v9132_v33  ;;  %v8765_v45 = vmul.f32 0.6931472, %v11944_v27  ;;  %11963 = vlog2.f32 %v8185_v24  ;;  %v7868_v15 = vmul.f32 1.442695, %v7245_v4  ;;  %v6582_v40 = vmax.f32 %v15691_v12, 0.0 }
 0x894   : > { %v11946_v58 = vpop.eup %11945  ;;  %9454 = vst [vmem:[%s14908_s2 + $0x880] sm:$0xff] %v9134_v19  ;;  %11965 = vlog2.f32 %v8192_v29  ;;  %v6934_v47 = vand.u32 2147483647, %v15774_v14  ;;  %v15784_v55 = vadd.f32 %v15406_v42, %v14760_v43  ;;  %v7252_v49 = vsub.f32 0.0, %v6932_v32  ;;  %v12769_v19 = vld [vmem:[%s17357_s16] sm:$0xff]  ;;  %v5950_v29 = vpop.f32.mrf.mxu1 }
 0x895   : > { %v11948_v3 = vpop.eup %11947  ;;  %v9133_v8 = vadd.f32 %v8765_v45, %v6573_v35  ;;  %v8194_v11 = vadd.f32 1.0, %v11946_v58  ;;  %11967 = vpow2.f32 %v7864_v9  ;;  %v6584_v48 = vmax.f32 %v15699_v34, 0.0 }
 0x896   : > { %v11950_v59 = vpop.eup %11949  ;;  %v8769_v5 = vmul.f32 0.6931472, %v11948_v3  ;;  %11969 = vpow2.f32 %v7868_v15  ;;  %v7254_v12 = vsub.f32 0.0, %v6934_v47  ;;  %v7882_v31 = vmul.f32 1.442695, %v7252_v49 }
 0x897   : > { %v11952_v36 = vpop.eup %11951  ;;  %9453 = vst [vmem:[%s14908_s2 + $0x878] sm:$0xff] %v9133_v8  ;;  %11971 = vlog2.f32 %v8194_v11  ;;  %v8193_v23 = vadd.f32 1.0, %v11950_v59  ;;  %v6933_v43 = vand.u32 2147483647, %v15784_v55  ;;  %v15790_v25 = vadd.f32 %v5720_v60, %v14762_v46 }
 0x898   : > { %v9135_v42 = vadd.f32 %v8769_v5, %v6575_v20  ;;  %v8783_v35 = vmul.f32 0.6931472, %v11952_v36  ;;  %v7886_v16 = vmul.f32 1.442695, %v7254_v12  ;;  %v4905_v34 = vsub.s32 4, %v17518_v63 }
 0x899   : > { %11973 = vlog2.f32 %v8193_v23  ;;  %v7253_v17 = vsub.f32 0.0, %v6933_v43  ;;  %v4913_v18 = vsub.s32 6, %v17518_v63  ;;  %v6583_v33 = vmax.f32 %v15703_v54, 0.0 }
 0x89a   : > { %v11954_v13 = vpop.eup %11953  ;;  %9455 = vst [vmem:[%s14908_s2 + $0x888] sm:$0xff] %v9135_v42  ;;  %v9142_v0 = vadd.f32 %v8783_v35, %v6582_v40  ;;  %11975 = vpow2.f32 %v7882_v31  ;;  %v6935_v24 = vand.u32 2147483647, %v15790_v25  ;;  %v15800_v20 = vrot.slane %v12769_v19, %v4905_v34 }
 0x89b   : > { %v11956_v4 = vpop.eup %11955  ;;  %v8195_v27 = vadd.f32 1.0, %v11954_v13  ;;  %11977 = vpow2.f32 %v7886_v16  ;;  %v7884_v46 = vmul.f32 1.442695, %v7253_v17  ;;  %v15803_v32 = vrot.slane %v12769_v19, %v4913_v18 }
 0x89c   : > { %v11958_v9 = vpop.eup %11957  ;;  %9462 = vst [vmem:[%s14908_s2 + $0x8c0] sm:$0xff] %v9142_v0  ;;  %v8202_v45 = vadd.f32 1.0, %v11956_v4  ;;  %v7255_v15 = vsub.f32 0.0, %v6935_v24  ;;  %v4909_v54 = vsub.s32 5, %v17518_v63  ;;  %v15808_v47 = vadd.f32 %v15440_v50, %v15800_v20 }
 0x89d   : > { %v11960_v58 = vpop.eup %11959  ;;  %v8787_v40 = vmul.f32 0.6931472, %v11958_v9  ;;  %11979 = vlog2.f32 %v8195_v27  ;;  %v4917_v3 = vsub.s32 7, %v17518_v63  ;;  %v15812_v60 = vadd.f32 %v5950_v29, %v15803_v32 }
 0x89e   : > { %v11962_v8 = vpop.eup %11961  ;;  %v8785_v11 = vmul.f32 0.6931472, %v11960_v58  ;;  %11981 = vlog2.f32 %v8202_v45  ;;  %v7888_v49 = vmul.f32 1.442695, %v7255_v15  ;;  %v6585_v5 = vmax.f32 %v15710_v22, 0.0 }
 0x89f   : > { %v9144_v59 = vadd.f32 %v8787_v40, %v6584_v48  ;;  %v8204_v12 = vadd.f32 1.0, %v11962_v8  ;;  %11983 = vpow2.f32 %v7884_v46  ;;  %v6592_v50 = vmax.f32 %v15719_v51, 0.0  ;;  %v5952_v48 = vpop.f32.mrf.mxu1 }
 0x8a0   : > { %v11964_v36 = vpop.eup %11963  ;;  %v9143_v23 = vadd.f32 %v8785_v11, %v6583_v33  ;;  %11985 = vpow2.f32 %v7888_v49  ;;  %v6626_v31 = vand.u32 2147483647, %v15808_v47  ;;  %v6628_v35 = vand.u32 2147483647, %v15812_v60 }
 0x8a1   : > { %v11966_v43 = vpop.eup %11965  ;;  %9464 = vst [vmem:[%s14908_s2 + $0x8d0] sm:$0xff] %v9144_v59  ;;  %v8789_v42 = vmul.f32 0.6931472, %v11964_v36  ;;  %11987 = vlog2.f32 %v8204_v12  ;;  %v15819_v16 = vrot.slane %v12769_v19, %v4909_v54  ;;  %v6594_v34 = vmax.f32 %v15722_v26, 0.0  ;;  %v5954_v54 = vpop.f32.mrf.mxu1 }
 0x8a2   : > { %v11968_v22 = vpop.eup %11967  ;;  %9463 = vst [vmem:[%s14908_s2 + $0x8c8] sm:$0xff] %v9143_v23  ;;  %v8803_v17 = vmul.f32 0.6931472, %v11966_v43  ;;  %v6946_v18 = vsub.f32 0.0, %v6626_v31  ;;  %v15823_v51 = vrot.slane %v12769_v19, %v4917_v3  ;;  %v6948_v24 = vsub.f32 0.0, %v6628_v35 }
 0x8a3   : > { %v11970_v13 = vpop.eup %11969  ;;  %v9145_v0 = vadd.f32 %v8789_v42, %v6585_v5  ;;  %v8203_v33 = vadd.f32 1.0, %v11968_v22  ;;  %v15827_v4 = vadd.f32 %v15459_v53, %v15819_v16  ;;  %v15835_v15 = vadd.f32 %v15468_v41, %v15800_v20  ;;  %v5956_v43 = vpop.f32.mrf.mxu1 }
 0x8a4   : > { %v11972_v27 = vpop.eup %11971  ;;  %v9152_v46 = vadd.f32 %v8803_v17, %v6592_v50  ;;  %v8205_v29 = vadd.f32 1.0, %v11970_v13  ;;  %v7270_v9 = vmul.f32 1.442695, %v6946_v18  ;;  %v15830_v45 = vadd.f32 %v5952_v48, %v15823_v51 }
 0x8a5   : > { %9465 = vst [vmem:[%s14908_s2 + $0x8d8] sm:$0xff] %v9145_v0  ;;  %v8807_v26 = vmul.f32 0.6931472, %v11972_v27  ;;  %11989 = vlog2.f32 %v8203_v33  ;;  %v7274_v19 = vmul.f32 1.442695, %v6948_v24  ;;  %v6593_v53 = vmax.f32 %v15729_v10, 0.0 }
 0x8a6   : > { %v11974_v58 = vpop.eup %11973  ;;  %9472 = vst [vmem:[%s14908_s2 + $0x910] sm:$0xff] %v9152_v46  ;;  %11991 = vlog2.f32 %v8205_v29  ;;  %v6627_v40 = vand.u32 2147483647, %v15827_v4  ;;  %v6629_v3 = vand.u32 2147483647, %v15830_v45  ;;  %v6595_v59 = vmax.f32 %v15738_v61, 0.0 }
 0x8a7   : > { %v11976_v8 = vpop.eup %11975  ;;  %v9154_v11 = vadd.f32 %v8807_v26, %v6594_v34  ;;  %v8805_v49 = vmul.f32 0.6931472, %v11974_v58  ;;  %11993 = vpow2.f32 %v7270_v9  ;;  %v6636_v50 = vand.u32 2147483647, %v15835_v15  ;;  %v5960_v9 = vpop.f32.mrf.mxu1 }
 0x8a8   : > { %v11978_v5 = vpop.eup %11977  ;;  %v8212_v41 = vadd.f32 1.0, %v11976_v8  ;;  %11995 = vpow2.f32 %v7274_v19  ;;  %v6947_v12 = vsub.f32 0.0, %v6627_v40  ;;  %v6949_v36 = vsub.f32 0.0, %v6629_v3 }
 0x8a9   : > { %9474 = vst [vmem:[%s14908_s2 + $0x920] sm:$0xff] %v9154_v11  ;;  %v9153_v23 = vadd.f32 %v8805_v49, %v6593_v53  ;;  %v8214_v10 = vadd.f32 1.0, %v11978_v5  ;;  %v15845_v31 = vadd.f32 %v5954_v54, %v15803_v32  ;;  %v15849_v48 = vadd.f32 %v15479_v39, %v15819_v16 }
 0x8aa   : > { %v11980_v42 = vpop.eup %11979  ;;  %11997 = vlog2.f32 %v8212_v41  ;;  %v7272_v35 = vmul.f32 1.442695, %v6947_v12  ;;  %v7276_v61 = vmul.f32 1.442695, %v6949_v36  ;;  %v6602_v34 = vmax.f32 %v15742_v7, 0.0 }
 0x8ab   : > { %v11982_v22 = vpop.eup %11981  ;;  %9473 = vst [vmem:[%s14908_s2 + $0x918] sm:$0xff] %v9153_v23  ;;  %v8809_v17 = vmul.f32 0.6931472, %v11980_v42  ;;  %11999 = vlog2.f32 %v8214_v10  ;;  %v6956_v18 = vsub.f32 0.0, %v6636_v50  ;;  %v6604_v33 = vmax.f32 %v15746_v57, 0.0  ;;  %v5962_v23 = vpop.f32.mrf.mxu1 }
 0x8ac   : > { %v11984_v13 = vpop.eup %11983  ;;  %v8823_v0 = vmul.f32 0.6931472, %v11982_v22  ;;  %12001 = vpow2.f32 %v7272_v35  ;;  %v6638_v24 = vand.u32 2147483647, %v15845_v31  ;;  %v6637_v58 = vand.u32 2147483647, %v15849_v48 }
 0x8ad   : > { %v11986_v27 = vpop.eup %11985  ;;  %v9155_v46 = vadd.f32 %v8809_v17, %v6595_v59  ;;  %v8213_v39 = vadd.f32 1.0, %v11984_v13  ;;  %12003 = vpow2.f32 %v7276_v61  ;;  %v7290_v29 = vmul.f32 1.442695, %v6956_v18 }
 0x8ae   : > { %v11988_v26 = vpop.eup %11987  ;;  %v9162_v19 = vadd.f32 %v8823_v0, %v6602_v34  ;;  %v8215_v7 = vadd.f32 1.0, %v11986_v27  ;;  %v6958_v54 = vsub.f32 0.0, %v6638_v24  ;;  %v15858_v57 = vadd.f32 %v5956_v43, %v15823_v51 }
 0x8af   : > { %9475 = vst [vmem:[%s14908_s2 + $0x928] sm:$0xff] %v9155_v46  ;;  %v8827_v53 = vmul.f32 0.6931472, %v11988_v26  ;;  %12005 = vlog2.f32 %v8213_v39  ;;  %v15862_v40 = vadd.f32 %v15500_v62, %v15800_v20  ;;  %v6957_v8 = vsub.f32 0.0, %v6637_v58  ;;  %v5964_v39 = vpop.f32.mrf.mxu1 }
 0x8b0   : > { %9482 = vst [vmem:[%s14908_s2 + $0x960] sm:$0xff] %v9162_v19  ;;  %12007 = vlog2.f32 %v8215_v7  ;;  %v7294_v3 = vmul.f32 1.442695, %v6958_v54  ;;  %v15866_v11 = vadd.f32 %v5960_v9, %v15803_v32  ;;  %v6603_v59 = vmax.f32 %v15757_v52, 0.0 }
 0x8b1   : > { %v9164_v49 = vadd.f32 %v8827_v53, %v6604_v33  ;;  %12009 = vpow2.f32 %v7290_v29  ;;  %v6639_v5 = vand.u32 2147483647, %v15858_v57  ;;  %v6605_v12 = vmax.f32 %v15760_v37, 0.0  ;;  %v17519_v37 = vld [vmem:[#allocation5_spill] sm:$0xff] }
 0x8b2   : > { %v11990_v41 = vpop.eup %11989  ;;  %12011 = vpow2.f32 %v7294_v3  ;;  %v7292_v62 = vmul.f32 1.442695, %v6957_v8  ;;  %v6646_v36 = vand.u32 2147483647, %v15862_v40  ;;  %v6612_v43 = vmax.f32 %v15770_v6, 0.0 }
 0x8b3   : > { %v11992_v10 = vpop.eup %11991  ;;  %9484 = vst [vmem:[%s14908_s2 + $0x970] sm:$0xff] %v9164_v49  ;;  %v8825_v50 = vmul.f32 0.6931472, %v11990_v41  ;;  %v6959_v42 = vsub.f32 0.0, %v6639_v5  ;;  %v6648_v35 = vand.u32 2147483647, %v15866_v11  ;;  %v15877_v17 = vadd.f32 %v17519_v37, %v15819_v16 }
 0x8b4   : > { %v11994_v52 = vpop.eup %11993  ;;  %v8829_v61 = vmul.f32 0.6931472, %v11992_v10  ;;  %12013 = vpow2.f32 %v7292_v62  ;;  %v6966_v22 = vsub.f32 0.0, %v6646_v36  ;;  %v6614_v6 = vmax.f32 %v15774_v14, 0.0 }
 0x8b5   : > { %v11996_v34 = vpop.eup %11995  ;;  %v9163_v18 = vadd.f32 %v8825_v50, %v6603_v59  ;;  %v7906_v13 = vadd.f32 1.0, %v11994_v52  ;;  %v7296_v0 = vmul.f32 1.442695, %v6959_v42  ;;  %v6968_v33 = vsub.f32 0.0, %v6648_v35 }
 0x8b6   : > { %v9165_v24 = vadd.f32 %v8829_v61, %v6605_v12  ;;  %v7908_v27 = vadd.f32 1.0, %v11996_v34  ;;  %v7310_v46 = vmul.f32 1.442695, %v6966_v22  ;;  %v6647_v26 = vand.u32 2147483647, %v15877_v17  ;;  %v15895_v12 = vpop.f32.mrf.mxu0 }
 0x8b7   : > { %v11998_v29 = vpop.eup %11997  ;;  %9483 = vst [vmem:[%s14908_s2 + $0x968] sm:$0xff] %v9163_v18  ;;  %12015 = vlog2.f32 %v7906_v13  ;;  %v7314_v9 = vmul.f32 1.442695, %v6968_v33  ;;  %v15883_v19 = vadd.f32 %v5962_v23, %v15823_v51  ;;  %v6613_v58 = vmax.f32 %v15784_v55, 0.0 }
 0x8b8   : > { %v12000_v7 = vpop.eup %11999  ;;  %9485 = vst [vmem:[%s14908_s2 + $0x978] sm:$0xff] %v9165_v24  ;;  %v8843_v54 = vmul.f32 0.6931472, %v11998_v29  ;;  %12017 = vlog2.f32 %v7908_v27  ;;  %v15889_v14 = vadd.f32 %v15522_v28, %v15800_v20  ;;  %v6967_v8 = vsub.f32 0.0, %v6647_v26 }
 0x8b9   : > { %v12002_v53 = vpop.eup %12001  ;;  %v8847_v3 = vmul.f32 0.6931472, %v12000_v7  ;;  %12019 = vpow2.f32 %v7296_v0  ;;  %v15892_v49 = vadd.f32 %v5964_v39, %v15803_v32  ;;  %v6649_v55 = vand.u32 2147483647, %v15883_v19 }
 0x8ba   : > { %v12004_v59 = vpop.eup %12003  ;;  %v9172_v5 = vadd.f32 %v8843_v54, %v6612_v43  ;;  %v7907_v41 = vadd.f32 1.0, %v12002_v53  ;;  %12021 = vpow2.f32 %v7310_v46  ;;  %v7312_v36 = vmul.f32 1.442695, %v6967_v8  ;;  %v5966_v43 = vpop.f32.mrf.mxu1 }
 0x8bb   : > { %v9174_v62 = vadd.f32 %v8847_v3, %v6614_v6  ;;  %v7909_v28 = vadd.f32 1.0, %v12004_v59  ;;  %12023 = vpow2.f32 %v7314_v9  ;;  %v6615_v10 = vmax.f32 %v15790_v25, 0.0  ;;  %v15903_v25 = vpop.f32.mrf.mxu0 }
 0x8bc   : > { %v12006_v23 = vpop.eup %12005  ;;  %9492 = vst [vmem:[%s14908_s2 + $0x9b0] sm:$0xff] %v9172_v5  ;;  %12025 = vlog2.f32 %v7907_v41  ;;  %v6969_v50 = vsub.f32 0.0, %v6649_v55  ;;  %v6656_v42 = vand.u32 2147483647, %v15889_v14  ;;  %v6306_v61 = vmax.f32 %v15808_v47, 0.0  ;;  %v5970_v29 = vpop.f32.mrf.mxu1 }
 0x8bd   : > { %v12008_v35 = vpop.eup %12007  ;;  %9494 = vst [vmem:[%s14908_s2 + $0x9c0] sm:$0xff] %v9174_v62  ;;  %v8845_v52 = vmul.f32 0.6931472, %v12006_v23  ;;  %12027 = vlog2.f32 %v7909_v28  ;;  %v6658_v22 = vand.u32 2147483647, %v15892_v49  ;;  %v15907_v27 = vadd.f32 %v15539_v2, %v15819_v16  ;;  %v15920_v3 = vpop.f32.mrf.mxu0 }
 0x8be   : > { %v12010_v37 = vpop.eup %12009  ;;  %v8849_v34 = vmul.f32 0.6931472, %v12008_v35  ;;  %12029 = vpow2.f32 %v7312_v36  ;;  %v7316_v18 = vmul.f32 1.442695, %v6969_v50  ;;  %v6976_v13 = vsub.f32 0.0, %v6656_v42 }
 0x8bf   : > { %v12012_v0 = vpop.eup %12011  ;;  %v9173_v33 = vadd.f32 %v8845_v52, %v6613_v58  ;;  %v7916_v24 = vadd.f32 1.0, %v12010_v37  ;;  %v6978_v6 = vsub.f32 0.0, %v6658_v22  ;;  %v6308_v26 = vmax.f32 %v15812_v60, 0.0 }
 0x8c0   : > { %v9175_v47 = vadd.f32 %v8849_v34, %v6615_v10  ;;  %v7918_v46 = vadd.f32 1.0, %v12012_v0  ;;  %12031 = vpow2.f32 %v7316_v18  ;;  %v7330_v39 = vmul.f32 1.442695, %v6976_v13 }
 0x8c1   : > { %v12014_v9 = vpop.eup %12013  ;;  %9493 = vst [vmem:[%s14908_s2 + $0x9b8] sm:$0xff] %v9173_v33  ;;  %12033 = vlog2.f32 %v7916_v24  ;;  %v7334_v7 = vmul.f32 1.442695, %v6978_v6  ;;  %v6657_v54 = vand.u32 2147483647, %v15907_v27  ;;  %v15914_v53 = vadd.f32 %v5966_v43, %v15823_v51  ;;  %v15935_v43 = vpop.f32.mrf.mxu0 }
 0x8c2   : > { %9495 = vst [vmem:[%s14908_s2 + $0x9c8] sm:$0xff] %v9175_v47  ;;  %12035 = vlog2.f32 %v7918_v46  ;;  %v7917_v58 = vadd.f32 1.0, %v12014_v9  ;;  %v15918_v2 = vadd.f32 %v15563_v38, %v15800_v20  ;;  %v6307_v8 = vmax.f32 %v15827_v4, 0.0  ;;  %v5972_v24 = vpop.f32.mrf.mxu1 }
 0x8c3   : > { %12037 = vpow2.f32 %v7330_v39  ;;  %v6977_v60 = vsub.f32 0.0, %v6657_v54  ;;  %v15924_v59 = vadd.f32 %v5970_v29, %v15803_v32  ;;  %v6309_v41 = vmax.f32 %v15830_v45, 0.0 }
 0x8c4   : > { %v12016_v5 = vpop.eup %12015  ;;  %v6316_v55 = vmax.f32 %v15835_v15, 0.0  ;;  %12039 = vlog2.f32 %v7917_v58  ;;  %v6659_v62 = vand.u32 2147483647, %v15914_v53  ;;  %v6666_v23 = vand.u32 2147483647, %v15918_v2 }
 0x8c5   : > { %v12018_v28 = vpop.eup %12017  ;;  %v8231_v38 = vmul.f32 0.6931472, %v12016_v5  ;;  %12041 = vpow2.f32 %v7334_v7  ;;  %v7332_v36 = vmul.f32 1.442695, %v6977_v60  ;;  %v6668_v42 = vand.u32 2147483647, %v15924_v59  ;;  %v15941_v7 = vpop.f32.mrf.mxu0 }
 0x8c6   : > { %v12020_v4 = vpop.eup %12019  ;;  %v8235_v10 = vmul.f32 0.6931472, %v12018_v28  ;;  %v6979_v50 = vsub.f32 0.0, %v6659_v62  ;;  %v15933_v45 = vadd.f32 %v15575_v1, %v15819_v16  ;;  %v6986_v37 = vsub.f32 0.0, %v6666_v23 }
 0x8c7   : > { %v12022_v35 = vpop.eup %12021  ;;  %v8866_v52 = vadd.f32 %v8231_v38, %v6306_v61  ;;  %v7919_v22 = vadd.f32 1.0, %v12020_v4  ;;  %12043 = vpow2.f32 %v7332_v36  ;;  %v6988_v33 = vsub.f32 0.0, %v6668_v42  ;;  %v5974_v4 = vpop.f32.mrf.mxu1 }
 0x8c8   : > { %v12024_v34 = vpop.eup %12023  ;;  %v8868_v18 = vadd.f32 %v8235_v10, %v6308_v26  ;;  %v7926_v13 = vadd.f32 1.0, %v12022_v35  ;;  %v7336_v0 = vmul.f32 1.442695, %v6979_v50  ;;  %v6318_v47 = vmax.f32 %v15845_v31, 0.0 }
 0x8c9   : > { %v12026_v6 = vpop.eup %12025  ;;  %9186 = vst [vmem:[%s14908_s2 + $0x20] sm:$0xff] %v8866_v52  ;;  %12045 = vlog2.f32 %v7919_v22  ;;  %v7928_v1 = vadd.f32 1.0, %v12024_v34  ;;  %v7350_v46 = vmul.f32 1.442695, %v6986_v37  ;;  %v7354_v29 = vmul.f32 1.442695, %v6988_v33 }
 0x8ca   : > { %v12028_v39 = vpop.eup %12027  ;;  %9188 = vst [vmem:[%s14908_s2 + $0x30] sm:$0xff] %v8868_v18  ;;  %v8233_v61 = vmul.f32 0.6931472, %v12026_v6  ;;  %12047 = vlog2.f32 %v7926_v13  ;;  %v6667_v9 = vand.u32 2147483647, %v15933_v45  ;;  %v15944_v58 = vadd.f32 %v5972_v24, %v15823_v51  ;;  %v5976_v24 = vpop.f32.mrf.mxu1 }
 0x8cb   : > { %v12030_v26 = vpop.eup %12029  ;;  %v8237_v54 = vmul.f32 0.6931472, %v12028_v39  ;;  %12049 = vlog2.f32 %v7928_v1  ;;  %v15948_v31 = vadd.f32 %v15582_v56, %v15800_v20  ;;  %v6317_v36 = vmax.f32 %v15849_v48, 0.0 }
 0x8cc   : > { %v8867_v60 = vadd.f32 %v8233_v61, %v6307_v8  ;;  %v7927_v5 = vadd.f32 1.0, %v12030_v26  ;;  %12051 = vpow2.f32 %v7336_v0  ;;  %v6987_v62 = vsub.f32 0.0, %v6667_v9  ;;  %v15954_v8 = vpop.f32.mrf.mxu0 }
 0x8cd   : > { %v12032_v28 = vpop.eup %12031  ;;  %v8869_v38 = vadd.f32 %v8237_v54, %v6309_v41  ;;  %12053 = vpow2.f32 %v7350_v46  ;;  %v6669_v23 = vand.u32 2147483647, %v15944_v58  ;;  %v6319_v50 = vmax.f32 %v15858_v57, 0.0 }
 0x8ce   : > { %v12034_v10 = vpop.eup %12033  ;;  %9187 = vst [vmem:[%s14908_s2 + $0x28] sm:$0xff] %v8867_v60  ;;  %12055 = vlog2.f32 %v7927_v5  ;;  %v7929_v56 = vadd.f32 1.0, %v12032_v28  ;;  %v7352_v42 = vmul.f32 1.442695, %v6987_v62  ;;  %v6676_v48 = vand.u32 2147483647, %v15948_v31  ;;  %v5980_v62 = vpop.f32.mrf.mxu1 }
 0x8cf   : > { %v12036_v35 = vpop.eup %12035  ;;  %9189 = vst [vmem:[%s14908_s2 + $0x38] sm:$0xff] %v8869_v38  ;;  %v8251_v52 = vmul.f32 0.6931472, %v12034_v10  ;;  %12057 = vpow2.f32 %v7354_v29  ;;  %v6989_v41 = vsub.f32 0.0, %v6669_v23  ;;  %v15959_v34 = vadd.f32 %v5974_v4, %v15803_v32  ;;  %v15968_v29 = vpop.f32.mrf.mxu0 }
 0x8d0   : > { %v12038_v22 = vpop.eup %12037  ;;  %v8255_v37 = vmul.f32 0.6931472, %v12036_v35  ;;  %12059 = vlog2.f32 %v7929_v56  ;;  %v15963_v57 = vadd.f32 %v15597_v21, %v15819_v16  ;;  %v6326_v39 = vmax.f32 %v15862_v40, 0.0 }
 0x8d1   : > { %v12040_v18 = vpop.eup %12039  ;;  %v8876_v13 = vadd.f32 %v8251_v52, %v6316_v55  ;;  %v7936_v0 = vadd.f32 1.0, %v12038_v22  ;;  %12061 = vpow2.f32 %v7352_v42  ;;  %v7356_v33 = vmul.f32 1.442695, %v6989_v41 }
 0x8d2   : > { %v12042_v6 = vpop.eup %12041  ;;  %v8878_v1 = vadd.f32 %v8255_v37, %v6318_v47  ;;  %v8253_v46 = vmul.f32 0.6931472, %v12040_v18  ;;  %v6996_v61 = vsub.f32 0.0, %v6676_v48  ;;  %v6328_v21 = vmax.f32 %v15866_v11, 0.0 }
 0x8d3   : > { %9196 = vst [vmem:[%s14908_s2 + $0x70] sm:$0xff] %v8876_v13  ;;  %12063 = vlog2.f32 %v7936_v0  ;;  %v7938_v15 = vadd.f32 1.0, %v12042_v6  ;;  %v6678_v55 = vand.u32 2147483647, %v15959_v34  ;;  %v6677_v47 = vand.u32 2147483647, %v15963_v57 }
 0x8d4   : > { %v12044_v9 = vpop.eup %12043  ;;  %9198 = vst [vmem:[%s14908_s2 + $0x80] sm:$0xff] %v8878_v1  ;;  %v8877_v26 = vadd.f32 %v8253_v46, %v6317_v36  ;;  %12065 = vpow2.f32 %v7356_v33  ;;  %v7370_v54 = vmul.f32 1.442695, %v6996_v61  ;;  %v15976_v5 = vadd.f32 %v5976_v24, %v15823_v51  ;;  %v15981_v36 = vpop.f32.mrf.mxu0 }
 0x8d5   : > { %12067 = vlog2.f32 %v7938_v15  ;;  %v7937_v40 = vadd.f32 1.0, %v12044_v9  ;;  %v6998_v60 = vsub.f32 0.0, %v6678_v55  ;;  %v6327_v28 = vmax.f32 %v15877_v17, 0.0 }
 0x8d6   : > { %v12046_v11 = vpop.eup %12045  ;;  %9197 = vst [vmem:[%s14908_s2 + $0x78] sm:$0xff] %v8877_v26  ;;  %v6329_v38 = vmax.f32 %v15883_v19, 0.0  ;;  %12069 = vpow2.f32 %v7370_v54  ;;  %v6997_v23 = vsub.f32 0.0, %v6677_v47  ;;  %v15985_v42 = vadd.f32 %v15621_v30, %v15800_v20  ;;  %v15992_v24 = vpop.f32.mrf.mxu0 }
 0x8d7   : > { %v12048_v4 = vpop.eup %12047  ;;  %v8257_v10 = vmul.f32 0.6931472, %v12046_v11  ;;  %12071 = vlog2.f32 %v7937_v40  ;;  %v7374_v56 = vmul.f32 1.442695, %v6998_v60  ;;  %v6679_v17 = vand.u32 2147483647, %v15976_v5 }
 0x8d8   : > { %v12050_v35 = vpop.eup %12049  ;;  %v8271_v52 = vmul.f32 0.6931472, %v12048_v4  ;;  %v7372_v41 = vmul.f32 1.442695, %v6997_v23  ;;  %v15989_v19 = vadd.f32 %v5980_v62, %v15803_v32  ;;  %v6336_v18 = vmax.f32 %v15889_v14, 0.0  ;;  %v5982_v14 = vpop.f32.mrf.mxu1 }
 0x8d9   : > { %v12052_v48 = vpop.eup %12051  ;;  %v8879_v22 = vadd.f32 %v8257_v10, %v6319_v50  ;;  %v8275_v37 = vmul.f32 0.6931472, %v12050_v35  ;;  %12073 = vpow2.f32 %v7374_v56  ;;  %v6999_v33 = vsub.f32 0.0, %v6679_v17  ;;  %v16004_v11 = vpop.f32.mrf.mxu0 }
 0x8da   : > { %v12054_v13 = vpop.eup %12053  ;;  %v8886_v0 = vadd.f32 %v8271_v52, %v6326_v39  ;;  %v7939_v30 = vadd.f32 1.0, %v12052_v48  ;;  %12075 = vpow2.f32 %v7372_v41  ;;  %v6686_v61 = vand.u32 2147483647, %v15985_v42  ;;  %v5984_v56 = vpop.f32.mrf.mxu1 }
 0x8db   : > { %v12056_v6 = vpop.eup %12055  ;;  %9199 = vst [vmem:[%s14908_s2 + $0x88] sm:$0xff] %v8879_v22  ;;  %v8888_v1 = vadd.f32 %v8275_v37, %v6328_v21  ;;  %v7946_v46 = vadd.f32 1.0, %v12054_v13  ;;  %v15998_v50 = vadd.f32 %v15634_v44, %v15819_v16  ;;  %v7376_v55 = vmul.f32 1.442695, %v6999_v33  ;;  %v17520_v37 = vld [vmem:[#allocation6_spill] sm:$0xff]  ;;  %v16021_v33 = vpop.f32.mrf.mxu0 }
 0x8dc   : > { %v12058_v15 = vpop.eup %12057  ;;  %9206 = vst [vmem:[%s14908_s2 + $0xc0] sm:$0xff] %v8886_v0  ;;  %v8273_v39 = vmul.f32 0.6931472, %v12056_v6  ;;  %12077 = vlog2.f32 %v7939_v30  ;;  %v6688_v9 = vand.u32 2147483647, %v15989_v19  ;;  %v6338_v54 = vmax.f32 %v15892_v49, 0.0 }
 0x8dd   : > { %v12060_v26 = vpop.eup %12059  ;;  %9208 = vst [vmem:[%s14908_s2 + $0xd0] sm:$0xff] %v8888_v1  ;;  %12079 = vlog2.f32 %v7946_v46  ;;  %v7948_v21 = vadd.f32 1.0, %v12058_v15  ;;  %v7006_v47 = vsub.f32 0.0, %v6686_v61  ;;  %v6687_v10 = vand.u32 2147483647, %v15998_v50 }
 0x8de   : > { %v12062_v40 = vpop.eup %12061  ;;  %v8887_v60 = vadd.f32 %v8273_v39, %v6327_v28  ;;  %v8277_v44 = vmul.f32 0.6931472, %v12060_v26  ;;  %12081 = vpow2.f32 %v7376_v55  ;;  %v7008_v62 = vsub.f32 0.0, %v6688_v9 }
 0x8df   : > { %12083 = vlog2.f32 %v7948_v21  ;;  %v7947_v23 = vadd.f32 1.0, %v12062_v40  ;;  %v7390_v4 = vmul.f32 1.442695, %v7006_v47  ;;  %v6337_v52 = vmax.f32 %v15907_v27, 0.0  ;;  %v5986_v47 = vpop.f32.mrf.mxu1 }
 0x8e0   : > { %v12064_v35 = vpop.eup %12063  ;;  %9207 = vst [vmem:[%s14908_s2 + $0xc8] sm:$0xff] %v8887_v60  ;;  %v8889_v49 = vadd.f32 %v8277_v44, %v6329_v38  ;;  %v7394_v41 = vmul.f32 1.442695, %v7008_v62  ;;  %v16010_v28 = vadd.f32 %v5982_v14, %v15823_v51  ;;  %v7007_v22 = vsub.f32 0.0, %v6687_v10  ;;  %v17521_v10 = vld [vmem:[#allocation7_spill] sm:$0xff] }
 0x8e1   : > { %v12066_v17 = vpop.eup %12065  ;;  %v8291_v48 = vmul.f32 0.6931472, %v12064_v35  ;;  %12085 = vlog2.f32 %v7947_v23  ;;  %v16014_v13 = vadd.f32 %v17520_v37, %v15800_v20  ;;  %v16019_v27 = vadd.f32 %v5984_v56, %v15803_v32 }
 0x8e2   : > { %v12068_v0 = vpop.eup %12067  ;;  %9209 = vst [vmem:[%s14908_s2 + $0xd8] sm:$0xff] %v8889_v49  ;;  %v7949_v30 = vadd.f32 1.0, %v12066_v17  ;;  %12087 = vpow2.f32 %v7390_v4  ;;  %v6689_v38 = vand.u32 2147483647, %v16010_v28  ;;  %v7392_v61 = vmul.f32 1.442695, %v7007_v22 }
 0x8e3   : > { %v12070_v6 = vpop.eup %12069  ;;  %v8896_v1 = vadd.f32 %v8291_v48, %v6336_v18  ;;  %v8295_v46 = vmul.f32 0.6931472, %v12068_v0  ;;  %12089 = vpow2.f32 %v7394_v41  ;;  %v6339_v15 = vmax.f32 %v15914_v53, 0.0  ;;  %v16028_v53 = vpop.f32.mrf.mxu0 }
 0x8e4   : > { %v12072_v14 = vpop.eup %12071  ;;  %12091 = vlog2.f32 %v7949_v30  ;;  %v7956_v39 = vadd.f32 1.0, %v12070_v6  ;;  %v7009_v55 = vsub.f32 0.0, %v6689_v38  ;;  %v6696_v21 = vand.u32 2147483647, %v16014_v13 }
 0x8e5   : > { %9216 = vst [vmem:[%s14908_s2 + $0x110] sm:$0xff] %v8896_v1  ;;  %v8898_v9 = vadd.f32 %v8295_v46, %v6338_v54  ;;  %v8293_v26 = vmul.f32 0.6931472, %v12072_v14  ;;  %12093 = vpow2.f32 %v7392_v61  ;;  %v6346_v18 = vmax.f32 %v15918_v2, 0.0  ;;  %v16042_v38 = vpop.f32.mrf.mxu0 }
 0x8e6   : > { %v12074_v40 = vpop.eup %12073  ;;  %12095 = vlog2.f32 %v7956_v39  ;;  %v7396_v60 = vmul.f32 1.442695, %v7009_v55  ;;  %v6698_v44 = vand.u32 2147483647, %v16019_v27  ;;  %v7016_v54 = vsub.f32 0.0, %v6696_v21 }
 0x8e7   : > { %v12076_v62 = vpop.eup %12075  ;;  %9218 = vst [vmem:[%s14908_s2 + $0x120] sm:$0xff] %v8898_v9  ;;  %v8897_v23 = vadd.f32 %v8293_v26, %v6337_v52  ;;  %v7958_v4 = vadd.f32 1.0, %v12074_v40  ;;  %v16033_v56 = vadd.f32 %v17521_v10, %v15819_v16  ;;  %v16036_v2 = vadd.f32 %v5986_v47, %v15823_v51 }
 0x8e8   : > { %v7957_v35 = vadd.f32 1.0, %v12076_v62  ;;  %12097 = vpow2.f32 %v7396_v60  ;;  %v7018_v49 = vsub.f32 0.0, %v6698_v44  ;;  %v6348_v17 = vmax.f32 %v15924_v59, 0.0  ;;  %v5990_v59 = vpop.f32.mrf.mxu1  ;;  %v16055_v62 = vpop.f32.mrf.mxu0 }
 0x8e9   : > { %v12078_v41 = vpop.eup %12077  ;;  %9217 = vst [vmem:[%s14908_s2 + $0x118] sm:$0xff] %v8897_v23  ;;  %12099 = vlog2.f32 %v7958_v4  ;;  %v7410_v48 = vmul.f32 1.442695, %v7016_v54  ;;  %v6697_v52 = vand.u32 2147483647, %v16033_v56  ;;  %v6347_v0 = vmax.f32 %v15933_v45, 0.0 }
 0x8ea   : > { %v12080_v22 = vpop.eup %12079  ;;  %v8297_v37 = vmul.f32 0.6931472, %v12078_v41  ;;  %12101 = vlog2.f32 %v7957_v35  ;;  %v7414_v30 = vmul.f32 1.442695, %v7018_v49  ;;  %v6699_v61 = vand.u32 2147483647, %v16036_v2  ;;  %v5992_v41 = vpop.f32.mrf.mxu1 }
 0x8eb   : > { %v12082_v6 = vpop.eup %12081  ;;  %v8311_v1 = vmul.f32 0.6931472, %v12080_v22  ;;  %12103 = vpow2.f32 %v7410_v48  ;;  %v7017_v46 = vsub.f32 0.0, %v6697_v52  ;;  %v16047_v45 = vadd.f32 %v15895_v12, %v15800_v20 }
 0x8ec   : > { %v12084_v14 = vpop.eup %12083  ;;  %v8899_v39 = vadd.f32 %v8297_v37, %v6339_v15  ;;  %v7959_v55 = vadd.f32 1.0, %v12082_v6  ;;  %12105 = vpow2.f32 %v7414_v30  ;;  %v7019_v47 = vsub.f32 0.0, %v6699_v61 }
 0x8ed   : > { %v8906_v9 = vadd.f32 %v8311_v1, %v6346_v18  ;;  %v8315_v26 = vmul.f32 0.6931472, %v12084_v14  ;;  %v7412_v21 = vmul.f32 1.442695, %v7017_v46  ;;  %v6349_v60 = vmax.f32 %v15944_v58, 0.0  ;;  %v16065_v1 = vpop.f32.mrf.mxu0 }
 0x8ee   : > { %v12086_v40 = vpop.eup %12085  ;;  %9219 = vst [vmem:[%s14908_s2 + $0x128] sm:$0xff] %v8899_v39  ;;  %12107 = vlog2.f32 %v7959_v55  ;;  %v6706_v44 = vand.u32 2147483647, %v16047_v45  ;;  %v16053_v15 = vadd.f32 %v5990_v59, %v15803_v32  ;;  %v7416_v4 = vmul.f32 1.442695, %v7019_v47  ;;  %v5994_v55 = vpop.f32.mrf.mxu1 }
 0x8ef   : > { %v12088_v23 = vpop.eup %12087  ;;  %9226 = vst [vmem:[%s14908_s2 + $0x160] sm:$0xff] %v8906_v9  ;;  %v8908_v12 = vadd.f32 %v8315_v26, %v6348_v17  ;;  %v8313_v18 = vmul.f32 0.6931472, %v12086_v40  ;;  %12109 = vpow2.f32 %v7412_v21  ;;  %v6356_v10 = vmax.f32 %v15948_v31, 0.0 }
 0x8f0   : > { %v12090_v54 = vpop.eup %12089  ;;  %v7966_v35 = vadd.f32 1.0, %v12088_v23  ;;  %v7026_v58 = vsub.f32 0.0, %v6706_v44  ;;  %v6708_v49 = vand.u32 2147483647, %v16053_v15  ;;  %12111 = vpow2.f32 %v7416_v4  ;;  %v16079_v23 = vpop.f32.mrf.mxu0 }
 0x8f1   : > { %v12092_v48 = vpop.eup %12091  ;;  %9228 = vst [vmem:[%s14908_s2 + $0x170] sm:$0xff] %v8908_v12  ;;  %v8907_v52 = vadd.f32 %v8313_v18, %v6347_v0  ;;  %v7968_v22 = vadd.f32 1.0, %v12090_v54  ;;  %v16063_v17 = vadd.f32 %v15903_v25, %v15819_v16  ;;  %v6358_v61 = vmax.f32 %v15959_v34, 0.0 }
 0x8f2   : > { %v12094_v37 = vpop.eup %12093  ;;  %v8317_v30 = vmul.f32 0.6931472, %v12092_v48  ;;  %12113 = vlog2.f32 %v7966_v35  ;;  %v7430_v6 = vmul.f32 1.442695, %v7026_v58  ;;  %v7028_v31 = vsub.f32 0.0, %v6708_v49  ;;  %v5996_v49 = vpop.f32.mrf.mxu1 }
 0x8f3   : > { %v12096_v46 = vpop.eup %12095  ;;  %9227 = vst [vmem:[%s14908_s2 + $0x168] sm:$0xff] %v8907_v52  ;;  %12115 = vlog2.f32 %v7968_v22  ;;  %v7967_v0 = vadd.f32 1.0, %v12094_v37  ;;  %v6707_v59 = vand.u32 2147483647, %v16063_v17  ;;  %v16071_v21 = vadd.f32 %v5992_v41, %v15823_v51 }
 0x8f4   : > { %v8909_v14 = vadd.f32 %v8317_v30, %v6349_v60  ;;  %v8331_v39 = vmul.f32 0.6931472, %v12096_v46  ;;  %12117 = vpow2.f32 %v7430_v6  ;;  %v7434_v25 = vmul.f32 1.442695, %v7028_v31  ;;  %v16089_v31 = vpop.f32.mrf.mxu0 }
 0x8f5   : > { %v12098_v9 = vpop.eup %12097  ;;  %12119 = vlog2.f32 %v7967_v0  ;;  %v7027_v26 = vsub.f32 0.0, %v6707_v59  ;;  %v16075_v47 = vadd.f32 %v15920_v3, %v15800_v20  ;;  %v6357_v60 = vmax.f32 %v15963_v57, 0.0 }
 0x8f6   : > { %v12100_v34 = vpop.eup %12099  ;;  %9229 = vst [vmem:[%s14908_s2 + $0x178] sm:$0xff] %v8909_v14  ;;  %v8916_v40 = vadd.f32 %v8331_v39, %v6356_v10  ;;  %v7969_v44 = vadd.f32 1.0, %v12098_v9  ;;  %12121 = vpow2.f32 %v7434_v25  ;;  %v6359_v4 = vmax.f32 %v15976_v5, 0.0 }
 0x8f7   : > { %v12102_v12 = vpop.eup %12101  ;;  %v8335_v18 = vmul.f32 0.6931472, %v12100_v34  ;;  %v7432_v54 = vmul.f32 1.442695, %v7027_v26  ;;  %v16083_v35 = vadd.f32 %v5994_v55, %v15803_v32  ;;  %v6709_v10 = vand.u32 2147483647, %v16071_v21 }
 0x8f8   : > { %v12104_v58 = vpop.eup %12103  ;;  %9236 = vst [vmem:[%s14908_s2 + $0x1b0] sm:$0xff] %v8916_v40  ;;  %v8333_v3 = vmul.f32 0.6931472, %v12102_v12  ;;  %12123 = vlog2.f32 %v7969_v44  ;;  %v6716_v57 = vand.u32 2147483647, %v16075_v47  ;;  %v6366_v52 = vmax.f32 %v15985_v42, 0.0  ;;  %v6000_v12 = vpop.f32.mrf.mxu1 }
 0x8f9   : > { %v12106_v41 = vpop.eup %12105  ;;  %v8918_v48 = vadd.f32 %v8335_v18, %v6358_v61  ;;  %v7976_v5 = vadd.f32 1.0, %v12104_v58  ;;  %12125 = vpow2.f32 %v7432_v54  ;;  %v7029_v30 = vsub.f32 0.0, %v6709_v10  ;;  %v16105_v18 = vpop.f32.mrf.mxu0 }
 0x8fa   : > { %v8917_v22 = vadd.f32 %v8333_v3, %v6357_v60  ;;  %v7978_v37 = vadd.f32 1.0, %v12106_v41  ;;  %v7036_v6 = vsub.f32 0.0, %v6716_v57  ;;  %v6718_v0 = vand.u32 2147483647, %v16083_v35 }
 0x8fb   : > { %v12108_v46 = vpop.eup %12107  ;;  %9238 = vst [vmem:[%s14908_s2 + $0x1c0] sm:$0xff] %v8918_v48  ;;  %12127 = vlog2.f32 %v7976_v5  ;;  %v16095_v59 = vadd.f32 %v15935_v43, %v15819_v16  ;;  %v16098_v61 = vadd.f32 %v5996_v49, %v15823_v51  ;;  %v7436_v39 = vmul.f32 1.442695, %v7029_v30 }
 0x8fc   : > { %v12110_v42 = vpop.eup %12109  ;;  %9237 = vst [vmem:[%s14908_s2 + $0x1b8] sm:$0xff] %v8917_v22  ;;  %v8337_v14 = vmul.f32 0.6931472, %v12108_v46  ;;  %12129 = vlog2.f32 %v7978_v37  ;;  %v7450_v25 = vmul.f32 1.442695, %v7036_v6  ;;  %v6368_v55 = vmax.f32 %v15989_v19, 0.0  ;;  %v16115_v46 = vpop.f32.mrf.mxu0 }
 0x8fd   : > { %v7977_v9 = vadd.f32 1.0, %v12110_v42  ;;  %v7038_v26 = vsub.f32 0.0, %v6718_v0  ;;  %v6717_v34 = vand.u32 2147483647, %v16095_v59  ;;  %v12112_v40 = vpop.eup %12111  ;;  %v6367_v43 = vmax.f32 %v15998_v50, 0.0 }
 0x8fe   : > { %v8919_v60 = vadd.f32 %v8337_v14, %v6359_v4  ;;  %12131 = vpow2.f32 %v7436_v39  ;;  %v6719_v44 = vand.u32 2147483647, %v16098_v61  ;;  %v7979_v58 = vadd.f32 1.0, %v12112_v40  ;;  %v6002_v39 = vpop.f32.mrf.mxu1 }
 0x8ff   : > { %v12114_v54 = vpop.eup %12113  ;;  %12133 = vlog2.f32 %v7977_v9  ;;  %v7454_v3 = vmul.f32 1.442695, %v7038_v26  ;;  %v7037_v19 = vsub.f32 0.0, %v6717_v34  ;;  %v16110_v4 = vadd.f32 %v15941_v7, %v15800_v20 }
 0x900   : > { %v12116_v10 = vpop.eup %12115  ;;  %9239 = vst [vmem:[%s14908_s2 + $0x1c8] sm:$0xff] %v8919_v60  ;;  %v8351_v57 = vmul.f32 0.6931472, %v12114_v54  ;;  %12135 = vpow2.f32 %v7450_v25  ;;  %v7039_v49 = vsub.f32 0.0, %v6719_v44  ;;  %v16113_v5 = vadd.f32 %v6000_v12, %v15803_v32  ;;  %v16130_v12 = vpop.f32.mrf.mxu0 }
 0x901   : > { %v12118_v50 = vpop.eup %12117  ;;  %v8355_v41 = vmul.f32 0.6931472, %v12116_v10  ;;  %12137 = vlog2.f32 %v7979_v58  ;;  %v7452_v48 = vmul.f32 1.442695, %v7037_v19  ;;  %v6369_v14 = vmax.f32 %v16010_v28, 0.0 }
 0x902   : > { %v12120_v22 = vpop.eup %12119  ;;  %v8926_v37 = vadd.f32 %v8351_v57, %v6366_v52  ;;  %v7986_v30 = vadd.f32 1.0, %v12118_v50  ;;  %12139 = vpow2.f32 %v7454_v3  ;;  %v7456_v6 = vmul.f32 1.442695, %v7039_v49  ;;  %v6004_v50 = vpop.f32.mrf.mxu1 }
 0x903   : > { %v12122_v0 = vpop.eup %12121  ;;  %v8928_v42 = vadd.f32 %v8355_v41, %v6368_v55  ;;  %v8353_v7 = vmul.f32 0.6931472, %v12120_v22  ;;  %12141 = vpow2.f32 %v7452_v48  ;;  %v6376_v25 = vmax.f32 %v16014_v13, 0.0 }
 0x904   : > { %9246 = vst [vmem:[%s14908_s2 + $0x200] sm:$0xff] %v8926_v37  ;;  %12143 = vlog2.f32 %v7986_v30  ;;  %v7988_v9 = vadd.f32 1.0, %v12122_v0  ;;  %v6726_v52 = vand.u32 2147483647, %v16110_v4  ;;  %v6728_v40 = vand.u32 2147483647, %v16113_v5  ;;  %v16142_v0 = vpop.f32.mrf.mxu0 }
 0x905   : > { %v12124_v26 = vpop.eup %12123  ;;  %9248 = vst [vmem:[%s14908_s2 + $0x210] sm:$0xff] %v8928_v42  ;;  %v8927_v34 = vadd.f32 %v8353_v7, %v6367_v43  ;;  %12145 = vpow2.f32 %v7456_v6  ;;  %v16125_v55 = vadd.f32 %v15954_v8, %v15819_v16  ;;  %v16128_v13 = vadd.f32 %v6002_v39, %v15823_v51 }
 0x906   : > { %v12126_v28 = vpop.eup %12125  ;;  %v8357_v60 = vmul.f32 0.6931472, %v12124_v26  ;;  %12147 = vlog2.f32 %v7988_v9  ;;  %v7046_v44 = vsub.f32 0.0, %v6726_v52  ;;  %v6378_v43 = vmax.f32 %v16019_v27, 0.0 }
 0x907   : > { %9247 = vst [vmem:[%s14908_s2 + $0x208] sm:$0xff] %v8927_v34  ;;  %v7987_v54 = vadd.f32 1.0, %v12126_v28  ;;  %v7048_v58 = vsub.f32 0.0, %v6728_v40  ;;  %v6727_v3 = vand.u32 2147483647, %v16125_v55  ;;  %v6377_v10 = vmax.f32 %v16033_v56, 0.0 }
 0x908   : > { %v12128_v19 = vpop.eup %12127  ;;  %v8929_v8 = vadd.f32 %v8357_v60, %v6369_v14  ;;  %v7470_v57 = vmul.f32 1.442695, %v7046_v44  ;;  %v6729_v49 = vand.u32 2147483647, %v16128_v13  ;;  %v16140_v6 = vadd.f32 %v15968_v29, %v15800_v20 }
 0x909   : > { %v12130_v41 = vpop.eup %12129  ;;  %v8371_v48 = vmul.f32 0.6931472, %v12128_v19  ;;  %12149 = vlog2.f32 %v7987_v54  ;;  %v7474_v22 = vmul.f32 1.442695, %v7048_v58  ;;  %v7047_v37 = vsub.f32 0.0, %v6727_v3 }
 0x90a   : > { %9249 = vst [vmem:[%s14908_s2 + $0x218] sm:$0xff] %v8929_v8  ;;  %v8375_v30 = vmul.f32 0.6931472, %v12130_v41  ;;  %12151 = vpow2.f32 %v7470_v57  ;;  %v7049_v27 = vsub.f32 0.0, %v6729_v49  ;;  %v16145_v14 = vadd.f32 %v6004_v50, %v15803_v32  ;;  %v6006_v8 = vpop.f32.mrf.mxu1 }
 0x90b   : > { %v12132_v56 = vpop.eup %12131  ;;  %v8936_v42 = vadd.f32 %v8371_v48, %v6376_v25  ;;  %12153 = vpow2.f32 %v7474_v22  ;;  %v7472_v7 = vmul.f32 1.442695, %v7047_v37  ;;  %v6379_v52 = vmax.f32 %v16036_v2, 0.0 }
 0x90c   : > { %v12134_v39 = vpop.eup %12133  ;;  %v8938_v9 = vadd.f32 %v8375_v30, %v6378_v43  ;;  %v7989_v26 = vadd.f32 1.0, %v12132_v56  ;;  %v7476_v34 = vmul.f32 1.442695, %v7049_v27  ;;  %v6386_v28 = vmax.f32 %v16047_v45, 0.0  ;;  %v16157_v43 = vpop.f32.mrf.mxu0 }
 0x90d   : > { %v12136_v40 = vpop.eup %12135  ;;  %9256 = vst [vmem:[%s14908_s2 + $0x250] sm:$0xff] %v8936_v42  ;;  %v8373_v29 = vmul.f32 0.6931472, %v12134_v39  ;;  %12155 = vpow2.f32 %v7472_v7  ;;  %v6736_v25 = vand.u32 2147483647, %v16140_v6  ;;  %v16155_v2 = vadd.f32 %v15981_v36, %v15819_v16 }
 0x90e   : > { %v12138_v60 = vpop.eup %12137  ;;  %9258 = vst [vmem:[%s14908_s2 + $0x260] sm:$0xff] %v8938_v9  ;;  %12157 = vlog2.f32 %v7989_v26  ;;  %v7996_v44 = vadd.f32 1.0, %v12136_v40  ;;  %v6738_v54 = vand.u32 2147483647, %v16145_v14  ;;  %v6388_v49 = vmax.f32 %v16053_v15, 0.0  ;;  %v16165_v7 = vpop.f32.mrf.mxu0 }
 0x90f   : > { %v12140_v58 = vpop.eup %12139  ;;  %v8937_v3 = vadd.f32 %v8373_v29, %v6377_v10  ;;  %v8377_v19 = vmul.f32 0.6931472, %v12138_v60  ;;  %12159 = vpow2.f32 %v7476_v34  ;;  %v7056_v45 = vsub.f32 0.0, %v6736_v25  ;;  %v6010_v26 = vpop.f32.mrf.mxu1 }
 0x910   : > { %v12142_v57 = vpop.eup %12141  ;;  %12161 = vlog2.f32 %v7996_v44  ;;  %v7998_v50 = vadd.f32 1.0, %v12140_v58  ;;  %v7058_v41 = vsub.f32 0.0, %v6738_v54  ;;  %v6737_v30 = vand.u32 2147483647, %v16155_v2 }
 0x911   : > { %v12144_v48 = vpop.eup %12143  ;;  %9257 = vst [vmem:[%s14908_s2 + $0x258] sm:$0xff] %v8937_v3  ;;  %v8939_v22 = vadd.f32 %v8377_v19, %v6379_v52  ;;  %v7997_v36 = vadd.f32 1.0, %v12142_v57  ;;  %v7490_v37 = vmul.f32 1.442695, %v7056_v45  ;;  %v16163_v42 = vadd.f32 %v6006_v8, %v15823_v51 }
 0x912   : > { %v12146_v27 = vpop.eup %12145  ;;  %v8391_v10 = vmul.f32 0.6931472, %v12144_v48  ;;  %12163 = vlog2.f32 %v7998_v50  ;;  %v7494_v56 = vmul.f32 1.442695, %v7058_v41  ;;  %v7057_v9 = vsub.f32 0.0, %v6737_v30  ;;  %v6012_v48 = vpop.f32.mrf.mxu1 }
 0x913   : > { %v12148_v15 = vpop.eup %12147  ;;  %9259 = vst [vmem:[%s14908_s2 + $0x268] sm:$0xff] %v8939_v22  ;;  %12165 = vlog2.f32 %v7997_v36  ;;  %v7999_v39 = vadd.f32 1.0, %v12146_v27  ;;  %v16170_v52 = vadd.f32 %v15992_v24, %v15800_v20  ;;  %v6387_v29 = vmax.f32 %v16063_v17, 0.0 }
 0x914   : > { %v8946_v34 = vadd.f32 %v8391_v10, %v6386_v28  ;;  %v8395_v40 = vmul.f32 0.6931472, %v12148_v15  ;;  %12167 = vpow2.f32 %v7490_v37  ;;  %v6389_v25 = vmax.f32 %v16071_v21, 0.0  ;;  %v16180_v28 = vpop.f32.mrf.mxu0 }
 0x915   : > { %12169 = vlog2.f32 %v7999_v39  ;;  %v7492_v60 = vmul.f32 1.442695, %v7057_v9  ;;  %v6739_v44 = vand.u32 2147483647, %v16163_v42  ;;  %v6746_v24 = vand.u32 2147483647, %v16170_v52 }
 0x916   : > { %v12150_v54 = vpop.eup %12149  ;;  %9266 = vst [vmem:[%s14908_s2 + $0x2a0] sm:$0xff] %v8946_v34  ;;  %v8948_v58 = vadd.f32 %v8395_v40, %v6388_v49  ;;  %12171 = vpow2.f32 %v7494_v56  ;;  %v16178_v3 = vadd.f32 %v6010_v26, %v15803_v32  ;;  %v16184_v45 = vadd.f32 %v16004_v11, %v15819_v16  ;;  %v16191_v15 = vpop.f32.mrf.mxu0 }
 0x917   : > { %v12152_v17 = vpop.eup %12151  ;;  %v8393_v19 = vmul.f32 0.6931472, %v12150_v54  ;;  %12173 = vpow2.f32 %v7492_v60  ;;  %v7059_v21 = vsub.f32 0.0, %v6739_v44  ;;  %v6396_v57 = vmax.f32 %v16075_v47, 0.0 }
 0x918   : > { %v12154_v8 = vpop.eup %12153  ;;  %9268 = vst [vmem:[%s14908_s2 + $0x2b0] sm:$0xff] %v8948_v58  ;;  %v8006_v49 = vadd.f32 1.0, %v12152_v17  ;;  %v7066_v50 = vsub.f32 0.0, %v6746_v24  ;;  %v6748_v41 = vand.u32 2147483647, %v16178_v3  ;;  %v6398_v36 = vmax.f32 %v16083_v35, 0.0  ;;  %v6014_v24 = vpop.f32.mrf.mxu1 }
 0x919   : > { %v8947_v22 = vadd.f32 %v8393_v19, %v6387_v29  ;;  %v8008_v37 = vadd.f32 1.0, %v12154_v8  ;;  %v7496_v30 = vmul.f32 1.442695, %v7059_v21  ;;  %v6747_v56 = vand.u32 2147483647, %v16184_v45 }
 0x91a   : > { %v12156_v27 = vpop.eup %12155  ;;  %12175 = vlog2.f32 %v8006_v49  ;;  %v7510_v10 = vmul.f32 1.442695, %v7066_v50  ;;  %v7068_v11 = vsub.f32 0.0, %v6748_v41  ;;  %v16195_v9 = vadd.f32 %v6012_v48, %v15823_v51 }
 0x91b   : > { %v12158_v47 = vpop.eup %12157  ;;  %9267 = vst [vmem:[%s14908_s2 + $0x2a8] sm:$0xff] %v8947_v22  ;;  %12177 = vlog2.f32 %v8008_v37  ;;  %v8007_v39 = vadd.f32 1.0, %v12156_v27  ;;  %v16199_v35 = vadd.f32 %v16021_v33, %v15800_v20  ;;  %v7067_v29 = vsub.f32 0.0, %v6747_v56  ;;  %v16203_v33 = vpop.f32.mrf.mxu0 }
 0x91c   : > { %v12160_v26 = vpop.eup %12159  ;;  %v8397_v34 = vmul.f32 0.6931472, %v12158_v47  ;;  %12179 = vpow2.f32 %v7496_v30  ;;  %v7514_v40 = vmul.f32 1.442695, %v7068_v11  ;;  %v6397_v44 = vmax.f32 %v16095_v59, 0.0 }
 0x91d   : > { %v12162_v60 = vpop.eup %12161  ;;  %12181 = vlog2.f32 %v8007_v39  ;;  %v8009_v54 = vadd.f32 1.0, %v12160_v26  ;;  %v6749_v58 = vand.u32 2147483647, %v16195_v9  ;;  %v7512_v21 = vmul.f32 1.442695, %v7067_v29  ;;  %v16214_v26 = vpop.f32.mrf.mxu0 }
 0x91e   : > { %v8949_v17 = vadd.f32 %v8397_v34, %v6389_v25  ;;  %v8411_v19 = vmul.f32 0.6931472, %v12162_v60  ;;  %12183 = vpow2.f32 %v7510_v10  ;;  %v6399_v49 = vmax.f32 %v16098_v61, 0.0  ;;  %v6016_v61 = vpop.f32.mrf.mxu1 }
 0x91f   : > { %v12164_v8 = vpop.eup %12163  ;;  %12185 = vlog2.f32 %v8009_v54  ;;  %v7069_v50 = vsub.f32 0.0, %v6749_v58  ;;  %v6756_v59 = vand.u32 2147483647, %v16199_v35  ;;  %v16209_v25 = vadd.f32 %v6014_v24, %v15803_v32 }
 0x920   : > { %v12166_v41 = vpop.eup %12165  ;;  %9269 = vst [vmem:[%s14908_s2 + $0x2b8] sm:$0xff] %v8949_v17  ;;  %v8956_v48 = vadd.f32 %v8411_v19, %v6396_v57  ;;  %v8415_v22 = vmul.f32 0.6931472, %v12164_v8  ;;  %12187 = vpow2.f32 %v7514_v40  ;;  %v6406_v47 = vmax.f32 %v16110_v4, 0.0 }
 0x921   : > { %v12168_v37 = vpop.eup %12167  ;;  %v8413_v30 = vmul.f32 0.6931472, %v12166_v41  ;;  %12189 = vpow2.f32 %v7512_v21  ;;  %v7516_v27 = vmul.f32 1.442695, %v7069_v50  ;;  %v7076_v10 = vsub.f32 0.0, %v6756_v59  ;;  %v16227_v59 = vpop.f32.mrf.mxu0 }
 0x922   : > { %v12170_v11 = vpop.eup %12169  ;;  %9276 = vst [vmem:[%s14908_s2 + $0x2f0] sm:$0xff] %v8956_v48  ;;  %v8958_v56 = vadd.f32 %v8415_v22, %v6398_v36  ;;  %v8016_v39 = vadd.f32 1.0, %v12168_v37  ;;  %v6758_v57 = vand.u32 2147483647, %v16209_v25  ;;  %v16219_v36 = vadd.f32 %v16028_v53, %v15819_v16 }
 0x923   : > { %v12172_v34 = vpop.eup %12171  ;;  %v8957_v40 = vadd.f32 %v8413_v30, %v6397_v44  ;;  %v8417_v29 = vmul.f32 0.6931472, %v12170_v11  ;;  %12191 = vpow2.f32 %v7516_v27  ;;  %v7530_v60 = vmul.f32 1.442695, %v7076_v10  ;;  %v6020_v44 = vpop.f32.mrf.mxu1 }
 0x924   : > { %v12174_v54 = vpop.eup %12173  ;;  %9278 = vst [vmem:[%s14908_s2 + $0x300] sm:$0xff] %v8958_v56  ;;  %12193 = vlog2.f32 %v8016_v39  ;;  %v8018_v58 = vadd.f32 1.0, %v12172_v34  ;;  %v7078_v24 = vsub.f32 0.0, %v6758_v57  ;;  %v16223_v19 = vadd.f32 %v6016_v61, %v15823_v51 }
 0x925   : > { %9277 = vst [vmem:[%s14908_s2 + $0x2f8] sm:$0xff] %v8957_v40  ;;  %v8959_v4 = vadd.f32 %v8417_v29, %v6399_v49  ;;  %v8017_v17 = vadd.f32 1.0, %v12174_v54  ;;  %12195 = vpow2.f32 %v7530_v60  ;;  %v6408_v21 = vmax.f32 %v16113_v5, 0.0  ;;  %v16242_v40 = vpop.f32.mrf.mxu0 }
 0x926   : > { %12197 = vlog2.f32 %v8018_v58  ;;  %v7534_v8 = vmul.f32 1.442695, %v7078_v24  ;;  %v6757_v50 = vand.u32 2147483647, %v16219_v36  ;;  %v6407_v53 = vmax.f32 %v16125_v55, 0.0 }
 0x927   : > { %v12176_v41 = vpop.eup %12175  ;;  %9279 = vst [vmem:[%s14908_s2 + $0x308] sm:$0xff] %v8959_v4  ;;  %12199 = vlog2.f32 %v8017_v17  ;;  %v6759_v49 = vand.u32 2147483647, %v16223_v19  ;;  %v16234_v48 = vadd.f32 %v16042_v38, %v15800_v20  ;;  %v16237_v30 = vadd.f32 %v6020_v44, %v15803_v32  ;;  %v6022_v4 = vpop.f32.mrf.mxu1 }
 0x928   : > { %v12178_v22 = vpop.eup %12177  ;;  %v8431_v37 = vmul.f32 0.6931472, %v12176_v41  ;;  %12201 = vpow2.f32 %v7534_v8  ;;  %v7077_v5 = vsub.f32 0.0, %v6757_v50  ;;  %v6409_v61 = vmax.f32 %v16128_v13, 0.0 }
 0x929   : > { %v12180_v27 = vpop.eup %12179  ;;  %v8435_v10 = vmul.f32 0.6931472, %v12178_v22  ;;  %v7079_v55 = vsub.f32 0.0, %v6759_v49  ;;  %v6766_v11 = vand.u32 2147483647, %v16234_v48  ;;  %v6416_v38 = vmax.f32 %v16140_v6, 0.0 }
 0x92a   : > { %v12182_v56 = vpop.eup %12181  ;;  %v8966_v39 = vadd.f32 %v8431_v37, %v6406_v47  ;;  %v8019_v57 = vadd.f32 1.0, %v12180_v27  ;;  %v7532_v34 = vmul.f32 1.442695, %v7077_v5  ;;  %v6768_v47 = vand.u32 2147483647, %v16237_v30  ;;  %v16252_v5 = vpop.f32.mrf.mxu0 }
 0x92b   : > { %v12184_v29 = vpop.eup %12183  ;;  %v8968_v60 = vadd.f32 %v8435_v10, %v6408_v21  ;;  %v8433_v54 = vmul.f32 0.6931472, %v12182_v56  ;;  %v7536_v58 = vmul.f32 1.442695, %v7079_v55  ;;  %v7086_v24 = vsub.f32 0.0, %v6766_v11  ;;  %v6024_v55 = vpop.f32.mrf.mxu1 }
 0x92c   : > { %v12186_v13 = vpop.eup %12185  ;;  %9286 = vst [vmem:[%s14908_s2 + $0x340] sm:$0xff] %v8966_v39  ;;  %12203 = vlog2.f32 %v8019_v57  ;;  %v8026_v17 = vadd.f32 1.0, %v12184_v29  ;;  %v16248_v6 = vadd.f32 %v16055_v62, %v15819_v16  ;;  %v6418_v21 = vmax.f32 %v16145_v14, 0.0 }
 0x92d   : > { %v12188_v44 = vpop.eup %12187  ;;  %9288 = vst [vmem:[%s14908_s2 + $0x350] sm:$0xff] %v8968_v60  ;;  %v8967_v8 = vadd.f32 %v8433_v54, %v6407_v53  ;;  %v8437_v50 = vmul.f32 0.6931472, %v12186_v13  ;;  %12205 = vpow2.f32 %v7532_v34  ;;  %v7550_v22 = vmul.f32 1.442695, %v7086_v24 }
 0x92e   : > { %v12190_v41 = vpop.eup %12189  ;;  %12207 = vlog2.f32 %v8026_v17  ;;  %v8028_v49 = vadd.f32 1.0, %v12188_v44  ;;  %v7088_v37 = vsub.f32 0.0, %v6768_v47  ;;  %v6767_v62 = vand.u32 2147483647, %v16248_v6  ;;  %v6026_v47 = vpop.f32.mrf.mxu1 }
 0x92f   : > { %9287 = vst [vmem:[%s14908_s2 + $0x348] sm:$0xff] %v8967_v8  ;;  %v8969_v27 = vadd.f32 %v8437_v50, %v6409_v61  ;;  %v8027_v10 = vadd.f32 1.0, %v12190_v41  ;;  %12209 = vpow2.f32 %v7536_v58  ;;  %v6417_v11 = vmax.f32 %v16155_v2, 0.0  ;;  %v16267_v58 = vpop.f32.mrf.mxu0 }
 0x930   : > { %v12192_v53 = vpop.eup %12191  ;;  %12211 = vlog2.f32 %v8028_v49  ;;  %v7554_v14 = vmul.f32 1.442695, %v7088_v37  ;;  %v16258_v56 = vadd.f32 %v6022_v4, %v15823_v51  ;;  %v7087_v34 = vsub.f32 0.0, %v6767_v62 }
 0x931   : > { %v12194_v39 = vpop.eup %12193  ;;  %9289 = vst [vmem:[%s14908_s2 + $0x358] sm:$0xff] %v8969_v27  ;;  %12213 = vlog2.f32 %v8027_v10  ;;  %v8029_v57 = vadd.f32 1.0, %v12192_v53  ;;  %v16263_v61 = vadd.f32 %v16065_v1, %v15800_v20  ;;  %v6419_v54 = vmax.f32 %v16163_v42, 0.0  ;;  %v16275_v62 = vpop.f32.mrf.mxu0 }
 0x932   : > { %v12196_v29 = vpop.eup %12195  ;;  %v8451_v60 = vmul.f32 0.6931472, %v12194_v39  ;;  %12215 = vpow2.f32 %v7550_v22  ;;  %v6769_v2 = vand.u32 2147483647, %v16258_v56  ;;  %v7552_v13 = vmul.f32 1.442695, %v7087_v34 }
 0x933   : > { %v12198_v24 = vpop.eup %12197  ;;  %12217 = vlog2.f32 %v8029_v57  ;;  %v8036_v4 = vadd.f32 1.0, %v12196_v29  ;;  %v16270_v17 = vadd.f32 %v6024_v55, %v15803_v32  ;;  %v6426_v49 = vmax.f32 %v16170_v52, 0.0  ;;  %v6030_v52 = vpop.f32.mrf.mxu1 }
 0x934   : > { %v12200_v1 = vpop.eup %12199  ;;  %v8976_v44 = vadd.f32 %v8451_v60, %v6416_v38  ;;  %v8455_v8 = vmul.f32 0.6931472, %v12198_v24  ;;  %12219 = vpow2.f32 %v7554_v14  ;;  %v7089_v50 = vsub.f32 0.0, %v6769_v2 }
 0x935   : > { %v12202_v42 = vpop.eup %12201  ;;  %v8453_v41 = vmul.f32 0.6931472, %v12200_v1  ;;  %12221 = vlog2.f32 %v8036_v4  ;;  %v6776_v22 = vand.u32 2147483647, %v16263_v61  ;;  %v6778_v53 = vand.u32 2147483647, %v16270_v17 }
 0x936   : > { %9296 = vst [vmem:[%s14908_s2 + $0x390] sm:$0xff] %v8976_v44  ;;  %v8978_v37 = vadd.f32 %v8455_v8, %v6418_v21  ;;  %v8038_v27 = vadd.f32 1.0, %v12202_v42  ;;  %12223 = vpow2.f32 %v7552_v13  ;;  %v7556_v10 = vmul.f32 1.442695, %v7089_v50  ;;  %v16298_v13 = vpop.f32.mrf.mxu0 }
 0x937   : > { %v8977_v38 = vadd.f32 %v8453_v41, %v6417_v11  ;;  %v7096_v55 = vsub.f32 0.0, %v6776_v22  ;;  %v16280_v14 = vadd.f32 %v16079_v23, %v15819_v16  ;;  %v6428_v39 = vmax.f32 %v16178_v3, 0.0 }
 0x938   : > { %9298 = vst [vmem:[%s14908_s2 + $0x3a0] sm:$0xff] %v8978_v37  ;;  %12225 = vlog2.f32 %v8038_v27  ;;  %v16285_v21 = vadd.f32 %v6026_v47, %v15823_v51  ;;  %v16289_v57 = vadd.f32 %v16089_v31, %v15800_v20  ;;  %v6427_v34 = vmax.f32 %v16184_v45, 0.0 }
 0x939   : > { %v12204_v11 = vpop.eup %12203  ;;  %9297 = vst [vmem:[%s14908_s2 + $0x398] sm:$0xff] %v8977_v38  ;;  %12227 = vpow2.f32 %v7556_v10  ;;  %v7570_v29 = vmul.f32 1.442695, %v7096_v55  ;;  %v7098_v23 = vsub.f32 0.0, %v6778_v53  ;;  %v6429_v24 = vmax.f32 %v16195_v9, 0.0 }
 0x93a   : > { %v12206_v60 = vpop.eup %12205  ;;  %v8457_v2 = vmul.f32 0.6931472, %v12204_v11  ;;  %v6777_v3 = vand.u32 2147483647, %v16280_v14  ;;  %v16296_v4 = vadd.f32 %v6030_v52, %v15803_v32  ;;  %v6779_v45 = vand.u32 2147483647, %v16285_v21  ;;  %v16304_v52 = vpop.f32.mrf.mxu0 }
 0x93b   : > { %v12208_v31 = vpop.eup %12207  ;;  %v8037_v47 = vadd.f32 1.0, %v12206_v60  ;;  %12229 = vpow2.f32 %v7570_v29  ;;  %v7574_v1 = vmul.f32 1.442695, %v7098_v23  ;;  %v6786_v9 = vand.u32 2147483647, %v16289_v57  ;;  %v6032_v60 = vpop.f32.mrf.mxu1 }
 0x93c   : > { %v12210_v44 = vpop.eup %12209  ;;  %v8979_v8 = vadd.f32 %v8457_v2, %v6419_v54  ;;  %v8471_v50 = vmul.f32 0.6931472, %v12208_v31  ;;  %v7097_v42 = vsub.f32 0.0, %v6777_v3  ;;  %v6436_v22 = vmax.f32 %v16199_v35, 0.0 }
 0x93d   : > { %v12212_v41 = vpop.eup %12211  ;;  %12231 = vlog2.f32 %v8037_v47  ;;  %v8039_v37 = vadd.f32 1.0, %v12210_v44  ;;  %v7099_v27 = vsub.f32 0.0, %v6779_v45  ;;  %v7106_v23 = vsub.f32 0.0, %v6786_v9 }
 0x93e   : > { %v12214_v10 = vpop.eup %12213  ;;  %9299 = vst [vmem:[%s14908_s2 + $0x3a8] sm:$0xff] %v8979_v8  ;;  %v8986_v38 = vadd.f32 %v8471_v50, %v6426_v49  ;;  %v8475_v55 = vmul.f32 0.6931472, %v12212_v41  ;;  %12233 = vpow2.f32 %v7574_v1  ;;  %v7572_v53 = vmul.f32 1.442695, %v7097_v42 }
 0x93f   : > { %v12216_v54 = vpop.eup %12215  ;;  %v8473_v11 = vmul.f32 0.6931472, %v12214_v10  ;;  %12235 = vlog2.f32 %v8039_v37  ;;  %v7576_v29 = vmul.f32 1.442695, %v7099_v27  ;;  %v6788_v49 = vand.u32 2147483647, %v16296_v4  ;;  %v6034_v27 = vpop.f32.mrf.mxu1 }
 0x940   : > { %v12218_v35 = vpop.eup %12217  ;;  %9306 = vst [vmem:[%s14908_s2 + $0x3e0] sm:$0xff] %v8986_v38  ;;  %v8988_v2 = vadd.f32 %v8475_v55, %v6428_v39  ;;  %v8046_v3 = vadd.f32 1.0, %v12216_v54  ;;  %12237 = vpow2.f32 %v7572_v53  ;;  %v7590_v45 = vmul.f32 1.442695, %v7106_v23  ;;  %v16313_v39 = vpop.f32.mrf.mxu0 }
 0x941   : > { %v12220_v31 = vpop.eup %12219  ;;  %v8987_v47 = vadd.f32 %v8473_v11, %v6427_v34  ;;  %v8477_v1 = vmul.f32 0.6931472, %v12218_v35  ;;  %12239 = vpow2.f32 %v7576_v29  ;;  %v7108_v50 = vsub.f32 0.0, %v6788_v49 }
 0x942   : > { %v12222_v44 = vpop.eup %12221  ;;  %9308 = vst [vmem:[%s14908_s2 + $0x3f0] sm:$0xff] %v8988_v2  ;;  %12241 = vlog2.f32 %v8046_v3  ;;  %v8048_v8 = vadd.f32 1.0, %v12220_v31  ;;  %v16311_v42 = vadd.f32 %v16105_v18, %v15819_v16  ;;  %v16317_v34 = vadd.f32 %v6032_v60, %v15823_v51  ;;  %v16330_v35 = vpop.f32.mrf.mxu0 }
 0x943   : > { %v12224_v9 = vpop.eup %12223  ;;  %9307 = vst [vmem:[%s14908_s2 + $0x3e8] sm:$0xff] %v8987_v47  ;;  %v8989_v41 = vadd.f32 %v8477_v1, %v6429_v24  ;;  %v8491_v37 = vmul.f32 0.6931472, %v12222_v44  ;;  %12243 = vpow2.f32 %v7590_v45  ;;  %v7594_v38 = vmul.f32 1.442695, %v7108_v50  ;;  %v6036_v1 = vpop.f32.mrf.mxu1 }
 0x944   : > { %12245 = vlog2.f32 %v8048_v8  ;;  %v8047_v10 = vadd.f32 1.0, %v12224_v9  ;;  %v6438_v18 = vmax.f32 %v16209_v25, 0.0  ;;  %v6787_v54 = vand.u32 2147483647, %v16311_v42 }
 0x945   : > { %v12226_v55 = vpop.eup %12225  ;;  %9309 = vst [vmem:[%s14908_s2 + $0x3f8] sm:$0xff] %v8989_v41  ;;  %v8996_v53 = vadd.f32 %v8491_v37, %v6436_v22  ;;  %v6789_v11 = vand.u32 2147483647, %v16317_v34  ;;  %v16325_v23 = vadd.f32 %v16115_v46, %v15800_v20  ;;  %v16328_v60 = vadd.f32 %v6034_v27, %v15803_v32 }
 0x946   : > { %v12228_v24 = vpop.eup %12227  ;;  %v8495_v29 = vmul.f32 0.6931472, %v12226_v55  ;;  %12247 = vlog2.f32 %v8047_v10  ;;  %v7107_v25 = vsub.f32 0.0, %v6787_v54  ;;  %v6437_v31 = vmax.f32 %v16219_v36, 0.0  ;;  %v16343_v36 = vpop.f32.mrf.mxu0 }
 0x947   : > { %9316 = vst [vmem:[%s14908_s2 + $0x430] sm:$0xff] %v8996_v53  ;;  %v8049_v22 = vadd.f32 1.0, %v12228_v24  ;;  %12249 = vpow2.f32 %v7594_v38  ;;  %v7109_v2 = vsub.f32 0.0, %v6789_v11  ;;  %v6439_v47 = vmax.f32 %v16223_v19, 0.0  ;;  %v6040_v11 = vpop.f32.mrf.mxu1 }
 0x948   : > { %v12230_v3 = vpop.eup %12229  ;;  %v8998_v49 = vadd.f32 %v8495_v29, %v6438_v18  ;;  %v6796_v46 = vand.u32 2147483647, %v16325_v23  ;;  %v7592_v44 = vmul.f32 1.442695, %v7107_v25  ;;  %v6446_v9 = vmax.f32 %v16234_v48, 0.0 }
 0x949   : > { %12251 = vlog2.f32 %v8049_v22  ;;  %v8056_v45 = vadd.f32 1.0, %v12230_v3  ;;  %v7596_v8 = vmul.f32 1.442695, %v7109_v2  ;;  %v6798_v37 = vand.u32 2147483647, %v16328_v60 }
 0x94a   : > { %v12232_v50 = vpop.eup %12231  ;;  %9318 = vst [vmem:[%s14908_s2 + $0x440] sm:$0xff] %v8998_v49  ;;  %v7116_v41 = vsub.f32 0.0, %v6796_v46  ;;  %v16341_v27 = vadd.f32 %v16130_v12, %v15819_v16  ;;  %v6448_v38 = vmax.f32 %v16237_v30, 0.0  ;;  %v16347_v55 = vadd.f32 %v6036_v1, %v15823_v51  ;;  %v16354_v49 = vpop.f32.mrf.mxu0 }
 0x94b   : > { %v12234_v19 = vpop.eup %12233  ;;  %v8493_v10 = vmul.f32 0.6931472, %v12232_v50  ;;  %12253 = vlog2.f32 %v8056_v45  ;;  %v7118_v54 = vsub.f32 0.0, %v6798_v37  ;;  %v16351_v22 = vadd.f32 %v16142_v0, %v15800_v20 }
 0x94c   : > { %v12236_v53 = vpop.eup %12235  ;;  %v8058_v18 = vadd.f32 1.0, %v12234_v19  ;;  %12255 = vpow2.f32 %v7592_v44  ;;  %v7610_v48 = vmul.f32 1.442695, %v7116_v41  ;;  %v6797_v3 = vand.u32 2147483647, %v16341_v27 }
 0x94d   : > { %v12238_v24 = vpop.eup %12237  ;;  %v8997_v12 = vadd.f32 %v8493_v10, %v6437_v31  ;;  %v8497_v29 = vmul.f32 0.6931472, %v12236_v53  ;;  %12257 = vpow2.f32 %v7596_v8  ;;  %v7614_v2 = vmul.f32 1.442695, %v7118_v54 }
 0x94e   : > { %v12240_v30 = vpop.eup %12239  ;;  %12259 = vlog2.f32 %v8058_v18  ;;  %v8057_v25 = vadd.f32 1.0, %v12238_v24  ;;  %v16358_v31 = vadd.f32 %v6040_v11, %v15803_v32  ;;  %v7117_v8 = vsub.f32 0.0, %v6797_v3 }
 0x94f   : > { %v12242_v46 = vpop.eup %12241  ;;  %9317 = vst [vmem:[%s14908_s2 + $0x438] sm:$0xff] %v8997_v12  ;;  %v8999_v1 = vadd.f32 %v8497_v29, %v6439_v47  ;;  %v8059_v45 = vadd.f32 1.0, %v12240_v30  ;;  %12261 = vpow2.f32 %v7610_v48  ;;  %v6799_v50 = vand.u32 2147483647, %v16347_v55  ;;  %v16364_v48 = vpop.f32.mrf.mxu0 }
 0x950   : > { %v12244_v44 = vpop.eup %12243  ;;  %v8511_v0 = vmul.f32 0.6931472, %v12242_v46  ;;  %12263 = vlog2.f32 %v8057_v25  ;;  %v6447_v37 = vmax.f32 %v16248_v6, 0.0  ;;  %v6806_v47 = vand.u32 2147483647, %v16351_v22  ;;  %v6042_v29 = vpop.f32.mrf.mxu1 }
 0x951   : > { %v12246_v41 = vpop.eup %12245  ;;  %9319 = vst [vmem:[%s14908_s2 + $0x448] sm:$0xff] %v8999_v1  ;;  %12265 = vlog2.f32 %v8059_v45  ;;  %v8066_v19 = vadd.f32 1.0, %v12244_v44  ;;  %v7612_v18 = vmul.f32 1.442695, %v7117_v8  ;;  %v6449_v11 = vmax.f32 %v16258_v56, 0.0  ;;  %v16378_v8 = vpop.f32.mrf.mxu0 }
 0x952   : > { %v9006_v10 = vadd.f32 %v8511_v0, %v6446_v9  ;;  %v8515_v53 = vmul.f32 0.6931472, %v12246_v41  ;;  %12267 = vpow2.f32 %v7614_v2  ;;  %v7119_v24 = vsub.f32 0.0, %v6799_v50 }
 0x953   : > { %v12248_v54 = vpop.eup %12247  ;;  %12269 = vlog2.f32 %v8066_v19  ;;  %v7126_v12 = vsub.f32 0.0, %v6806_v47  ;;  %v6808_v9 = vand.u32 2147483647, %v16358_v31  ;;  %v16371_v1 = vadd.f32 %v16157_v43, %v15819_v16 }
 0x954   : > { %v12250_v6 = vpop.eup %12249  ;;  %9326 = vst [vmem:[%s14908_s2 + $0x480] sm:$0xff] %v9006_v10  ;;  %v9008_v30 = vadd.f32 %v8515_v53, %v6448_v38  ;;  %v8513_v25 = vmul.f32 0.6931472, %v12248_v54  ;;  %12271 = vpow2.f32 %v7612_v18  ;;  %v7616_v2 = vmul.f32 1.442695, %v7119_v24  ;;  %v6044_v10 = vpop.f32.mrf.mxu1 }
 0x955   : > { %v8068_v3 = vadd.f32 1.0, %v12250_v6  ;;  %v7630_v46 = vmul.f32 1.442695, %v7126_v12  ;;  %v6456_v44 = vmax.f32 %v16263_v61, 0.0  ;;  %v7128_v0 = vsub.f32 0.0, %v6808_v9 }
 0x956   : > { %v12252_v56 = vpop.eup %12251  ;;  %9328 = vst [vmem:[%s14908_s2 + $0x490] sm:$0xff] %v9008_v30  ;;  %v9007_v45 = vadd.f32 %v8513_v25, %v6447_v37  ;;  %v16376_v38 = vadd.f32 %v6042_v29, %v15823_v51  ;;  %v6807_v41 = vand.u32 2147483647, %v16371_v1  ;;  %v16383_v19 = vadd.f32 %v16165_v7, %v15800_v20  ;;  %v16389_v30 = vpop.f32.mrf.mxu0 }
 0x957   : > { %v8517_v50 = vmul.f32 0.6931472, %v12252_v56  ;;  %12273 = vlog2.f32 %v8068_v3  ;;  %v6458_v37 = vmax.f32 %v16270_v17, 0.0  ;;  %v7634_v61 = vmul.f32 1.442695, %v7128_v0 }
 0x958   : > { %v12254_v43 = vpop.eup %12253  ;;  %9327 = vst [vmem:[%s14908_s2 + $0x488] sm:$0xff] %v9007_v45  ;;  %12275 = vpow2.f32 %v7616_v2  ;;  %v6809_v47 = vand.u32 2147483647, %v16376_v38  ;;  %v7127_v24 = vsub.f32 0.0, %v6807_v41  ;;  %v6457_v29 = vmax.f32 %v16280_v14, 0.0  ;;  %v6046_v14 = vpop.f32.mrf.mxu1 }
 0x959   : > { %v12256_v53 = vpop.eup %12255  ;;  %v9009_v18 = vadd.f32 %v8517_v50, %v6449_v11  ;;  %v8531_v54 = vmul.f32 0.6931472, %v12254_v43  ;;  %12277 = vpow2.f32 %v7630_v46  ;;  %v6816_v2 = vand.u32 2147483647, %v16383_v19 }
 0x95a   : > { %v12258_v12 = vpop.eup %12257  ;;  %v8067_v7 = vadd.f32 1.0, %v12256_v53  ;;  %12279 = vpow2.f32 %v7634_v61  ;;  %v7129_v6 = vsub.f32 0.0, %v6809_v47  ;;  %v7632_v3 = vmul.f32 1.442695, %v7127_v24 }
 0x95b   : > { %v12260_v17 = vpop.eup %12259  ;;  %9329 = vst [vmem:[%s14908_s2 + $0x498] sm:$0xff] %v9009_v18  ;;  %v9016_v25 = vadd.f32 %v8531_v54, %v6456_v44  ;;  %v8069_v9 = vadd.f32 1.0, %v12258_v12  ;;  %v16394_v45 = vadd.f32 %v6044_v10, %v15803_v32  ;;  %v6459_v50 = vmax.f32 %v16285_v21, 0.0  ;;  %v16402_v18 = vpop.f32.mrf.mxu0 }
 0x95c   : > { %v12262_v11 = vpop.eup %12261  ;;  %v8535_v56 = vmul.f32 0.6931472, %v12260_v17  ;;  %12281 = vlog2.f32 %v8067_v7  ;;  %v7636_v46 = vmul.f32 1.442695, %v7129_v6  ;;  %v7136_v44 = vsub.f32 0.0, %v6816_v2  ;;  %v6050_v17 = vpop.f32.mrf.mxu1 }
 0x95d   : > { %v12264_v0 = vpop.eup %12263  ;;  %9336 = vst [vmem:[%s14908_s2 + $0x4d0] sm:$0xff] %v9016_v25  ;;  %12283 = vlog2.f32 %v8069_v9  ;;  %v8076_v41 = vadd.f32 1.0, %v12262_v11  ;;  %v16400_v53 = vadd.f32 %v16180_v28, %v15819_v16  ;;  %v6818_v21 = vand.u32 2147483647, %v16394_v45 }
 0x95e   : > { %v12266_v43 = vpop.eup %12265  ;;  %v9018_v61 = vadd.f32 %v8535_v56, %v6458_v37  ;;  %v8533_v47 = vmul.f32 0.6931472, %v12264_v0  ;;  %12285 = vpow2.f32 %v7632_v3  ;;  %v7650_v24 = vmul.f32 1.442695, %v7136_v44 }
 0x95f   : > { %v12268_v10 = vpop.eup %12267  ;;  %v8537_v54 = vmul.f32 0.6931472, %v12266_v43  ;;  %12287 = vlog2.f32 %v8076_v41  ;;  %v6466_v37 = vmax.f32 %v16289_v57, 0.0  ;;  %v7138_v3 = vsub.f32 0.0, %v6818_v21 }
 0x960   : > { %v12270_v12 = vpop.eup %12269  ;;  %9338 = vst [vmem:[%s14908_s2 + $0x4e0] sm:$0xff] %v9018_v61  ;;  %v9017_v7 = vadd.f32 %v8533_v47, %v6457_v29  ;;  %v8078_v6 = vadd.f32 1.0, %v12268_v10  ;;  %12289 = vpow2.f32 %v7636_v46  ;;  %v6817_v11 = vand.u32 2147483647, %v16400_v53  ;;  %v16412_v29 = vpop.f32.mrf.mxu0 }
 0x961   : > { %v12272_v28 = vpop.eup %12271  ;;  %v9019_v25 = vadd.f32 %v8537_v54, %v6459_v50  ;;  %v8551_v9 = vmul.f32 0.6931472, %v12270_v12  ;;  %12291 = vpow2.f32 %v7650_v24  ;;  %v16410_v56 = vadd.f32 %v6046_v14, %v15823_v51 }
 0x962   : > { %9337 = vst [vmem:[%s14908_s2 + $0x4d8] sm:$0xff] %v9017_v7  ;;  %12293 = vlog2.f32 %v8078_v6  ;;  %v8077_v2 = vadd.f32 1.0, %v12272_v28  ;;  %v7654_v46 = vmul.f32 1.442695, %v7138_v3  ;;  %v16417_v0 = vadd.f32 %v16191_v15, %v15800_v20 }
 0x963   : > { %9339 = vst [vmem:[%s14908_s2 + $0x4e8] sm:$0xff] %v9019_v25  ;;  %v9026_v57 = vadd.f32 %v8551_v9, %v6466_v37  ;;  %v16420_v50 = vadd.f32 %v6050_v17, %v15803_v32  ;;  %v6468_v44 = vmax.f32 %v16296_v4, 0.0  ;;  %v7137_v43 = vsub.f32 0.0, %v6817_v11  ;;  %v6052_v4 = vpop.f32.mrf.mxu1  ;;  %v16428_v37 = vpop.f32.mrf.mxu0 }
 0x964   : > { %v12274_v41 = vpop.eup %12273  ;;  %12295 = vlog2.f32 %v8077_v2  ;;  %v6819_v14 = vand.u32 2147483647, %v16410_v56  ;;  %v6467_v10 = vmax.f32 %v16311_v42, 0.0  ;;  %v6826_v54 = vand.u32 2147483647, %v16417_v0 }
 0x965   : > { %v12276_v61 = vpop.eup %12275  ;;  %9346 = vst [vmem:[%s14908_s2 + $0x520] sm:$0xff] %v9026_v57  ;;  %v8555_v47 = vmul.f32 0.6931472, %v12274_v41  ;;  %12297 = vpow2.f32 %v7654_v46  ;;  %v6469_v24 = vmax.f32 %v16317_v34, 0.0  ;;  %v7652_v12 = vmul.f32 1.442695, %v7137_v43 }
 0x966   : > { %v12278_v15 = vpop.eup %12277  ;;  %v8079_v21 = vadd.f32 1.0, %v12276_v61  ;;  %v7139_v7 = vsub.f32 0.0, %v6819_v14  ;;  %v7146_v25 = vsub.f32 0.0, %v6826_v54  ;;  %v6828_v9 = vand.u32 2147483647, %v16420_v50  ;;  %v16441_v61 = vpop.f32.mrf.mxu0 }
 0x967   : > { %v12280_v6 = vpop.eup %12279  ;;  %v9028_v17 = vadd.f32 %v8555_v47, %v6468_v44  ;;  %v8086_v28 = vadd.f32 1.0, %v12278_v15  ;;  %v16433_v2 = vadd.f32 %v16203_v33, %v15819_v16  ;;  %v16437_v46 = vadd.f32 %v6052_v4, %v15823_v51 }
 0x968   : > { %12299 = vlog2.f32 %v8079_v21  ;;  %v8088_v42 = vadd.f32 1.0, %v12280_v6  ;;  %v7656_v3 = vmul.f32 1.442695, %v7139_v7  ;;  %v7670_v11 = vmul.f32 1.442695, %v7146_v25 }
 0x969   : > { %v12282_v34 = vpop.eup %12281  ;;  %9348 = vst [vmem:[%s14908_s2 + $0x530] sm:$0xff] %v9028_v17  ;;  %12301 = vlog2.f32 %v8086_v28  ;;  %v7148_v57 = vsub.f32 0.0, %v6828_v9  ;;  %v6476_v43 = vmax.f32 %v16325_v23, 0.0  ;;  %v6827_v14 = vand.u32 2147483647, %v16433_v2  ;;  %v6054_v17 = vpop.f32.mrf.mxu1 }
 0x96a   : > { %v12284_v41 = vpop.eup %12283  ;;  %v8553_v44 = vmul.f32 0.6931472, %v12282_v34  ;;  %12303 = vlog2.f32 %v8088_v42  ;;  %v6478_v54 = vmax.f32 %v16328_v60, 0.0  ;;  %v6829_v9 = vand.u32 2147483647, %v16437_v46 }
 0x96b   : > { %v12286_v47 = vpop.eup %12285  ;;  %v8557_v33 = vmul.f32 0.6931472, %v12284_v41  ;;  %12305 = vpow2.f32 %v7652_v12  ;;  %v7674_v15 = vmul.f32 1.442695, %v7148_v57  ;;  %v7147_v6 = vsub.f32 0.0, %v6827_v14  ;;  %v16450_v12 = vpop.f32.mrf.mxu0 }
 0x96c   : > { %v12288_v21 = vpop.eup %12287  ;;  %v9027_v7 = vadd.f32 %v8553_v44, %v6467_v10  ;;  %v8087_v4 = vadd.f32 1.0, %v12286_v47  ;;  %12307 = vpow2.f32 %v7656_v3  ;;  %v16448_v10 = vadd.f32 %v16214_v26, %v15800_v20  ;;  %v6056_v47 = vpop.f32.mrf.mxu1 }
 0x96d   : > { %v12290_v23 = vpop.eup %12289  ;;  %v9029_v28 = vadd.f32 %v8557_v33, %v6469_v24  ;;  %v8571_v25 = vmul.f32 0.6931472, %v12288_v21  ;;  %12309 = vpow2.f32 %v7670_v11  ;;  %v7672_v60 = vmul.f32 1.442695, %v7147_v6  ;;  %v16463_v6 = vpop.f32.mrf.mxu0 }
 0x96e   : > { %v12292_v42 = vpop.eup %12291  ;;  %9347 = vst [vmem:[%s14908_s2 + $0x528] sm:$0xff] %v9027_v7  ;;  %12311 = vlog2.f32 %v8087_v4  ;;  %v8089_v34 = vadd.f32 1.0, %v12290_v23  ;;  %v7149_v11 = vsub.f32 0.0, %v6829_v9  ;;  %v6477_v44 = vmax.f32 %v16341_v27, 0.0 }
 0x96f   : > { %v12294_v3 = vpop.eup %12293  ;;  %9349 = vst [vmem:[%s14908_s2 + $0x538] sm:$0xff] %v9029_v28  ;;  %v9036_v57 = vadd.f32 %v8571_v25, %v6476_v43  ;;  %v8096_v24 = vadd.f32 1.0, %v12292_v42  ;;  %12313 = vpow2.f32 %v7674_v15  ;;  %v6836_v14 = vand.u32 2147483647, %v16448_v10 }
 0x970   : > { %v8575_v41 = vmul.f32 0.6931472, %v12294_v3  ;;  %12315 = vlog2.f32 %v8089_v34  ;;  %v7676_v26 = vmul.f32 1.442695, %v7149_v11  ;;  %v16457_v21 = vadd.f32 %v6054_v17, %v15803_v32 }
 0x971   : > { %v12296_v33 = vpop.eup %12295  ;;  %9356 = vst [vmem:[%s14908_s2 + $0x570] sm:$0xff] %v9036_v57  ;;  %12317 = vlog2.f32 %v8096_v24  ;;  %v16461_v43 = vadd.f32 %v16227_v59, %v15819_v16  ;;  %v7156_v27 = vsub.f32 0.0, %v6836_v14  ;;  %v6479_v23 = vmax.f32 %v16347_v55, 0.0 }
 0x972   : > { %v12298_v15 = vpop.eup %12297  ;;  %v9038_v7 = vadd.f32 %v8575_v41, %v6478_v54  ;;  %v8573_v4 = vmul.f32 0.6931472, %v12296_v33  ;;  %12319 = vpow2.f32 %v7672_v60  ;;  %v6838_v25 = vand.u32 2147483647, %v16457_v21  ;;  %v6060_v54 = vpop.f32.mrf.mxu1 }
 0x973   : > { %v8098_v28 = vadd.f32 1.0, %v12298_v15  ;;  %12321 = vpow2.f32 %v7676_v26  ;;  %v6486_v9 = vmax.f32 %v16351_v22, 0.0  ;;  %v7690_v59 = vmul.f32 1.442695, %v7156_v27  ;;  %v16479_v41 = vpop.f32.mrf.mxu0 }
 0x974   : > { %9358 = vst [vmem:[%s14908_s2 + $0x580] sm:$0xff] %v9038_v7  ;;  %v9037_v17 = vadd.f32 %v8573_v4, %v6477_v44  ;;  %v6837_v42 = vand.u32 2147483647, %v16461_v43  ;;  %v7158_v60 = vsub.f32 0.0, %v6838_v25  ;;  %v16471_v3 = vadd.f32 %v6056_v47, %v15823_v51 }
 0x975   : > { %v12300_v34 = vpop.eup %12299  ;;  %12323 = vlog2.f32 %v8098_v28  ;;  %v16475_v55 = vadd.f32 %v16242_v40, %v15800_v20  ;;  %v6488_v11 = vmax.f32 %v16358_v31, 0.0  ;;  %v6487_v33 = vmax.f32 %v16371_v1, 0.0 }
 0x976   : > { %v12302_v57 = vpop.eup %12301  ;;  %9357 = vst [vmem:[%s14908_s2 + $0x578] sm:$0xff] %v9037_v17  ;;  %v8577_v24 = vmul.f32 0.6931472, %v12300_v34  ;;  %12325 = vpow2.f32 %v7690_v59  ;;  %v7157_v22 = vsub.f32 0.0, %v6837_v42  ;;  %v7694_v47 = vmul.f32 1.442695, %v7158_v60  ;;  %v16488_v34 = vpop.f32.mrf.mxu0 }
 0x977   : > { %v12304_v44 = vpop.eup %12303  ;;  %v8591_v14 = vmul.f32 0.6931472, %v12302_v57  ;;  %v16483_v26 = vadd.f32 %v6060_v54, %v15803_v32  ;;  %v6839_v31 = vand.u32 2147483647, %v16471_v3  ;;  %v6846_v17 = vand.u32 2147483647, %v16475_v55 }
 0x978   : > { %v12306_v40 = vpop.eup %12305  ;;  %v9039_v15 = vadd.f32 %v8577_v24, %v6479_v23  ;;  %v8595_v7 = vmul.f32 0.6931472, %v12304_v44  ;;  %v7692_v4 = vmul.f32 1.442695, %v7157_v22  ;;  %12327 = vpow2.f32 %v7694_v47  ;;  %v6062_v24 = vpop.f32.mrf.mxu1 }
 0x979   : > { %v12308_v27 = vpop.eup %12307  ;;  %v9046_v28 = vadd.f32 %v8591_v14, %v6486_v9  ;;  %v8097_v25 = vadd.f32 1.0, %v12306_v40  ;;  %v7159_v54 = vsub.f32 0.0, %v6839_v31  ;;  %v6489_v60 = vmax.f32 %v16376_v38, 0.0 }
 0x97a   : > { %v12310_v59 = vpop.eup %12309  ;;  %9359 = vst [vmem:[%s14908_s2 + $0x588] sm:$0xff] %v9039_v15  ;;  %v9048_v1 = vadd.f32 %v8595_v7, %v6488_v11  ;;  %v8099_v42 = vadd.f32 1.0, %v12308_v27  ;;  %12329 = vpow2.f32 %v7692_v4  ;;  %v7166_v9 = vsub.f32 0.0, %v6846_v17 }
 0x97b   : > { %v12312_v23 = vpop.eup %12311  ;;  %9366 = vst [vmem:[%s14908_s2 + $0x5c0] sm:$0xff] %v9046_v28  ;;  %12331 = vlog2.f32 %v8097_v25  ;;  %v8106_v57 = vadd.f32 1.0, %v12310_v59  ;;  %v7696_v14 = vmul.f32 1.442695, %v7159_v54  ;;  %v6848_v11 = vand.u32 2147483647, %v16483_v26  ;;  %v16498_v28 = vpop.f32.mrf.mxu0 }
 0x97c   : > { %v12314_v22 = vpop.eup %12313  ;;  %9368 = vst [vmem:[%s14908_s2 + $0x5d0] sm:$0xff] %v9048_v1  ;;  %v8593_v44 = vmul.f32 0.6931472, %v12312_v23  ;;  %12333 = vlog2.f32 %v8099_v42  ;;  %v7710_v15 = vmul.f32 1.442695, %v7166_v9  ;;  %v16496_v7 = vadd.f32 %v16252_v5, %v15819_v16  ;;  %v6064_v42 = vpop.f32.mrf.mxu1 }
 0x97d   : > { %v12316_v47 = vpop.eup %12315  ;;  %12335 = vlog2.f32 %v8106_v57  ;;  %v8108_v40 = vadd.f32 1.0, %v12314_v22  ;;  %v7168_v27 = vsub.f32 0.0, %v6848_v11  ;;  %v6496_v17 = vmax.f32 %v16383_v19, 0.0 }
 0x97e   : > { %v12318_v38 = vpop.eup %12317  ;;  %v9047_v4 = vadd.f32 %v8593_v44, %v6487_v33  ;;  %v8597_v31 = vmul.f32 0.6931472, %v12316_v47  ;;  %12337 = vpow2.f32 %v7696_v14  ;;  %v6847_v1 = vand.u32 2147483647, %v16496_v7  ;;  %v16515_v47 = vpop.f32.mrf.mxu0 }
 0x97f   : > { %v12320_v25 = vpop.eup %12319  ;;  %v8611_v59 = vmul.f32 0.6931472, %v12318_v38  ;;  %12339 = vlog2.f32 %v8108_v40  ;;  %v7714_v33 = vmul.f32 1.442695, %v7168_v27  ;;  %v16504_v44 = vadd.f32 %v6062_v24, %v15823_v51 }
 0x980   : > { %v12322_v54 = vpop.eup %12321  ;;  %9367 = vst [vmem:[%s14908_s2 + $0x5c8] sm:$0xff] %v9047_v4  ;;  %v9049_v5 = vadd.f32 %v8597_v31, %v6489_v60  ;;  %v8107_v23 = vadd.f32 1.0, %v12320_v25  ;;  %12341 = vpow2.f32 %v7710_v15  ;;  %v7167_v22 = vsub.f32 0.0, %v6847_v1 }
 0x981   : > { %v9056_v57 = vadd.f32 %v8611_v59, %v6496_v17  ;;  %v8109_v9 = vadd.f32 1.0, %v12322_v54  ;;  %v6498_v14 = vmax.f32 %v16394_v45, 0.0  ;;  %v16510_v11 = vadd.f32 %v16267_v58, %v15800_v20  ;;  %v6066_v17 = vpop.f32.mrf.mxu1 }
 0x982   : > { %v12324_v19 = vpop.eup %12323  ;;  %9369 = vst [vmem:[%s14908_s2 + $0x5d8] sm:$0xff] %v9049_v5  ;;  %12343 = vlog2.f32 %v8107_v23  ;;  %v16513_v60 = vadd.f32 %v6064_v42, %v15803_v32  ;;  %v7712_v24 = vmul.f32 1.442695, %v7167_v22  ;;  %v16520_v38 = vadd.f32 %v16275_v62, %v15819_v16 }
 0x983   : > { %v12326_v40 = vpop.eup %12325  ;;  %9376 = vst [vmem:[%s14908_s2 + $0x610] sm:$0xff] %v9056_v57  ;;  %v8615_v15 = vmul.f32 0.6931472, %v12324_v19  ;;  %12345 = vlog2.f32 %v8109_v9  ;;  %v6497_v45 = vmax.f32 %v16400_v53, 0.0  ;;  %v6849_v58 = vand.u32 2147483647, %v16504_v44  ;;  %v16528_v53 = vpop.f32.mrf.mxu0 }
 0x984   : > { %v8116_v4 = vadd.f32 1.0, %v12326_v40  ;;  %12347 = vpow2.f32 %v7714_v33  ;;  %v6499_v27 = vmax.f32 %v16410_v56, 0.0  ;;  %v6856_v25 = vand.u32 2147483647, %v16510_v11 }
 0x985   : > { %v9058_v31 = vadd.f32 %v8615_v15, %v6498_v14  ;;  %12349 = vpow2.f32 %v7712_v24  ;;  %v12328_v59 = vpop.eup %12327  ;;  %v6506_v1 = vmax.f32 %v16417_v0, 0.0  ;;  %v7169_v62 = vsub.f32 0.0, %v6849_v58 }
 0x986   : > { %12351 = vlog2.f32 %v8116_v4  ;;  %v6858_v42 = vand.u32 2147483647, %v16513_v60  ;;  %v6508_v5 = vmax.f32 %v16420_v50, 0.0  ;;  %v8118_v23 = vadd.f32 1.0, %v12328_v59  ;;  %v16540_v59 = vpop.f32.mrf.mxu0 }
 0x987   : > { %v12330_v54 = vpop.eup %12329  ;;  %9378 = vst [vmem:[%s14908_s2 + $0x620] sm:$0xff] %v9058_v31  ;;  %v7176_v33 = vsub.f32 0.0, %v6856_v25  ;;  %v6857_v56 = vand.u32 2147483647, %v16520_v38  ;;  %v7716_v22 = vmul.f32 1.442695, %v7169_v62  ;;  %v16534_v0 = vadd.f32 %v6066_v17, %v15823_v51  ;;  %v6070_v25 = vpop.f32.mrf.mxu1 }
 0x988   : > { %v12332_v57 = vpop.eup %12331  ;;  %v8117_v9 = vadd.f32 1.0, %v12330_v54  ;;  %v7178_v19 = vsub.f32 0.0, %v6858_v42  ;;  %12353 = vlog2.f32 %v8118_v23  ;;  %v16538_v31 = vadd.f32 %v16298_v13, %v15800_v20 }
 0x989   : > { %v12334_v14 = vpop.eup %12333  ;;  %v8613_v40 = vmul.f32 0.6931472, %v12332_v57  ;;  %v7730_v15 = vmul.f32 1.442695, %v7176_v33  ;;  %v7177_v24 = vsub.f32 0.0, %v6857_v56 }
 0x98a   : > { %v12336_v4 = vpop.eup %12335  ;;  %v8617_v58 = vmul.f32 0.6931472, %v12334_v14  ;;  %12355 = vlog2.f32 %v8117_v9  ;;  %v7734_v50 = vmul.f32 1.442695, %v7178_v19  ;;  %v6859_v57 = vand.u32 2147483647, %v16534_v0 }
 0x98b   : > { %v12338_v62 = vpop.eup %12337  ;;  %v9057_v17 = vadd.f32 %v8613_v40, %v6497_v45  ;;  %v8631_v42 = vmul.f32 0.6931472, %v12336_v4  ;;  %12357 = vpow2.f32 %v7716_v22  ;;  %v7732_v54 = vmul.f32 1.442695, %v7177_v24  ;;  %v16547_v24 = vpop.f32.mrf.mxu0 }
 0x98c   : > { %v12340_v23 = vpop.eup %12339  ;;  %v9059_v33 = vadd.f32 %v8617_v58, %v6499_v27  ;;  %v8119_v56 = vadd.f32 1.0, %v12338_v62  ;;  %12359 = vpow2.f32 %v7730_v15  ;;  %v6507_v14 = vmax.f32 %v16433_v2, 0.0  ;;  %v6072_v27 = vpop.f32.mrf.mxu1 }
 0x98d   : > { %v12342_v9 = vpop.eup %12341  ;;  %9377 = vst [vmem:[%s14908_s2 + $0x618] sm:$0xff] %v9057_v17  ;;  %v9066_v13 = vadd.f32 %v8631_v42, %v6506_v1  ;;  %v8635_v19 = vmul.f32 0.6931472, %v12340_v23  ;;  %12361 = vpow2.f32 %v7734_v50  ;;  %v7179_v40 = vsub.f32 0.0, %v6859_v57 }
 0x98e   : > { %9379 = vst [vmem:[%s14908_s2 + $0x628] sm:$0xff] %v9059_v33  ;;  %12363 = vlog2.f32 %v8119_v56  ;;  %v8126_v45 = vadd.f32 1.0, %v12342_v9  ;;  %v6866_v22 = vand.u32 2147483647, %v16538_v31  ;;  %v16551_v1 = vadd.f32 %v6070_v25, %v15803_v32  ;;  %v6074_v9 = vpop.f32.mrf.mxu1 }
 0x98f   : > { %v12344_v15 = vpop.eup %12343  ;;  %9386 = vst [vmem:[%s14908_s2 + $0x660] sm:$0xff] %v9066_v13  ;;  %v9068_v4 = vadd.f32 %v8635_v19, %v6508_v5  ;;  %12365 = vpow2.f32 %v7732_v54  ;;  %v16555_v2 = vadd.f32 %v16304_v52, %v15819_v16  ;;  %v7736_v62 = vmul.f32 1.442695, %v7179_v40  ;;  %v16561_v13 = vpop.f32.mrf.mxu0 }
 0x990   : > { %v12346_v58 = vpop.eup %12345  ;;  %v8633_v50 = vmul.f32 0.6931472, %v12344_v15  ;;  %12367 = vlog2.f32 %v8126_v45  ;;  %v7186_v17 = vsub.f32 0.0, %v6866_v22  ;;  %v6509_v23 = vmax.f32 %v16437_v46, 0.0 }
 0x991   : > { %v12348_v42 = vpop.eup %12347  ;;  %9388 = vst [vmem:[%s14908_s2 + $0x670] sm:$0xff] %v9068_v4  ;;  %v8637_v33 = vmul.f32 0.6931472, %v12346_v58  ;;  %v6516_v5 = vmax.f32 %v16448_v10, 0.0  ;;  %v6868_v25 = vand.u32 2147483647, %v16551_v1  ;;  %12369 = vpow2.f32 %v7736_v62 }
 0x992   : > { %v12350_v54 = vpop.eup %12349  ;;  %v9067_v56 = vadd.f32 %v8633_v50, %v6507_v14  ;;  %v8128_v52 = vadd.f32 1.0, %v12348_v42  ;;  %v7750_v57 = vmul.f32 1.442695, %v7186_v17  ;;  %v6867_v46 = vand.u32 2147483647, %v16555_v2 }
 0x993   : > { %v12352_v19 = vpop.eup %12351  ;;  %v9069_v45 = vadd.f32 %v8637_v33, %v6509_v23  ;;  %v8127_v40 = vadd.f32 1.0, %v12350_v54  ;;  %v7188_v22 = vsub.f32 0.0, %v6868_v25  ;;  %v16566_v10 = vadd.f32 %v6072_v27, %v15823_v51  ;;  %v16578_v23 = vpop.f32.mrf.mxu0 }
 0x994   : > { %9387 = vst [vmem:[%s14908_s2 + $0x668] sm:$0xff] %v9067_v56  ;;  %v8651_v15 = vmul.f32 0.6931472, %v12352_v19  ;;  %12371 = vlog2.f32 %v8128_v52  ;;  %v16570_v14 = vadd.f32 %v16313_v39, %v15800_v20  ;;  %v7187_v58 = vsub.f32 0.0, %v6867_v46 }
 0x995   : > { %9389 = vst [vmem:[%s14908_s2 + $0x678] sm:$0xff] %v9069_v45  ;;  %12373 = vlog2.f32 %v8127_v40  ;;  %v7754_v4 = vmul.f32 1.442695, %v7188_v22  ;;  %v16574_v50 = vadd.f32 %v6074_v9, %v15803_v32  ;;  %v12354_v62 = vpop.eup %12353  ;;  %v6518_v42 = vmax.f32 %v16457_v21, 0.0  ;;  %v6076_v22 = vpop.f32.mrf.mxu1 }
 0x996   : > { %v9076_v17 = vadd.f32 %v8651_v15, %v6516_v5  ;;  %12375 = vpow2.f32 %v7750_v57  ;;  %v6869_v27 = vand.u32 2147483647, %v16566_v10  ;;  %v8655_v39 = vmul.f32 0.6931472, %v12354_v62  ;;  %v16585_v62 = vpop.f32.mrf.mxu0 }
 0x997   : > { %v12356_v33 = vpop.eup %12355  ;;  %v6517_v25 = vmax.f32 %v16461_v43, 0.0  ;;  %12377 = vpow2.f32 %v7754_v4  ;;  %v7752_v54 = vmul.f32 1.442695, %v7187_v58  ;;  %v6519_v9 = vmax.f32 %v16471_v3, 0.0 }
 0x998   : > { %v12358_v56 = vpop.eup %12357  ;;  %9396 = vst [vmem:[%s14908_s2 + $0x6b0] sm:$0xff] %v9076_v17  ;;  %v8653_v52 = vmul.f32 0.6931472, %v12356_v33  ;;  %v7189_v5 = vsub.f32 0.0, %v6869_v27  ;;  %v6876_v21 = vand.u32 2147483647, %v16570_v14  ;;  %v9078_v19 = vadd.f32 %v8655_v39, %v6518_v42 }
 0x999   : > { %v12360_v57 = vpop.eup %12359  ;;  %v8129_v45 = vadd.f32 1.0, %v12358_v56  ;;  %12379 = vpow2.f32 %v7752_v54  ;;  %v6878_v40 = vand.u32 2147483647, %v16574_v50  ;;  %v16590_v42 = vadd.f32 %v16330_v35, %v15819_v16 }
 0x99a   : > { %v12362_v43 = vpop.eup %12361  ;;  %v9077_v46 = vadd.f32 %v8653_v52, %v6517_v25  ;;  %v8136_v15 = vadd.f32 1.0, %v12360_v57  ;;  %v7756_v4 = vmul.f32 1.442695, %v7189_v5  ;;  %v7196_v58 = vsub.f32 0.0, %v6876_v21  ;;  %9398 = vst [vmem:[%s14908_s2 + $0x6c0] sm:$0xff] %v9078_v19 }
 0x99b   : > { %v12364_v3 = vpop.eup %12363  ;;  %12381 = vlog2.f32 %v8129_v45  ;;  %v8138_v17 = vadd.f32 1.0, %v12362_v43  ;;  %v7198_v27 = vsub.f32 0.0, %v6878_v40  ;;  %v16594_v25 = vadd.f32 %v6076_v22, %v15823_v51  ;;  %v16598_v45 = vpop.f32.mrf.mxu0 }
 0x99c   : > { %v12366_v33 = vpop.eup %12365  ;;  %9397 = vst [vmem:[%s14908_s2 + $0x6b8] sm:$0xff] %v9077_v46  ;;  %v8657_v39 = vmul.f32 0.6931472, %v12364_v3  ;;  %12383 = vlog2.f32 %v8136_v15  ;;  %v7770_v54 = vmul.f32 1.442695, %v7196_v58  ;;  %v6526_v52 = vmax.f32 %v16475_v55, 0.0  ;;  %v6080_v46 = vpop.f32.mrf.mxu1 }
 0x99d   : > { %v12368_v56 = vpop.eup %12367  ;;  %12385 = vlog2.f32 %v8138_v17  ;;  %v8137_v5 = vadd.f32 1.0, %v12366_v33  ;;  %v7774_v21 = vmul.f32 1.442695, %v7198_v27  ;;  %v6877_v35 = vand.u32 2147483647, %v16590_v42 }
 0x99e   : > { %v9079_v57 = vadd.f32 %v8657_v39, %v6519_v9  ;;  %v8671_v19 = vmul.f32 0.6931472, %v12368_v56  ;;  %12387 = vpow2.f32 %v7756_v4  ;;  %v12370_v40 = vpop.eup %12369  ;;  %v6528_v43 = vmax.f32 %v16483_v26, 0.0  ;;  %v16613_v56 = vpop.f32.mrf.mxu0 }
 0x99f   : > { %12389 = vlog2.f32 %v8137_v5  ;;  %v6879_v22 = vand.u32 2147483647, %v16594_v25  ;;  %v16604_v55 = vadd.f32 %v16343_v36, %v15800_v20  ;;  %v8139_v15 = vadd.f32 1.0, %v12370_v40 }
 0x9a0   : > { %9399 = vst [vmem:[%s14908_s2 + $0x6c8] sm:$0xff] %v9079_v57  ;;  %v9086_v9 = vadd.f32 %v8671_v19, %v6526_v52  ;;  %12391 = vpow2.f32 %v7770_v54  ;;  %v7197_v4 = vsub.f32 0.0, %v6877_v35  ;;  %v6527_v3 = vmax.f32 %v16496_v7, 0.0 }
 0x9a1   : > { %v12372_v58 = vpop.eup %12371  ;;  %12393 = vpow2.f32 %v7774_v21  ;;  %v7199_v17 = vsub.f32 0.0, %v6879_v22  ;;  %v6886_v26 = vand.u32 2147483647, %v16604_v55  ;;  %v16611_v36 = vadd.f32 %v6080_v46, %v15803_v32  ;;  %v6082_v21 = vpop.f32.mrf.mxu1 }
 0x9a2   : > { %v12374_v27 = vpop.eup %12373  ;;  %9406 = vst [vmem:[%s14908_s2 + $0x700] sm:$0xff] %v9086_v9  ;;  %v8675_v33 = vmul.f32 0.6931472, %v12372_v58  ;;  %12395 = vlog2.f32 %v8139_v15  ;;  %v7772_v39 = vmul.f32 1.442695, %v7197_v4  ;;  %v16617_v7 = vadd.f32 %v16354_v49, %v15819_v16 }
 0x9a3   : > { %v12376_v52 = vpop.eup %12375  ;;  %v8673_v54 = vmul.f32 0.6931472, %v12374_v27  ;;  %v7776_v5 = vmul.f32 1.442695, %v7199_v17  ;;  %v7206_v57 = vsub.f32 0.0, %v6886_v26  ;;  %v6529_v40 = vmax.f32 %v16504_v44, 0.0  ;;  %v16624_v26 = vpop.f32.mrf.mxu0 }
 0x9a4   : > { %v12378_v19 = vpop.eup %12377  ;;  %v9088_v35 = vadd.f32 %v8675_v33, %v6528_v43  ;;  %v8146_v22 = vadd.f32 1.0, %v12376_v52  ;;  %12397 = vpow2.f32 %v7772_v39  ;;  %v6536_v58 = vmax.f32 %v16510_v11, 0.0  ;;  %v6084_v27 = vpop.f32.mrf.mxu1 }
 0x9a5   : > { %v9087_v46 = vadd.f32 %v8673_v54, %v6527_v3  ;;  %v8148_v9 = vadd.f32 1.0, %v12378_v19  ;;  %12399 = vpow2.f32 %v7776_v5  ;;  %v7790_v15 = vmul.f32 1.442695, %v7206_v57 }
 0x9a6   : > { %v12380_v4 = vpop.eup %12379  ;;  %9408 = vst [vmem:[%s14908_s2 + $0x710] sm:$0xff] %v9088_v35  ;;  %12401 = vlog2.f32 %v8146_v22  ;;  %v6888_v49 = vand.u32 2147483647, %v16611_v36  ;;  %v6887_v17 = vand.u32 2147483647, %v16617_v7  ;;  %v6538_v44 = vmax.f32 %v16513_v60, 0.0 }
 0x9a7   : > { %9407 = vst [vmem:[%s14908_s2 + $0x708] sm:$0xff] %v9087_v46  ;;  %12403 = vlog2.f32 %v8148_v9  ;;  %v8147_v43 = vadd.f32 1.0, %v12380_v4  ;;  %v16629_v3 = vadd.f32 %v6082_v21, %v15823_v51  ;;  %v16633_v52 = vadd.f32 %v16364_v48, %v15800_v20  ;;  %v16640_v9 = vpop.f32.mrf.mxu0 }
 0x9a8   : > { %v12382_v33 = vpop.eup %12381  ;;  %12405 = vpow2.f32 %v7790_v15  ;;  %v7208_v39 = vsub.f32 0.0, %v6888_v49  ;;  %v7207_v11 = vsub.f32 0.0, %v6887_v17  ;;  %v6537_v57 = vmax.f32 %v16520_v38, 0.0  ;;  %17522 = vst [vmem:[#allocation8_spill] sm:$0xff] %v16640_v9 }
 0x9a9   : > { %v12384_v54 = vpop.eup %12383  ;;  %v8677_v5 = vmul.f32 0.6931472, %v12382_v33  ;;  %12407 = vlog2.f32 %v8147_v43  ;;  %v6889_v60 = vand.u32 2147483647, %v16629_v3  ;;  %v16638_v46 = vadd.f32 %v6084_v27, %v15803_v32 }
 0x9aa   : > { %v12386_v19 = vpop.eup %12385  ;;  %v8691_v35 = vmul.f32 0.6931472, %v12384_v54  ;;  %v7794_v21 = vmul.f32 1.442695, %v7208_v39  ;;  %v7792_v22 = vmul.f32 1.442695, %v7207_v11  ;;  %v16644_v38 = vadd.f32 %v16378_v8, %v15819_v16 }
 0x9ab   : > { %v12388_v15 = vpop.eup %12387  ;;  %v9089_v48 = vadd.f32 %v8677_v5, %v6529_v40  ;;  %v8695_v4 = vmul.f32 0.6931472, %v12386_v19  ;;  %v7209_v49 = vsub.f32 0.0, %v6889_v60  ;;  %v6896_v39 = vand.u32 2147483647, %v16633_v52 }
 0x9ac   : > { %v12390_v17 = vpop.eup %12389  ;;  %v9096_v43 = vadd.f32 %v8691_v35, %v6536_v58  ;;  %v8149_v33 = vadd.f32 1.0, %v12388_v15  ;;  %12409 = vpow2.f32 %v7794_v21  ;;  %v6539_v60 = vmax.f32 %v16534_v0, 0.0  ;;  %v6086_v58 = vpop.f32.mrf.mxu1 }
 0x9ad   : > { %v12392_v27 = vpop.eup %12391  ;;  %9409 = vst [vmem:[%s14908_s2 + $0x718] sm:$0xff] %v9089_v48  ;;  %v9098_v11 = vadd.f32 %v8695_v4, %v6538_v44  ;;  %v8693_v54 = vmul.f32 0.6931472, %v12390_v17  ;;  %12411 = vpow2.f32 %v7792_v22  ;;  %v7796_v40 = vmul.f32 1.442695, %v7209_v49  ;;  %v16650_v35 = vpop.f32.mrf.mxu0 }
 0x9ae   : > { %v12394_v5 = vpop.eup %12393  ;;  %9416 = vst [vmem:[%s14908_s2 + $0x750] sm:$0xff] %v9096_v43  ;;  %12413 = vlog2.f32 %v8149_v33  ;;  %v8156_v8 = vadd.f32 1.0, %v12392_v27  ;;  %v7216_v19 = vsub.f32 0.0, %v6896_v39  ;;  %v6898_v44 = vand.u32 2147483647, %v16638_v46 }
 0x9af   : > { %v12396_v21 = vpop.eup %12395  ;;  %9418 = vst [vmem:[%s14908_s2 + $0x760] sm:$0xff] %v9098_v11  ;;  %v9097_v15 = vadd.f32 %v8693_v54, %v6537_v57  ;;  %v8158_v9 = vadd.f32 1.0, %v12394_v5  ;;  %12415 = vpow2.f32 %v7796_v40  ;;  %v6546_v48 = vmax.f32 %v16538_v31, 0.0  ;;  %v6090_v31 = vpop.f32.mrf.mxu1 }
 0x9b0   : > { %v8697_v22 = vmul.f32 0.6931472, %v12396_v21  ;;  %12417 = vlog2.f32 %v8156_v8  ;;  %v7810_v4 = vmul.f32 1.442695, %v7216_v19  ;;  %v7218_v49 = vsub.f32 0.0, %v6898_v44  ;;  %v16664_v11 = vpop.f32.mrf.mxu0 }
 0x9b1   : > { %v12398_v0 = vpop.eup %12397  ;;  %9417 = vst [vmem:[%s14908_s2 + $0x758] sm:$0xff] %v9097_v15  ;;  %12419 = vlog2.f32 %v8158_v9  ;;  %v6897_v17 = vand.u32 2147483647, %v16644_v38  ;;  %v16658_v43 = vadd.f32 %v6086_v58, %v15823_v51  ;;  %v16662_v27 = vadd.f32 %v16389_v30, %v15800_v20 }
 0x9b2   : > { %v12400_v57 = vpop.eup %12399  ;;  %v9099_v33 = vadd.f32 %v8697_v22, %v6539_v60  ;;  %v8157_v39 = vadd.f32 1.0, %v12398_v0  ;;  %12421 = vpow2.f32 %v7810_v4  ;;  %v6548_v9 = vmax.f32 %v16551_v1, 0.0 }
 0x9b3   : > { %v12402_v54 = vpop.eup %12401  ;;  %v8159_v40 = vadd.f32 1.0, %v12400_v57  ;;  %v7814_v5 = vmul.f32 1.442695, %v7218_v49  ;;  %v7217_v8 = vsub.f32 0.0, %v6897_v17  ;;  %v6547_v60 = vmax.f32 %v16555_v2, 0.0  ;;  %v6092_v17 = vpop.f32.mrf.mxu1 }
 0x9b4   : > { %v12404_v19 = vpop.eup %12403  ;;  %9419 = vst [vmem:[%s14908_s2 + $0x768] sm:$0xff] %v9099_v33  ;;  %v8711_v58 = vmul.f32 0.6931472, %v12402_v54  ;;  %12423 = vlog2.f32 %v8157_v39  ;;  %v6899_v21 = vand.u32 2147483647, %v16658_v43  ;;  %v16671_v57 = vpop.f32.mrf.mxu0 }
 0x9b5   : > { %v12406_v15 = vpop.eup %12405  ;;  %v8715_v30 = vmul.f32 0.6931472, %v12404_v19  ;;  %12425 = vlog2.f32 %v8159_v40  ;;  %v7812_v44 = vmul.f32 1.442695, %v7217_v8  ;;  %v6906_v22 = vand.u32 2147483647, %v16662_v27 }
 0x9b6   : > { %v12408_v4 = vpop.eup %12407  ;;  %v9106_v1 = vadd.f32 %v8711_v58, %v6546_v48  ;;  %v8166_v0 = vadd.f32 1.0, %v12406_v15  ;;  %12427 = vpow2.f32 %v7814_v5  ;;  %v7219_v49 = vsub.f32 0.0, %v6899_v21 }
 0x9b7   : > { %v9108_v2 = vadd.f32 %v8715_v30, %v6548_v9  ;;  %v8713_v33 = vmul.f32 0.6931472, %v12408_v4  ;;  %12429 = vpow2.f32 %v7812_v44  ;;  %v7226_v39 = vsub.f32 0.0, %v6906_v22  ;;  %v16688_v44 = vpop.f32.mrf.mxu0 }
 0x9b8   : > { %9426 = vst [vmem:[%s14908_s2 + $0x7a0] sm:$0xff] %v9106_v1  ;;  %12431 = vlog2.f32 %v8166_v0  ;;  %v7816_v54 = vmul.f32 1.442695, %v7219_v49  ;;  %v16675_v40 = vadd.f32 %v6090_v31, %v15803_v32  ;;  %v16679_v48 = vadd.f32 %v16402_v18, %v15819_v16 }
 0x9b9   : > { %v12410_v5 = vpop.eup %12409  ;;  %9428 = vst [vmem:[%s14908_s2 + $0x7b0] sm:$0xff] %v9108_v2  ;;  %v9107_v8 = vadd.f32 %v8713_v33, %v6547_v60  ;;  %v6549_v19 = vmax.f32 %v16566_v10, 0.0  ;;  %v7830_v9 = vmul.f32 1.442695, %v7226_v39  ;;  %v16684_v58 = vadd.f32 %v6092_v17, %v15823_v51 }
 0x9ba   : > { %v12412_v21 = vpop.eup %12411  ;;  %v6556_v15 = vmax.f32 %v16570_v14, 0.0  ;;  %v8168_v30 = vadd.f32 1.0, %v12410_v5  ;;  %12433 = vpow2.f32 %v7816_v54  ;;  %v6908_v31 = vand.u32 2147483647, %v16675_v40 }
 0x9bb   : > { %v12414_v18 = vpop.eup %12413  ;;  %9427 = vst [vmem:[%s14908_s2 + $0x7a8] sm:$0xff] %v9107_v8  ;;  %v6558_v22 = vmax.f32 %v16574_v50, 0.0  ;;  %v8167_v60 = vadd.f32 1.0, %v12412_v21  ;;  %12435 = vpow2.f32 %v7830_v9  ;;  %v6907_v10 = vand.u32 2147483647, %v16679_v48  ;;  %v6094_v50 = vpop.f32.mrf.mxu1 }
 0x9bc   : > { %v12416_v4 = vpop.eup %12415  ;;  %v8717_v1 = vmul.f32 0.6931472, %v12414_v18  ;;  %12437 = vlog2.f32 %v8168_v30  ;;  %v7228_v0 = vsub.f32 0.0, %v6908_v31  ;;  %v16695_v14 = vadd.f32 %v16412_v29, %v15800_v20  ;;  %v16699_v21 = vpop.f32.mrf.mxu0 }
 0x9bd   : > { %v12418_v49 = vpop.eup %12417  ;;  %12439 = vlog2.f32 %v8167_v60  ;;  %v8169_v17 = vadd.f32 1.0, %v12416_v4  ;;  %v7227_v2 = vsub.f32 0.0, %v6907_v10  ;;  %v6909_v33 = vand.u32 2147483647, %v16684_v58 }
 0x9be   : > { %v12420_v39 = vpop.eup %12419  ;;  %v9109_v54 = vadd.f32 %v8717_v1, %v6549_v19  ;;  %v8731_v5 = vmul.f32 0.6931472, %v12418_v49  ;;  %v6557_v8 = vmax.f32 %v16590_v42, 0.0  ;;  %v7834_v9 = vmul.f32 1.442695, %v7228_v0  ;;  %v6096_v49 = vpop.f32.mrf.mxu1 }
 0x9bf   : > { %v12422_v30 = vpop.eup %12421  ;;  %v8735_v31 = vmul.f32 0.6931472, %v12420_v39  ;;  %12441 = vlog2.f32 %v8169_v17  ;;  %v7832_v29 = vmul.f32 1.442695, %v7227_v2  ;;  %v7229_v18 = vsub.f32 0.0, %v6909_v33  ;;  %v16711_v33 = vpop.f32.mrf.mxu0 }
 0x9c0   : > { %9429 = vst [vmem:[%s14908_s2 + $0x7b8] sm:$0xff] %v9109_v54  ;;  %v9116_v60 = vadd.f32 %v8731_v5, %v6556_v15  ;;  %v8176_v10 = vadd.f32 1.0, %v12422_v30  ;;  %12443 = vpow2.f32 %v7834_v9  ;;  %v6916_v4 = vand.u32 2147483647, %v16695_v14 }
 0x9c1   : > { %v12424_v19 = vpop.eup %12423  ;;  %v9118_v1 = vadd.f32 %v8735_v31, %v6558_v22  ;;  %12445 = vpow2.f32 %v7832_v29  ;;  %v7836_v42 = vmul.f32 1.442695, %v7229_v18  ;;  %v16704_v0 = vadd.f32 %v6094_v50, %v15803_v32 }
 0x9c2   : > { %v12426_v39 = vpop.eup %12425  ;;  %9436 = vst [vmem:[%s14908_s2 + $0x7f0] sm:$0xff] %v9116_v60  ;;  %v8733_v17 = vmul.f32 0.6931472, %v12424_v19  ;;  %12447 = vlog2.f32 %v8176_v10  ;;  %v7236_v2 = vsub.f32 0.0, %v6916_v4  ;;  %v16709_v15 = vadd.f32 %v16428_v37, %v15819_v16 }
 0x9c3   : > { %v12428_v54 = vpop.eup %12427  ;;  %9438 = vst [vmem:[%s14908_s2 + $0x800] sm:$0xff] %v9118_v1  ;;  %v6559_v22 = vmax.f32 %v16594_v25, 0.0  ;;  %v8737_v5 = vmul.f32 0.6931472, %v12426_v39  ;;  %12449 = vpow2.f32 %v7836_v42  ;;  %v6918_v50 = vand.u32 2147483647, %v16704_v0  ;;  %v6100_v1 = vpop.f32.mrf.mxu1 }
 0x9c4   : > { %v12430_v9 = vpop.eup %12429  ;;  %v9117_v30 = vadd.f32 %v8733_v17, %v6557_v8  ;;  %v6566_v31 = vmax.f32 %v16604_v55, 0.0  ;;  %v8178_v29 = vadd.f32 1.0, %v12428_v54  ;;  %v7850_v18 = vmul.f32 1.442695, %v7236_v2  ;;  %v16726_v55 = vpop.f32.mrf.mxu0 }
 0x9c5   : > { %v12432_v37 = vpop.eup %12431  ;;  %v9119_v60 = vadd.f32 %v8737_v5, %v6559_v22  ;;  %v8177_v10 = vadd.f32 1.0, %v12430_v9  ;;  %v7238_v4 = vsub.f32 0.0, %v6918_v50  ;;  %v6917_v19 = vand.u32 2147483647, %v16709_v15 }
 0x9c6   : > { %9437 = vst [vmem:[%s14908_s2 + $0x7f8] sm:$0xff] %v9117_v30  ;;  %v8751_v25 = vmul.f32 0.6931472, %v12432_v37  ;;  %12451 = vlog2.f32 %v8178_v29  ;;  %v16720_v42 = vadd.f32 %v6096_v49, %v15823_v51  ;;  %v16724_v8 = vadd.f32 %v16441_v61, %v15800_v20 }
 0x9c7   : > { %v12434_v39 = vpop.eup %12433  ;;  %9439 = vst [vmem:[%s14908_s2 + $0x808] sm:$0xff] %v9119_v60  ;;  %v6568_v17 = vmax.f32 %v16611_v36, 0.0  ;;  %12453 = vlog2.f32 %v8177_v10  ;;  %v7854_v2 = vmul.f32 1.442695, %v7238_v4  ;;  %v7237_v54 = vsub.f32 0.0, %v6917_v19 }
 0x9c8   : > { %v12436_v22 = vpop.eup %12435  ;;  %v9126_v5 = vadd.f32 %v8751_v25, %v6566_v31  ;;  %v8179_v50 = vadd.f32 1.0, %v12434_v39  ;;  %12455 = vpow2.f32 %v7850_v18  ;;  %v16731_v49 = vadd.f32 %v6100_v1, %v15803_v32  ;;  %v16737_v31 = vpop.f32.mrf.mxu0 }
 0x9c9   : > { %v12438_v9 = vpop.eup %12437  ;;  %v8186_v61 = vadd.f32 1.0, %v12436_v22  ;;  %12457 = vpow2.f32 %v7854_v2  ;;  %v7852_v30 = vmul.f32 1.442695, %v7237_v54  ;;  %v6919_v29 = vand.u32 2147483647, %v16720_v42  ;;  %v6102_v1 = vpop.f32.mrf.mxu1 }
 0x9ca   : > { %v12440_v37 = vpop.eup %12439  ;;  %9446 = vst [vmem:[%s14908_s2 + $0x840] sm:$0xff] %v9126_v5  ;;  %v8755_v60 = vmul.f32 0.6931472, %v12438_v9  ;;  %v6567_v36 = vmax.f32 %v16617_v7, 0.0  ;;  %12459 = vlog2.f32 %v8179_v50  ;;  %v6926_v10 = vand.u32 2147483647, %v16724_v8 }
 0x9cb   : > { %v8753_v18 = vmul.f32 0.6931472, %v12440_v37  ;;  %v6569_v4 = vmax.f32 %v16629_v3, 0.0  ;;  %12461 = vlog2.f32 %v8186_v61  ;;  %v7239_v19 = vsub.f32 0.0, %v6919_v29 }
 0x9cc   : > { %v12442_v25 = vpop.eup %12441  ;;  %v9128_v39 = vadd.f32 %v8755_v60, %v6568_v17  ;;  %12463 = vpow2.f32 %v7852_v30  ;;  %v7246_v2 = vsub.f32 0.0, %v6926_v10  ;;  %v6928_v54 = vand.u32 2147483647, %v16731_v49  ;;  %v16749_v30 = vpop.f32.mrf.mxu0 }
 0x9cd   : > { %v12444_v7 = vpop.eup %12443  ;;  %v9127_v22 = vadd.f32 %v8753_v18, %v6567_v36  ;;  %v8757_v5 = vmul.f32 0.6931472, %v12442_v25  ;;  %v7856_v50 = vmul.f32 1.442695, %v7239_v19  ;;  %v16743_v9 = vadd.f32 %v16450_v12, %v15819_v16  ;;  %v6104_v12 = vpop.f32.mrf.mxu1 }
 0x9ce   : > { %v12446_v37 = vpop.eup %12445  ;;  %9448 = vst [vmem:[%s14908_s2 + $0x850] sm:$0xff] %v9128_v39  ;;  %v8188_v3 = vadd.f32 1.0, %v12444_v7  ;;  %v7870_v61 = vmul.f32 1.442695, %v7246_v2  ;;  %v7248_v29 = vsub.f32 0.0, %v6928_v54  ;;  %v16747_v17 = vadd.f32 %v6102_v1, %v15823_v51 }
 0x9cf   : > { %v12448_v60 = vpop.eup %12447  ;;  %9447 = vst [vmem:[%s14908_s2 + $0x848] sm:$0xff] %v9127_v22  ;;  %v9129_v36 = vadd.f32 %v8757_v5, %v6569_v4  ;;  %v6576_v10 = vmax.f32 %v16633_v52, 0.0  ;;  %v8187_v18 = vadd.f32 1.0, %v12446_v37  ;;  %12465 = vpow2.f32 %v7856_v50  ;;  %v16761_v5 = vpop.f32.mrf.mxu0 }
 0x9d0   : > { %v12450_v19 = vpop.eup %12449  ;;  %v8771_v25 = vmul.f32 0.6931472, %v12448_v60  ;;  %12467 = vlog2.f32 %v8188_v3  ;;  %v7874_v39 = vmul.f32 1.442695, %v7248_v29  ;;  %v6927_v2 = vand.u32 2147483647, %v16743_v9  ;;  %v6106_v29 = vpop.f32.mrf.mxu1 }
 0x9d1   : > { %9449 = vst [vmem:[%s14908_s2 + $0x858] sm:$0xff] %v9129_v36  ;;  %v6578_v1 = vmax.f32 %v16638_v46, 0.0  ;;  %12469 = vlog2.f32 %v8187_v18  ;;  %v8189_v54 = vadd.f32 1.0, %v12450_v19  ;;  %v6929_v7 = vand.u32 2147483647, %v16747_v17 }
 0x9d2   : > { %v9136_v4 = vadd.f32 %v8771_v25, %v6576_v10  ;;  %12471 = vpow2.f32 %v7870_v61  ;;  %v7247_v52 = vsub.f32 0.0, %v6927_v2  ;;  %v16759_v22 = vadd.f32 %v16463_v6, %v15800_v20 }
 0x9d3   : > { %v12452_v50 = vpop.eup %12451  ;;  %v6577_v37 = vmax.f32 %v16644_v38, 0.0  ;;  %v6579_v3 = vmax.f32 %v16658_v43, 0.0  ;;  %12473 = vlog2.f32 %v8189_v54  ;;  %v7249_v46 = vsub.f32 0.0, %v6929_v7 }
 0x9d4   : > { %v12454_v60 = vpop.eup %12453  ;;  %9456 = vst [vmem:[%s14908_s2 + $0x890] sm:$0xff] %v9136_v4  ;;  %v8775_v36 = vmul.f32 0.6931472, %v12452_v50  ;;  %12475 = vpow2.f32 %v7874_v39  ;;  %v7872_v61 = vmul.f32 1.442695, %v7247_v52  ;;  %v16767_v10 = vadd.f32 %v6104_v12, %v15803_v32  ;;  %v16777_v32 = vpop.f32.mrf.mxu0 }
 0x9d5   : > { %v12456_v20 = vpop.eup %12455  ;;  %v8773_v6 = vmul.f32 0.6931472, %v12454_v60  ;;  %v7876_v18 = vmul.f32 1.442695, %v7249_v46  ;;  %v6936_v19 = vand.u32 2147483647, %v16759_v22  ;;  %v16772_v38 = vadd.f32 %v16479_v41, %v15819_v16 }
 0x9d6   : > { %v12458_v43 = vpop.eup %12457  ;;  %v9138_v25 = vadd.f32 %v8775_v36, %v6578_v1  ;;  %v8196_v2 = vadd.f32 1.0, %v12456_v20  ;;  %12477 = vpow2.f32 %v7872_v61  ;;  %v16775_v39 = vadd.f32 %v6106_v29, %v15823_v51  ;;  %v4884_v16 = vld [vmem:[%s17357_s16 + $0x8] sm:$0x3] }
 0x9d7   : > { %v12460_v12 = vpop.eup %12459  ;;  %v9137_v54 = vadd.f32 %v8773_v6, %v6577_v37  ;;  %v8198_v7 = vadd.f32 1.0, %v12458_v43  ;;  %12479 = vpow2.f32 %v7876_v18  ;;  %v7256_v4 = vsub.f32 0.0, %v6936_v19  ;;  %v16788_v6 = vpop.f32.mrf.mxu0 }
 0x9d8   : > { %v12462_v41 = vpop.eup %12461  ;;  %9458 = vst [vmem:[%s14908_s2 + $0x8a0] sm:$0xff] %v9138_v25  ;;  %v8777_v1 = vmul.f32 0.6931472, %v12460_v12  ;;  %v6586_v52 = vmax.f32 %v16662_v27, 0.0  ;;  %12481 = vlog2.f32 %v8196_v2  ;;  %v6938_v51 = vand.u32 2147483647, %v16767_v10 }
 0x9d9   : > { %v12464_v50 = vpop.eup %12463  ;;  %9457 = vst [vmem:[%s14908_s2 + $0x898] sm:$0xff] %v9137_v54  ;;  %v8791_v46 = vmul.f32 0.6931472, %v12462_v41  ;;  %12483 = vlog2.f32 %v8198_v7  ;;  %v7890_v37 = vmul.f32 1.442695, %v7256_v4  ;;  %v6588_v36 = vmax.f32 %v16675_v40, 0.0 }
 0x9da   : > { %v6937_v29 = vand.u32 2147483647, %v16772_v38  ;;  %v9139_v60 = vadd.f32 %v8777_v1, %v6579_v3  ;;  %v8197_v61 = vadd.f32 1.0, %v12464_v50  ;;  %v7258_v20 = vsub.f32 0.0, %v6938_v51 }
 0x9db   : > { %v9146_v27 = vadd.f32 %v8791_v46, %v6586_v52  ;;  %12485 = vpow2.f32 %v7890_v37  ;;  %v6939_v19 = vand.u32 2147483647, %v16775_v39  ;;  %v17523_v2 = vsub.s32 0, %v17518_v63 }
 0x9dc   : > { %v7257_v18 = vsub.f32 0.0, %v6937_v29  ;;  %v12466_v43 = vpop.eup %12465  ;;  %9459 = vst [vmem:[%s14908_s2 + $0x8a8] sm:$0xff] %v9139_v60  ;;  %12487 = vlog2.f32 %v8197_v61  ;;  %v7894_v25 = vmul.f32 1.442695, %v7258_v20  ;;  %v17524_v3 = vsub.s32 1, %v17518_v63  ;;  %v16810_v63 = vpop.f32.mrf.mxu0 }
 0x9dd   : > { %v16794_v12 = vrot.slane %v4884_v16, %v17523_v2  ;;  %v12468_v54 = vpop.eup %12467  ;;  %9466 = vst [vmem:[%s14908_s2 + $0x8e0] sm:$0xff] %v9146_v27  ;;  %v6587_v7 = vmax.f32 %v16679_v48, 0.0  ;;  %v8199_v4 = vadd.f32 1.0, %v12466_v43  ;;  %v7259_v1 = vsub.f32 0.0, %v6939_v19 }
 0x9de   : > { %v16798_v40 = vrot.slane %v4884_v16, %v17524_v3  ;;  %v7892_v41 = vmul.f32 1.442695, %v7257_v18  ;;  %v12470_v52 = vpop.eup %12469  ;;  %v8795_v51 = vmul.f32 0.6931472, %v12468_v54  ;;  %12489 = vpow2.f32 %v7894_v25 }
 0x9df   : > { %v16804_v50 = vadd.f32 %v16488_v34, %v16794_v12  ;;  %v12472_v16 = vpop.eup %12471  ;;  %v8793_v37 = vmul.f32 0.6931472, %v12470_v52  ;;  %12491 = vlog2.f32 %v8199_v4  ;;  %v7896_v48 = vmul.f32 1.442695, %v7259_v1 }
 0x9e0   : > { %v16808_v46 = vadd.f32 %v16498_v28, %v16798_v40  ;;  %v16814_v29 = vadd.f32 %v16515_v47, %v16794_v12  ;;  %v12474_v60 = vpop.eup %12473  ;;  %v9148_v61 = vadd.f32 %v8795_v51, %v6588_v36  ;;  %v6589_v34 = vmax.f32 %v16684_v58, 0.0  ;;  %v16821_v36 = vpop.f32.mrf.mxu0 }
 0x9e1   : > { %v8206_v20 = vadd.f32 1.0, %v12472_v16  ;;  %12493 = vpow2.f32 %v7892_v41  ;;  %v12476_v28 = vpop.eup %12475  ;;  %v9147_v27 = vadd.f32 %v8793_v37, %v6587_v7  ;;  %v8797_v18 = vmul.f32 0.6931472, %v12474_v60 }
 0x9e2   : > { %12495 = vpow2.f32 %v7896_v48  ;;  %v6630_v19 = vand.u32 2147483647, %v16804_v50  ;;  %9468 = vst [vmem:[%s14908_s2 + $0x8f0] sm:$0xff] %v9148_v61  ;;  %v6596_v43 = vmax.f32 %v16695_v14, 0.0  ;;  %v8208_v47 = vadd.f32 1.0, %v12476_v28 }
 0x9e3   : > { %12497 = vlog2.f32 %v8206_v20  ;;  %v6631_v25 = vand.u32 2147483647, %v16808_v46  ;;  %v12478_v2 = vpop.eup %12477  ;;  %9467 = vst [vmem:[%s14908_s2 + $0x8e8] sm:$0xff] %v9147_v27  ;;  %v9149_v58 = vadd.f32 %v8797_v18, %v6589_v34  ;;  %v6598_v3 = vmax.f32 %v16704_v0, 0.0  ;;  %v16836_v20 = vpop.f32.mrf.mxu0 }
 0x9e4   : > { %v6950_v54 = vsub.f32 0.0, %v6630_v19  ;;  %v6640_v7 = vand.u32 2147483647, %v16814_v29  ;;  %v12480_v4 = vpop.eup %12479  ;;  %12499 = vlog2.f32 %v8208_v47  ;;  %v8207_v41 = vadd.f32 1.0, %v12478_v2 }
 0x9e5   : > { %v6951_v1 = vsub.f32 0.0, %v6631_v25  ;;  %v16828_v14 = vadd.f32 %v16528_v53, %v16798_v40  ;;  %v12482_v52 = vpop.eup %12481  ;;  %9469 = vst [vmem:[%s14908_s2 + $0x8f8] sm:$0xff] %v9149_v58  ;;  %v8209_v51 = vadd.f32 1.0, %v12480_v4  ;;  %v16833_v48 = vadd.f32 %v16540_v59, %v16794_v12 }
 0x9e6   : > { %v7278_v16 = vmul.f32 1.442695, %v6950_v54  ;;  %v6960_v37 = vsub.f32 0.0, %v6640_v7  ;;  %v12484_v0 = vpop.eup %12483  ;;  %v8811_v60 = vmul.f32 0.6931472, %v12482_v52  ;;  %v6597_v61 = vmax.f32 %v16709_v15, 0.0 }
 0x9e7   : > { %12501 = vlog2.f32 %v8207_v41  ;;  %v7280_v34 = vmul.f32 1.442695, %v6951_v1  ;;  %v8815_v53 = vmul.f32 0.6931472, %v12484_v0  ;;  %v6641_v27 = vand.u32 2147483647, %v16828_v14 }
 0x9e8   : > { %12503 = vlog2.f32 %v8209_v51  ;;  %v7298_v28 = vmul.f32 1.442695, %v6960_v37  ;;  %v12486_v18 = vpop.eup %12485  ;;  %v9156_v19 = vadd.f32 %v8811_v60, %v6596_v43  ;;  %v6599_v59 = vmax.f32 %v16720_v42, 0.0  ;;  %v16846_v43 = vpop.f32.mrf.mxu0 }
 0x9e9   : > { %12505 = vpow2.f32 %v7278_v16  ;;  %v6650_v47 = vand.u32 2147483647, %v16833_v48  ;;  %v12488_v25 = vpop.eup %12487  ;;  %v9158_v15 = vadd.f32 %v8815_v53, %v6598_v3  ;;  %v8216_v2 = vadd.f32 1.0, %v12486_v18 }
 0x9ea   : > { %12507 = vpow2.f32 %v7280_v34  ;;  %v6961_v58 = vsub.f32 0.0, %v6641_v27  ;;  %9476 = vst [vmem:[%s14908_s2 + $0x930] sm:$0xff] %v9156_v19  ;;  %v8813_v54 = vmul.f32 0.6931472, %v12488_v25  ;;  %v16844_v4 = vadd.f32 %v16547_v24, %v16798_v40  ;;  %v16863_v27 = vpop.f32.mrf.mxu0 }
 0x9eb   : > { %12509 = vpow2.f32 %v7298_v28  ;;  %v6970_v7 = vsub.f32 0.0, %v6650_v47  ;;  %v12490_v41 = vpop.eup %12489  ;;  %9478 = vst [vmem:[%s14908_s2 + $0x940] sm:$0xff] %v9158_v15  ;;  %v6606_v42 = vmax.f32 %v16724_v8, 0.0  ;;  %v16852_v1 = vadd.f32 %v16561_v13, %v16794_v12 }
 0x9ec   : > { %12511 = vlog2.f32 %v8216_v2  ;;  %v7300_v3 = vmul.f32 1.442695, %v6961_v58  ;;  %v12492_v52 = vpop.eup %12491  ;;  %v9157_v51 = vadd.f32 %v8813_v54, %v6597_v61  ;;  %v8218_v16 = vadd.f32 1.0, %v12490_v41 }
 0x9ed   : > { %v7318_v37 = vmul.f32 1.442695, %v6970_v7  ;;  %v16856_v24 = vadd.f32 %v16578_v23, %v16798_v40  ;;  %v8817_v60 = vmul.f32 0.6931472, %v12492_v52  ;;  %v6608_v34 = vmax.f32 %v16731_v49, 0.0  ;;  %v16875_v52 = vpop.f32.mrf.mxu0 }
 0x9ee   : > { %v12494_v0 = vpop.eup %12493  ;;  %12513 = vpow2.f32 %v7300_v3  ;;  %v6651_v8 = vand.u32 2147483647, %v16844_v4  ;;  %9477 = vst [vmem:[%s14908_s2 + $0x938] sm:$0xff] %v9157_v51  ;;  %v6607_v13 = vmax.f32 %v16743_v9, 0.0  ;;  %v6660_v28 = vand.u32 2147483647, %v16852_v1 }
 0x9ef   : > { %v12496_v53 = vpop.eup %12495  ;;  %12515 = vlog2.f32 %v8218_v16  ;;  %v8217_v61 = vadd.f32 1.0, %v12494_v0  ;;  %v9159_v18 = vadd.f32 %v8817_v60, %v6599_v59  ;;  %v6661_v15 = vand.u32 2147483647, %v16856_v24 }
 0x9f0   : > { %v12498_v23 = vpop.eup %12497  ;;  %v8219_v19 = vadd.f32 1.0, %v12496_v53  ;;  %12517 = vpow2.f32 %v7318_v37  ;;  %v6971_v47 = vsub.f32 0.0, %v6651_v8  ;;  %v6980_v25 = vsub.f32 0.0, %v6660_v28 }
 0x9f1   : > { %v8831_v49 = vmul.f32 0.6931472, %v12498_v23  ;;  %12519 = vlog2.f32 %v8217_v61  ;;  %v12500_v2 = vpop.eup %12499  ;;  %9479 = vst [vmem:[%s14908_s2 + $0x948] sm:$0xff] %v9159_v18  ;;  %v16869_v58 = vadd.f32 %v16585_v62, %v16794_v12  ;;  %v16873_v59 = vadd.f32 %v16598_v45, %v16798_v40 }
 0x9f2   : > { %12521 = vlog2.f32 %v8219_v19  ;;  %v7320_v9 = vmul.f32 1.442695, %v6971_v47  ;;  %v8835_v7 = vmul.f32 0.6931472, %v12500_v2  ;;  %v7338_v41 = vmul.f32 1.442695, %v6980_v25  ;;  %v16891_v19 = vpop.f32.mrf.mxu0 }
 0x9f3   : > { %v9166_v54 = vadd.f32 %v8831_v49, %v6606_v42  ;;  %v6981_v3 = vsub.f32 0.0, %v6661_v15  ;;  %v6609_v16 = vmax.f32 %v16747_v17, 0.0  ;;  %v6616_v37 = vmax.f32 %v16759_v22, 0.0 }
 0x9f4   : > { %v12502_v51 = vpop.eup %12501  ;;  %12523 = vpow2.f32 %v7320_v9  ;;  %v6670_v62 = vand.u32 2147483647, %v16869_v58  ;;  %v9168_v60 = vadd.f32 %v8835_v7, %v6608_v34  ;;  %v6671_v28 = vand.u32 2147483647, %v16873_v59 }
 0x9f5   : > { %v12504_v0 = vpop.eup %12503  ;;  %9486 = vst [vmem:[%s14908_s2 + $0x980] sm:$0xff] %v9166_v54  ;;  %v8833_v45 = vmul.f32 0.6931472, %v12502_v51  ;;  %12525 = vpow2.f32 %v7338_v41  ;;  %v7340_v42 = vmul.f32 1.442695, %v6981_v3  ;;  %v16884_v17 = vadd.f32 %v16613_v56, %v16794_v12 }
 0x9f6   : > { %v12506_v8 = vpop.eup %12505  ;;  %v8837_v53 = vmul.f32 0.6931472, %v12504_v0  ;;  %v6990_v61 = vsub.f32 0.0, %v6670_v62  ;;  %9488 = vst [vmem:[%s14908_s2 + $0x990] sm:$0xff] %v9168_v60  ;;  %v16889_v34 = vadd.f32 %v16624_v26, %v16798_v40  ;;  %v6991_v2 = vsub.f32 0.0, %v6671_v28  ;;  %v17525_v62 = vld [vmem:[#allocation8_spill] sm:$0xff] }
 0x9f7   : > { %v12508_v22 = vpop.eup %12507  ;;  %v9167_v23 = vadd.f32 %v8833_v45, %v6607_v13  ;;  %v7910_v18 = vadd.f32 1.0, %v12506_v8  ;;  %12527 = vpow2.f32 %v7340_v42  ;;  %v6618_v56 = vmax.f32 %v16767_v10, 0.0  ;;  %v16903_v10 = vpop.f32.mrf.mxu0 }
 0x9f8   : > { %v12510_v47 = vpop.eup %12509  ;;  %v9169_v49 = vadd.f32 %v8837_v53, %v6609_v16  ;;  %v7911_v25 = vadd.f32 1.0, %v12508_v22  ;;  %v7358_v15 = vmul.f32 1.442695, %v6990_v61  ;;  %v6680_v54 = vand.u32 2147483647, %v16884_v17 }
 0x9f9   : > { %v12512_v9 = vpop.eup %12511  ;;  %9487 = vst [vmem:[%s14908_s2 + $0x988] sm:$0xff] %v9167_v23  ;;  %12529 = vlog2.f32 %v7910_v18  ;;  %v7920_v13 = vadd.f32 1.0, %v12510_v47  ;;  %v6617_v26 = vmax.f32 %v16772_v38, 0.0  ;;  %v7360_v41 = vmul.f32 1.442695, %v6991_v2 }
 0x9fa   : > { %9489 = vst [vmem:[%s14908_s2 + $0x998] sm:$0xff] %v9169_v49  ;;  %v8851_v7 = vmul.f32 0.6931472, %v12512_v9  ;;  %12531 = vlog2.f32 %v7911_v25  ;;  %v7000_v51 = vsub.f32 0.0, %v6680_v54  ;;  %v6681_v16 = vand.u32 2147483647, %v16889_v34 }
 0x9fb   : > { %v12514_v3 = vpop.eup %12513  ;;  %12533 = vlog2.f32 %v7920_v13  ;;  %v16901_v0 = vadd.f32 %v17525_v62, %v16794_v12  ;;  %v16907_v38 = vadd.f32 %v16650_v35, %v16798_v40  ;;  %v6619_v23 = vmax.f32 %v16775_v39, 0.0 }
 0x9fc   : > { %v12516_v60 = vpop.eup %12515  ;;  %v9176_v45 = vadd.f32 %v8851_v7, %v6616_v37  ;;  %v7921_v42 = vadd.f32 1.0, %v12514_v3  ;;  %12535 = vpow2.f32 %v7358_v15  ;;  %v7378_v61 = vmul.f32 1.442695, %v7000_v51  ;;  %v16912_v15 = vpop.f32.mrf.mxu0 }
 0x9fd   : > { %v12518_v8 = vpop.eup %12517  ;;  %v8855_v53 = vmul.f32 0.6931472, %v12516_v60  ;;  %12537 = vpow2.f32 %v7360_v41  ;;  %v7001_v28 = vsub.f32 0.0, %v6681_v16  ;;  %v6690_v37 = vand.u32 2147483647, %v16901_v0 }
 0x9fe   : > { %v12520_v22 = vpop.eup %12519  ;;  %9496 = vst [vmem:[%s14908_s2 + $0x9d0] sm:$0xff] %v9176_v45  ;;  %12539 = vlog2.f32 %v7921_v42  ;;  %v7930_v18 = vadd.f32 1.0, %v12518_v8  ;;  %v6310_v9 = vmax.f32 %v16804_v50, 0.0  ;;  %v6691_v7 = vand.u32 2147483647, %v16907_v38  ;;  %v16928_v42 = vpop.f32.mrf.mxu0 }
 0x9ff   : > { %v12522_v47 = vpop.eup %12521  ;;  %v9178_v49 = vadd.f32 %v8855_v53, %v6618_v56  ;;  %v8853_v25 = vmul.f32 0.6931472, %v12520_v22  ;;  %12541 = vpow2.f32 %v7378_v61  ;;  %v7380_v35 = vmul.f32 1.442695, %v7001_v28 }
 0xa00   : > { %v8857_v2 = vmul.f32 0.6931472, %v12522_v47  ;;  %12543 = vlog2.f32 %v7930_v18  ;;  %v7010_v13 = vsub.f32 0.0, %v6690_v37  ;;  %v16919_v56 = vadd.f32 %v16664_v11, %v16794_v12 }
 0xa01   : > { %v12524_v54 = vpop.eup %12523  ;;  %9498 = vst [vmem:[%s14908_s2 + $0x9e0] sm:$0xff] %v9178_v49  ;;  %v9177_v39 = vadd.f32 %v8853_v25, %v6617_v26  ;;  %12545 = vpow2.f32 %v7380_v35  ;;  %v16923_v50 = vadd.f32 %v16671_v57, %v16798_v40  ;;  %v6311_v62 = vmax.f32 %v16808_v46, 0.0 }
 0xa02   : > { %v12526_v41 = vpop.eup %12525  ;;  %v9179_v3 = vadd.f32 %v8857_v2, %v6619_v23  ;;  %v7931_v51 = vadd.f32 1.0, %v12524_v54  ;;  %v7398_v16 = vmul.f32 1.442695, %v7010_v13  ;;  %v7011_v60 = vsub.f32 0.0, %v6691_v7 }
 0xa03   : > { %9497 = vst [vmem:[%s14908_s2 + $0x9d8] sm:$0xff] %v9177_v39  ;;  %v7940_v26 = vadd.f32 1.0, %v12526_v41  ;;  %v6700_v45 = vand.u32 2147483647, %v16919_v56  ;;  %v6320_v11 = vmax.f32 %v16814_v29, 0.0  ;;  %v16935_v57 = vadd.f32 %v16688_v44, %v16794_v12  ;;  %v16943_v44 = vpop.f32.mrf.mxu0 }
 0xa04   : > { %v12528_v8 = vpop.eup %12527  ;;  %9499 = vst [vmem:[%s14908_s2 + $0x9e8] sm:$0xff] %v9179_v3  ;;  %12547 = vlog2.f32 %v7931_v51  ;;  %v6701_v53 = vand.u32 2147483647, %v16923_v50  ;;  %v7400_v46 = vmul.f32 1.442695, %v7011_v60  ;;  %v6321_v23 = vmax.f32 %v16828_v14, 0.0 }
 0xa05   : > { %12549 = vlog2.f32 %v7940_v26  ;;  %v7941_v61 = vadd.f32 1.0, %v12528_v8  ;;  %v7020_v28 = vsub.f32 0.0, %v6700_v45  ;;  %v6710_v37 = vand.u32 2147483647, %v16935_v57 }
 0xa06   : > { %v12530_v22 = vpop.eup %12529  ;;  %12551 = vpow2.f32 %v7398_v16  ;;  %v7021_v18 = vsub.f32 0.0, %v6701_v53  ;;  %v16941_v25 = vadd.f32 %v16699_v21, %v16798_v40  ;;  %v6330_v41 = vmax.f32 %v16833_v48, 0.0  ;;  %v16952_v53 = vpop.f32.mrf.mxu0 }
 0xa07   : > { %v12532_v47 = vpop.eup %12531  ;;  %v8239_v29 = vmul.f32 0.6931472, %v12530_v22  ;;  %12553 = vlog2.f32 %v7941_v61  ;;  %v7418_v49 = vmul.f32 1.442695, %v7020_v28  ;;  %v7030_v14 = vsub.f32 0.0, %v6710_v37 }
 0xa08   : > { %v12534_v35 = vpop.eup %12533  ;;  %v8241_v2 = vmul.f32 0.6931472, %v12532_v47  ;;  %12555 = vpow2.f32 %v7400_v46  ;;  %v7420_v13 = vmul.f32 1.442695, %v7021_v18  ;;  %v6711_v8 = vand.u32 2147483647, %v16941_v25 }
 0xa09   : > { %v12536_v54 = vpop.eup %12535  ;;  %v8870_v39 = vadd.f32 %v8239_v29, %v6310_v9  ;;  %v8259_v7 = vmul.f32 0.6931472, %v12534_v35  ;;  %12557 = vpow2.f32 %v7418_v49  ;;  %v7438_v21 = vmul.f32 1.442695, %v7030_v14  ;;  %v16967_v35 = vpop.f32.mrf.mxu0 }
 0xa0a   : > { %v12538_v3 = vpop.eup %12537  ;;  %v8871_v51 = vadd.f32 %v8241_v2, %v6311_v62  ;;  %v7950_v16 = vadd.f32 1.0, %v12536_v54  ;;  %12559 = vpow2.f32 %v7420_v13  ;;  %v16950_v9 = vadd.f32 %v16711_v33, %v16794_v12 }
 0xa0b   : > { %v12540_v26 = vpop.eup %12539  ;;  %9190 = vst [vmem:[%s14908_s2 + $0x40] sm:$0xff] %v8870_v39  ;;  %v8880_v60 = vadd.f32 %v8259_v7, %v6320_v11  ;;  %v7951_v45 = vadd.f32 1.0, %v12538_v3  ;;  %v6331_v62 = vmax.f32 %v16844_v4, 0.0  ;;  %v16958_v46 = vadd.f32 %v16726_v55, %v16798_v40 }
 0xa0c   : > { %v12542_v48 = vpop.eup %12541  ;;  %9191 = vst [vmem:[%s14908_s2 + $0x48] sm:$0xff] %v8871_v51  ;;  %v8261_v61 = vmul.f32 0.6931472, %v12540_v26  ;;  %12561 = vlog2.f32 %v7950_v16  ;;  %v7031_v22 = vsub.f32 0.0, %v6711_v8  ;;  %v16963_v33 = vadd.f32 %v16737_v31, %v16794_v12 }
 0xa0d   : > { %v12544_v11 = vpop.eup %12543  ;;  %9200 = vst [vmem:[%s14908_s2 + $0x90] sm:$0xff] %v8880_v60  ;;  %12563 = vlog2.f32 %v7951_v45  ;;  %v7960_v28 = vadd.f32 1.0, %v12542_v48  ;;  %v6720_v4 = vand.u32 2147483647, %v16950_v9  ;;  %v6340_v29 = vmax.f32 %v16852_v1, 0.0 }
 0xa0e   : > { %v12546_v18 = vpop.eup %12545  ;;  %v8881_v37 = vadd.f32 %v8261_v61, %v6321_v23  ;;  %v8279_v47 = vmul.f32 0.6931472, %v12544_v11  ;;  %12565 = vpow2.f32 %v7438_v21  ;;  %v7440_v49 = vmul.f32 1.442695, %v7031_v22 }
 0xa0f   : > { %12567 = vlog2.f32 %v7960_v28  ;;  %v7961_v55 = vadd.f32 1.0, %v12546_v18  ;;  %v6341_v13 = vmax.f32 %v16856_v24, 0.0  ;;  %v7040_v31 = vsub.f32 0.0, %v6720_v4 }
 0xa10   : > { %9201 = vst [vmem:[%s14908_s2 + $0x98] sm:$0xff] %v8881_v37  ;;  %v8890_v2 = vadd.f32 %v8279_v47, %v6330_v41  ;;  %v6721_v14 = vand.u32 2147483647, %v16958_v46  ;;  %v6730_v54 = vand.u32 2147483647, %v16963_v33  ;;  %v16975_v1 = vadd.f32 %v16749_v30, %v16798_v40  ;;  %v16984_v30 = vpop.f32.mrf.mxu0 }
 0xa11   : > { %v12548_v23 = vpop.eup %12547  ;;  %12569 = vlog2.f32 %v7961_v55  ;;  %v16979_v39 = vadd.f32 %v16761_v5, %v16794_v12  ;;  %v7458_v24 = vmul.f32 1.442695, %v7040_v31  ;;  %v6350_v21 = vmax.f32 %v16869_v58, 0.0 }
 0xa12   : > { %v12550_v7 = vpop.eup %12549  ;;  %9210 = vst [vmem:[%s14908_s2 + $0xe0] sm:$0xff] %v8890_v2  ;;  %v8281_v41 = vmul.f32 0.6931472, %v12548_v23  ;;  %12571 = vpow2.f32 %v7440_v49  ;;  %v7041_v3 = vsub.f32 0.0, %v6721_v14  ;;  %v7050_v26 = vsub.f32 0.0, %v6730_v54  ;;  %v16990_v31 = vpop.f32.mrf.mxu0 }
 0xa13   : > { %v12552_v51 = vpop.eup %12551  ;;  %v8299_v16 = vmul.f32 0.6931472, %v12550_v7  ;;  %v6731_v60 = vand.u32 2147483647, %v16975_v1  ;;  %12573 = vpow2.f32 %v7458_v24  ;;  %v6351_v22 = vmax.f32 %v16873_v59, 0.0 }
 0xa14   : > { %v12554_v45 = vpop.eup %12553  ;;  %v8891_v8 = vadd.f32 %v8281_v41, %v6331_v62  ;;  %v7970_v5 = vadd.f32 1.0, %v12552_v51  ;;  %v7460_v48 = vmul.f32 1.442695, %v7041_v3  ;;  %v7478_v47 = vmul.f32 1.442695, %v7050_v26 }
 0xa15   : > { %v12556_v61 = vpop.eup %12555  ;;  %v8900_v11 = vadd.f32 %v8299_v16, %v6340_v29  ;;  %v8301_v28 = vmul.f32 0.6931472, %v12554_v45  ;;  %v7051_v18 = vsub.f32 0.0, %v6731_v60  ;;  %v6740_v4 = vand.u32 2147483647, %v16979_v39 }
 0xa16   : > { %v12558_v37 = vpop.eup %12557  ;;  %9211 = vst [vmem:[%s14908_s2 + $0xe8] sm:$0xff] %v8891_v8  ;;  %12575 = vlog2.f32 %v7970_v5  ;;  %v7971_v58 = vadd.f32 1.0, %v12556_v61  ;;  %v16994_v14 = vadd.f32 %v16777_v32, %v16798_v40  ;;  %v6360_v54 = vmax.f32 %v16884_v17, 0.0 }
 0xa17   : > { %v12560_v55 = vpop.eup %12559  ;;  %9220 = vst [vmem:[%s14908_s2 + $0x130] sm:$0xff] %v8900_v11  ;;  %v8901_v62 = vadd.f32 %v8301_v28, %v6341_v13  ;;  %v7980_v49 = vadd.f32 1.0, %v12558_v37  ;;  %12577 = vpow2.f32 %v7460_v48  ;;  %v7480_v2 = vmul.f32 1.442695, %v7051_v18 }
 0xa18   : > { %12579 = vlog2.f32 %v7971_v58  ;;  %v7981_v29 = vadd.f32 1.0, %v12560_v55  ;;  %v7060_v59 = vsub.f32 0.0, %v6740_v4  ;;  %v6361_v7 = vmax.f32 %v16889_v34, 0.0 }
 0xa19   : > { %v12562_v23 = vpop.eup %12561  ;;  %9221 = vst [vmem:[%s14908_s2 + $0x138] sm:$0xff] %v8901_v62  ;;  %12581 = vlog2.f32 %v7980_v49  ;;  %v17001_v13 = vadd.f32 %v16788_v6, %v16794_v12  ;;  %v17005_v51 = vadd.f32 %v16810_v63, %v16798_v40  ;;  %v6741_v17 = vand.u32 2147483647, %v16994_v14  ;;  %v17012_v6 = vpop.f32.mrf.mxu0 }
 0xa1a   : > { %v12564_v41 = vpop.eup %12563  ;;  %v8319_v24 = vmul.f32 0.6931472, %v12562_v23  ;;  %12583 = vlog2.f32 %v7981_v29  ;;  %v7498_v3 = vmul.f32 1.442695, %v7060_v59  ;;  %v17010_v34 = vadd.f32 %v16821_v36, %v16794_v12 }
 0xa1b   : > { %v12566_v32 = vpop.eup %12565  ;;  %v8321_v16 = vmul.f32 0.6931472, %v12564_v41  ;;  %12585 = vpow2.f32 %v7478_v47  ;;  %v6750_v63 = vand.u32 2147483647, %v17001_v13  ;;  %v7061_v48 = vsub.f32 0.0, %v6741_v17 }
 0xa1c   : > { %v12568_v26 = vpop.eup %12567  ;;  %v8910_v60 = vadd.f32 %v8319_v24, %v6350_v21  ;;  %v7990_v45 = vadd.f32 1.0, %v12566_v32  ;;  %12587 = vpow2.f32 %v7480_v2  ;;  %v6370_v11 = vmax.f32 %v16901_v0, 0.0 }
 0xa1d   : > { %v8911_v8 = vadd.f32 %v8321_v16, %v6351_v22  ;;  %v8339_v5 = vmul.f32 0.6931472, %v12568_v26  ;;  %12589 = vpow2.f32 %v7498_v3  ;;  %v7070_v36 = vsub.f32 0.0, %v6750_v63  ;;  %v17020_v22 = vpop.f32.mrf.mxu0 }
 0xa1e   : > { %v12570_v61 = vpop.eup %12569  ;;  %9230 = vst [vmem:[%s14908_s2 + $0x180] sm:$0xff] %v8910_v60  ;;  %12591 = vlog2.f32 %v7990_v45  ;;  %v6751_v28 = vand.u32 2147483647, %v17005_v51  ;;  %v6371_v58 = vmax.f32 %v16907_v38, 0.0  ;;  %v7500_v47 = vmul.f32 1.442695, %v7061_v48 }
 0xa1f   : > { %v12572_v18 = vpop.eup %12571  ;;  %9231 = vst [vmem:[%s14908_s2 + $0x188] sm:$0xff] %v8911_v8  ;;  %v8920_v21 = vadd.f32 %v8339_v5, %v6360_v54  ;;  %v8341_v37 = vmul.f32 0.6931472, %v12570_v61  ;;  %v7518_v55 = vmul.f32 1.442695, %v7070_v36  ;;  %v17026_v29 = vadd.f32 %v16836_v20, %v16798_v40  ;;  %v17036_v32 = vpop.f32.mrf.mxu0 }
 0xa20   : > { %v7991_v4 = vadd.f32 1.0, %v12572_v18  ;;  %v7071_v62 = vsub.f32 0.0, %v6751_v28  ;;  %v6760_v0 = vand.u32 2147483647, %v17010_v34  ;;  %v12574_v49 = vpop.eup %12573  ;;  %12593 = vpow2.f32 %v7500_v47 }
 0xa21   : > { %9240 = vst [vmem:[%s14908_s2 + $0x1d0] sm:$0xff] %v8920_v21  ;;  %v8921_v2 = vadd.f32 %v8341_v37, %v6361_v7  ;;  %v17030_v38 = vadd.f32 %v16846_v43, %v16794_v12  ;;  %v8000_v59 = vadd.f32 1.0, %v12574_v49  ;;  %v6380_v24 = vmax.f32 %v16919_v56, 0.0  ;;  %v17044_v18 = vpop.f32.mrf.mxu0 }
 0xa22   : > { %12595 = vlog2.f32 %v7991_v4  ;;  %v7520_v23 = vmul.f32 1.442695, %v7071_v62  ;;  %v7080_v54 = vsub.f32 0.0, %v6760_v0  ;;  %v6381_v3 = vmax.f32 %v16923_v50, 0.0 }
 0xa23   : > { %v12576_v41 = vpop.eup %12575  ;;  %9241 = vst [vmem:[%s14908_s2 + $0x1d8] sm:$0xff] %v8921_v2  ;;  %12597 = vpow2.f32 %v7518_v55  ;;  %v6761_v7 = vand.u32 2147483647, %v17026_v29  ;;  %v6770_v17 = vand.u32 2147483647, %v17030_v38  ;;  %v17041_v56 = vadd.f32 %v16863_v27, %v16798_v40 }
 0xa24   : > { %v12578_v20 = vpop.eup %12577  ;;  %v8359_v16 = vmul.f32 0.6931472, %v12576_v41  ;;  %12599 = vlog2.f32 %v8000_v59  ;;  %v7538_v43 = vmul.f32 1.442695, %v7080_v54  ;;  %v6390_v36 = vmax.f32 %v16935_v57, 0.0 }
 0xa25   : > { %v12580_v26 = vpop.eup %12579  ;;  %v8001_v60 = vadd.f32 1.0, %v12578_v20  ;;  %12601 = vpow2.f32 %v7520_v23  ;;  %v7081_v45 = vsub.f32 0.0, %v6761_v7  ;;  %v7090_v5 = vsub.f32 0.0, %v6770_v17 }
 0xa26   : > { %v12582_v50 = vpop.eup %12581  ;;  %v8930_v63 = vadd.f32 %v8359_v16, %v6370_v11  ;;  %v8361_v8 = vmul.f32 0.6931472, %v12580_v26  ;;  %12603 = vpow2.f32 %v7538_v43  ;;  %v6771_v11 = vand.u32 2147483647, %v17041_v56 }
 0xa27   : > { %v12584_v48 = vpop.eup %12583  ;;  %v8379_v61 = vmul.f32 0.6931472, %v12582_v50  ;;  %12605 = vlog2.f32 %v8001_v60  ;;  %v7540_v28 = vmul.f32 1.442695, %v7081_v45  ;;  %v7558_v47 = vmul.f32 1.442695, %v7090_v5 }
 0xa28   : > { %v12586_v21 = vpop.eup %12585  ;;  %9250 = vst [vmem:[%s14908_s2 + $0x220] sm:$0xff] %v8930_v63  ;;  %v8931_v37 = vadd.f32 %v8361_v8, %v6371_v58  ;;  %v8381_v27 = vmul.f32 0.6931472, %v12584_v48  ;;  %v17050_v57 = vadd.f32 %v16875_v52, %v16794_v12  ;;  %v7091_v58 = vsub.f32 0.0, %v6771_v11 }
 0xa29   : > { %v12588_v4 = vpop.eup %12587  ;;  %v8940_v55 = vadd.f32 %v8379_v61, %v6380_v24  ;;  %v8010_v62 = vadd.f32 1.0, %v12586_v21  ;;  %12607 = vpow2.f32 %v7540_v28  ;;  %v6391_v23 = vmax.f32 %v16941_v25, 0.0  ;;  %v17056_v24 = vpop.f32.mrf.mxu0 }
 0xa2a   : > { %v12590_v0 = vpop.eup %12589  ;;  %9251 = vst [vmem:[%s14908_s2 + $0x228] sm:$0xff] %v8931_v37  ;;  %v8941_v49 = vadd.f32 %v8381_v27, %v6381_v3  ;;  %v8011_v2 = vadd.f32 1.0, %v12588_v4  ;;  %12609 = vpow2.f32 %v7558_v47  ;;  %v6780_v41 = vand.u32 2147483647, %v17050_v57 }
 0xa2b   : > { %v12592_v59 = vpop.eup %12591  ;;  %9260 = vst [vmem:[%s14908_s2 + $0x270] sm:$0xff] %v8940_v55  ;;  %12611 = vlog2.f32 %v8010_v62  ;;  %v8020_v54 = vadd.f32 1.0, %v12590_v0  ;;  %v7560_v52 = vmul.f32 1.442695, %v7091_v58  ;;  %v17061_v3 = vadd.f32 %v16891_v19, %v16798_v40 }
 0xa2c   : > { %9261 = vst [vmem:[%s14908_s2 + $0x278] sm:$0xff] %v8941_v49  ;;  %v8399_v7 = vmul.f32 0.6931472, %v12592_v59  ;;  %12613 = vlog2.f32 %v8011_v2  ;;  %v7100_v20 = vsub.f32 0.0, %v6780_v41  ;;  %v17065_v25 = vadd.f32 %v16903_v10, %v16794_v12  ;;  %v17075_v10 = vpop.f32.mrf.mxu0 }
 0xa2d   : > { %12615 = vlog2.f32 %v8020_v54  ;;  %v17069_v16 = vadd.f32 %v16912_v15, %v16798_v40  ;;  %v12594_v43 = vpop.eup %12593  ;;  %v6400_v26 = vmax.f32 %v16950_v9, 0.0  ;;  %v6781_v60 = vand.u32 2147483647, %v17061_v3 }
 0xa2e   : > { %v8950_v17 = vadd.f32 %v8399_v7, %v6390_v36  ;;  %12617 = vpow2.f32 %v7560_v52  ;;  %v6401_v45 = vmax.f32 %v16958_v46, 0.0  ;;  %v8021_v50 = vadd.f32 1.0, %v12594_v43  ;;  %v17084_v0 = vpop.f32.mrf.mxu0 }
 0xa2f   : > { %v12596_v19 = vpop.eup %12595  ;;  %v7578_v63 = vmul.f32 1.442695, %v7100_v20  ;;  %v6790_v8 = vand.u32 2147483647, %v17065_v25  ;;  %v6410_v48 = vmax.f32 %v16963_v33, 0.0  ;;  %v7101_v61 = vsub.f32 0.0, %v6781_v60 }
 0xa30   : > { %v12598_v5 = vpop.eup %12597  ;;  %9270 = vst [vmem:[%s14908_s2 + $0x2c0] sm:$0xff] %v8950_v17  ;;  %v8401_v15 = vmul.f32 0.6931472, %v12596_v19  ;;  %v6791_v9 = vand.u32 2147483647, %v17069_v16  ;;  %12619 = vlog2.f32 %v8021_v50  ;;  %v17082_v46 = vadd.f32 %v16928_v42, %v16794_v12  ;;  %v17099_v60 = vpop.f32.mrf.mxu0 }
 0xa31   : > { %v12600_v36 = vpop.eup %12599  ;;  %v8030_v28 = vadd.f32 1.0, %v12598_v5  ;;  %v7110_v21 = vsub.f32 0.0, %v6790_v8  ;;  %12621 = vpow2.f32 %v7578_v63  ;;  %v7580_v11 = vmul.f32 1.442695, %v7101_v61 }
 0xa32   : > { %v12602_v37 = vpop.eup %12601  ;;  %v8951_v27 = vadd.f32 %v8401_v15, %v6391_v23  ;;  %v8419_v47 = vmul.f32 0.6931472, %v12600_v36  ;;  %v7111_v62 = vsub.f32 0.0, %v6791_v9  ;;  %v6411_v58 = vmax.f32 %v16975_v1, 0.0 }
 0xa33   : > { %v12604_v4 = vpop.eup %12603  ;;  %12623 = vlog2.f32 %v8030_v28  ;;  %v8031_v33 = vadd.f32 1.0, %v12602_v37  ;;  %v7598_v55 = vmul.f32 1.442695, %v7110_v21  ;;  %v6800_v54 = vand.u32 2147483647, %v17082_v46  ;;  %v17110_v37 = vpop.f32.mrf.mxu0 }
 0xa34   : > { %v12606_v49 = vpop.eup %12605  ;;  %9271 = vst [vmem:[%s14908_s2 + $0x2c8] sm:$0xff] %v8951_v27  ;;  %v8960_v2 = vadd.f32 %v8419_v47, %v6400_v26  ;;  %v8040_v42 = vadd.f32 1.0, %v12604_v4  ;;  %12625 = vpow2.f32 %v7580_v11  ;;  %v7600_v23 = vmul.f32 1.442695, %v7111_v62 }
 0xa35   : > { %v8421_v59 = vmul.f32 0.6931472, %v12606_v49  ;;  %12627 = vlog2.f32 %v8031_v33  ;;  %v6420_v7 = vmax.f32 %v16979_v39, 0.0  ;;  %v17093_v52 = vadd.f32 %v16943_v44, %v16798_v40 }
 0xa36   : > { %v12608_v41 = vpop.eup %12607  ;;  %9280 = vst [vmem:[%s14908_s2 + $0x310] sm:$0xff] %v8960_v2  ;;  %12629 = vlog2.f32 %v8040_v42  ;;  %v17097_v1 = vadd.f32 %v16952_v53, %v16794_v12  ;;  %v7120_v26 = vsub.f32 0.0, %v6800_v54  ;;  %v6421_v39 = vmax.f32 %v16994_v14, 0.0 }
 0xa37   : > { %v12610_v20 = vpop.eup %12609  ;;  %v8961_v43 = vadd.f32 %v8421_v59, %v6401_v45  ;;  %v8041_v17 = vadd.f32 1.0, %v12608_v41  ;;  %12631 = vpow2.f32 %v7598_v55  ;;  %v6801_v63 = vand.u32 2147483647, %v17093_v52 }
 0xa38   : > { %v12612_v19 = vpop.eup %12611  ;;  %v8050_v50 = vadd.f32 1.0, %v12610_v20  ;;  %12633 = vpow2.f32 %v7600_v23  ;;  %v7618_v53 = vmul.f32 1.442695, %v7120_v26  ;;  %v17106_v45 = vadd.f32 %v16967_v35, %v16798_v40  ;;  %v17127_v23 = vpop.f32.mrf.mxu0 }
 0xa39   : > { %v12614_v44 = vpop.eup %12613  ;;  %9281 = vst [vmem:[%s14908_s2 + $0x318] sm:$0xff] %v8961_v43  ;;  %v8439_v8 = vmul.f32 0.6931472, %v12612_v19  ;;  %12635 = vlog2.f32 %v8041_v17  ;;  %v7121_v61 = vsub.f32 0.0, %v6801_v63  ;;  %v6810_v14 = vand.u32 2147483647, %v17097_v1 }
 0xa3a   : > { %v12616_v5 = vpop.eup %12615  ;;  %v8441_v15 = vmul.f32 0.6931472, %v12614_v44  ;;  %12637 = vlog2.f32 %v8050_v50  ;;  %v6430_v21 = vmax.f32 %v17001_v13, 0.0  ;;  %v6811_v33 = vand.u32 2147483647, %v17106_v45 }
 0xa3b   : > { %v12618_v9 = vpop.eup %12617  ;;  %v8970_v36 = vadd.f32 %v8439_v8, %v6410_v48  ;;  %v8459_v28 = vmul.f32 0.6931472, %v12616_v5  ;;  %12639 = vpow2.f32 %v7618_v53  ;;  %v7620_v47 = vmul.f32 1.442695, %v7121_v61 }
 0xa3c   : > { %v8971_v27 = vadd.f32 %v8441_v15, %v6411_v58  ;;  %v8051_v35 = vadd.f32 1.0, %v12618_v9  ;;  %v7130_v11 = vsub.f32 0.0, %v6810_v14  ;;  %v17116_v55 = vadd.f32 %v16984_v30, %v16794_v12 }
 0xa3d   : > { %9290 = vst [vmem:[%s14908_s2 + $0x360] sm:$0xff] %v8970_v36  ;;  %v8980_v4 = vadd.f32 %v8459_v28, %v6420_v7  ;;  %v17120_v48 = vadd.f32 %v16990_v31, %v16798_v40  ;;  %v12620_v13 = vpop.eup %12619  ;;  %v6431_v62 = vmax.f32 %v17005_v51, 0.0  ;;  %v6440_v49 = vmax.f32 %v17010_v34, 0.0 }
 0xa3e   : > { %9291 = vst [vmem:[%s14908_s2 + $0x368] sm:$0xff] %v8971_v27  ;;  %12641 = vlog2.f32 %v8051_v35  ;;  %v7638_v2 = vmul.f32 1.442695, %v7130_v11  ;;  %v12622_v58 = vpop.eup %12621  ;;  %v8461_v42 = vmul.f32 0.6931472, %v12620_v13  ;;  %v6441_v59 = vmax.f32 %v17026_v29, 0.0 }
 0xa3f   : > { %9300 = vst [vmem:[%s14908_s2 + $0x3b0] sm:$0xff] %v8980_v4  ;;  %12643 = vpow2.f32 %v7620_v47  ;;  %v7131_v30 = vsub.f32 0.0, %v6811_v33  ;;  %v8060_v31 = vadd.f32 1.0, %v12622_v58  ;;  %v6820_v41 = vand.u32 2147483647, %v17116_v55 }
 0xa40   : > { %v12624_v54 = vpop.eup %12623  ;;  %12645 = vpow2.f32 %v7638_v2  ;;  %v17132_v51 = vadd.f32 %v17012_v6, %v16794_v12  ;;  %v8981_v7 = vadd.f32 %v8461_v42, %v6421_v39  ;;  %v6821_v29 = vand.u32 2147483647, %v17120_v48  ;;  %v17140_v39 = vpop.f32.mrf.mxu0 }
 0xa41   : > { %v12626_v34 = vpop.eup %12625  ;;  %v8479_v20 = vmul.f32 0.6931472, %v12624_v54  ;;  %v7640_v43 = vmul.f32 1.442695, %v7131_v30  ;;  %12647 = vlog2.f32 %v8060_v31  ;;  %v7140_v19 = vsub.f32 0.0, %v6820_v41 }
 0xa42   : > { %v12628_v17 = vpop.eup %12627  ;;  %v8061_v26 = vadd.f32 1.0, %v12626_v34  ;;  %v17137_v50 = vadd.f32 %v17020_v22, %v16798_v40  ;;  %9301 = vst [vmem:[%s14908_s2 + $0x3b8] sm:$0xff] %v8981_v7  ;;  %v7141_v8 = vsub.f32 0.0, %v6821_v29  ;;  %v6830_v61 = vand.u32 2147483647, %v17132_v51 }
 0xa43   : > { %v12630_v63 = vpop.eup %12629  ;;  %v8990_v44 = vadd.f32 %v8479_v20, %v6430_v21  ;;  %v8481_v6 = vmul.f32 0.6931472, %v12628_v17  ;;  %12649 = vpow2.f32 %v7640_v43  ;;  %v7658_v15 = vmul.f32 1.442695, %v7140_v19 }
 0xa44   : > { %v12632_v53 = vpop.eup %12631  ;;  %v8499_v5 = vmul.f32 0.6931472, %v12630_v63  ;;  %12651 = vlog2.f32 %v8061_v26  ;;  %v6450_v22 = vmax.f32 %v17030_v38, 0.0  ;;  %v7660_v28 = vmul.f32 1.442695, %v7141_v8  ;;  %v17151_v38 = vpop.f32.mrf.mxu0 }
 0xa45   : > { %v12634_v14 = vpop.eup %12633  ;;  %9310 = vst [vmem:[%s14908_s2 + $0x400] sm:$0xff] %v8990_v44  ;;  %v8991_v9 = vadd.f32 %v8481_v6, %v6431_v62  ;;  %v8070_v36 = vadd.f32 1.0, %v12632_v53  ;;  %12653 = vpow2.f32 %v7658_v15  ;;  %v7150_v47 = vsub.f32 0.0, %v6830_v61 }
 0xa46   : > { %v12636_v21 = vpop.eup %12635  ;;  %v9000_v27 = vadd.f32 %v8499_v5, %v6440_v49  ;;  %v8071_v35 = vadd.f32 1.0, %v12634_v14  ;;  %v6831_v33 = vand.u32 2147483647, %v17137_v50  ;;  %v17149_v13 = vadd.f32 %v17036_v32, %v16794_v12  ;;  %v17162_v43 = vpop.f32.mrf.mxu0 }
 0xa47   : > { %v12638_v11 = vpop.eup %12637  ;;  %9311 = vst [vmem:[%s14908_s2 + $0x408] sm:$0xff] %v8991_v9  ;;  %v8501_v4 = vmul.f32 0.6931472, %v12636_v21  ;;  %12655 = vlog2.f32 %v8070_v36  ;;  %v7678_v49 = vmul.f32 1.442695, %v7150_v47  ;;  %v17156_v58 = vadd.f32 %v17044_v18, %v16798_v40 }
 0xa48   : > { %v12640_v62 = vpop.eup %12639  ;;  %9320 = vst [vmem:[%s14908_s2 + $0x450] sm:$0xff] %v9000_v27  ;;  %v8519_v2 = vmul.f32 0.6931472, %v12638_v11  ;;  %12657 = vlog2.f32 %v8071_v35  ;;  %v7151_v54 = vsub.f32 0.0, %v6831_v33  ;;  %v6840_v32 = vand.u32 2147483647, %v17149_v13  ;;  %v17180_v14 = vpop.f32.mrf.mxu0 }
 0xa49   : > { %v9001_v42 = vadd.f32 %v8501_v4, %v6441_v59  ;;  %v8080_v30 = vadd.f32 1.0, %v12640_v62  ;;  %12659 = vpow2.f32 %v7660_v28  ;;  %v6451_v34 = vmax.f32 %v17041_v56, 0.0 }
 0xa4a   : > { %v9010_v31 = vadd.f32 %v8519_v2, %v6450_v22  ;;  %12661 = vpow2.f32 %v7678_v49  ;;  %v7680_v7 = vmul.f32 1.442695, %v7151_v54  ;;  %v6841_v20 = vand.u32 2147483647, %v17156_v58  ;;  %v17190_v62 = vpop.f32.mrf.mxu0 }
 0xa4b   : > { %v12642_v41 = vpop.eup %12641  ;;  %9321 = vst [vmem:[%s14908_s2 + $0x458] sm:$0xff] %v9001_v42  ;;  %12663 = vlog2.f32 %v8080_v30  ;;  %v7160_v29 = vsub.f32 0.0, %v6840_v32  ;;  %v17167_v17 = vadd.f32 %v17056_v24, %v16794_v12  ;;  %v17171_v26 = vadd.f32 %v17075_v10, %v16798_v40 }
 0xa4c   : > { %v12644_v18 = vpop.eup %12643  ;;  %9330 = vst [vmem:[%s14908_s2 + $0x4a0] sm:$0xff] %v9010_v31  ;;  %v8521_v59 = vmul.f32 0.6931472, %v12642_v41  ;;  %12665 = vpow2.f32 %v7680_v7  ;;  %v7161_v63 = vsub.f32 0.0, %v6841_v20  ;;  %v17175_v44 = vadd.f32 %v17084_v0, %v16794_v12 }
 0xa4d   : > { %v12646_v19 = vpop.eup %12645  ;;  %v8081_v56 = vadd.f32 1.0, %v12644_v18  ;;  %v6460_v8 = vmax.f32 %v17050_v57, 0.0  ;;  %v7698_v5 = vmul.f32 1.442695, %v7160_v29  ;;  %v6461_v15 = vmax.f32 %v17061_v3, 0.0 }
 0xa4e   : > { %v9011_v6 = vadd.f32 %v8521_v59, %v6451_v34  ;;  %v8090_v53 = vadd.f32 1.0, %v12646_v19  ;;  %v12648_v24 = vpop.eup %12647  ;;  %v7700_v10 = vmul.f32 1.442695, %v7161_v63  ;;  %v6850_v61 = vand.u32 2147483647, %v17167_v17 }
 0xa4f   : > { %12667 = vlog2.f32 %v8081_v56  ;;  %v8539_v22 = vmul.f32 0.6931472, %v12648_v24  ;;  %v6470_v0 = vmax.f32 %v17065_v25, 0.0  ;;  %v6851_v36 = vand.u32 2147483647, %v17171_v26  ;;  %v17202_v56 = vpop.f32.mrf.mxu0 }
 0xa50   : > { %v12650_v9 = vpop.eup %12649  ;;  %9331 = vst [vmem:[%s14908_s2 + $0x4a8] sm:$0xff] %v9011_v6  ;;  %12669 = vlog2.f32 %v8090_v53  ;;  %v7170_v21 = vsub.f32 0.0, %v6850_v61  ;;  %v6860_v3 = vand.u32 2147483647, %v17175_v44  ;;  %v17188_v25 = vadd.f32 %v17099_v60, %v16798_v40 }
 0xa51   : > { %v12652_v57 = vpop.eup %12651  ;;  %v8091_v28 = vadd.f32 1.0, %v12650_v9  ;;  %12671 = vpow2.f32 %v7698_v5  ;;  %v9020_v27 = vadd.f32 %v8539_v22, %v6460_v8  ;;  %v7171_v47 = vsub.f32 0.0, %v6851_v36 }
 0xa52   : > { %v8541_v35 = vmul.f32 0.6931472, %v12652_v57  ;;  %12673 = vpow2.f32 %v7700_v10  ;;  %v12654_v11 = vpop.eup %12653  ;;  %v7718_v4 = vmul.f32 1.442695, %v7170_v21  ;;  %v7180_v33 = vsub.f32 0.0, %v6860_v3 }
 0xa53   : > { %12675 = vlog2.f32 %v8091_v28  ;;  %9340 = vst [vmem:[%s14908_s2 + $0x4f0] sm:$0xff] %v9020_v27  ;;  %v8100_v42 = vadd.f32 1.0, %v12654_v11  ;;  %v7720_v30 = vmul.f32 1.442695, %v7171_v47  ;;  %v17195_v54 = vadd.f32 %v17110_v37, %v16794_v12 }
 0xa54   : > { %v12656_v2 = vpop.eup %12655  ;;  %v9021_v49 = vadd.f32 %v8541_v35, %v6461_v15  ;;  %v6471_v41 = vmax.f32 %v17069_v16, 0.0  ;;  %12677 = vpow2.f32 %v7718_v4  ;;  %v7738_v34 = vmul.f32 1.442695, %v7180_v33 }
 0xa55   : > { %v12658_v31 = vpop.eup %12657  ;;  %v8559_v32 = vmul.f32 0.6931472, %v12656_v2  ;;  %v6480_v20 = vmax.f32 %v17082_v46, 0.0  ;;  %12679 = vlog2.f32 %v8100_v42  ;;  %v6861_v18 = vand.u32 2147483647, %v17188_v25 }
 0xa56   : > { %v12660_v7 = vpop.eup %12659  ;;  %9341 = vst [vmem:[%s14908_s2 + $0x4f8] sm:$0xff] %v9021_v49  ;;  %v8561_v60 = vmul.f32 0.6931472, %v12658_v31  ;;  %12681 = vpow2.f32 %v7720_v30  ;;  %v6870_v19 = vand.u32 2147483647, %v17195_v54  ;;  %v17207_v5 = vadd.f32 %v17127_v23, %v16798_v40  ;;  %v17219_v23 = vpop.f32.mrf.mxu0 }
 0xa57   : > { %v12662_v59 = vpop.eup %12661  ;;  %v9030_v29 = vadd.f32 %v8559_v32, %v6470_v0  ;;  %v8101_v37 = vadd.f32 1.0, %v12660_v7  ;;  %12683 = vpow2.f32 %v7738_v34  ;;  %v7181_v8 = vsub.f32 0.0, %v6861_v18 }
 0xa58   : > { %v12664_v16 = vpop.eup %12663  ;;  %v9031_v63 = vadd.f32 %v8561_v60, %v6471_v41  ;;  %v8110_v6 = vadd.f32 1.0, %v12662_v59  ;;  %v7190_v46 = vsub.f32 0.0, %v6870_v19  ;;  %v17212_v10 = vadd.f32 %v17140_v39, %v16794_v12  ;;  %v17231_v30 = vpop.f32.mrf.mxu0 }
 0xa59   : > { %9350 = vst [vmem:[%s14908_s2 + $0x540] sm:$0xff] %v9030_v29  ;;  %v8579_v53 = vmul.f32 0.6931472, %v12664_v16  ;;  %12685 = vlog2.f32 %v8101_v37  ;;  %v12666_v24 = vpop.eup %12665  ;;  %v7740_v15 = vmul.f32 1.442695, %v7181_v8  ;;  %v17216_v61 = vadd.f32 %v17151_v38, %v16798_v40 }
 0xa5a   : > { %9351 = vst [vmem:[%s14908_s2 + $0x548] sm:$0xff] %v9031_v63  ;;  %12687 = vlog2.f32 %v8110_v6  ;;  %v6481_v22 = vmax.f32 %v17093_v52, 0.0  ;;  %v8111_v0 = vadd.f32 1.0, %v12666_v24  ;;  %v7758_v36 = vmul.f32 1.442695, %v7190_v46 }
 0xa5b   : > { %v9040_v9 = vadd.f32 %v8579_v53, %v6480_v20  ;;  %v6490_v28 = vmax.f32 %v17097_v1, 0.0  ;;  %12689 = vpow2.f32 %v7740_v15  ;;  %v6871_v21 = vand.u32 2147483647, %v17207_v5 }
 0xa5c   : > { %v12668_v57 = vpop.eup %12667  ;;  %v6880_v39 = vand.u32 2147483647, %v17212_v10  ;;  %v6491_v38 = vmax.f32 %v17106_v45, 0.0  ;;  %12691 = vlog2.f32 %v8111_v0  ;;  %v6881_v52 = vand.u32 2147483647, %v17216_v61 }
 0xa5d   : > { %v12670_v3 = vpop.eup %12669  ;;  %9360 = vst [vmem:[%s14908_s2 + $0x590] sm:$0xff] %v9040_v9  ;;  %v8581_v27 = vmul.f32 0.6931472, %v12668_v57  ;;  %12693 = vpow2.f32 %v7758_v36  ;;  %v7191_v11 = vsub.f32 0.0, %v6871_v21  ;;  %v17229_v42 = vadd.f32 %v17162_v43, %v16794_v12 }
 0xa5e   : > { %v12672_v35 = vpop.eup %12671  ;;  %v8599_v47 = vmul.f32 0.6931472, %v12670_v3  ;;  %v7200_v4 = vsub.f32 0.0, %v6880_v39  ;;  %v7201_v49 = vsub.f32 0.0, %v6881_v52  ;;  %v6500_v60 = vmax.f32 %v17116_v55, 0.0 }
 0xa5f   : > { %v12674_v1 = vpop.eup %12673  ;;  %v9041_v33 = vadd.f32 %v8581_v27, %v6481_v22  ;;  %v8120_v2 = vadd.f32 1.0, %v12672_v35  ;;  %v7760_v41 = vmul.f32 1.442695, %v7191_v11  ;;  %v6501_v20 = vmax.f32 %v17120_v48, 0.0  ;;  %v6287_v48 = vpop.f32.mrf.mxu0 }
 0xa60   : > { %v12676_v45 = vpop.eup %12675  ;;  %v9050_v31 = vadd.f32 %v8599_v47, %v6490_v28  ;;  %v8121_v32 = vadd.f32 1.0, %v12674_v1  ;;  %v7778_v34 = vmul.f32 1.442695, %v7200_v4  ;;  %v7780_v43 = vmul.f32 1.442695, %v7201_v49 }
 0xa61   : > { %9361 = vst [vmem:[%s14908_s2 + $0x598] sm:$0xff] %v9041_v33  ;;  %v8601_v7 = vmul.f32 0.6931472, %v12676_v45  ;;  %12695 = vlog2.f32 %v8120_v2  ;;  %v12678_v18 = vpop.eup %12677  ;;  %v6890_v59 = vand.u32 2147483647, %v17229_v42  ;;  %v17240_v29 = vadd.f32 %v17180_v14, %v16798_v40  ;;  %v6289_v21 = vpop.f32.mrf.mxu0 }
 0xa62   : > { %9370 = vst [vmem:[%s14908_s2 + $0x5e0] sm:$0xff] %v9050_v31  ;;  %12697 = vlog2.f32 %v8121_v32  ;;  %v12680_v37 = vpop.eup %12679  ;;  %v8130_v16 = vadd.f32 1.0, %v12678_v18  ;;  %v17244_v55 = vadd.f32 %v17190_v62, %v16794_v12  ;;  %v17248_v53 = vadd.f32 %v17202_v56, %v16798_v40 }
 0xa63   : > { %v9051_v19 = vadd.f32 %v8601_v7, %v6491_v38  ;;  %12699 = vpow2.f32 %v7760_v41  ;;  %v12682_v63 = vpop.eup %12681  ;;  %v8619_v6 = vmul.f32 0.6931472, %v12680_v37  ;;  %v7210_v8 = vsub.f32 0.0, %v6890_v59  ;;  %v6293_v31 = vpop.f32.mrf.mxu0 }
 0xa64   : > { %12701 = vpow2.f32 %v7778_v34  ;;  %v12684_v46 = vpop.eup %12683  ;;  %v6510_v14 = vmax.f32 %v17132_v51, 0.0  ;;  %v8131_v24 = vadd.f32 1.0, %v12682_v63  ;;  %v6891_v15 = vand.u32 2147483647, %v17240_v29 }
 0xa65   : > { %9371 = vst [vmem:[%s14908_s2 + $0x5e8] sm:$0xff] %v9051_v19  ;;  %12703 = vlog2.f32 %v8130_v16  ;;  %v9060_v9 = vadd.f32 %v8619_v6, %v6500_v60  ;;  %v8140_v22 = vadd.f32 1.0, %v12684_v46  ;;  %v7798_v0 = vmul.f32 1.442695, %v7210_v8 }
 0xa66   : > { %v12686_v62 = vpop.eup %12685  ;;  %12705 = vpow2.f32 %v7780_v43  ;;  %v7211_v28 = vsub.f32 0.0, %v6891_v15  ;;  %v6900_v56 = vand.u32 2147483647, %v17244_v55  ;;  %v6511_v51 = vmax.f32 %v17137_v50, 0.0 }
 0xa67   : > { %v12688_v36 = vpop.eup %12687  ;;  %v8621_v57 = vmul.f32 0.6931472, %v12686_v62  ;;  %12707 = vlog2.f32 %v8131_v24  ;;  %9380 = vst [vmem:[%s14908_s2 + $0x630] sm:$0xff] %v9060_v9  ;;  %v6901_v3 = vand.u32 2147483647, %v17248_v53  ;;  %v17259_v33 = vadd.f32 %v17219_v23, %v16794_v12 }
 0xa68   : > { %v8639_v39 = vmul.f32 0.6931472, %v12688_v36  ;;  %12709 = vlog2.f32 %v8140_v22  ;;  %v12690_v27 = vpop.eup %12689  ;;  %v7800_v52 = vmul.f32 1.442695, %v7211_v28  ;;  %v7220_v35 = vsub.f32 0.0, %v6900_v56 }
 0xa69   : > { %v9061_v38 = vadd.f32 %v8621_v57, %v6501_v20  ;;  %12711 = vpow2.f32 %v7798_v0  ;;  %v12692_v47 = vpop.eup %12691  ;;  %v8141_v4 = vadd.f32 1.0, %v12690_v27  ;;  %v7221_v1 = vsub.f32 0.0, %v6901_v3 }
 0xa6a   : > { %v9070_v11 = vadd.f32 %v8639_v39, %v6510_v14  ;;  %v12694_v2 = vpop.eup %12693  ;;  %v8641_v50 = vmul.f32 0.6931472, %v12692_v47  ;;  %12713 = vpow2.f32 %v7800_v52  ;;  %v7818_v49 = vmul.f32 1.442695, %v7220_v35 }
 0xa6b   : > { %9381 = vst [vmem:[%s14908_s2 + $0x638] sm:$0xff] %v9061_v38  ;;  %v17264_v45 = vadd.f32 %v17231_v30, %v16798_v40  ;;  %v6520_v32 = vmax.f32 %v17149_v13, 0.0  ;;  %12715 = vlog2.f32 %v8141_v4  ;;  %v8150_v41 = vadd.f32 1.0, %v12694_v2 }
 0xa6c   : > { %9390 = vst [vmem:[%s14908_s2 + $0x680] sm:$0xff] %v9070_v11  ;;  %v7820_v34 = vmul.f32 1.442695, %v7221_v1  ;;  %v9071_v7 = vadd.f32 %v8641_v50, %v6511_v51  ;;  %v6521_v23 = vmax.f32 %v17156_v58, 0.0  ;;  %12717 = vpow2.f32 %v7818_v49  ;;  %v6295_v58 = vpop.f32.mrf.mxu0 }
 0xa6d   : > { %v6910_v60 = vand.u32 2147483647, %v17259_v33  ;;  %v6530_v18 = vmax.f32 %v17167_v17, 0.0  ;;  %12719 = vlog2.f32 %v8150_v41  ;;  %v6911_v30 = vand.u32 2147483647, %v17264_v45 }
 0xa6e   : > { %v12696_v20 = vpop.eup %12695  ;;  %v17273_v43 = vadd.f32 %v6287_v48, %v16794_v12  ;;  %9391 = vst [vmem:[%s14908_s2 + $0x688] sm:$0xff] %v9071_v7  ;;  %12721 = vpow2.f32 %v7820_v34  ;;  %v17277_v19 = vadd.f32 %v6289_v21, %v16798_v40  ;;  %v17281_v8 = vadd.f32 %v6293_v31, %v16794_v12  ;;  %v6297_v39 = vpop.f32.mrf.mxu0 }
 0xa6f   : > { %v12698_v59 = vpop.eup %12697  ;;  %v8659_v13 = vmul.f32 0.6931472, %v12696_v20  ;;  %v7230_v37 = vsub.f32 0.0, %v6910_v60  ;;  %v7231_v6 = vsub.f32 0.0, %v6911_v30  ;;  %v6531_v14 = vmax.f32 %v17171_v26, 0.0 }
 0xa70   : > { %v12700_v16 = vpop.eup %12699  ;;  %v8661_v63 = vmul.f32 0.6931472, %v12698_v59  ;;  %v6920_v17 = vand.u32 2147483647, %v17273_v43  ;;  %v6540_v22 = vmax.f32 %v17175_v44, 0.0  ;;  %v17290_v1 = vadd.f32 %v6295_v58, %v16798_v40  ;;  %v6299_v31 = vpop.f32.mrf.mxu0 }
 0xa71   : > { %v12702_v48 = vpop.eup %12701  ;;  %v9080_v46 = vadd.f32 %v8659_v13, %v6520_v32  ;;  %v8151_v24 = vadd.f32 1.0, %v12700_v16  ;;  %v7838_v15 = vmul.f32 1.442695, %v7230_v37  ;;  %v7840_v56 = vmul.f32 1.442695, %v7231_v6 }
 0xa72   : > { %v12704_v62 = vpop.eup %12703  ;;  %v9081_v9 = vadd.f32 %v8661_v63, %v6521_v23  ;;  %v8160_v0 = vadd.f32 1.0, %v12702_v48  ;;  %v7240_v36 = vsub.f32 0.0, %v6920_v17  ;;  %v6921_v21 = vand.u32 2147483647, %v17277_v19 }
 0xa73   : > { %v12706_v57 = vpop.eup %12705  ;;  %9400 = vst [vmem:[%s14908_s2 + $0x6d0] sm:$0xff] %v9080_v46  ;;  %v8679_v28 = vmul.f32 0.6931472, %v12704_v62  ;;  %12723 = vlog2.f32 %v8151_v24  ;;  %v6930_v27 = vand.u32 2147483647, %v17281_v8  ;;  %v17296_v20 = vadd.f32 %v6297_v39, %v16794_v12 }
 0xa74   : > { %v12708_v51 = vpop.eup %12707  ;;  %9401 = vst [vmem:[%s14908_s2 + $0x6d8] sm:$0xff] %v9081_v9  ;;  %12725 = vlog2.f32 %v8160_v0  ;;  %v8161_v26 = vadd.f32 1.0, %v12706_v57  ;;  %v7858_v3 = vmul.f32 1.442695, %v7240_v36  ;;  %v7241_v35 = vsub.f32 0.0, %v6921_v21 }
 0xa75   : > { %v12710_v38 = vpop.eup %12709  ;;  %v9090_v44 = vadd.f32 %v8679_v28, %v6530_v18  ;;  %v8681_v52 = vmul.f32 0.6931472, %v12708_v51  ;;  %12727 = vpow2.f32 %v7838_v15  ;;  %v7250_v4 = vsub.f32 0.0, %v6930_v27 }
 0xa76   : > { %v12712_v47 = vpop.eup %12711  ;;  %v8699_v11 = vmul.f32 0.6931472, %v12710_v38  ;;  %12729 = vlog2.f32 %v8161_v26  ;;  %v7860_v49 = vmul.f32 1.442695, %v7241_v35  ;;  %v6931_v60 = vand.u32 2147483647, %v17290_v1 }
 0xa77   : > { %9410 = vst [vmem:[%s14908_s2 + $0x720] sm:$0xff] %v9090_v44  ;;  %v9091_v2 = vadd.f32 %v8681_v52, %v6531_v14  ;;  %v8170_v50 = vadd.f32 1.0, %v12712_v47  ;;  %12731 = vpow2.f32 %v7840_v56  ;;  %v12714_v32 = vpop.eup %12713  ;;  %v7878_v34 = vmul.f32 1.442695, %v7250_v4 }
 0xa78   : > { %v9100_v41 = vadd.f32 %v8699_v11, %v6540_v22  ;;  %12733 = vpow2.f32 %v7858_v3  ;;  %v12716_v7 = vpop.eup %12715  ;;  %v8171_v23 = vadd.f32 1.0, %v12714_v32  ;;  %v6541_v30 = vmax.f32 %v17188_v25, 0.0 }
 0xa79   : > { %9411 = vst [vmem:[%s14908_s2 + $0x728] sm:$0xff] %v9091_v2  ;;  %12735 = vlog2.f32 %v8170_v50  ;;  %v12718_v18 = vpop.eup %12717  ;;  %v8701_v59 = vmul.f32 0.6931472, %v12716_v7  ;;  %v17301_v13 = vadd.f32 %v6299_v31, %v16798_v40  ;;  %v6550_v58 = vmax.f32 %v17195_v54, 0.0 }
 0xa7a   : > { %9420 = vst [vmem:[%s14908_s2 + $0x770] sm:$0xff] %v9100_v41  ;;  %12737 = vpow2.f32 %v7860_v49  ;;  %v12720_v37 = vpop.eup %12719  ;;  %v8180_v16 = vadd.f32 1.0, %v12718_v18  ;;  %v7251_v63 = vsub.f32 0.0, %v6931_v60  ;;  %v6940_v48 = vand.u32 2147483647, %v17296_v20 }
 0xa7b   : > { %12739 = vlog2.f32 %v8171_v23  ;;  %v12722_v6 = vpop.eup %12721  ;;  %v9101_v12 = vadd.f32 %v8701_v59, %v6541_v30  ;;  %v8719_v17 = vmul.f32 0.6931472, %v12720_v37  ;;  %v6941_v24 = vand.u32 2147483647, %v17301_v13 }
 0xa7c   : > { %12741 = vpow2.f32 %v7878_v34  ;;  %v8181_v25 = vadd.f32 1.0, %v12722_v6  ;;  %v7880_v46 = vmul.f32 1.442695, %v7251_v63  ;;  %v7260_v40 = vsub.f32 0.0, %v6940_v48 }
 0xa7d   : > { %12743 = vlog2.f32 %v8180_v16  ;;  %9421 = vst [vmem:[%s14908_s2 + $0x778] sm:$0xff] %v9101_v12  ;;  %v9110_v14 = vadd.f32 %v8719_v17, %v6550_v58  ;;  %v7261_v62 = vsub.f32 0.0, %v6941_v24  ;;  %v6551_v22 = vmax.f32 %v17207_v5, 0.0 }
 0xa7e   : > { %12745 = vlog2.f32 %v8181_v25  ;;  %v7898_v15 = vmul.f32 1.442695, %v7260_v40  ;;  %v6560_v57 = vmax.f32 %v17212_v10, 0.0  ;;  %v6561_v27 = vmax.f32 %v17216_v61, 0.0 }
 0xa7f   : > { %9430 = vst [vmem:[%s14908_s2 + $0x7c0] sm:$0xff] %v9110_v14  ;;  %12747 = vpow2.f32 %v7880_v46  ;;  %v7900_v56 = vmul.f32 1.442695, %v7261_v62  ;;  %v6570_v11 = vmax.f32 %v17229_v42, 0.0  ;;  %v6571_v31 = vmax.f32 %v17240_v29, 0.0 }
 0xa80   : > { %v12724_v54 = vpop.eup %12723  ;;  %12749 = vpow2.f32 %v7898_v15  ;;  %v6580_v42 = vmax.f32 %v17244_v55, 0.0  ;;  %v6581_v59 = vmax.f32 %v17248_v53, 0.0  ;;  %v6590_v17 = vmax.f32 %v17259_v33, 0.0 }
 0xa81   : > { %v12726_v9 = vpop.eup %12725  ;;  %v8721_v0 = vmul.f32 0.6931472, %v12724_v54  ;;  %12751 = vpow2.f32 %v7900_v56  ;;  %v6591_v14 = vmax.f32 %v17264_v45, 0.0  ;;  %v6600_v24 = vmax.f32 %v17273_v43, 0.0 }
 0xa82   : > { %v12728_v36 = vpop.eup %12727  ;;  %v8739_v28 = vmul.f32 0.6931472, %v12726_v9  ;;  %v6601_v33 = vmax.f32 %v17277_v19, 0.0  ;;  %v6610_v45 = vmax.f32 %v17281_v8, 0.0  ;;  %v6611_v56 = vmax.f32 %v17290_v1, 0.0 }
 0xa83   : > { %v12730_v21 = vpop.eup %12729  ;;  %v9111_v39 = vadd.f32 %v8721_v0, %v6551_v22  ;;  %v8190_v51 = vadd.f32 1.0, %v12728_v36  ;;  %v6621_v8 = vmax.f32 %v17301_v13, 0.0 }
 0xa84   : > { %v12732_v26 = vpop.eup %12731  ;;  %v9120_v3 = vadd.f32 %v8739_v28, %v6560_v57  ;;  %v8741_v38 = vmul.f32 0.6931472, %v12730_v21 }
 0xa85   : > { %v12734_v5 = vpop.eup %12733  ;;  %9431 = vst [vmem:[%s14908_s2 + $0x7c8] sm:$0xff] %v9111_v39  ;;  %12753 = vlog2.f32 %v8190_v51  ;;  %v8191_v44 = vadd.f32 1.0, %v12732_v26  ;;  %v6620_v51 = vmax.f32 %v17296_v20, 0.0 }
 0xa86   : > { %v12736_v52 = vpop.eup %12735  ;;  %9440 = vst [vmem:[%s14908_s2 + $0x810] sm:$0xff] %v9120_v3  ;;  %v9121_v10 = vadd.f32 %v8741_v38, %v6561_v27  ;;  %v8200_v35 = vadd.f32 1.0, %v12734_v5 }
 0xa87   : > { %v12738_v47 = vpop.eup %12737  ;;  %v8759_v4 = vmul.f32 0.6931472, %v12736_v52  ;;  %12755 = vlog2.f32 %v8191_v44 }
 0xa88   : > { %v12740_v2 = vpop.eup %12739  ;;  %9441 = vst [vmem:[%s14908_s2 + $0x818] sm:$0xff] %v9121_v10  ;;  %12757 = vlog2.f32 %v8200_v35  ;;  %v8201_v61 = vadd.f32 1.0, %v12738_v47 }
 0xa89   : > { %v12742_v50 = vpop.eup %12741  ;;  %v9130_v49 = vadd.f32 %v8759_v4, %v6570_v11  ;;  %v8761_v32 = vmul.f32 0.6931472, %v12740_v2 }
 0xa8a   : > { %v12744_v41 = vpop.eup %12743  ;;  %12759 = vlog2.f32 %v8201_v61  ;;  %v8210_v34 = vadd.f32 1.0, %v12742_v50 }
 0xa8b   : > { %9450 = vst [vmem:[%s14908_s2 + $0x860] sm:$0xff] %v9130_v49  ;;  %v9131_v7 = vadd.f32 %v8761_v32, %v6571_v31  ;;  %v8779_v23 = vmul.f32 0.6931472, %v12744_v41  ;;  %v12746_v60 = vpop.eup %12745 }
 0xa8c   : > { %12761 = vlog2.f32 %v8210_v34  ;;  %v12748_v18 = vpop.eup %12747  ;;  %v8781_v37 = vmul.f32 0.6931472, %v12746_v60 }
 0xa8d   : > { %9451 = vst [vmem:[%s14908_s2 + $0x868] sm:$0xff] %v9131_v7  ;;  %v9140_v30 = vadd.f32 %v8779_v23, %v6580_v42  ;;  %v8211_v29 = vadd.f32 1.0, %v12748_v18  ;;  %v12750_v58 = vpop.eup %12749 }
 0xa8e   : > { %v9141_v16 = vadd.f32 %v8781_v37, %v6581_v59  ;;  %v8220_v63 = vadd.f32 1.0, %v12750_v58  ;;  %v12752_v6 = vpop.eup %12751 }
 0xa8f   : > { %9460 = vst [vmem:[%s14908_s2 + $0x8b0] sm:$0xff] %v9140_v30  ;;  %12763 = vlog2.f32 %v8211_v29  ;;  %v8221_v12 = vadd.f32 1.0, %v12752_v6 }
 0xa90   : > { %9461 = vst [vmem:[%s14908_s2 + $0x8b8] sm:$0xff] %v9141_v16  ;;  %12765 = vlog2.f32 %v8220_v63 }
 0xa91   : > { %12767 = vlog2.f32 %v8221_v12 }
 0xa92   : > { %v12754_v55 = vpop.eup %12753 }
 0xa93   : > { %v8799_v48 = vmul.f32 0.6931472, %v12754_v55 }
 0xa94   : > { %v12756_v25 = vpop.eup %12755 }
 0xa95   : > { %v12758_v53 = vpop.eup %12757  ;;  %v9150_v46 = vadd.f32 %v8799_v48, %v6590_v17  ;;  %v8801_v40 = vmul.f32 0.6931472, %v12756_v25 }
 0xa96   : > { %v8819_v54 = vmul.f32 0.6931472, %v12758_v53 }
 0xa97   : > { %v12760_v15 = vpop.eup %12759  ;;  %9470 = vst [vmem:[%s14908_s2 + $0x900] sm:$0xff] %v9150_v46  ;;  %v9151_v62 = vadd.f32 %v8801_v40, %v6591_v14 }
 0xa98   : > { %v9160_v9 = vadd.f32 %v8819_v54, %v6600_v24  ;;  %v8821_v22 = vmul.f32 0.6931472, %v12760_v15 }
 0xa99   : > { %v12762_v0 = vpop.eup %12761  ;;  %9471 = vst [vmem:[%s14908_s2 + $0x908] sm:$0xff] %v9151_v62 }
 0xa9a   : > { %9480 = vst [vmem:[%s14908_s2 + $0x950] sm:$0xff] %v9160_v9  ;;  %v9161_v36 = vadd.f32 %v8821_v22, %v6601_v33  ;;  %v8839_v57 = vmul.f32 0.6931472, %v12762_v0 }
 0xa9c   : > { %9481 = vst [vmem:[%s14908_s2 + $0x958] sm:$0xff] %v9161_v36  ;;  %v9170_v43 = vadd.f32 %v8839_v57, %v6610_v45  ;;  %v12764_v28 = vpop.eup %12763 }
 0xa9d   : > { %v8841_v21 = vmul.f32 0.6931472, %v12764_v28  ;;  %v12766_v39 = vpop.eup %12765 }
 0xa9e   : > { %9490 = vst [vmem:[%s14908_s2 + $0x9a0] sm:$0xff] %v9170_v43  ;;  %v8859_v26 = vmul.f32 0.6931472, %v12766_v39  ;;  %v12768_v3 = vpop.eup %12767 }
 0xa9f   : > { %v9171_v19 = vadd.f32 %v8841_v21, %v6611_v56  ;;  %v8861_v38 = vmul.f32 0.6931472, %v12768_v3 }
 0xaa0   : > { %v9180_v27 = vadd.f32 %v8859_v26, %v6620_v51 }
 0xaa1   : > { %9491 = vst [vmem:[%s14908_s2 + $0x9a8] sm:$0xff] %v9171_v19  ;;  %v9181_v5 = vadd.f32 %v8861_v38, %v6621_v8 }
 0xaa2   : > { %9500 = vst [vmem:[%s14908_s2 + $0x9f0] sm:$0xff] %v9180_v27 }
 0xaa3   : > { %9501 = vst [vmem:[%s14908_s2 + $0x9f8] sm:$0xff] %v9181_v5 }
 0xaa4 PF: > { %s29_s27 = sadd.s32 1, %s12776_s27  }
 0xaa5   : > { %p26_p4 = scmp.ge.s32.totalorder %s29_s27, 4  }
 0xaa7   :  { %28 = sbr.rel (!%p26_p4) target bundleno = 4 (0x4), region = 130 }

</bundles_post_ra>
